<compile_context>
chip_gen: v7x
topology: tpu7x:2x2x1
jax: 0.10.0
libtpu: 0.0.40
codegen_flags: <defaults>
</compile_context>

<pallas_src>
import functools

import jax
import jax.numpy as jnp
from jax.experimental import pallas as pl
from jax.experimental.pallas import tpu as pltpu


_VMEM_LIMIT = 32 * 1024 * 1024  # safe on v5e (128 MiB), v6e (128 MiB), v7x (64 MiB)


def _chunk(n, target):
    """Largest divisor of n that is <= target (>= 1)."""
    t = min(n, target)
    while n % t != 0:
        t -= 1
    return t


def _row_tile(m, target=256):
    """Row tile: full dim if small, else a multiple-of-8 tile (cdiv grid masks the rest)."""
    if m <= target:
        return m
    return (target // 8) * 8


# ----------------------------------------------------------------------------
# BiLSTM recurrence: fused fwd+bwd, time-chunked grid
# ----------------------------------------------------------------------------
def bilstm_chunk_kernel(lens_ref, gxf_ref, gxb_ref, whhf_ref, whhb_ref,
                        of_ref, ob_ref, hf_scr, cf_scr, hb_scr, cb_scr):
    """One time-chunk of the fused fwd+bwd LSTM recurrence.

    lens_ref : (B, 1) int32, VMEM resident (constant index_map -> no re-DMA)
    gxf_ref  : (Tc, B, 4H) fwd pre-activations for times [c*Tc, (c+1)*Tc)
    gxb_ref  : (Tc, B, 4H) bwd pre-activations for times [T-(c+1)*Tc, T-c*Tc)
    whh*_ref : (H, 4H) bf16 recurrent weights (resident)
    of_ref   : (Tc, B, H) bf16 fwd outputs (same time window as gxf)
    ob_ref   : (Tc, B, H) bf16 bwd outputs (same time window as gxb)
    scratch  : (B, H) f32 recurrent state per direction (persists across grid)
    """
    c = pl.program_id(0)
    Tc = gxf_ref.shape[0]
    T = pl.num_programs(0) * Tc

    @pl.when(c == 0)
    def _():
        hf_scr[...] = jnp.zeros_like(hf_scr)
        cf_scr[...] = jnp.zeros_like(cf_scr)
        hb_scr[...] = jnp.zeros_like(hb_scr)
        cb_scr[...] = jnp.zeros_like(cb_scr)

    lens = lens_ref[...]                  # (B, 1) int32
    whh_f = whhf_ref[...]                 # (H, 4H) bf16
    whh_b = whhb_ref[...]
    H = whh_f.shape[0]

    def lstm_cell(gx, h_prev, c_prev, whh, valid):
        # bf16 x bf16 -> f32 accumulation on the MXU.
        gates = gx + jnp.dot(h_prev.astype(jnp.bfloat16), whh,
                             preferred_element_type=jnp.float32)
        i_g = jax.nn.sigmoid(gates[:, 0 * H:1 * H])
        f_g = jax.nn.sigmoid(gates[:, 1 * H:2 * H])
        g_g = jnp.tanh(gates[:, 2 * H:3 * H])
        o_g = jax.nn.sigmoid(gates[:, 3 * H:4 * H])
        c_new = f_g * c_prev + i_g * g_g
        h_new = o_g * jnp.tanh(c_new)
        # pack_padded emulation: freeze state past each length, zero the output.
        c_keep = jnp.where(valid, c_new, c_prev)
        h_keep = jnp.where(valid, h_new, h_prev)
        h_out = jnp.where(valid, h_new, jnp.zeros_like(h_new))
        return h_out, h_keep, c_keep

    # State carried in vregs across the (static, unrolled) inner loop.
    h_f = hf_scr[...]
    c_f = cf_scr[...]
    h_b = hb_scr[...]
    c_b = cb_scr[...]
    base_t = c * Tc
    for i in range(Tc):
        t_f = base_t + i                  # forward global time
        t_b = T - 1 - t_f                 # backward global time (reversed)
        valid_f = t_f < lens              # (B, 1) bool
        valid_b = t_b < lens

        h_out_f, h_f, c_f = lstm_cell(gxf_ref[i], h_f, c_f, whh_f, valid_f)
        of_ref[i] = h_out_f.astype(of_ref.dtype)

        h_out_b, h_b, c_b = lstm_cell(gxb_ref[Tc - 1 - i], h_b, c_b, whh_b, valid_b)
        ob_ref[Tc - 1 - i] = h_out_b.astype(ob_ref.dtype)

    hf_scr[...] = h_f
    cf_scr[...] = c_f
    hb_scr[...] = h_b
    cb_scr[...] = c_b


def bilstm_recurrence(lens_col, gx, w_hh_f, w_hh_b, tc_target=8):
    """gx: (T, B, 8H) f32 fused pre-activations [fwd | bwd].

    Returns (h_fwd, h_bwd), each (T, B, H) bf16.
    """
    T, B, G2 = gx.shape
    G = G2 // 2                 # 4H
    H = G // 4
    Tc = _chunk(T, tc_target)
    n_chunks = T // Tc

    if G % 128 == 0:
        # Read the two 4H column halves of the same array via block indexing
        # (no slice copy in XLA).
        gx_f_arr, gx_b_arr = gx, gx
        f_idx = lambda c: (c, 0, 0)
        b_idx = lambda c: (n_chunks - 1 - c, 0, 1)
    else:
        # Lane-unaligned 4H: fall back to materialized halves.
        gx_f_arr, gx_b_arr = gx[..., :G], gx[..., G:]
        f_idx = lambda c: (c, 0, 0)
        b_idx = lambda c: (n_chunks - 1 - c, 0, 0)

    return pl.pallas_call(
        bilstm_chunk_kernel,
        out_shape=(jax.ShapeDtypeStruct((T, B, H), jnp.bfloat16),
                   jax.ShapeDtypeStruct((T, B, H), jnp.bfloat16)),
        grid=(n_chunks,),
        in_specs=[
            pl.BlockSpec((B, 1), lambda c: (0, 0)),       # lens, resident
            pl.BlockSpec((Tc, B, G), f_idx),              # fwd pre-acts
            pl.BlockSpec((Tc, B, G), b_idx),              # bwd pre-acts (reversed time)
            pl.BlockSpec((H, G), lambda c: (0, 0)),       # W_hh fwd, resident
            pl.BlockSpec((H, G), lambda c: (0, 0)),       # W_hh bwd, resident
        ],
        out_specs=(
            pl.BlockSpec((Tc, B, H), lambda c: (c, 0, 0)),
            pl.BlockSpec((Tc, B, H), lambda c: (n_chunks - 1 - c, 0, 0)),
        ),
        scratch_shapes=[pltpu.VMEM((B, H), jnp.float32) for _ in range(4)],
        compiler_params=pltpu.CompilerParams(
            dimension_semantics=("arbitrary",),
            vmem_limit_bytes=_VMEM_LIMIT),
    )(lens_col, gx_f_arr, gx_b_arr, w_hh_f, w_hh_b)


# ----------------------------------------------------------------------------
# Dense kernels (row-tiled, bf16 operands, f32 accumulation)
# ----------------------------------------------------------------------------
def dense1_kernel(x_ref, w_ref, b_ref, o_ref):
    o_ref[...] = (jnp.dot(x_ref[...], w_ref[...],
                          preferred_element_type=jnp.float32)
                  + b_ref[...]).astype(o_ref.dtype)


def dense1(x, w, b, out_dtype=jnp.float32, row_target=256):
    """x: (M, K) bf16, w: (K, N) bf16, b: (1, N) f32 -> (M, N)."""
    M, K = x.shape
    N = w.shape[1]
    tm = _row_tile(M, row_target)
    return pl.pallas_call(
        dense1_kernel,
        out_shape=jax.ShapeDtypeStruct((M, N), out_dtype),
        grid=(pl.cdiv(M, tm),),
        in_specs=[
            pl.BlockSpec((tm, K), lambda i: (i, 0)),
            pl.BlockSpec((K, N), lambda i: (0, 0)),
            pl.BlockSpec((1, N), lambda i: (0, 0)),
        ],
        out_specs=pl.BlockSpec((tm, N), lambda i: (i, 0)),
        compiler_params=pltpu.CompilerParams(
            dimension_semantics=("parallel",),
            vmem_limit_bytes=_VMEM_LIMIT),
    )(x, w, b)


def dense2_kernel(xf_ref, xb_ref, wt_ref, wb_ref, b_ref, o_ref):
    """o = xf @ w_top + xb @ w_bot + b  (replaces concat([xf, xb]) @ W)."""
    acc = jnp.dot(xf_ref[...], wt_ref[...], preferred_element_type=jnp.float32)
    acc = acc + jnp.dot(xb_ref[...], wb_ref[...], preferred_element_type=jnp.float32)
    o_ref[...] = (acc + b_ref[...]).astype(o_ref.dtype)


def dense2(xf, xb, w_top, w_bot, b, out_dtype=jnp.float32, row_target=256):
    """xf: (M, Kf), xb: (M, Kb) bf16; w_top: (Kf, N), w_bot: (Kb, N) bf16; b: (1, N)."""
    M, Kf = xf.shape
    Kb = xb.shape[1]
    N = w_top.shape[1]
    tm = _row_tile(M, row_target)
    return pl.pallas_call(
        dense2_kernel,
        out_shape=jax.ShapeDtypeStruct((M, N), out_dtype),
        grid=(pl.cdiv(M, tm),),
        in_specs=[
            pl.BlockSpec((tm, Kf), lambda i: (i, 0)),
            pl.BlockSpec((tm, Kb), lambda i: (i, 0)),
            pl.BlockSpec((Kf, N), lambda i: (0, 0)),
            pl.BlockSpec((Kb, N), lambda i: (0, 0)),
            pl.BlockSpec((1, N), lambda i: (0, 0)),
        ],
        out_specs=pl.BlockSpec((tm, N), lambda i: (i, 0)),
        compiler_params=pltpu.CompilerParams(
            dimension_semantics=("parallel",),
            vmem_limit_bytes=_VMEM_LIMIT),
    )(xf, xb, w_top, w_bot, b)


# ----------------------------------------------------------------------------
# Big projection + log_softmax, reduction over T streamed in Kc-sized chunks
# ----------------------------------------------------------------------------
def proj_logsoftmax_kernel(x_ref, w_ref, b_ref, o_ref, acc_ref):
    """Grid = (S, T//Kc): for target position s,
         logits[b, v] += sum_{t in chunk} h[t, b, :] @ W[s, t, :, v]
       then apply log_softmax over V at the last reduction step.

    x_ref  : (Kc, B, F) bf16 chunk of h_enc (F = en_hidden_size)
    w_ref  : (1, Kc, F, V) bf16 streamed weight chunk
    b_ref  : (1, 1, V) f32 bias
    o_ref  : (1, B, V) f32 output block
    acc_ref: VMEM (B, V) f32 accumulator
    """
    k = pl.program_id(1)

    @pl.when(k == 0)
    def _():
        acc_ref[...] = jnp.broadcast_to(b_ref[0], acc_ref.shape)

    Kc = x_ref.shape[0]
    acc = acc_ref[...]
    for kc in range(Kc):                  # static unrolled chunk loop
        acc = acc + jnp.dot(x_ref[kc], w_ref[0, kc],
                            preferred_element_type=jnp.float32)
    acc_ref[...] = acc

    @pl.when(k == pl.num_programs(1) - 1)
    def _():
        logits = acc_ref[...]
        m = jnp.max(logits, axis=-1, keepdims=True)
        z = logits - m
        lse = jnp.log(jnp.sum(jnp.exp(z), axis=-1, keepdims=True))
        o_ref[0] = z - lse


def proj_logsoftmax(h_enc, w_r, b_r, kc_target=8):
    """h_enc: (T, B, F) bf16, w_r: (S, T, F, V) bf16, b_r: (S, 1, V) f32 -> (S, B, V) f32."""
    T, B, F = h_enc.shape
    S = w_r.shape[0]
    V = w_r.shape[-1]
    Kc = _chunk(T, kc_target)
    nk = T // Kc
    return pl.pallas_call(
        proj_logsoftmax_kernel,
        out_shape=jax.ShapeDtypeStruct((S, B, V), jnp.float32),
        grid=(S, nk),
        in_specs=[
            pl.BlockSpec((Kc, B, F), lambda s, k: (k, 0, 0)),
            pl.BlockSpec((1, Kc, F, V), lambda s, k: (s, k, 0, 0)),
            pl.BlockSpec((1, 1, V), lambda s, k: (s, 0, 0)),
        ],
        out_specs=pl.BlockSpec((1, B, V), lambda s, k: (s, 0, 0)),
        scratch_shapes=[pltpu.VMEM((B, V), jnp.float32)],
        compiler_params=pltpu.CompilerParams(
            dimension_semantics=("parallel", "arbitrary"),
            vmem_limit_bytes=_VMEM_LIMIT),
    )(h_enc, w_r, b_r)


# ----------------------------------------------------------------------------
# Model glue (parameter setup, layer stacking)
# ----------------------------------------------------------------------------
def init_params(key, cfg):
    """Matches init_parameters: weights ~ N(0, 0.01), biases 0."""
    E = cfg["en_embedding_size"]
    Hfull = cfg["en_hidden_size"]
    H = Hfull // 2
    L = cfg["en_num_layers"]
    T = cfg["max_seq_len"]
    S = cfg["tgt_seq_len"]
    V = cfg["tgt_vocab_size"]
    std = 0.01

    keys = jax.random.split(key, 4 * L + 3)
    ki = iter(keys)

    params = {}
    params["embedding"] = std * jax.random.normal(
        next(ki), (cfg["src_vocab_size"], E), jnp.float32)

    layers = []
    for layer in range(L):
        d_in = E if layer == 0 else Hfull
        w_ih_f = std * jax.random.normal(next(ki), (d_in, 4 * H), jnp.float32)
        w_ih_b = std * jax.random.normal(next(ki), (d_in, 4 * H), jnp.float32)
        w_ih = jnp.concatenate([w_ih_f, w_ih_b], axis=1).astype(jnp.bfloat16)  # (d_in, 8H)
        lp = {
            "b_ih": jnp.zeros((1, 8 * H), jnp.float32),
            "w_hh_f": (std * jax.random.normal(next(ki), (H, 4 * H), jnp.float32)
                       ).astype(jnp.bfloat16),
            "w_hh_b": (std * jax.random.normal(next(ki), (H, 4 * H), jnp.float32)
                       ).astype(jnp.bfloat16),
        }
        if layer == 0:
            lp["w_ih"] = w_ih
        else:
            # Row split so the next layer consumes (h_fwd, h_bwd) without a concat.
            lp["w_ih_top"] = w_ih[:H]
            lp["w_ih_bot"] = w_ih[H:]
        layers.append(lp)
    params["lstm_layers"] = layers

    # encoder output projection (proj=True): Linear(Hfull -> Hfull), row-split.
    enc_w = (std * jax.random.normal(next(ki), (Hfull, Hfull), jnp.float32)
             ).astype(jnp.bfloat16)
    params["enc_proj_w_top"] = enc_w[:H]
    params["enc_proj_w_bot"] = enc_w[H:]
    params["enc_proj_b"] = jnp.zeros((1, Hfull), jnp.float32)

    # proj_layer: Linear(T*Hfull -> S*V); stored in reduction layout (S, T, F, V),
    # bf16 for weight streaming (f32 accumulation in-kernel).
    w_full = std * jax.random.normal(next(ki), (S, T, Hfull, V), jnp.float32)
    params["proj_w"] = w_full.astype(jnp.bfloat16)
    params["proj_b"] = jnp.zeros((S, 1, V), jnp.float32)
    return params


@functools.partial(jax.jit, static_argnames=("cfg_static",))
def model_forward(params, xs, x_lens, cfg_static):
    cfg = dict(cfg_static)
    B, T = xs.shape
    Hfull = cfg["en_hidden_size"]
    H = Hfull // 2

    # Embedding lookup (XLA gather) + dropout (eval -> identity).
    emb = jnp.take(params["embedding"], xs, axis=0)              # (B, T, E) f32
    h0 = jnp.transpose(emb, (1, 0, 2)).astype(jnp.bfloat16)      # (T, B, E) time-major
    lens_col = x_lens.astype(jnp.int32).reshape(B, 1)

    # Bidirectional LSTM stack: fused (fwd|bwd) input matmuls hoisted out of the
    # time loop + time-chunked fused fwd/bwd recurrence; no per-layer concat.
    h_f = h_b = None
    for li, lp in enumerate(params["lstm_layers"]):
        if li == 0:
            d_in = h0.shape[-1]
            gx = dense1(h0.reshape(T * B, d_in), lp["w_ih"], lp["b_ih"])
        else:
            gx = dense2(h_f.reshape(T * B, H), h_b.reshape(T * B, H),
                        lp["w_ih_top"], lp["w_ih_bot"], lp["b_ih"])
        gx = gx.reshape(T, B, 8 * H)                             # [fwd 4H | bwd 4H]
        h_f, h_b = bilstm_recurrence(lens_col, gx, lp["w_hh_f"], lp["w_hh_b"])

    # Encoder projection (proj=True), consumes (h_fwd, h_bwd) directly.
    h_enc = dense2(h_f.reshape(T * B, H), h_b.reshape(T * B, H),
                   params["enc_proj_w_top"], params["enc_proj_w_bot"],
                   params["enc_proj_b"], out_dtype=jnp.bfloat16).reshape(T, B, Hfull)

    # Big projection + log_softmax fused; T reduction streamed in Kc chunks.
    out_sbv = proj_logsoftmax(h_enc, params["proj_w"], params["proj_b"])  # (S, B, V)
    return jnp.transpose(out_sbv, (1, 0, 2))                     # (B, S, V)


if __name__ == "__main__":
    # Small demo config (update_config allows kwargs overrides of 512-sized defaults).
    cfg = {
        "src_vocab_size": 64,
        "tgt_vocab_size": 32,
        "max_seq_len": 8,
        "tgt_seq_len": 4,
        "en_embedding_size": 128,
        "en_hidden_size": 256,   # per-direction hidden H = 128 (lane-aligned gates)
        "en_num_layers": 2,
        "PAD_IDX": 0,
    }
    cfg_static = tuple(sorted(cfg.items()))

    key = jax.random.PRNGKey(0)
    k_param, k_tok = jax.random.split(key)
    params = init_params(k_param, cfg)

    B, T = 2, cfg["max_seq_len"]
    xs = jax.random.randint(k_tok, (B, T), 1, cfg["src_vocab_size"], dtype=jnp.int32)
    x_lens = jnp.array([T, T - 3], dtype=jnp.int32)
    # zero-pad past each length with PAD_IDX
    pad_mask = jnp.arange(T)[None, :] < x_lens[:, None]
    xs = jnp.where(pad_mask, xs, cfg["PAD_IDX"])

    out = model_forward(params, xs, x_lens, cfg_static)
    out = jax.block_until_ready(out)

    assert out.shape == (B, cfg["tgt_seq_len"], cfg["tgt_vocab_size"])
    assert bool(jnp.all(jnp.isfinite(out)))
    # rows of log_softmax must sum (in prob space) to 1
    assert bool(jnp.allclose(jnp.sum(jnp.exp(out), axis=-1), 1.0, atol=1e-3))
    print("KERNEL_OK")
</pallas_src>

<mosaic_0001>
module attributes {stable_mosaic.version = 11 : i64} {
  func.func @dense1_kernel(%arg0: i32, %arg1: memref<16x128xbf16, #tpu.memory_space<vmem>>, %arg2: memref<128x1024xbf16, #tpu.memory_space<vmem>>, %arg3: memref<1x1024xf32, #tpu.memory_space<vmem>>, %arg4: memref<16x1024xf32, #tpu.memory_space<vmem>>) attributes {dimension_semantics = [#tpu.dimension_semantics<parallel>], iteration_bounds = array<i64: 1>, scalar_prefetch = 0 : i64, scratch_operands = 0 : i64, tpu.core_type = #tpu.core_type<tc>, window_params = [{transform_indices = @transform_0, window_bounds = array<i64: 16, 128>}, {pipeline_mode = #tpu.pipeline_mode<synchronous>, transform_indices = @transform_1, window_bounds = array<i64: 128, 1024>}, {pipeline_mode = #tpu.pipeline_mode<synchronous>, transform_indices = @transform_2, window_bounds = array<i64: 1, 1024>}, {transform_indices = @transform_3, window_bounds = array<i64: 16, 1024>}]} {
    %c0 = arith.constant 0 : index
    %c0_0 = arith.constant 0 : index
    %0 = vector.load %arg1[%c0, %c0_0] : memref<16x128xbf16, #tpu.memory_space<vmem>>, vector<16x128xbf16>
    %c0_1 = arith.constant 0 : index
    %c0_2 = arith.constant 0 : index
    %1 = vector.load %arg2[%c0_1, %c0_2] : memref<128x1024xbf16, #tpu.memory_space<vmem>>, vector<128x1024xbf16>
    %cst = arith.constant dense<0.000000e+00> : vector<16x1024xf32>
    %2 = tpu.matmul %0, %1, %cst {dimension_numbers = #tpu.dot_dimension_numbers<[1], [0], [0], [1], [0, 0, 1, 1], [], []>} : vector<16x128xbf16>, vector<128x1024xbf16>, vector<16x1024xf32> -> vector<16x1024xf32>
    %c0_3 = arith.constant 0 : index
    %c0_4 = arith.constant 0 : index
    %3 = vector.load %arg3[%c0_3, %c0_4] : memref<1x1024xf32, #tpu.memory_space<vmem>>, vector<1x1024xf32>
    %4 = vector.broadcast %3 : vector<1x1024xf32> to vector<16x1024xf32>
    %5 = arith.addf %2, %4 : vector<16x1024xf32>
    %c0_5 = arith.constant 0 : index
    %c0_6 = arith.constant 0 : index
    %6 = vector.load %arg4[%c0_5, %c0_6] : memref<16x1024xf32, #tpu.memory_space<vmem>>, vector<16x1024xf32>
    tpu.vector_store %arg4[%c0_5, %c0_6], %5 {strides = array<i32>} : memref<16x1024xf32, #tpu.memory_space<vmem>>, vector<16x1024xf32>,
    return
  }
  func.func @transform_0(%arg0: i32) -> (i32, i32) {
    %c0_i32 = arith.constant 0 : i32
    %c0_i32_0 = arith.constant 0 : i32
    return %arg0, %c0_i32 : i32, i32
  }
  func.func @transform_1(%arg0: i32) -> (i32, i32) {
    %c0_i32 = arith.constant 0 : i32
    %c0_i32_0 = arith.constant 0 : i32
    %c0_i32_1 = arith.constant 0 : i32
    return %c0_i32, %c0_i32_0 : i32, i32
  }
  func.func @transform_2(%arg0: i32) -> (i32, i32) {
    %c0_i32 = arith.constant 0 : i32
    %c0_i32_0 = arith.constant 0 : i32
    %c0_i32_1 = arith.constant 0 : i32
    return %c0_i32, %c0_i32_0 : i32, i32
  }
  func.func @transform_3(%arg0: i32) -> (i32, i32) {
    %c0_i32 = arith.constant 0 : i32
    %c0_i32_0 = arith.constant 0 : i32
    return %arg0, %c0_i32 : i32, i32
  }
}

module attributes {stable_mosaic.version = 11 : i64} {
  func.func @dense2_kernel(%arg0: i32, %arg1: memref<16x128xbf16, #tpu.memory_space<vmem>>, %arg2: memref<16x128xbf16, #tpu.memory_space<vmem>>, %arg3: memref<128x1024xbf16, #tpu.memory_space<vmem>>, %arg4: memref<128x1024xbf16, #tpu.memory_space<vmem>>, %arg5: memref<1x1024xf32, #tpu.memory_space<vmem>>, %arg6: memref<16x1024xf32, #tpu.memory_space<vmem>>) attributes {dimension_semantics = [#tpu.dimension_semantics<parallel>], iteration_bounds = array<i64: 1>, scalar_prefetch = 0 : i64, scratch_operands = 0 : i64, tpu.core_type = #tpu.core_type<tc>, window_params = [{transform_indices = @transform_0, window_bounds = array<i64: 16, 128>}, {transform_indices = @transform_1, window_bounds = array<i64: 16, 128>}, {pipeline_mode = #tpu.pipeline_mode<synchronous>, transform_indices = @transform_2, window_bounds = array<i64: 128, 1024>}, {pipeline_mode = #tpu.pipeline_mode<synchronous>, transform_indices = @transform_3, window_bounds = array<i64: 128, 1024>}, {pipeline_mode = #tpu.pipeline_mode<synchronous>, transform_indices = @transform_4, window_bounds = array<i64: 1, 1024>}, {transform_indices = @transform_5, window_bounds = array<i64: 16, 1024>}]} {
    %c0 = arith.constant 0 : index
    %c0_0 = arith.constant 0 : index
    %0 = vector.load %arg1[%c0, %c0_0] : memref<16x128xbf16, #tpu.memory_space<vmem>>, vector<16x128xbf16>
    %c0_1 = arith.constant 0 : index
    %c0_2 = arith.constant 0 : index
    %1 = vector.load %arg3[%c0_1, %c0_2] : memref<128x1024xbf16, #tpu.memory_space<vmem>>, vector<128x1024xbf16>
    %cst = arith.constant dense<0.000000e+00> : vector<16x1024xf32>
    %2 = tpu.matmul %0, %1, %cst {dimension_numbers = #tpu.dot_dimension_numbers<[1], [0], [0], [1], [0, 0, 1, 1], [], []>} : vector<16x128xbf16>, vector<128x1024xbf16>, vector<16x1024xf32> -> vector<16x1024xf32>
    %c0_3 = arith.constant 0 : index
    %c0_4 = arith.constant 0 : index
    %3 = vector.load %arg2[%c0_3, %c0_4] : memref<16x128xbf16, #tpu.memory_space<vmem>>, vector<16x128xbf16>
    %c0_5 = arith.constant 0 : index
    %c0_6 = arith.constant 0 : index
    %4 = vector.load %arg4[%c0_5, %c0_6] : memref<128x1024xbf16, #tpu.memory_space<vmem>>, vector<128x1024xbf16>
    %cst_7 = arith.constant dense<0.000000e+00> : vector<16x1024xf32>
    %5 = tpu.matmul %3, %4, %cst_7 {dimension_numbers = #tpu.dot_dimension_numbers<[1], [0], [0], [1], [0, 0, 1, 1], [], []>} : vector<16x128xbf16>, vector<128x1024xbf16>, vector<16x1024xf32> -> vector<16x1024xf32>
    %6 = arith.addf %2, %5 : vector<16x1024xf32>
    %c0_8 = arith.constant 0 : index
    %c0_9 = arith.constant 0 : index
    %7 = vector.load %arg5[%c0_8, %c0_9] : memref<1x1024xf32, #tpu.memory_space<vmem>>, vector<1x1024xf32>
    %8 = vector.broadcast %7 : vector<1x1024xf32> to vector<16x1024xf32>
    %9 = arith.addf %6, %8 : vector<16x1024xf32>
    %c0_10 = arith.constant 0 : index
    %c0_11 = arith.constant 0 : index
    %10 = vector.load %arg6[%c0_10, %c0_11] : memref<16x1024xf32, #tpu.memory_space<vmem>>, vector<16x1024xf32>
    tpu.vector_store %arg6[%c0_10, %c0_11], %9 {strides = array<i32>} : memref<16x1024xf32, #tpu.memory_space<vmem>>, vector<16x1024xf32>,
    return
  }
  func.func @transform_0(%arg0: i32) -> (i32, i32) {
    %c0_i32 = arith.constant 0 : i32
    %c0_i32_0 = arith.constant 0 : i32
    return %arg0, %c0_i32 : i32, i32
  }
  func.func @transform_1(%arg0: i32) -> (i32, i32) {
    %c0_i32 = arith.constant 0 : i32
    %c0_i32_0 = arith.constant 0 : i32
    return %arg0, %c0_i32 : i32, i32
  }
  func.func @transform_2(%arg0: i32) -> (i32, i32) {
    %c0_i32 = arith.constant 0 : i32
    %c0_i32_0 = arith.constant 0 : i32
    %c0_i32_1 = arith.constant 0 : i32
    return %c0_i32, %c0_i32_0 : i32, i32
  }
  func.func @transform_3(%arg0: i32) -> (i32, i32) {
    %c0_i32 = arith.constant 0 : i32
    %c0_i32_0 = arith.constant 0 : i32
    %c0_i32_1 = arith.constant 0 : i32
    return %c0_i32, %c0_i32_0 : i32, i32
  }
  func.func @transform_4(%arg0: i32) -> (i32, i32) {
    %c0_i32 = arith.constant 0 : i32
    %c0_i32_0 = arith.constant 0 : i32
    %c0_i32_1 = arith.constant 0 : i32
    return %c0_i32, %c0_i32_0 : i32, i32
  }
  func.func @transform_5(%arg0: i32) -> (i32, i32) {
    %c0_i32 = arith.constant 0 : i32
    %c0_i32_0 = arith.constant 0 : i32
    return %arg0, %c0_i32 : i32, i32
  }
}

module attributes {stable_mosaic.version = 11 : i64} {
  func.func @bilstm_chunk_kernel(%arg0: i32, %arg1: memref<2x1xi32, #tpu.memory_space<vmem>>, %arg2: memref<8x2x512xf32, #tpu.memory_space<vmem>>, %arg3: memref<8x2x512xf32, #tpu.memory_space<vmem>>, %arg4: memref<128x512xbf16, #tpu.memory_space<vmem>>, %arg5: memref<128x512xbf16, #tpu.memory_space<vmem>>, %arg6: memref<8x2x128xbf16, #tpu.memory_space<vmem>>, %arg7: memref<8x2x128xbf16, #tpu.memory_space<vmem>>, %arg8: memref<2x128xf32, #tpu.memory_space<vmem>>, %arg9: memref<2x128xf32, #tpu.memory_space<vmem>>, %arg10: memref<2x128xf32, #tpu.memory_space<vmem>>, %arg11: memref<2x128xf32, #tpu.memory_space<vmem>>) attributes {dimension_semantics = [#tpu.dimension_semantics<arbitrary>], iteration_bounds = array<i64: 1>, scalar_prefetch = 0 : i64, scratch_operands = 4 : i64, tpu.core_type = #tpu.core_type<tc>, window_params = [{pipeline_mode = #tpu.pipeline_mode<synchronous>, transform_indices = @transform_0, window_bounds = array<i64: 2, 1>}, {transform_indices = @transform_1, window_bounds = array<i64: 8, 2, 512>}, {transform_indices = @transform_2, window_bounds = array<i64: 8, 2, 512>}, {pipeline_mode = #tpu.pipeline_mode<synchronous>, transform_indices = @transform_3, window_bounds = array<i64: 128, 512>}, {pipeline_mode = #tpu.pipeline_mode<synchronous>, transform_indices = @transform_4, window_bounds = array<i64: 128, 512>}, {transform_indices = @transform_5, window_bounds = array<i64: 8, 2, 128>}, {transform_indices = @transform_6, window_bounds = array<i64: 8, 2, 128>}]} {
    %c0_i32 = arith.constant 0 : i32
    %0 = arith.cmpi eq, %arg0, %c0_i32 : i32
    %1 = arith.extui %0 : i1 to i32
    %c0_i32_0 = arith.constant 0 : i32
    %2 = arith.cmpi ne, %1, %c0_i32_0 : i32
    scf.if %2 {
      %cst_199 = arith.constant 0.000000e+00 : f32
      %767 = vector.broadcast %cst_199 : f32 to vector<2x128xf32>
      %c0_200 = arith.constant 0 : index
      %c0_201 = arith.constant 0 : index
      %768 = vector.load %arg8[%c0_200, %c0_201] : memref<2x128xf32, #tpu.memory_space<vmem>>, vector<2x128xf32>
      tpu.vector_store %arg8[%c0_200, %c0_201], %767 {strides = array<i32>} : memref<2x128xf32, #tpu.memory_space<vmem>>, vector<2x128xf32>,
      %cst_202 = arith.constant 0.000000e+00 : f32
      %769 = vector.broadcast %cst_202 : f32 to vector<2x128xf32>
      %c0_203 = arith.constant 0 : index
      %c0_204 = arith.constant 0 : index
      %770 = vector.load %arg9[%c0_203, %c0_204] : memref<2x128xf32, #tpu.memory_space<vmem>>, vector<2x128xf32>
      tpu.vector_store %arg9[%c0_203, %c0_204], %769 {strides = array<i32>} : memref<2x128xf32, #tpu.memory_space<vmem>>, vector<2x128xf32>,
      %cst_205 = arith.constant 0.000000e+00 : f32
      %771 = vector.broadcast %cst_205 : f32 to vector<2x128xf32>
      %c0_206 = arith.constant 0 : index
      %c0_207 = arith.constant 0 : index
      %772 = vector.load %arg10[%c0_206, %c0_207] : memref<2x128xf32, #tpu.memory_space<vmem>>, vector<2x128xf32>
      tpu.vector_store %arg10[%c0_206, %c0_207], %771 {strides = array<i32>} : memref<2x128xf32, #tpu.memory_space<vmem>>, vector<2x128xf32>,
      %cst_208 = arith.constant 0.000000e+00 : f32
      %773 = vector.broadcast %cst_208 : f32 to vector<2x128xf32>
      %c0_209 = arith.constant 0 : index
      %c0_210 = arith.constant 0 : index
      %774 = vector.load %arg11[%c0_209, %c0_210] : memref<2x128xf32, #tpu.memory_space<vmem>>, vector<2x128xf32>
      tpu.vector_store %arg11[%c0_209, %c0_210], %773 {strides = array<i32>} : memref<2x128xf32, #tpu.memory_space<vmem>>, vector<2x128xf32>,
    } else {
    }
    %c0 = arith.constant 0 : index
    %c0_1 = arith.constant 0 : index
    %3 = vector.load %arg1[%c0, %c0_1] : memref<2x1xi32, #tpu.memory_space<vmem>>, vector<2x1xi32>
    %c0_2 = arith.constant 0 : index
    %c0_3 = arith.constant 0 : index
    %4 = vector.load %arg4[%c0_2, %c0_3] : memref<128x512xbf16, #tpu.memory_space<vmem>>, vector<128x512xbf16>
    %c0_4 = arith.constant 0 : index
    %c0_5 = arith.constant 0 : index
    %5 = vector.load %arg5[%c0_4, %c0_5] : memref<128x512xbf16, #tpu.memory_space<vmem>>, vector<128x512xbf16>
    %c0_6 = arith.constant 0 : index
    %c0_7 = arith.constant 0 : index
    %6 = vector.load %arg8[%c0_6, %c0_7] : memref<2x128xf32, #tpu.memory_space<vmem>>, vector<2x128xf32>
    %c0_8 = arith.constant 0 : index
    %c0_9 = arith.constant 0 : index
    %7 = vector.load %arg9[%c0_8, %c0_9] : memref<2x128xf32, #tpu.memory_space<vmem>>, vector<2x128xf32>
    %c0_10 = arith.constant 0 : index
    %c0_11 = arith.constant 0 : index
    %8 = vector.load %arg10[%c0_10, %c0_11] : memref<2x128xf32, #tpu.memory_space<vmem>>, vector<2x128xf32>
    %c0_12 = arith.constant 0 : index
    %c0_13 = arith.constant 0 : index
    %9 = vector.load %arg11[%c0_12, %c0_13] : memref<2x128xf32, #tpu.memory_space<vmem>>, vector<2x128xf32>
    %c8_i32 = arith.constant 8 : i32
    %10 = arith.muli %arg0, %c8_i32 : i32
    %c0_i32_14 = arith.constant 0 : i32
    %11 = arith.addi %10, %c0_i32_14 : i32
    %c7_i32 = arith.constant 7 : i32
    %12 = arith.subi %c7_i32, %11 : i32
    %13 = vector.broadcast %11 : i32 to vector<2x1xi32>
    %14 = arith.cmpi slt, %13, %3 : vector<2x1xi32>
    %15 = vector.broadcast %12 : i32 to vector<2x1xi32>
    %16 = arith.cmpi slt, %15, %3 : vector<2x1xi32>
    %c0_15 = arith.constant 0 : index
    %c0_16 = arith.constant 0 : index
    %c0_17 = arith.constant 0 : index
    %17 = vector.load %arg2[%c0_15, %c0_16, %c0_17] : memref<8x2x512xf32, #tpu.memory_space<vmem>>, vector<1x2x512xf32>
    %18 = vector.shape_cast %17 : vector<1x2x512xf32> to vector<2x512xf32>
    %19 = arith.truncf %6 : vector<2x128xf32> to vector<2x128xbf16>
    %cst = arith.constant dense<0.000000e+00> : vector<2x512xf32>
    %20 = tpu.matmul %19, %4, %cst {dimension_numbers = #tpu.dot_dimension_numbers<[1], [0], [0], [1], [0, 0, 1, 1], [], []>} : vector<2x128xbf16>, vector<128x512xbf16>, vector<2x512xf32> -> vector<2x512xf32>
    %21 = arith.addf %18, %20 : vector<2x512xf32>
    %22 = vector.extract_strided_slice %21 {offsets = [0, 0], sizes = [2, 128], strides = [1, 1]} : vector<2x512xf32> to vector<2x128xf32>
    %23 = arith.negf %22 : vector<2x128xf32>
    %24 = math.exp %23 : vector<2x128xf32>
    %cst_18 = arith.constant 1.000000e+00 : f32
    %25 = vector.broadcast %cst_18 : f32 to vector<2x128xf32>
    %26 = arith.addf %25, %24 : vector<2x128xf32>
    %27 = arith.divf %25, %26 : vector<2x128xf32>
    %28 = vector.extract_strided_slice %21 {offsets = [0, 128], sizes = [2, 128], strides = [1, 1]} : vector<2x512xf32> to vector<2x128xf32>
    %29 = arith.negf %28 : vector<2x128xf32>
    %30 = math.exp %29 : vector<2x128xf32>
    %cst_19 = arith.constant 1.000000e+00 : f32
    %31 = vector.broadcast %cst_19 : f32 to vector<2x128xf32>
    %32 = arith.addf %31, %30 : vector<2x128xf32>
    %33 = arith.divf %31, %32 : vector<2x128xf32>
    %34 = vector.extract_strided_slice %21 {offsets = [0, 256], sizes = [2, 128], strides = [1, 1]} : vector<2x512xf32> to vector<2x128xf32>
    %35 = math.tanh %34 : vector<2x128xf32>
    %36 = vector.extract_strided_slice %21 {offsets = [0, 384], sizes = [2, 128], strides = [1, 1]} : vector<2x512xf32> to vector<2x128xf32>
    %37 = arith.negf %36 : vector<2x128xf32>
    %38 = math.exp %37 : vector<2x128xf32>
    %cst_20 = arith.constant 1.000000e+00 : f32
    %39 = vector.broadcast %cst_20 : f32 to vector<2x128xf32>
    %40 = arith.addf %39, %38 : vector<2x128xf32>
    %41 = arith.divf %39, %40 : vector<2x128xf32>
    %42 = arith.mulf %33, %7 : vector<2x128xf32>
    %43 = arith.mulf %27, %35 : vector<2x128xf32>
    %44 = arith.addf %42, %43 : vector<2x128xf32>
    %45 = math.tanh %44 : vector<2x128xf32>
    %46 = arith.mulf %41, %45 : vector<2x128xf32>
    %47 = vector.shape_cast %14 : vector<2x1xi1> to vector<2x1xi1>
    %48 = vector.broadcast %47 : vector<2x1xi1> to vector<2x128xi1>
    %49 = arith.select %48, %44, %7 : vector<2x128xi1>, vector<2x128xf32>
    %50 = vector.shape_cast %14 : vector<2x1xi1> to vector<2x1xi1>
    %51 = vector.broadcast %50 : vector<2x1xi1> to vector<2x128xi1>
    %52 = arith.select %51, %46, %6 : vector<2x128xi1>, vector<2x128xf32>
    %cst_21 = arith.constant 0.000000e+00 : f32
    %53 = vector.broadcast %cst_21 : f32 to vector<2x128xf32>
    %54 = vector.shape_cast %14 : vector<2x1xi1> to vector<2x1xi1>
    %55 = vector.broadcast %54 : vector<2x1xi1> to vector<2x128xi1>
    %56 = arith.select %55, %46, %53 : vector<2x128xi1>, vector<2x128xf32>
    %57 = arith.truncf %56 : vector<2x128xf32> to vector<2x128xbf16>
    %c0_22 = arith.constant 0 : index
    %c0_23 = arith.constant 0 : index
    %c0_24 = arith.constant 0 : index
    %58 = vector.load %arg6[%c0_22, %c0_23, %c0_24] : memref<8x2x128xbf16, #tpu.memory_space<vmem>>, vector<1x2x128xbf16>
    %59 = vector.shape_cast %58 : vector<1x2x128xbf16> to vector<2x128xbf16>
    %60 = vector.shape_cast %57 : vector<2x128xbf16> to vector<1x2x128xbf16>
    tpu.vector_store %arg6[%c0_22, %c0_23, %c0_24], %60 {strides = array<i32>} : memref<8x2x128xbf16, #tpu.memory_space<vmem>>, vector<1x2x128xbf16>,
    %c7 = arith.constant 7 : index
    %c0_25 = arith.constant 0 : index
    %c0_26 = arith.constant 0 : index
    %61 = vector.load %arg3[%c7, %c0_25, %c0_26] : memref<8x2x512xf32, #tpu.memory_space<vmem>>, vector<1x2x512xf32>
    %62 = vector.shape_cast %61 : vector<1x2x512xf32> to vector<2x512xf32>
    %63 = arith.truncf %8 : vector<2x128xf32> to vector<2x128xbf16>
    %cst_27 = arith.constant dense<0.000000e+00> : vector<2x512xf32>
    %64 = tpu.matmul %63, %5, %cst_27 {dimension_numbers = #tpu.dot_dimension_numbers<[1], [0], [0], [1], [0, 0, 1, 1], [], []>} : vector<2x128xbf16>, vector<128x512xbf16>, vector<2x512xf32> -> vector<2x512xf32>
    %65 = arith.addf %62, %64 : vector<2x512xf32>
    %66 = vector.extract_strided_slice %65 {offsets = [0, 0], sizes = [2, 128], strides = [1, 1]} : vector<2x512xf32> to vector<2x128xf32>
    %67 = arith.negf %66 : vector<2x128xf32>
    %68 = math.exp %67 : vector<2x128xf32>
    %cst_28 = arith.constant 1.000000e+00 : f32
    %69 = vector.broadcast %cst_28 : f32 to vector<2x128xf32>
    %70 = arith.addf %69, %68 : vector<2x128xf32>
    %71 = arith.divf %69, %70 : vector<2x128xf32>
    %72 = vector.extract_strided_slice %65 {offsets = [0, 128], sizes = [2, 128], strides = [1, 1]} : vector<2x512xf32> to vector<2x128xf32>
    %73 = arith.negf %72 : vector<2x128xf32>
    %74 = math.exp %73 : vector<2x128xf32>
    %cst_29 = arith.constant 1.000000e+00 : f32
    %75 = vector.broadcast %cst_29 : f32 to vector<2x128xf32>
    %76 = arith.addf %75, %74 : vector<2x128xf32>
    %77 = arith.divf %75, %76 : vector<2x128xf32>
    %78 = vector.extract_strided_slice %65 {offsets = [0, 256], sizes = [2, 128], strides = [1, 1]} : vector<2x512xf32> to vector<2x128xf32>
    %79 = math.tanh %78 : vector<2x128xf32>
    %80 = vector.extract_strided_slice %65 {offsets = [0, 384], sizes = [2, 128], strides = [1, 1]} : vector<2x512xf32> to vector<2x128xf32>
    %81 = arith.negf %80 : vector<2x128xf32>
    %82 = math.exp %81 : vector<2x128xf32>
    %cst_30 = arith.constant 1.000000e+00 : f32
    %83 = vector.broadcast %cst_30 : f32 to vector<2x128xf32>
    %84 = arith.addf %83, %82 : vector<2x128xf32>
    %85 = arith.divf %83, %84 : vector<2x128xf32>
    %86 = arith.mulf %77, %9 : vector<2x128xf32>
    %87 = arith.mulf %71, %79 : vector<2x128xf32>
    %88 = arith.addf %86, %87 : vector<2x128xf32>
    %89 = math.tanh %88 : vector<2x128xf32>
    %90 = arith.mulf %85, %89 : vector<2x128xf32>
    %91 = vector.shape_cast %16 : vector<2x1xi1> to vector<2x1xi1>
    %92 = vector.broadcast %91 : vector<2x1xi1> to vector<2x128xi1>
    %93 = arith.select %92, %88, %9 : vector<2x128xi1>, vector<2x128xf32>
    %94 = vector.shape_cast %16 : vector<2x1xi1> to vector<2x1xi1>
    %95 = vector.broadcast %94 : vector<2x1xi1> to vector<2x128xi1>
    %96 = arith.select %95, %90, %8 : vector<2x128xi1>, vector<2x128xf32>
    %cst_31 = arith.constant 0.000000e+00 : f32
    %97 = vector.broadcast %cst_31 : f32 to vector<2x128xf32>
    %98 = vector.shape_cast %16 : vector<2x1xi1> to vector<2x1xi1>
    %99 = vector.broadcast %98 : vector<2x1xi1> to vector<2x128xi1>
    %100 = arith.select %99, %90, %97 : vector<2x128xi1>, vector<2x128xf32>
    %101 = arith.truncf %100 : vector<2x128xf32> to vector<2x128xbf16>
    %c7_32 = arith.constant 7 : index
    %c0_33 = arith.constant 0 : index
    %c0_34 = arith.constant 0 : index
    %102 = vector.load %arg7[%c7_32, %c0_33, %c0_34] : memref<8x2x128xbf16, #tpu.memory_space<vmem>>, vector<1x2x128xbf16>
    %103 = vector.shape_cast %102 : vector<1x2x128xbf16> to vector<2x128xbf16>
    %104 = vector.shape_cast %101 : vector<2x128xbf16> to vector<1x2x128xbf16>
    tpu.vector_store %arg7[%c7_32, %c0_33, %c0_34], %104 {strides = array<i32>} : memref<8x2x128xbf16, #tpu.memory_space<vmem>>, vector<1x2x128xbf16>,
    %c1_i32 = arith.constant 1 : i32
    %105 = arith.addi %10, %c1_i32 : i32
    %c7_i32_35 = arith.constant 7 : i32
    %106 = arith.subi %c7_i32_35, %105 : i32
    %107 = vector.broadcast %105 : i32 to vector<2x1xi32>
    %108 = arith.cmpi slt, %107, %3 : vector<2x1xi32>
    %109 = vector.broadcast %106 : i32 to vector<2x1xi32>
    %110 = arith.cmpi slt, %109, %3 : vector<2x1xi32>
    %c1 = arith.constant 1 : index
    %c0_36 = arith.constant 0 : index
    %c0_37 = arith.constant 0 : index
    %111 = vector.load %arg2[%c1, %c0_36, %c0_37] : memref<8x2x512xf32, #tpu.memory_space<vmem>>, vector<1x2x512xf32>
    %112 = vector.shape_cast %111 : vector<1x2x512xf32> to vector<2x512xf32>
    %113 = arith.truncf %52 : vector<2x128xf32> to vector<2x128xbf16>
    %cst_38 = arith.constant dense<0.000000e+00> : vector<2x512xf32>
    %114 = tpu.matmul %113, %4, %cst_38 {dimension_numbers = #tpu.dot_dimension_numbers<[1], [0], [0], [1], [0, 0, 1, 1], [], []>} : vector<2x128xbf16>, vector<128x512xbf16>, vector<2x512xf32> -> vector<2x512xf32>
    %115 = arith.addf %112, %114 : vector<2x512xf32>
    %116 = vector.extract_strided_slice %115 {offsets = [0, 0], sizes = [2, 128], strides = [1, 1]} : vector<2x512xf32> to vector<2x128xf32>
    %117 = arith.negf %116 : vector<2x128xf32>
    %118 = math.exp %117 : vector<2x128xf32>
    %cst_39 = arith.constant 1.000000e+00 : f32
    %119 = vector.broadcast %cst_39 : f32 to vector<2x128xf32>
    %120 = arith.addf %119, %118 : vector<2x128xf32>
    %121 = arith.divf %119, %120 : vector<2x128xf32>
    %122 = vector.extract_strided_slice %115 {offsets = [0, 128], sizes = [2, 128], strides = [1, 1]} : vector<2x512xf32> to vector<2x128xf32>
    %123 = arith.negf %122 : vector<2x128xf32>
    %124 = math.exp %123 : vector<2x128xf32>
    %cst_40 = arith.constant 1.000000e+00 : f32
    %125 = vector.broadcast %cst_40 : f32 to vector<2x128xf32>
    %126 = arith.addf %125, %124 : vector<2x128xf32>
    %127 = arith.divf %125, %126 : vector<2x128xf32>
    %128 = vector.extract_strided_slice %115 {offsets = [0, 256], sizes = [2, 128], strides = [1, 1]} : vector<2x512xf32> to vector<2x128xf32>
    %129 = math.tanh %128 : vector<2x128xf32>
    %130 = vector.extract_strided_slice %115 {offsets = [0, 384], sizes = [2, 128], strides = [1, 1]} : vector<2x512xf32> to vector<2x128xf32>
    %131 = arith.negf %130 : vector<2x128xf32>
    %132 = math.exp %131 : vector<2x128xf32>
    %cst_41 = arith.constant 1.000000e+00 : f32
    %133 = vector.broadcast %cst_41 : f32 to vector<2x128xf32>
    %134 = arith.addf %133, %132 : vector<2x128xf32>
    %135 = arith.divf %133, %134 : vector<2x128xf32>
    %136 = arith.mulf %127, %49 : vector<2x128xf32>
    %137 = arith.mulf %121, %129 : vector<2x128xf32>
    %138 = arith.addf %136, %137 : vector<2x128xf32>
    %139 = math.tanh %138 : vector<2x128xf32>
    %140 = arith.mulf %135, %139 : vector<2x128xf32>
    %141 = vector.shape_cast %108 : vector<2x1xi1> to vector<2x1xi1>
    %142 = vector.broadcast %141 : vector<2x1xi1> to vector<2x128xi1>
    %143 = arith.select %142, %138, %49 : vector<2x128xi1>, vector<2x128xf32>
    %144 = vector.shape_cast %108 : vector<2x1xi1> to vector<2x1xi1>
    %145 = vector.broadcast %144 : vector<2x1xi1> to vector<2x128xi1>
    %146 = arith.select %145, %140, %52 : vector<2x128xi1>, vector<2x128xf32>
    %cst_42 = arith.constant 0.000000e+00 : f32
    %147 = vector.broadcast %cst_42 : f32 to vector<2x128xf32>
    %148 = vector.shape_cast %108 : vector<2x1xi1> to vector<2x1xi1>
    %149 = vector.broadcast %148 : vector<2x1xi1> to vector<2x128xi1>
    %150 = arith.select %149, %140, %147 : vector<2x128xi1>, vector<2x128xf32>
    %151 = arith.truncf %150 : vector<2x128xf32> to vector<2x128xbf16>
    %c1_43 = arith.constant 1 : index
    %c0_44 = arith.constant 0 : index
    %c0_45 = arith.constant 0 : index
    %152 = vector.load %arg6[%c1_43, %c0_44, %c0_45] : memref<8x2x128xbf16, #tpu.memory_space<vmem>>, vector<1x2x128xbf16>
    %153 = vector.shape_cast %152 : vector<1x2x128xbf16> to vector<2x128xbf16>
    %154 = vector.shape_cast %151 : vector<2x128xbf16> to vector<1x2x128xbf16>
    tpu.vector_store %arg6[%c1_43, %c0_44, %c0_45], %154 {strides = array<i32>} : memref<8x2x128xbf16, #tpu.memory_space<vmem>>, vector<1x2x128xbf16>,
    %c6 = arith.constant 6 : index
    %c0_46 = arith.constant 0 : index
    %c0_47 = arith.constant 0 : index
    %155 = vector.load %arg3[%c6, %c0_46, %c0_47] : memref<8x2x512xf32, #tpu.memory_space<vmem>>, vector<1x2x512xf32>
    %156 = vector.shape_cast %155 : vector<1x2x512xf32> to vector<2x512xf32>
    %157 = arith.truncf %96 : vector<2x128xf32> to vector<2x128xbf16>
    %cst_48 = arith.constant dense<0.000000e+00> : vector<2x512xf32>
    %158 = tpu.matmul %157, %5, %cst_48 {dimension_numbers = #tpu.dot_dimension_numbers<[1], [0], [0], [1], [0, 0, 1, 1], [], []>} : vector<2x128xbf16>, vector<128x512xbf16>, vector<2x512xf32> -> vector<2x512xf32>
    %159 = arith.addf %156, %158 : vector<2x512xf32>
    %160 = vector.extract_strided_slice %159 {offsets = [0, 0], sizes = [2, 128], strides = [1, 1]} : vector<2x512xf32> to vector<2x128xf32>
    %161 = arith.negf %160 : vector<2x128xf32>
    %162 = math.exp %161 : vector<2x128xf32>
    %cst_49 = arith.constant 1.000000e+00 : f32
    %163 = vector.broadcast %cst_49 : f32 to vector<2x128xf32>
    %164 = arith.addf %163, %162 : vector<2x128xf32>
    %165 = arith.divf %163, %164 : vector<2x128xf32>
    %166 = vector.extract_strided_slice %159 {offsets = [0, 128], sizes = [2, 128], strides = [1, 1]} : vector<2x512xf32> to vector<2x128xf32>
    %167 = arith.negf %166 : vector<2x128xf32>
    %168 = math.exp %167 : vector<2x128xf32>
    %cst_50 = arith.constant 1.000000e+00 : f32
    %169 = vector.broadcast %cst_50 : f32 to vector<2x128xf32>
    %170 = arith.addf %169, %168 : vector<2x128xf32>
    %171 = arith.divf %169, %170 : vector<2x128xf32>
    %172 = vector.extract_strided_slice %159 {offsets = [0, 256], sizes = [2, 128], strides = [1, 1]} : vector<2x512xf32> to vector<2x128xf32>
    %173 = math.tanh %172 : vector<2x128xf32>
    %174 = vector.extract_strided_slice %159 {offsets = [0, 384], sizes = [2, 128], strides = [1, 1]} : vector<2x512xf32> to vector<2x128xf32>
    %175 = arith.negf %174 : vector<2x128xf32>
    %176 = math.exp %175 : vector<2x128xf32>
    %cst_51 = arith.constant 1.000000e+00 : f32
    %177 = vector.broadcast %cst_51 : f32 to vector<2x128xf32>
    %178 = arith.addf %177, %176 : vector<2x128xf32>
    %179 = arith.divf %177, %178 : vector<2x128xf32>
    %180 = arith.mulf %171, %93 : vector<2x128xf32>
    %181 = arith.mulf %165, %173 : vector<2x128xf32>
    %182 = arith.addf %180, %181 : vector<2x128xf32>
    %183 = math.tanh %182 : vector<2x128xf32>
    %184 = arith.mulf %179, %183 : vector<2x128xf32>
    %185 = vector.shape_cast %110 : vector<2x1xi1> to vector<2x1xi1>
    %186 = vector.broadcast %185 : vector<2x1xi1> to vector<2x128xi1>
    %187 = arith.select %186, %182, %93 : vector<2x128xi1>, vector<2x128xf32>
    %188 = vector.shape_cast %110 : vector<2x1xi1> to vector<2x1xi1>
    %189 = vector.broadcast %188 : vector<2x1xi1> to vector<2x128xi1>
    %190 = arith.select %189, %184, %96 : vector<2x128xi1>, vector<2x128xf32>
    %cst_52 = arith.constant 0.000000e+00 : f32
    %191 = vector.broadcast %cst_52 : f32 to vector<2x128xf32>
    %192 = vector.shape_cast %110 : vector<2x1xi1> to vector<2x1xi1>
    %193 = vector.broadcast %192 : vector<2x1xi1> to vector<2x128xi1>
    %194 = arith.select %193, %184, %191 : vector<2x128xi1>, vector<2x128xf32>
    %195 = arith.truncf %194 : vector<2x128xf32> to vector<2x128xbf16>
    %c6_53 = arith.constant 6 : index
    %c0_54 = arith.constant 0 : index
    %c0_55 = arith.constant 0 : index
    %196 = vector.load %arg7[%c6_53, %c0_54, %c0_55] : memref<8x2x128xbf16, #tpu.memory_space<vmem>>, vector<1x2x128xbf16>
    %197 = vector.shape_cast %196 : vector<1x2x128xbf16> to vector<2x128xbf16>
    %198 = vector.shape_cast %195 : vector<2x128xbf16> to vector<1x2x128xbf16>
    tpu.vector_store %arg7[%c6_53, %c0_54, %c0_55], %198 {strides = array<i32>} : memref<8x2x128xbf16, #tpu.memory_space<vmem>>, vector<1x2x128xbf16>,
    %c2_i32 = arith.constant 2 : i32
    %199 = arith.addi %10, %c2_i32 : i32
    %c7_i32_56 = arith.constant 7 : i32
    %200 = arith.subi %c7_i32_56, %199 : i32
    %201 = vector.broadcast %199 : i32 to vector<2x1xi32>
    %202 = arith.cmpi slt, %201, %3 : vector<2x1xi32>
    %203 = vector.broadcast %200 : i32 to vector<2x1xi32>
    %204 = arith.cmpi slt, %203, %3 : vector<2x1xi32>
    %c2 = arith.constant 2 : index
    %c0_57 = arith.constant 0 : index
    %c0_58 = arith.constant 0 : index
    %205 = vector.load %arg2[%c2, %c0_57, %c0_58] : memref<8x2x512xf32, #tpu.memory_space<vmem>>, vector<1x2x512xf32>
    %206 = vector.shape_cast %205 : vector<1x2x512xf32> to vector<2x512xf32>
    %207 = arith.truncf %146 : vector<2x128xf32> to vector<2x128xbf16>
    %cst_59 = arith.constant dense<0.000000e+00> : vector<2x512xf32>
    %208 = tpu.matmul %207, %4, %cst_59 {dimension_numbers = #tpu.dot_dimension_numbers<[1], [0], [0], [1], [0, 0, 1, 1], [], []>} : vector<2x128xbf16>, vector<128x512xbf16>, vector<2x512xf32> -> vector<2x512xf32>
    %209 = arith.addf %206, %208 : vector<2x512xf32>
    %210 = vector.extract_strided_slice %209 {offsets = [0, 0], sizes = [2, 128], strides = [1, 1]} : vector<2x512xf32> to vector<2x128xf32>
    %211 = arith.negf %210 : vector<2x128xf32>
    %212 = math.exp %211 : vector<2x128xf32>
    %cst_60 = arith.constant 1.000000e+00 : f32
    %213 = vector.broadcast %cst_60 : f32 to vector<2x128xf32>
    %214 = arith.addf %213, %212 : vector<2x128xf32>
    %215 = arith.divf %213, %214 : vector<2x128xf32>
    %216 = vector.extract_strided_slice %209 {offsets = [0, 128], sizes = [2, 128], strides = [1, 1]} : vector<2x512xf32> to vector<2x128xf32>
    %217 = arith.negf %216 : vector<2x128xf32>
    %218 = math.exp %217 : vector<2x128xf32>
    %cst_61 = arith.constant 1.000000e+00 : f32
    %219 = vector.broadcast %cst_61 : f32 to vector<2x128xf32>
    %220 = arith.addf %219, %218 : vector<2x128xf32>
    %221 = arith.divf %219, %220 : vector<2x128xf32>
    %222 = vector.extract_strided_slice %209 {offsets = [0, 256], sizes = [2, 128], strides = [1, 1]} : vector<2x512xf32> to vector<2x128xf32>
    %223 = math.tanh %222 : vector<2x128xf32>
    %224 = vector.extract_strided_slice %209 {offsets = [0, 384], sizes = [2, 128], strides = [1, 1]} : vector<2x512xf32> to vector<2x128xf32>
    %225 = arith.negf %224 : vector<2x128xf32>
    %226 = math.exp %225 : vector<2x128xf32>
    %cst_62 = arith.constant 1.000000e+00 : f32
    %227 = vector.broadcast %cst_62 : f32 to vector<2x128xf32>
    %228 = arith.addf %227, %226 : vector<2x128xf32>
    %229 = arith.divf %227, %228 : vector<2x128xf32>
    %230 = arith.mulf %221, %143 : vector<2x128xf32>
    %231 = arith.mulf %215, %223 : vector<2x128xf32>
    %232 = arith.addf %230, %231 : vector<2x128xf32>
    %233 = math.tanh %232 : vector<2x128xf32>
    %234 = arith.mulf %229, %233 : vector<2x128xf32>
    %235 = vector.shape_cast %202 : vector<2x1xi1> to vector<2x1xi1>
    %236 = vector.broadcast %235 : vector<2x1xi1> to vector<2x128xi1>
    %237 = arith.select %236, %232, %143 : vector<2x128xi1>, vector<2x128xf32>
    %238 = vector.shape_cast %202 : vector<2x1xi1> to vector<2x1xi1>
    %239 = vector.broadcast %238 : vector<2x1xi1> to vector<2x128xi1>
    %240 = arith.select %239, %234, %146 : vector<2x128xi1>, vector<2x128xf32>
    %cst_63 = arith.constant 0.000000e+00 : f32
    %241 = vector.broadcast %cst_63 : f32 to vector<2x128xf32>
    %242 = vector.shape_cast %202 : vector<2x1xi1> to vector<2x1xi1>
    %243 = vector.broadcast %242 : vector<2x1xi1> to vector<2x128xi1>
    %244 = arith.select %243, %234, %241 : vector<2x128xi1>, vector<2x128xf32>
    %245 = arith.truncf %244 : vector<2x128xf32> to vector<2x128xbf16>
    %c2_64 = arith.constant 2 : index
    %c0_65 = arith.constant 0 : index
    %c0_66 = arith.constant 0 : index
    %246 = vector.load %arg6[%c2_64, %c0_65, %c0_66] : memref<8x2x128xbf16, #tpu.memory_space<vmem>>, vector<1x2x128xbf16>
    %247 = vector.shape_cast %246 : vector<1x2x128xbf16> to vector<2x128xbf16>
    %248 = vector.shape_cast %245 : vector<2x128xbf16> to vector<1x2x128xbf16>
    tpu.vector_store %arg6[%c2_64, %c0_65, %c0_66], %248 {strides = array<i32>} : memref<8x2x128xbf16, #tpu.memory_space<vmem>>, vector<1x2x128xbf16>,
    %c5 = arith.constant 5 : index
    %c0_67 = arith.constant 0 : index
    %c0_68 = arith.constant 0 : index
    %249 = vector.load %arg3[%c5, %c0_67, %c0_68] : memref<8x2x512xf32, #tpu.memory_space<vmem>>, vector<1x2x512xf32>
    %250 = vector.shape_cast %249 : vector<1x2x512xf32> to vector<2x512xf32>
    %251 = arith.truncf %190 : vector<2x128xf32> to vector<2x128xbf16>
    %cst_69 = arith.constant dense<0.000000e+00> : vector<2x512xf32>
    %252 = tpu.matmul %251, %5, %cst_69 {dimension_numbers = #tpu.dot_dimension_numbers<[1], [0], [0], [1], [0, 0, 1, 1], [], []>} : vector<2x128xbf16>, vector<128x512xbf16>, vector<2x512xf32> -> vector<2x512xf32>
    %253 = arith.addf %250, %252 : vector<2x512xf32>
    %254 = vector.extract_strided_slice %253 {offsets = [0, 0], sizes = [2, 128], strides = [1, 1]} : vector<2x512xf32> to vector<2x128xf32>
    %255 = arith.negf %254 : vector<2x128xf32>
    %256 = math.exp %255 : vector<2x128xf32>
    %cst_70 = arith.constant 1.000000e+00 : f32
    %257 = vector.broadcast %cst_70 : f32 to vector<2x128xf32>
    %258 = arith.addf %257, %256 : vector<2x128xf32>
    %259 = arith.divf %257, %258 : vector<2x128xf32>
    %260 = vector.extract_strided_slice %253 {offsets = [0, 128], sizes = [2, 128], strides = [1, 1]} : vector<2x512xf32> to vector<2x128xf32>
    %261 = arith.negf %260 : vector<2x128xf32>
    %262 = math.exp %261 : vector<2x128xf32>
    %cst_71 = arith.constant 1.000000e+00 : f32
    %263 = vector.broadcast %cst_71 : f32 to vector<2x128xf32>
    %264 = arith.addf %263, %262 : vector<2x128xf32>
    %265 = arith.divf %263, %264 : vector<2x128xf32>
    %266 = vector.extract_strided_slice %253 {offsets = [0, 256], sizes = [2, 128], strides = [1, 1]} : vector<2x512xf32> to vector<2x128xf32>
    %267 = math.tanh %266 : vector<2x128xf32>
    %268 = vector.extract_strided_slice %253 {offsets = [0, 384], sizes = [2, 128], strides = [1, 1]} : vector<2x512xf32> to vector<2x128xf32>
    %269 = arith.negf %268 : vector<2x128xf32>
    %270 = math.exp %269 : vector<2x128xf32>
    %cst_72 = arith.constant 1.000000e+00 : f32
    %271 = vector.broadcast %cst_72 : f32 to vector<2x128xf32>
    %272 = arith.addf %271, %270 : vector<2x128xf32>
    %273 = arith.divf %271, %272 : vector<2x128xf32>
    %274 = arith.mulf %265, %187 : vector<2x128xf32>
    %275 = arith.mulf %259, %267 : vector<2x128xf32>
    %276 = arith.addf %274, %275 : vector<2x128xf32>
    %277 = math.tanh %276 : vector<2x128xf32>
    %278 = arith.mulf %273, %277 : vector<2x128xf32>
    %279 = vector.shape_cast %204 : vector<2x1xi1> to vector<2x1xi1>
    %280 = vector.broadcast %279 : vector<2x1xi1> to vector<2x128xi1>
    %281 = arith.select %280, %276, %187 : vector<2x128xi1>, vector<2x128xf32>
    %282 = vector.shape_cast %204 : vector<2x1xi1> to vector<2x1xi1>
    %283 = vector.broadcast %282 : vector<2x1xi1> to vector<2x128xi1>
    %284 = arith.select %283, %278, %190 : vector<2x128xi1>, vector<2x128xf32>
    %cst_73 = arith.constant 0.000000e+00 : f32
    %285 = vector.broadcast %cst_73 : f32 to vector<2x128xf32>
    %286 = vector.shape_cast %204 : vector<2x1xi1> to vector<2x1xi1>
    %287 = vector.broadcast %286 : vector<2x1xi1> to vector<2x128xi1>
    %288 = arith.select %287, %278, %285 : vector<2x128xi1>, vector<2x128xf32>
    %289 = arith.truncf %288 : vector<2x128xf32> to vector<2x128xbf16>
    %c5_74 = arith.constant 5 : index
    %c0_75 = arith.constant 0 : index
    %c0_76 = arith.constant 0 : index
    %290 = vector.load %arg7[%c5_74, %c0_75, %c0_76] : memref<8x2x128xbf16, #tpu.memory_space<vmem>>, vector<1x2x128xbf16>
    %291 = vector.shape_cast %290 : vector<1x2x128xbf16> to vector<2x128xbf16>
    %292 = vector.shape_cast %289 : vector<2x128xbf16> to vector<1x2x128xbf16>
    tpu.vector_store %arg7[%c5_74, %c0_75, %c0_76], %292 {strides = array<i32>} : memref<8x2x128xbf16, #tpu.memory_space<vmem>>, vector<1x2x128xbf16>,
    %c3_i32 = arith.constant 3 : i32
    %293 = arith.addi %10, %c3_i32 : i32
    %c7_i32_77 = arith.constant 7 : i32
    %294 = arith.subi %c7_i32_77, %293 : i32
    %295 = vector.broadcast %293 : i32 to vector<2x1xi32>
    %296 = arith.cmpi slt, %295, %3 : vector<2x1xi32>
    %297 = vector.broadcast %294 : i32 to vector<2x1xi32>
    %298 = arith.cmpi slt, %297, %3 : vector<2x1xi32>
    %c3 = arith.constant 3 : index
    %c0_78 = arith.constant 0 : index
    %c0_79 = arith.constant 0 : index
    %299 = vector.load %arg2[%c3, %c0_78, %c0_79] : memref<8x2x512xf32, #tpu.memory_space<vmem>>, vector<1x2x512xf32>
    %300 = vector.shape_cast %299 : vector<1x2x512xf32> to vector<2x512xf32>
    %301 = arith.truncf %240 : vector<2x128xf32> to vector<2x128xbf16>
    %cst_80 = arith.constant dense<0.000000e+00> : vector<2x512xf32>
    %302 = tpu.matmul %301, %4, %cst_80 {dimension_numbers = #tpu.dot_dimension_numbers<[1], [0], [0], [1], [0, 0, 1, 1], [], []>} : vector<2x128xbf16>, vector<128x512xbf16>, vector<2x512xf32> -> vector<2x512xf32>
    %303 = arith.addf %300, %302 : vector<2x512xf32>
    %304 = vector.extract_strided_slice %303 {offsets = [0, 0], sizes = [2, 128], strides = [1, 1]} : vector<2x512xf32> to vector<2x128xf32>
    %305 = arith.negf %304 : vector<2x128xf32>
    %306 = math.exp %305 : vector<2x128xf32>
    %cst_81 = arith.constant 1.000000e+00 : f32
    %307 = vector.broadcast %cst_81 : f32 to vector<2x128xf32>
    %308 = arith.addf %307, %306 : vector<2x128xf32>
    %309 = arith.divf %307, %308 : vector<2x128xf32>
    %310 = vector.extract_strided_slice %303 {offsets = [0, 128], sizes = [2, 128], strides = [1, 1]} : vector<2x512xf32> to vector<2x128xf32>
    %311 = arith.negf %310 : vector<2x128xf32>
    %312 = math.exp %311 : vector<2x128xf32>
    %cst_82 = arith.constant 1.000000e+00 : f32
    %313 = vector.broadcast %cst_82 : f32 to vector<2x128xf32>
    %314 = arith.addf %313, %312 : vector<2x128xf32>
    %315 = arith.divf %313, %314 : vector<2x128xf32>
    %316 = vector.extract_strided_slice %303 {offsets = [0, 256], sizes = [2, 128], strides = [1, 1]} : vector<2x512xf32> to vector<2x128xf32>
    %317 = math.tanh %316 : vector<2x128xf32>
    %318 = vector.extract_strided_slice %303 {offsets = [0, 384], sizes = [2, 128], strides = [1, 1]} : vector<2x512xf32> to vector<2x128xf32>
    %319 = arith.negf %318 : vector<2x128xf32>
    %320 = math.exp %319 : vector<2x128xf32>
    %cst_83 = arith.constant 1.000000e+00 : f32
    %321 = vector.broadcast %cst_83 : f32 to vector<2x128xf32>
    %322 = arith.addf %321, %320 : vector<2x128xf32>
    %323 = arith.divf %321, %322 : vector<2x128xf32>
    %324 = arith.mulf %315, %237 : vector<2x128xf32>
    %325 = arith.mulf %309, %317 : vector<2x128xf32>
    %326 = arith.addf %324, %325 : vector<2x128xf32>
    %327 = math.tanh %326 : vector<2x128xf32>
    %328 = arith.mulf %323, %327 : vector<2x128xf32>
    %329 = vector.shape_cast %296 : vector<2x1xi1> to vector<2x1xi1>
    %330 = vector.broadcast %329 : vector<2x1xi1> to vector<2x128xi1>
    %331 = arith.select %330, %326, %237 : vector<2x128xi1>, vector<2x128xf32>
    %332 = vector.shape_cast %296 : vector<2x1xi1> to vector<2x1xi1>
    %333 = vector.broadcast %332 : vector<2x1xi1> to vector<2x128xi1>
    %334 = arith.select %333, %328, %240 : vector<2x128xi1>, vector<2x128xf32>
    %cst_84 = arith.constant 0.000000e+00 : f32
    %335 = vector.broadcast %cst_84 : f32 to vector<2x128xf32>
    %336 = vector.shape_cast %296 : vector<2x1xi1> to vector<2x1xi1>
    %337 = vector.broadcast %336 : vector<2x1xi1> to vector<2x128xi1>
    %338 = arith.select %337, %328, %335 : vector<2x128xi1>, vector<2x128xf32>
    %339 = arith.truncf %338 : vector<2x128xf32> to vector<2x128xbf16>
    %c3_85 = arith.constant 3 : index
    %c0_86 = arith.constant 0 : index
    %c0_87 = arith.constant 0 : index
    %340 = vector.load %arg6[%c3_85, %c0_86, %c0_87] : memref<8x2x128xbf16, #tpu.memory_space<vmem>>, vector<1x2x128xbf16>
    %341 = vector.shape_cast %340 : vector<1x2x128xbf16> to vector<2x128xbf16>
    %342 = vector.shape_cast %339 : vector<2x128xbf16> to vector<1x2x128xbf16>
    tpu.vector_store %arg6[%c3_85, %c0_86, %c0_87], %342 {strides = array<i32>} : memref<8x2x128xbf16, #tpu.memory_space<vmem>>, vector<1x2x128xbf16>,
    %c4 = arith.constant 4 : index
    %c0_88 = arith.constant 0 : index
    %c0_89 = arith.constant 0 : index
    %343 = vector.load %arg3[%c4, %c0_88, %c0_89] : memref<8x2x512xf32, #tpu.memory_space<vmem>>, vector<1x2x512xf32>
    %344 = vector.shape_cast %343 : vector<1x2x512xf32> to vector<2x512xf32>
    %345 = arith.truncf %284 : vector<2x128xf32> to vector<2x128xbf16>
    %cst_90 = arith.constant dense<0.000000e+00> : vector<2x512xf32>
    %346 = tpu.matmul %345, %5, %cst_90 {dimension_numbers = #tpu.dot_dimension_numbers<[1], [0], [0], [1], [0, 0, 1, 1], [], []>} : vector<2x128xbf16>, vector<128x512xbf16>, vector<2x512xf32> -> vector<2x512xf32>
    %347 = arith.addf %344, %346 : vector<2x512xf32>
    %348 = vector.extract_strided_slice %347 {offsets = [0, 0], sizes = [2, 128], strides = [1, 1]} : vector<2x512xf32> to vector<2x128xf32>
    %349 = arith.negf %348 : vector<2x128xf32>
    %350 = math.exp %349 : vector<2x128xf32>
    %cst_91 = arith.constant 1.000000e+00 : f32
    %351 = vector.broadcast %cst_91 : f32 to vector<2x128xf32>
    %352 = arith.addf %351, %350 : vector<2x128xf32>
    %353 = arith.divf %351, %352 : vector<2x128xf32>
    %354 = vector.extract_strided_slice %347 {offsets = [0, 128], sizes = [2, 128], strides = [1, 1]} : vector<2x512xf32> to vector<2x128xf32>
    %355 = arith.negf %354 : vector<2x128xf32>
    %356 = math.exp %355 : vector<2x128xf32>
    %cst_92 = arith.constant 1.000000e+00 : f32
    %357 = vector.broadcast %cst_92 : f32 to vector<2x128xf32>
    %358 = arith.addf %357, %356 : vector<2x128xf32>
    %359 = arith.divf %357, %358 : vector<2x128xf32>
    %360 = vector.extract_strided_slice %347 {offsets = [0, 256], sizes = [2, 128], strides = [1, 1]} : vector<2x512xf32> to vector<2x128xf32>
    %361 = math.tanh %360 : vector<2x128xf32>
    %362 = vector.extract_strided_slice %347 {offsets = [0, 384], sizes = [2, 128], strides = [1, 1]} : vector<2x512xf32> to vector<2x128xf32>
    %363 = arith.negf %362 : vector<2x128xf32>
    %364 = math.exp %363 : vector<2x128xf32>
    %cst_93 = arith.constant 1.000000e+00 : f32
    %365 = vector.broadcast %cst_93 : f32 to vector<2x128xf32>
    %366 = arith.addf %365, %364 : vector<2x128xf32>
    %367 = arith.divf %365, %366 : vector<2x128xf32>
    %368 = arith.mulf %359, %281 : vector<2x128xf32>
    %369 = arith.mulf %353, %361 : vector<2x128xf32>
    %370 = arith.addf %368, %369 : vector<2x128xf32>
    %371 = math.tanh %370 : vector<2x128xf32>
    %372 = arith.mulf %367, %371 : vector<2x128xf32>
    %373 = vector.shape_cast %298 : vector<2x1xi1> to vector<2x1xi1>
    %374 = vector.broadcast %373 : vector<2x1xi1> to vector<2x128xi1>
    %375 = arith.select %374, %370, %281 : vector<2x128xi1>, vector<2x128xf32>
    %376 = vector.shape_cast %298 : vector<2x1xi1> to vector<2x1xi1>
    %377 = vector.broadcast %376 : vector<2x1xi1> to vector<2x128xi1>
    %378 = arith.select %377, %372, %284 : vector<2x128xi1>, vector<2x128xf32>
    %cst_94 = arith.constant 0.000000e+00 : f32
    %379 = vector.broadcast %cst_94 : f32 to vector<2x128xf32>
    %380 = vector.shape_cast %298 : vector<2x1xi1> to vector<2x1xi1>
    %381 = vector.broadcast %380 : vector<2x1xi1> to vector<2x128xi1>
    %382 = arith.select %381, %372, %379 : vector<2x128xi1>, vector<2x128xf32>
    %383 = arith.truncf %382 : vector<2x128xf32> to vector<2x128xbf16>
    %c4_95 = arith.constant 4 : index
    %c0_96 = arith.constant 0 : index
    %c0_97 = arith.constant 0 : index
    %384 = vector.load %arg7[%c4_95, %c0_96, %c0_97] : memref<8x2x128xbf16, #tpu.memory_space<vmem>>, vector<1x2x128xbf16>
    %385 = vector.shape_cast %384 : vector<1x2x128xbf16> to vector<2x128xbf16>
    %386 = vector.shape_cast %383 : vector<2x128xbf16> to vector<1x2x128xbf16>
    tpu.vector_store %arg7[%c4_95, %c0_96, %c0_97], %386 {strides = array<i32>} : memref<8x2x128xbf16, #tpu.memory_space<vmem>>, vector<1x2x128xbf16>,
    %c4_i32 = arith.constant 4 : i32
    %387 = arith.addi %10, %c4_i32 : i32
    %c7_i32_98 = arith.constant 7 : i32
    %388 = arith.subi %c7_i32_98, %387 : i32
    %389 = vector.broadcast %387 : i32 to vector<2x1xi32>
    %390 = arith.cmpi slt, %389, %3 : vector<2x1xi32>
    %391 = vector.broadcast %388 : i32 to vector<2x1xi32>
    %392 = arith.cmpi slt, %391, %3 : vector<2x1xi32>
    %c4_99 = arith.constant 4 : index
    %c0_100 = arith.constant 0 : index
    %c0_101 = arith.constant 0 : index
    %393 = vector.load %arg2[%c4_99, %c0_100, %c0_101] : memref<8x2x512xf32, #tpu.memory_space<vmem>>, vector<1x2x512xf32>
    %394 = vector.shape_cast %393 : vector<1x2x512xf32> to vector<2x512xf32>
    %395 = arith.truncf %334 : vector<2x128xf32> to vector<2x128xbf16>
    %cst_102 = arith.constant dense<0.000000e+00> : vector<2x512xf32>
    %396 = tpu.matmul %395, %4, %cst_102 {dimension_numbers = #tpu.dot_dimension_numbers<[1], [0], [0], [1], [0, 0, 1, 1], [], []>} : vector<2x128xbf16>, vector<128x512xbf16>, vector<2x512xf32> -> vector<2x512xf32>
    %397 = arith.addf %394, %396 : vector<2x512xf32>
    %398 = vector.extract_strided_slice %397 {offsets = [0, 0], sizes = [2, 128], strides = [1, 1]} : vector<2x512xf32> to vector<2x128xf32>
    %399 = arith.negf %398 : vector<2x128xf32>
    %400 = math.exp %399 : vector<2x128xf32>
    %cst_103 = arith.constant 1.000000e+00 : f32
    %401 = vector.broadcast %cst_103 : f32 to vector<2x128xf32>
    %402 = arith.addf %401, %400 : vector<2x128xf32>
    %403 = arith.divf %401, %402 : vector<2x128xf32>
    %404 = vector.extract_strided_slice %397 {offsets = [0, 128], sizes = [2, 128], strides = [1, 1]} : vector<2x512xf32> to vector<2x128xf32>
    %405 = arith.negf %404 : vector<2x128xf32>
    %406 = math.exp %405 : vector<2x128xf32>
    %cst_104 = arith.constant 1.000000e+00 : f32
    %407 = vector.broadcast %cst_104 : f32 to vector<2x128xf32>
    %408 = arith.addf %407, %406 : vector<2x128xf32>
    %409 = arith.divf %407, %408 : vector<2x128xf32>
    %410 = vector.extract_strided_slice %397 {offsets = [0, 256], sizes = [2, 128], strides = [1, 1]} : vector<2x512xf32> to vector<2x128xf32>
    %411 = math.tanh %410 : vector<2x128xf32>
    %412 = vector.extract_strided_slice %397 {offsets = [0, 384], sizes = [2, 128], strides = [1, 1]} : vector<2x512xf32> to vector<2x128xf32>
    %413 = arith.negf %412 : vector<2x128xf32>
    %414 = math.exp %413 : vector<2x128xf32>
    %cst_105 = arith.constant 1.000000e+00 : f32
    %415 = vector.broadcast %cst_105 : f32 to vector<2x128xf32>
    %416 = arith.addf %415, %414 : vector<2x128xf32>
    %417 = arith.divf %415, %416 : vector<2x128xf32>
    %418 = arith.mulf %409, %331 : vector<2x128xf32>
    %419 = arith.mulf %403, %411 : vector<2x128xf32>
    %420 = arith.addf %418, %419 : vector<2x128xf32>
    %421 = math.tanh %420 : vector<2x128xf32>
    %422 = arith.mulf %417, %421 : vector<2x128xf32>
    %423 = vector.shape_cast %390 : vector<2x1xi1> to vector<2x1xi1>
    %424 = vector.broadcast %423 : vector<2x1xi1> to vector<2x128xi1>
    %425 = arith.select %424, %420, %331 : vector<2x128xi1>, vector<2x128xf32>
    %426 = vector.shape_cast %390 : vector<2x1xi1> to vector<2x1xi1>
    %427 = vector.broadcast %426 : vector<2x1xi1> to vector<2x128xi1>
    %428 = arith.select %427, %422, %334 : vector<2x128xi1>, vector<2x128xf32>
    %cst_106 = arith.constant 0.000000e+00 : f32
    %429 = vector.broadcast %cst_106 : f32 to vector<2x128xf32>
    %430 = vector.shape_cast %390 : vector<2x1xi1> to vector<2x1xi1>
    %431 = vector.broadcast %430 : vector<2x1xi1> to vector<2x128xi1>
    %432 = arith.select %431, %422, %429 : vector<2x128xi1>, vector<2x128xf32>
    %433 = arith.truncf %432 : vector<2x128xf32> to vector<2x128xbf16>
    %c4_107 = arith.constant 4 : index
    %c0_108 = arith.constant 0 : index
    %c0_109 = arith.constant 0 : index
    %434 = vector.load %arg6[%c4_107, %c0_108, %c0_109] : memref<8x2x128xbf16, #tpu.memory_space<vmem>>, vector<1x2x128xbf16>
    %435 = vector.shape_cast %434 : vector<1x2x128xbf16> to vector<2x128xbf16>
    %436 = vector.shape_cast %433 : vector<2x128xbf16> to vector<1x2x128xbf16>
    tpu.vector_store %arg6[%c4_107, %c0_108, %c0_109], %436 {strides = array<i32>} : memref<8x2x128xbf16, #tpu.memory_space<vmem>>, vector<1x2x128xbf16>,
    %c3_110 = arith.constant 3 : index
    %c0_111 = arith.constant 0 : index
    %c0_112 = arith.constant 0 : index
    %437 = vector.load %arg3[%c3_110, %c0_111, %c0_112] : memref<8x2x512xf32, #tpu.memory_space<vmem>>, vector<1x2x512xf32>
    %438 = vector.shape_cast %437 : vector<1x2x512xf32> to vector<2x512xf32>
    %439 = arith.truncf %378 : vector<2x128xf32> to vector<2x128xbf16>
    %cst_113 = arith.constant dense<0.000000e+00> : vector<2x512xf32>
    %440 = tpu.matmul %439, %5, %cst_113 {dimension_numbers = #tpu.dot_dimension_numbers<[1], [0], [0], [1], [0, 0, 1, 1], [], []>} : vector<2x128xbf16>, vector<128x512xbf16>, vector<2x512xf32> -> vector<2x512xf32>
    %441 = arith.addf %438, %440 : vector<2x512xf32>
    %442 = vector.extract_strided_slice %441 {offsets = [0, 0], sizes = [2, 128], strides = [1, 1]} : vector<2x512xf32> to vector<2x128xf32>
    %443 = arith.negf %442 : vector<2x128xf32>
    %444 = math.exp %443 : vector<2x128xf32>
    %cst_114 = arith.constant 1.000000e+00 : f32
    %445 = vector.broadcast %cst_114 : f32 to vector<2x128xf32>
    %446 = arith.addf %445, %444 : vector<2x128xf32>
    %447 = arith.divf %445, %446 : vector<2x128xf32>
    %448 = vector.extract_strided_slice %441 {offsets = [0, 128], sizes = [2, 128], strides = [1, 1]} : vector<2x512xf32> to vector<2x128xf32>
    %449 = arith.negf %448 : vector<2x128xf32>
    %450 = math.exp %449 : vector<2x128xf32>
    %cst_115 = arith.constant 1.000000e+00 : f32
    %451 = vector.broadcast %cst_115 : f32 to vector<2x128xf32>
    %452 = arith.addf %451, %450 : vector<2x128xf32>
    %453 = arith.divf %451, %452 : vector<2x128xf32>
    %454 = vector.extract_strided_slice %441 {offsets = [0, 256], sizes = [2, 128], strides = [1, 1]} : vector<2x512xf32> to vector<2x128xf32>
    %455 = math.tanh %454 : vector<2x128xf32>
    %456 = vector.extract_strided_slice %441 {offsets = [0, 384], sizes = [2, 128], strides = [1, 1]} : vector<2x512xf32> to vector<2x128xf32>
    %457 = arith.negf %456 : vector<2x128xf32>
    %458 = math.exp %457 : vector<2x128xf32>
    %cst_116 = arith.constant 1.000000e+00 : f32
    %459 = vector.broadcast %cst_116 : f32 to vector<2x128xf32>
    %460 = arith.addf %459, %458 : vector<2x128xf32>
    %461 = arith.divf %459, %460 : vector<2x128xf32>
    %462 = arith.mulf %453, %375 : vector<2x128xf32>
    %463 = arith.mulf %447, %455 : vector<2x128xf32>
    %464 = arith.addf %462, %463 : vector<2x128xf32>
    %465 = math.tanh %464 : vector<2x128xf32>
    %466 = arith.mulf %461, %465 : vector<2x128xf32>
    %467 = vector.shape_cast %392 : vector<2x1xi1> to vector<2x1xi1>
    %468 = vector.broadcast %467 : vector<2x1xi1> to vector<2x128xi1>
    %469 = arith.select %468, %464, %375 : vector<2x128xi1>, vector<2x128xf32>
    %470 = vector.shape_cast %392 : vector<2x1xi1> to vector<2x1xi1>
    %471 = vector.broadcast %470 : vector<2x1xi1> to vector<2x128xi1>
    %472 = arith.select %471, %466, %378 : vector<2x128xi1>, vector<2x128xf32>
    %cst_117 = arith.constant 0.000000e+00 : f32
    %473 = vector.broadcast %cst_117 : f32 to vector<2x128xf32>
    %474 = vector.shape_cast %392 : vector<2x1xi1> to vector<2x1xi1>
    %475 = vector.broadcast %474 : vector<2x1xi1> to vector<2x128xi1>
    %476 = arith.select %475, %466, %473 : vector<2x128xi1>, vector<2x128xf32>
    %477 = arith.truncf %476 : vector<2x128xf32> to vector<2x128xbf16>
    %c3_118 = arith.constant 3 : index
    %c0_119 = arith.constant 0 : index
    %c0_120 = arith.constant 0 : index
    %478 = vector.load %arg7[%c3_118, %c0_119, %c0_120] : memref<8x2x128xbf16, #tpu.memory_space<vmem>>, vector<1x2x128xbf16>
    %479 = vector.shape_cast %478 : vector<1x2x128xbf16> to vector<2x128xbf16>
    %480 = vector.shape_cast %477 : vector<2x128xbf16> to vector<1x2x128xbf16>
    tpu.vector_store %arg7[%c3_118, %c0_119, %c0_120], %480 {strides = array<i32>} : memref<8x2x128xbf16, #tpu.memory_space<vmem>>, vector<1x2x128xbf16>,
    %c5_i32 = arith.constant 5 : i32
    %481 = arith.addi %10, %c5_i32 : i32
    %c7_i32_121 = arith.constant 7 : i32
    %482 = arith.subi %c7_i32_121, %481 : i32
    %483 = vector.broadcast %481 : i32 to vector<2x1xi32>
    %484 = arith.cmpi slt, %483, %3 : vector<2x1xi32>
    %485 = vector.broadcast %482 : i32 to vector<2x1xi32>
    %486 = arith.cmpi slt, %485, %3 : vector<2x1xi32>
    %c5_122 = arith.constant 5 : index
    %c0_123 = arith.constant 0 : index
    %c0_124 = arith.constant 0 : index
    %487 = vector.load %arg2[%c5_122, %c0_123, %c0_124] : memref<8x2x512xf32, #tpu.memory_space<vmem>>, vector<1x2x512xf32>
    %488 = vector.shape_cast %487 : vector<1x2x512xf32> to vector<2x512xf32>
    %489 = arith.truncf %428 : vector<2x128xf32> to vector<2x128xbf16>
    %cst_125 = arith.constant dense<0.000000e+00> : vector<2x512xf32>
    %490 = tpu.matmul %489, %4, %cst_125 {dimension_numbers = #tpu.dot_dimension_numbers<[1], [0], [0], [1], [0, 0, 1, 1], [], []>} : vector<2x128xbf16>, vector<128x512xbf16>, vector<2x512xf32> -> vector<2x512xf32>
    %491 = arith.addf %488, %490 : vector<2x512xf32>
    %492 = vector.extract_strided_slice %491 {offsets = [0, 0], sizes = [2, 128], strides = [1, 1]} : vector<2x512xf32> to vector<2x128xf32>
    %493 = arith.negf %492 : vector<2x128xf32>
    %494 = math.exp %493 : vector<2x128xf32>
    %cst_126 = arith.constant 1.000000e+00 : f32
    %495 = vector.broadcast %cst_126 : f32 to vector<2x128xf32>
    %496 = arith.addf %495, %494 : vector<2x128xf32>
    %497 = arith.divf %495, %496 : vector<2x128xf32>
    %498 = vector.extract_strided_slice %491 {offsets = [0, 128], sizes = [2, 128], strides = [1, 1]} : vector<2x512xf32> to vector<2x128xf32>
    %499 = arith.negf %498 : vector<2x128xf32>
    %500 = math.exp %499 : vector<2x128xf32>
    %cst_127 = arith.constant 1.000000e+00 : f32
    %501 = vector.broadcast %cst_127 : f32 to vector<2x128xf32>
    %502 = arith.addf %501, %500 : vector<2x128xf32>
    %503 = arith.divf %501, %502 : vector<2x128xf32>
    %504 = vector.extract_strided_slice %491 {offsets = [0, 256], sizes = [2, 128], strides = [1, 1]} : vector<2x512xf32> to vector<2x128xf32>
    %505 = math.tanh %504 : vector<2x128xf32>
    %506 = vector.extract_strided_slice %491 {offsets = [0, 384], sizes = [2, 128], strides = [1, 1]} : vector<2x512xf32> to vector<2x128xf32>
    %507 = arith.negf %506 : vector<2x128xf32>
    %508 = math.exp %507 : vector<2x128xf32>
    %cst_128 = arith.constant 1.000000e+00 : f32
    %509 = vector.broadcast %cst_128 : f32 to vector<2x128xf32>
    %510 = arith.addf %509, %508 : vector<2x128xf32>
    %511 = arith.divf %509, %510 : vector<2x128xf32>
    %512 = arith.mulf %503, %425 : vector<2x128xf32>
    %513 = arith.mulf %497, %505 : vector<2x128xf32>
    %514 = arith.addf %512, %513 : vector<2x128xf32>
    %515 = math.tanh %514 : vector<2x128xf32>
    %516 = arith.mulf %511, %515 : vector<2x128xf32>
    %517 = vector.shape_cast %484 : vector<2x1xi1> to vector<2x1xi1>
    %518 = vector.broadcast %517 : vector<2x1xi1> to vector<2x128xi1>
    %519 = arith.select %518, %514, %425 : vector<2x128xi1>, vector<2x128xf32>
    %520 = vector.shape_cast %484 : vector<2x1xi1> to vector<2x1xi1>
    %521 = vector.broadcast %520 : vector<2x1xi1> to vector<2x128xi1>
    %522 = arith.select %521, %516, %428 : vector<2x128xi1>, vector<2x128xf32>
    %cst_129 = arith.constant 0.000000e+00 : f32
    %523 = vector.broadcast %cst_129 : f32 to vector<2x128xf32>
    %524 = vector.shape_cast %484 : vector<2x1xi1> to vector<2x1xi1>
    %525 = vector.broadcast %524 : vector<2x1xi1> to vector<2x128xi1>
    %526 = arith.select %525, %516, %523 : vector<2x128xi1>, vector<2x128xf32>
    %527 = arith.truncf %526 : vector<2x128xf32> to vector<2x128xbf16>
    %c5_130 = arith.constant 5 : index
    %c0_131 = arith.constant 0 : index
    %c0_132 = arith.constant 0 : index
    %528 = vector.load %arg6[%c5_130, %c0_131, %c0_132] : memref<8x2x128xbf16, #tpu.memory_space<vmem>>, vector<1x2x128xbf16>
    %529 = vector.shape_cast %528 : vector<1x2x128xbf16> to vector<2x128xbf16>
    %530 = vector.shape_cast %527 : vector<2x128xbf16> to vector<1x2x128xbf16>
    tpu.vector_store %arg6[%c5_130, %c0_131, %c0_132], %530 {strides = array<i32>} : memref<8x2x128xbf16, #tpu.memory_space<vmem>>, vector<1x2x128xbf16>,
    %c2_133 = arith.constant 2 : index
    %c0_134 = arith.constant 0 : index
    %c0_135 = arith.constant 0 : index
    %531 = vector.load %arg3[%c2_133, %c0_134, %c0_135] : memref<8x2x512xf32, #tpu.memory_space<vmem>>, vector<1x2x512xf32>
    %532 = vector.shape_cast %531 : vector<1x2x512xf32> to vector<2x512xf32>
    %533 = arith.truncf %472 : vector<2x128xf32> to vector<2x128xbf16>
    %cst_136 = arith.constant dense<0.000000e+00> : vector<2x512xf32>
    %534 = tpu.matmul %533, %5, %cst_136 {dimension_numbers = #tpu.dot_dimension_numbers<[1], [0], [0], [1], [0, 0, 1, 1], [], []>} : vector<2x128xbf16>, vector<128x512xbf16>, vector<2x512xf32> -> vector<2x512xf32>
    %535 = arith.addf %532, %534 : vector<2x512xf32>
    %536 = vector.extract_strided_slice %535 {offsets = [0, 0], sizes = [2, 128], strides = [1, 1]} : vector<2x512xf32> to vector<2x128xf32>
    %537 = arith.negf %536 : vector<2x128xf32>
    %538 = math.exp %537 : vector<2x128xf32>
    %cst_137 = arith.constant 1.000000e+00 : f32
    %539 = vector.broadcast %cst_137 : f32 to vector<2x128xf32>
    %540 = arith.addf %539, %538 : vector<2x128xf32>
    %541 = arith.divf %539, %540 : vector<2x128xf32>
    %542 = vector.extract_strided_slice %535 {offsets = [0, 128], sizes = [2, 128], strides = [1, 1]} : vector<2x512xf32> to vector<2x128xf32>
    %543 = arith.negf %542 : vector<2x128xf32>
    %544 = math.exp %543 : vector<2x128xf32>
    %cst_138 = arith.constant 1.000000e+00 : f32
    %545 = vector.broadcast %cst_138 : f32 to vector<2x128xf32>
    %546 = arith.addf %545, %544 : vector<2x128xf32>
    %547 = arith.divf %545, %546 : vector<2x128xf32>
    %548 = vector.extract_strided_slice %535 {offsets = [0, 256], sizes = [2, 128], strides = [1, 1]} : vector<2x512xf32> to vector<2x128xf32>
    %549 = math.tanh %548 : vector<2x128xf32>
    %550 = vector.extract_strided_slice %535 {offsets = [0, 384], sizes = [2, 128], strides = [1, 1]} : vector<2x512xf32> to vector<2x128xf32>
    %551 = arith.negf %550 : vector<2x128xf32>
    %552 = math.exp %551 : vector<2x128xf32>
    %cst_139 = arith.constant 1.000000e+00 : f32
    %553 = vector.broadcast %cst_139 : f32 to vector<2x128xf32>
    %554 = arith.addf %553, %552 : vector<2x128xf32>
    %555 = arith.divf %553, %554 : vector<2x128xf32>
    %556 = arith.mulf %547, %469 : vector<2x128xf32>
    %557 = arith.mulf %541, %549 : vector<2x128xf32>
    %558 = arith.addf %556, %557 : vector<2x128xf32>
    %559 = math.tanh %558 : vector<2x128xf32>
    %560 = arith.mulf %555, %559 : vector<2x128xf32>
    %561 = vector.shape_cast %486 : vector<2x1xi1> to vector<2x1xi1>
    %562 = vector.broadcast %561 : vector<2x1xi1> to vector<2x128xi1>
    %563 = arith.select %562, %558, %469 : vector<2x128xi1>, vector<2x128xf32>
    %564 = vector.shape_cast %486 : vector<2x1xi1> to vector<2x1xi1>
    %565 = vector.broadcast %564 : vector<2x1xi1> to vector<2x128xi1>
    %566 = arith.select %565, %560, %472 : vector<2x128xi1>, vector<2x128xf32>
    %cst_140 = arith.constant 0.000000e+00 : f32
    %567 = vector.broadcast %cst_140 : f32 to vector<2x128xf32>
    %568 = vector.shape_cast %486 : vector<2x1xi1> to vector<2x1xi1>
    %569 = vector.broadcast %568 : vector<2x1xi1> to vector<2x128xi1>
    %570 = arith.select %569, %560, %567 : vector<2x128xi1>, vector<2x128xf32>
    %571 = arith.truncf %570 : vector<2x128xf32> to vector<2x128xbf16>
    %c2_141 = arith.constant 2 : index
    %c0_142 = arith.constant 0 : index
    %c0_143 = arith.constant 0 : index
    %572 = vector.load %arg7[%c2_141, %c0_142, %c0_143] : memref<8x2x128xbf16, #tpu.memory_space<vmem>>, vector<1x2x128xbf16>
    %573 = vector.shape_cast %572 : vector<1x2x128xbf16> to vector<2x128xbf16>
    %574 = vector.shape_cast %571 : vector<2x128xbf16> to vector<1x2x128xbf16>
    tpu.vector_store %arg7[%c2_141, %c0_142, %c0_143], %574 {strides = array<i32>} : memref<8x2x128xbf16, #tpu.memory_space<vmem>>, vector<1x2x128xbf16>,
    %c6_i32 = arith.constant 6 : i32
    %575 = arith.addi %10, %c6_i32 : i32
    %c7_i32_144 = arith.constant 7 : i32
    %576 = arith.subi %c7_i32_144, %575 : i32
    %577 = vector.broadcast %575 : i32 to vector<2x1xi32>
    %578 = arith.cmpi slt, %577, %3 : vector<2x1xi32>
    %579 = vector.broadcast %576 : i32 to vector<2x1xi32>
    %580 = arith.cmpi slt, %579, %3 : vector<2x1xi32>
    %c6_145 = arith.constant 6 : index
    %c0_146 = arith.constant 0 : index
    %c0_147 = arith.constant 0 : index
    %581 = vector.load %arg2[%c6_145, %c0_146, %c0_147] : memref<8x2x512xf32, #tpu.memory_space<vmem>>, vector<1x2x512xf32>
    %582 = vector.shape_cast %581 : vector<1x2x512xf32> to vector<2x512xf32>
    %583 = arith.truncf %522 : vector<2x128xf32> to vector<2x128xbf16>
    %cst_148 = arith.constant dense<0.000000e+00> : vector<2x512xf32>
    %584 = tpu.matmul %583, %4, %cst_148 {dimension_numbers = #tpu.dot_dimension_numbers<[1], [0], [0], [1], [0, 0, 1, 1], [], []>} : vector<2x128xbf16>, vector<128x512xbf16>, vector<2x512xf32> -> vector<2x512xf32>
    %585 = arith.addf %582, %584 : vector<2x512xf32>
    %586 = vector.extract_strided_slice %585 {offsets = [0, 0], sizes = [2, 128], strides = [1, 1]} : vector<2x512xf32> to vector<2x128xf32>
    %587 = arith.negf %586 : vector<2x128xf32>
    %588 = math.exp %587 : vector<2x128xf32>
    %cst_149 = arith.constant 1.000000e+00 : f32
    %589 = vector.broadcast %cst_149 : f32 to vector<2x128xf32>
    %590 = arith.addf %589, %588 : vector<2x128xf32>
    %591 = arith.divf %589, %590 : vector<2x128xf32>
    %592 = vector.extract_strided_slice %585 {offsets = [0, 128], sizes = [2, 128], strides = [1, 1]} : vector<2x512xf32> to vector<2x128xf32>
    %593 = arith.negf %592 : vector<2x128xf32>
    %594 = math.exp %593 : vector<2x128xf32>
    %cst_150 = arith.constant 1.000000e+00 : f32
    %595 = vector.broadcast %cst_150 : f32 to vector<2x128xf32>
    %596 = arith.addf %595, %594 : vector<2x128xf32>
    %597 = arith.divf %595, %596 : vector<2x128xf32>
    %598 = vector.extract_strided_slice %585 {offsets = [0, 256], sizes = [2, 128], strides = [1, 1]} : vector<2x512xf32> to vector<2x128xf32>
    %599 = math.tanh %598 : vector<2x128xf32>
    %600 = vector.extract_strided_slice %585 {offsets = [0, 384], sizes = [2, 128], strides = [1, 1]} : vector<2x512xf32> to vector<2x128xf32>
    %601 = arith.negf %600 : vector<2x128xf32>
    %602 = math.exp %601 : vector<2x128xf32>
    %cst_151 = arith.constant 1.000000e+00 : f32
    %603 = vector.broadcast %cst_151 : f32 to vector<2x128xf32>
    %604 = arith.addf %603, %602 : vector<2x128xf32>
    %605 = arith.divf %603, %604 : vector<2x128xf32>
    %606 = arith.mulf %597, %519 : vector<2x128xf32>
    %607 = arith.mulf %591, %599 : vector<2x128xf32>
    %608 = arith.addf %606, %607 : vector<2x128xf32>
    %609 = math.tanh %608 : vector<2x128xf32>
    %610 = arith.mulf %605, %609 : vector<2x128xf32>
    %611 = vector.shape_cast %578 : vector<2x1xi1> to vector<2x1xi1>
    %612 = vector.broadcast %611 : vector<2x1xi1> to vector<2x128xi1>
    %613 = arith.select %612, %608, %519 : vector<2x128xi1>, vector<2x128xf32>
    %614 = vector.shape_cast %578 : vector<2x1xi1> to vector<2x1xi1>
    %615 = vector.broadcast %614 : vector<2x1xi1> to vector<2x128xi1>
    %616 = arith.select %615, %610, %522 : vector<2x128xi1>, vector<2x128xf32>
    %cst_152 = arith.constant 0.000000e+00 : f32
    %617 = vector.broadcast %cst_152 : f32 to vector<2x128xf32>
    %618 = vector.shape_cast %578 : vector<2x1xi1> to vector<2x1xi1>
    %619 = vector.broadcast %618 : vector<2x1xi1> to vector<2x128xi1>
    %620 = arith.select %619, %610, %617 : vector<2x128xi1>, vector<2x128xf32>
    %621 = arith.truncf %620 : vector<2x128xf32> to vector<2x128xbf16>
    %c6_153 = arith.constant 6 : index
    %c0_154 = arith.constant 0 : index
    %c0_155 = arith.constant 0 : index
    %622 = vector.load %arg6[%c6_153, %c0_154, %c0_155] : memref<8x2x128xbf16, #tpu.memory_space<vmem>>, vector<1x2x128xbf16>
    %623 = vector.shape_cast %622 : vector<1x2x128xbf16> to vector<2x128xbf16>
    %624 = vector.shape_cast %621 : vector<2x128xbf16> to vector<1x2x128xbf16>
    tpu.vector_store %arg6[%c6_153, %c0_154, %c0_155], %624 {strides = array<i32>} : memref<8x2x128xbf16, #tpu.memory_space<vmem>>, vector<1x2x128xbf16>,
    %c1_156 = arith.constant 1 : index
    %c0_157 = arith.constant 0 : index
    %c0_158 = arith.constant 0 : index
    %625 = vector.load %arg3[%c1_156, %c0_157, %c0_158] : memref<8x2x512xf32, #tpu.memory_space<vmem>>, vector<1x2x512xf32>
    %626 = vector.shape_cast %625 : vector<1x2x512xf32> to vector<2x512xf32>
    %627 = arith.truncf %566 : vector<2x128xf32> to vector<2x128xbf16>
    %cst_159 = arith.constant dense<0.000000e+00> : vector<2x512xf32>
    %628 = tpu.matmul %627, %5, %cst_159 {dimension_numbers = #tpu.dot_dimension_numbers<[1], [0], [0], [1], [0, 0, 1, 1], [], []>} : vector<2x128xbf16>, vector<128x512xbf16>, vector<2x512xf32> -> vector<2x512xf32>
    %629 = arith.addf %626, %628 : vector<2x512xf32>
    %630 = vector.extract_strided_slice %629 {offsets = [0, 0], sizes = [2, 128], strides = [1, 1]} : vector<2x512xf32> to vector<2x128xf32>
    %631 = arith.negf %630 : vector<2x128xf32>
    %632 = math.exp %631 : vector<2x128xf32>
    %cst_160 = arith.constant 1.000000e+00 : f32
    %633 = vector.broadcast %cst_160 : f32 to vector<2x128xf32>
    %634 = arith.addf %633, %632 : vector<2x128xf32>
    %635 = arith.divf %633, %634 : vector<2x128xf32>
    %636 = vector.extract_strided_slice %629 {offsets = [0, 128], sizes = [2, 128], strides = [1, 1]} : vector<2x512xf32> to vector<2x128xf32>
    %637 = arith.negf %636 : vector<2x128xf32>
    %638 = math.exp %637 : vector<2x128xf32>
    %cst_161 = arith.constant 1.000000e+00 : f32
    %639 = vector.broadcast %cst_161 : f32 to vector<2x128xf32>
    %640 = arith.addf %639, %638 : vector<2x128xf32>
    %641 = arith.divf %639, %640 : vector<2x128xf32>
    %642 = vector.extract_strided_slice %629 {offsets = [0, 256], sizes = [2, 128], strides = [1, 1]} : vector<2x512xf32> to vector<2x128xf32>
    %643 = math.tanh %642 : vector<2x128xf32>
    %644 = vector.extract_strided_slice %629 {offsets = [0, 384], sizes = [2, 128], strides = [1, 1]} : vector<2x512xf32> to vector<2x128xf32>
    %645 = arith.negf %644 : vector<2x128xf32>
    %646 = math.exp %645 : vector<2x128xf32>
    %cst_162 = arith.constant 1.000000e+00 : f32
    %647 = vector.broadcast %cst_162 : f32 to vector<2x128xf32>
    %648 = arith.addf %647, %646 : vector<2x128xf32>
    %649 = arith.divf %647, %648 : vector<2x128xf32>
    %650 = arith.mulf %641, %563 : vector<2x128xf32>
    %651 = arith.mulf %635, %643 : vector<2x128xf32>
    %652 = arith.addf %650, %651 : vector<2x128xf32>
    %653 = math.tanh %652 : vector<2x128xf32>
    %654 = arith.mulf %649, %653 : vector<2x128xf32>
    %655 = vector.shape_cast %580 : vector<2x1xi1> to vector<2x1xi1>
    %656 = vector.broadcast %655 : vector<2x1xi1> to vector<2x128xi1>
    %657 = arith.select %656, %652, %563 : vector<2x128xi1>, vector<2x128xf32>
    %658 = vector.shape_cast %580 : vector<2x1xi1> to vector<2x1xi1>
    %659 = vector.broadcast %658 : vector<2x1xi1> to vector<2x128xi1>
    %660 = arith.select %659, %654, %566 : vector<2x128xi1>, vector<2x128xf32>
    %cst_163 = arith.constant 0.000000e+00 : f32
    %661 = vector.broadcast %cst_163 : f32 to vector<2x128xf32>
    %662 = vector.shape_cast %580 : vector<2x1xi1> to vector<2x1xi1>
    %663 = vector.broadcast %662 : vector<2x1xi1> to vector<2x128xi1>
    %664 = arith.select %663, %654, %661 : vector<2x128xi1>, vector<2x128xf32>
    %665 = arith.truncf %664 : vector<2x128xf32> to vector<2x128xbf16>
    %c1_164 = arith.constant 1 : index
    %c0_165 = arith.constant 0 : index
    %c0_166 = arith.constant 0 : index
    %666 = vector.load %arg7[%c1_164, %c0_165, %c0_166] : memref<8x2x128xbf16, #tpu.memory_space<vmem>>, vector<1x2x128xbf16>
    %667 = vector.shape_cast %666 : vector<1x2x128xbf16> to vector<2x128xbf16>
    %668 = vector.shape_cast %665 : vector<2x128xbf16> to vector<1x2x128xbf16>
    tpu.vector_store %arg7[%c1_164, %c0_165, %c0_166], %668 {strides = array<i32>} : memref<8x2x128xbf16, #tpu.memory_space<vmem>>, vector<1x2x128xbf16>,
    %c7_i32_167 = arith.constant 7 : i32
    %669 = arith.addi %10, %c7_i32_167 : i32
    %c7_i32_168 = arith.constant 7 : i32
    %670 = arith.subi %c7_i32_168, %669 : i32
    %671 = vector.broadcast %669 : i32 to vector<2x1xi32>
    %672 = arith.cmpi slt, %671, %3 : vector<2x1xi32>
    %673 = vector.broadcast %670 : i32 to vector<2x1xi32>
    %674 = arith.cmpi slt, %673, %3 : vector<2x1xi32>
    %c7_169 = arith.constant 7 : index
    %c0_170 = arith.constant 0 : index
    %c0_171 = arith.constant 0 : index
    %675 = vector.load %arg2[%c7_169, %c0_170, %c0_171] : memref<8x2x512xf32, #tpu.memory_space<vmem>>, vector<1x2x512xf32>
    %676 = vector.shape_cast %675 : vector<1x2x512xf32> to vector<2x512xf32>
    %677 = arith.truncf %616 : vector<2x128xf32> to vector<2x128xbf16>
    %cst_172 = arith.constant dense<0.000000e+00> : vector<2x512xf32>
    %678 = tpu.matmul %677, %4, %cst_172 {dimension_numbers = #tpu.dot_dimension_numbers<[1], [0], [0], [1], [0, 0, 1, 1], [], []>} : vector<2x128xbf16>, vector<128x512xbf16>, vector<2x512xf32> -> vector<2x512xf32>
    %679 = arith.addf %676, %678 : vector<2x512xf32>
    %680 = vector.extract_strided_slice %679 {offsets = [0, 0], sizes = [2, 128], strides = [1, 1]} : vector<2x512xf32> to vector<2x128xf32>
    %681 = arith.negf %680 : vector<2x128xf32>
    %682 = math.exp %681 : vector<2x128xf32>
    %cst_173 = arith.constant 1.000000e+00 : f32
    %683 = vector.broadcast %cst_173 : f32 to vector<2x128xf32>
    %684 = arith.addf %683, %682 : vector<2x128xf32>
    %685 = arith.divf %683, %684 : vector<2x128xf32>
    %686 = vector.extract_strided_slice %679 {offsets = [0, 128], sizes = [2, 128], strides = [1, 1]} : vector<2x512xf32> to vector<2x128xf32>
    %687 = arith.negf %686 : vector<2x128xf32>
    %688 = math.exp %687 : vector<2x128xf32>
    %cst_174 = arith.constant 1.000000e+00 : f32
    %689 = vector.broadcast %cst_174 : f32 to vector<2x128xf32>
    %690 = arith.addf %689, %688 : vector<2x128xf32>
    %691 = arith.divf %689, %690 : vector<2x128xf32>
    %692 = vector.extract_strided_slice %679 {offsets = [0, 256], sizes = [2, 128], strides = [1, 1]} : vector<2x512xf32> to vector<2x128xf32>
    %693 = math.tanh %692 : vector<2x128xf32>
    %694 = vector.extract_strided_slice %679 {offsets = [0, 384], sizes = [2, 128], strides = [1, 1]} : vector<2x512xf32> to vector<2x128xf32>
    %695 = arith.negf %694 : vector<2x128xf32>
    %696 = math.exp %695 : vector<2x128xf32>
    %cst_175 = arith.constant 1.000000e+00 : f32
    %697 = vector.broadcast %cst_175 : f32 to vector<2x128xf32>
    %698 = arith.addf %697, %696 : vector<2x128xf32>
    %699 = arith.divf %697, %698 : vector<2x128xf32>
    %700 = arith.mulf %691, %613 : vector<2x128xf32>
    %701 = arith.mulf %685, %693 : vector<2x128xf32>
    %702 = arith.addf %700, %701 : vector<2x128xf32>
    %703 = math.tanh %702 : vector<2x128xf32>
    %704 = arith.mulf %699, %703 : vector<2x128xf32>
    %705 = vector.shape_cast %672 : vector<2x1xi1> to vector<2x1xi1>
    %706 = vector.broadcast %705 : vector<2x1xi1> to vector<2x128xi1>
    %707 = arith.select %706, %702, %613 : vector<2x128xi1>, vector<2x128xf32>
    %708 = vector.shape_cast %672 : vector<2x1xi1> to vector<2x1xi1>
    %709 = vector.broadcast %708 : vector<2x1xi1> to vector<2x128xi1>
    %710 = arith.select %709, %704, %616 : vector<2x128xi1>, vector<2x128xf32>
    %cst_176 = arith.constant 0.000000e+00 : f32
    %711 = vector.broadcast %cst_176 : f32 to vector<2x128xf32>
    %712 = vector.shape_cast %672 : vector<2x1xi1> to vector<2x1xi1>
    %713 = vector.broadcast %712 : vector<2x1xi1> to vector<2x128xi1>
    %714 = arith.select %713, %704, %711 : vector<2x128xi1>, vector<2x128xf32>
    %715 = arith.truncf %714 : vector<2x128xf32> to vector<2x128xbf16>
    %c7_177 = arith.constant 7 : index
    %c0_178 = arith.constant 0 : index
    %c0_179 = arith.constant 0 : index
    %716 = vector.load %arg6[%c7_177, %c0_178, %c0_179] : memref<8x2x128xbf16, #tpu.memory_space<vmem>>, vector<1x2x128xbf16>
    %717 = vector.shape_cast %716 : vector<1x2x128xbf16> to vector<2x128xbf16>
    %718 = vector.shape_cast %715 : vector<2x128xbf16> to vector<1x2x128xbf16>
    tpu.vector_store %arg6[%c7_177, %c0_178, %c0_179], %718 {strides = array<i32>} : memref<8x2x128xbf16, #tpu.memory_space<vmem>>, vector<1x2x128xbf16>,
    %c0_180 = arith.constant 0 : index
    %c0_181 = arith.constant 0 : index
    %c0_182 = arith.constant 0 : index
    %719 = vector.load %arg3[%c0_180, %c0_181, %c0_182] : memref<8x2x512xf32, #tpu.memory_space<vmem>>, vector<1x2x512xf32>
    %720 = vector.shape_cast %719 : vector<1x2x512xf32> to vector<2x512xf32>
    %721 = arith.truncf %660 : vector<2x128xf32> to vector<2x128xbf16>
    %cst_183 = arith.constant dense<0.000000e+00> : vector<2x512xf32>
    %722 = tpu.matmul %721, %5, %cst_183 {dimension_numbers = #tpu.dot_dimension_numbers<[1], [0], [0], [1], [0, 0, 1, 1], [], []>} : vector<2x128xbf16>, vector<128x512xbf16>, vector<2x512xf32> -> vector<2x512xf32>
    %723 = arith.addf %720, %722 : vector<2x512xf32>
    %724 = vector.extract_strided_slice %723 {offsets = [0, 0], sizes = [2, 128], strides = [1, 1]} : vector<2x512xf32> to vector<2x128xf32>
    %725 = arith.negf %724 : vector<2x128xf32>
    %726 = math.exp %725 : vector<2x128xf32>
    %cst_184 = arith.constant 1.000000e+00 : f32
    %727 = vector.broadcast %cst_184 : f32 to vector<2x128xf32>
    %728 = arith.addf %727, %726 : vector<2x128xf32>
    %729 = arith.divf %727, %728 : vector<2x128xf32>
    %730 = vector.extract_strided_slice %723 {offsets = [0, 128], sizes = [2, 128], strides = [1, 1]} : vector<2x512xf32> to vector<2x128xf32>
    %731 = arith.negf %730 : vector<2x128xf32>
    %732 = math.exp %731 : vector<2x128xf32>
    %cst_185 = arith.constant 1.000000e+00 : f32
    %733 = vector.broadcast %cst_185 : f32 to vector<2x128xf32>
    %734 = arith.addf %733, %732 : vector<2x128xf32>
    %735 = arith.divf %733, %734 : vector<2x128xf32>
    %736 = vector.extract_strided_slice %723 {offsets = [0, 256], sizes = [2, 128], strides = [1, 1]} : vector<2x512xf32> to vector<2x128xf32>
    %737 = math.tanh %736 : vector<2x128xf32>
    %738 = vector.extract_strided_slice %723 {offsets = [0, 384], sizes = [2, 128], strides = [1, 1]} : vector<2x512xf32> to vector<2x128xf32>
    %739 = arith.negf %738 : vector<2x128xf32>
    %740 = math.exp %739 : vector<2x128xf32>
    %cst_186 = arith.constant 1.000000e+00 : f32
    %741 = vector.broadcast %cst_186 : f32 to vector<2x128xf32>
    %742 = arith.addf %741, %740 : vector<2x128xf32>
    %743 = arith.divf %741, %742 : vector<2x128xf32>
    %744 = arith.mulf %735, %657 : vector<2x128xf32>
    %745 = arith.mulf %729, %737 : vector<2x128xf32>
    %746 = arith.addf %744, %745 : vector<2x128xf32>
    %747 = math.tanh %746 : vector<2x128xf32>
    %748 = arith.mulf %743, %747 : vector<2x128xf32>
    %749 = vector.shape_cast %674 : vector<2x1xi1> to vector<2x1xi1>
    %750 = vector.broadcast %749 : vector<2x1xi1> to vector<2x128xi1>
    %751 = arith.select %750, %746, %657 : vector<2x128xi1>, vector<2x128xf32>
    %752 = vector.shape_cast %674 : vector<2x1xi1> to vector<2x1xi1>
    %753 = vector.broadcast %752 : vector<2x1xi1> to vector<2x128xi1>
    %754 = arith.select %753, %748, %660 : vector<2x128xi1>, vector<2x128xf32>
    %cst_187 = arith.constant 0.000000e+00 : f32
    %755 = vector.broadcast %cst_187 : f32 to vector<2x128xf32>
    %756 = vector.shape_cast %674 : vector<2x1xi1> to vector<2x1xi1>
    %757 = vector.broadcast %756 : vector<2x1xi1> to vector<2x128xi1>
    %758 = arith.select %757, %748, %755 : vector<2x128xi1>, vector<2x128xf32>
    %759 = arith.truncf %758 : vector<2x128xf32> to vector<2x128xbf16>
    %c0_188 = arith.constant 0 : index
    %c0_189 = arith.constant 0 : index
    %c0_190 = arith.constant 0 : index
    %760 = vector.load %arg7[%c0_188, %c0_189, %c0_190] : memref<8x2x128xbf16, #tpu.memory_space<vmem>>, vector<1x2x128xbf16>
    %761 = vector.shape_cast %760 : vector<1x2x128xbf16> to vector<2x128xbf16>
    %762 = vector.shape_cast %759 : vector<2x128xbf16> to vector<1x2x128xbf16>
    tpu.vector_store %arg7[%c0_188, %c0_189, %c0_190], %762 {strides = array<i32>} : memref<8x2x128xbf16, #tpu.memory_space<vmem>>, vector<1x2x128xbf16>,
    %c0_191 = arith.constant 0 : index
    %c0_192 = arith.constant 0 : index
    %763 = vector.load %arg8[%c0_191, %c0_192] : memref<2x128xf32, #tpu.memory_space<vmem>>, vector<2x128xf32>
    tpu.vector_store %arg8[%c0_191, %c0_192], %710 {strides = array<i32>} : memref<2x128xf32, #tpu.memory_space<vmem>>, vector<2x128xf32>,
    %c0_193 = arith.constant 0 : index
    %c0_194 = arith.constant 0 : index
    %764 = vector.load %arg9[%c0_193, %c0_194] : memref<2x128xf32, #tpu.memory_space<vmem>>, vector<2x128xf32>
    tpu.vector_store %arg9[%c0_193, %c0_194], %707 {strides = array<i32>} : memref<2x128xf32, #tpu.memory_space<vmem>>, vector<2x128xf32>,
    %c0_195 = arith.constant 0 : index
    %c0_196 = arith.constant 0 : index
    %765 = vector.load %arg10[%c0_195, %c0_196] : memref<2x128xf32, #tpu.memory_space<vmem>>, vector<2x128xf32>
    tpu.vector_store %arg10[%c0_195, %c0_196], %754 {strides = array<i32>} : memref<2x128xf32, #tpu.memory_space<vmem>>, vector<2x128xf32>,
    %c0_197 = arith.constant 0 : index
    %c0_198 = arith.constant 0 : index
    %766 = vector.load %arg11[%c0_197, %c0_198] : memref<2x128xf32, #tpu.memory_space<vmem>>, vector<2x128xf32>
    tpu.vector_store %arg11[%c0_197, %c0_198], %751 {strides = array<i32>} : memref<2x128xf32, #tpu.memory_space<vmem>>, vector<2x128xf32>,
    return
  }
  func.func @transform_0(%arg0: i32) -> (i32, i32) {
    %c0_i32 = arith.constant 0 : i32
    %c0_i32_0 = arith.constant 0 : i32
    %c0_i32_1 = arith.constant 0 : i32
    return %c0_i32, %c0_i32_0 : i32, i32
  }
  func.func @transform_1(%arg0: i32) -> (i32, i32, i32) {
    %c0_i32 = arith.constant 0 : i32
    %c0_i32_0 = arith.constant 0 : i32
    %c0_i32_1 = arith.constant 0 : i32
    return %arg0, %c0_i32, %c0_i32_0 : i32, i32, i32
  }
  func.func @transform_2(%arg0: i32) -> (i32, i32, i32) {
    %c0_i32 = arith.constant 0 : i32
    %0 = arith.subi %c0_i32, %arg0 : i32
    %c0_i32_0 = arith.constant 0 : i32
    %c1_i32 = arith.constant 1 : i32
    %c0_i32_1 = arith.constant 0 : i32
    return %0, %c0_i32_0, %c1_i32 : i32, i32, i32
  }
  func.func @transform_3(%arg0: i32) -> (i32, i32) {
    %c0_i32 = arith.constant 0 : i32
    %c0_i32_0 = arith.constant 0 : i32
    %c0_i32_1 = arith.constant 0 : i32
    return %c0_i32, %c0_i32_0 : i32, i32
  }
  func.func @transform_4(%arg0: i32) -> (i32, i32) {
    %c0_i32 = arith.constant 0 : i32
    %c0_i32_0 = arith.constant 0 : i32
    %c0_i32_1 = arith.constant 0 : i32
    return %c0_i32, %c0_i32_0 : i32, i32
  }
  func.func @transform_5(%arg0: i32) -> (i32, i32, i32) {
    %c0_i32 = arith.constant 0 : i32
    %c0_i32_0 = arith.constant 0 : i32
    %c0_i32_1 = arith.constant 0 : i32
    return %arg0, %c0_i32, %c0_i32_0 : i32, i32, i32
  }
  func.func @transform_6(%arg0: i32) -> (i32, i32, i32) {
    %c0_i32 = arith.constant 0 : i32
    %0 = arith.subi %c0_i32, %arg0 : i32
    %c0_i32_0 = arith.constant 0 : i32
    %c0_i32_1 = arith.constant 0 : i32
    %c0_i32_2 = arith.constant 0 : i32
    return %0, %c0_i32_0, %c0_i32_1 : i32, i32, i32
  }
}

module attributes {stable_mosaic.version = 11 : i64} {
  func.func @dense2_kernel(%arg0: i32, %arg1: memref<16x128xbf16, #tpu.memory_space<vmem>>, %arg2: memref<16x128xbf16, #tpu.memory_space<vmem>>, %arg3: memref<128x256xbf16, #tpu.memory_space<vmem>>, %arg4: memref<128x256xbf16, #tpu.memory_space<vmem>>, %arg5: memref<1x256xf32, #tpu.memory_space<vmem>>, %arg6: memref<16x256xbf16, #tpu.memory_space<vmem>>) attributes {dimension_semantics = [#tpu.dimension_semantics<parallel>], iteration_bounds = array<i64: 1>, scalar_prefetch = 0 : i64, scratch_operands = 0 : i64, tpu.core_type = #tpu.core_type<tc>, window_params = [{transform_indices = @transform_0, window_bounds = array<i64: 16, 128>}, {transform_indices = @transform_1, window_bounds = array<i64: 16, 128>}, {pipeline_mode = #tpu.pipeline_mode<synchronous>, transform_indices = @transform_2, window_bounds = array<i64: 128, 256>}, {pipeline_mode = #tpu.pipeline_mode<synchronous>, transform_indices = @transform_3, window_bounds = array<i64: 128, 256>}, {pipeline_mode = #tpu.pipeline_mode<synchronous>, transform_indices = @transform_4, window_bounds = array<i64: 1, 256>}, {transform_indices = @transform_5, window_bounds = array<i64: 16, 256>}]} {
    %c0 = arith.constant 0 : index
    %c0_0 = arith.constant 0 : index
    %0 = vector.load %arg1[%c0, %c0_0] : memref<16x128xbf16, #tpu.memory_space<vmem>>, vector<16x128xbf16>
    %c0_1 = arith.constant 0 : index
    %c0_2 = arith.constant 0 : index
    %1 = vector.load %arg3[%c0_1, %c0_2] : memref<128x256xbf16, #tpu.memory_space<vmem>>, vector<128x256xbf16>
    %cst = arith.constant dense<0.000000e+00> : vector<16x256xf32>
    %2 = tpu.matmul %0, %1, %cst {dimension_numbers = #tpu.dot_dimension_numbers<[1], [0], [0], [1], [0, 0, 1, 1], [], []>} : vector<16x128xbf16>, vector<128x256xbf16>, vector<16x256xf32> -> vector<16x256xf32>
    %c0_3 = arith.constant 0 : index
    %c0_4 = arith.constant 0 : index
    %3 = vector.load %arg2[%c0_3, %c0_4] : memref<16x128xbf16, #tpu.memory_space<vmem>>, vector<16x128xbf16>
    %c0_5 = arith.constant 0 : index
    %c0_6 = arith.constant 0 : index
    %4 = vector.load %arg4[%c0_5, %c0_6] : memref<128x256xbf16, #tpu.memory_space<vmem>>, vector<128x256xbf16>
    %cst_7 = arith.constant dense<0.000000e+00> : vector<16x256xf32>
    %5 = tpu.matmul %3, %4, %cst_7 {dimension_numbers = #tpu.dot_dimension_numbers<[1], [0], [0], [1], [0, 0, 1, 1], [], []>} : vector<16x128xbf16>, vector<128x256xbf16>, vector<16x256xf32> -> vector<16x256xf32>
    %6 = arith.addf %2, %5 : vector<16x256xf32>
    %c0_8 = arith.constant 0 : index
    %c0_9 = arith.constant 0 : index
    %7 = vector.load %arg5[%c0_8, %c0_9] : memref<1x256xf32, #tpu.memory_space<vmem>>, vector<1x256xf32>
    %8 = vector.broadcast %7 : vector<1x256xf32> to vector<16x256xf32>
    %9 = arith.addf %6, %8 : vector<16x256xf32>
    %10 = arith.truncf %9 : vector<16x256xf32> to vector<16x256xbf16>
    %c0_10 = arith.constant 0 : index
    %c0_11 = arith.constant 0 : index
    %11 = vector.load %arg6[%c0_10, %c0_11] : memref<16x256xbf16, #tpu.memory_space<vmem>>, vector<16x256xbf16>
    tpu.vector_store %arg6[%c0_10, %c0_11], %10 {strides = array<i32>} : memref<16x256xbf16, #tpu.memory_space<vmem>>, vector<16x256xbf16>,
    return
  }
  func.func @transform_0(%arg0: i32) -> (i32, i32) {
    %c0_i32 = arith.constant 0 : i32
    %c0_i32_0 = arith.constant 0 : i32
    return %arg0, %c0_i32 : i32, i32
  }
  func.func @transform_1(%arg0: i32) -> (i32, i32) {
    %c0_i32 = arith.constant 0 : i32
    %c0_i32_0 = arith.constant 0 : i32
    return %arg0, %c0_i32 : i32, i32
  }
  func.func @transform_2(%arg0: i32) -> (i32, i32) {
    %c0_i32 = arith.constant 0 : i32
    %c0_i32_0 = arith.constant 0 : i32
    %c0_i32_1 = arith.constant 0 : i32
    return %c0_i32, %c0_i32_0 : i32, i32
  }
  func.func @transform_3(%arg0: i32) -> (i32, i32) {
    %c0_i32 = arith.constant 0 : i32
    %c0_i32_0 = arith.constant 0 : i32
    %c0_i32_1 = arith.constant 0 : i32
    return %c0_i32, %c0_i32_0 : i32, i32
  }
  func.func @transform_4(%arg0: i32) -> (i32, i32) {
    %c0_i32 = arith.constant 0 : i32
    %c0_i32_0 = arith.constant 0 : i32
    %c0_i32_1 = arith.constant 0 : i32
    return %c0_i32, %c0_i32_0 : i32, i32
  }
  func.func @transform_5(%arg0: i32) -> (i32, i32) {
    %c0_i32 = arith.constant 0 : i32
    %c0_i32_0 = arith.constant 0 : i32
    return %arg0, %c0_i32 : i32, i32
  }
}

module attributes {stable_mosaic.version = 11 : i64} {
  func.func @proj_logsoftmax_kernel(%arg0: i32, %arg1: i32, %arg2: memref<8x2x256xbf16, #tpu.memory_space<vmem>>, %arg3: memref<1x8x256x32xbf16, #tpu.memory_space<vmem>>, %arg4: memref<1x1x32xf32, #tpu.memory_space<vmem>>, %arg5: memref<1x2x32xf32, #tpu.memory_space<vmem>>, %arg6: memref<2x32xf32, #tpu.memory_space<vmem>>) attributes {dimension_semantics = [#tpu.dimension_semantics<parallel>, #tpu.dimension_semantics<arbitrary>], iteration_bounds = array<i64: 4, 1>, scalar_prefetch = 0 : i64, scratch_operands = 1 : i64, tpu.core_type = #tpu.core_type<tc>, window_params = [{transform_indices = @transform_0, window_bounds = array<i64: 8, 2, 256>}, {transform_indices = @transform_1, window_bounds = array<i64: 1, 8, 256, 32>}, {transform_indices = @transform_2, window_bounds = array<i64: 1, 1, 32>}, {transform_indices = @transform_3, window_bounds = array<i64: 1, 2, 32>}]} {
    %c0_i32 = arith.constant 0 : i32
    %0 = arith.cmpi eq, %arg1, %c0_i32 : i32
    %1 = arith.extui %0 : i1 to i32
    %c0_i32_0 = arith.constant 0 : i32
    %2 = arith.cmpi ne, %1, %c0_i32_0 : i32
    scf.if %2 {
      %c0_62 = arith.constant 0 : index
      %c0_63 = arith.constant 0 : index
      %c0_64 = arith.constant 0 : index
      %56 = vector.load %arg4[%c0_62, %c0_63, %c0_64] : memref<1x1x32xf32, #tpu.memory_space<vmem>>, vector<1x1x32xf32>
      %57 = vector.shape_cast %56 : vector<1x1x32xf32> to vector<1x32xf32>
      %58 = vector.shape_cast %57 : vector<1x32xf32> to vector<1x32xf32>
      %59 = vector.broadcast %58 : vector<1x32xf32> to vector<2x32xf32>
      %c0_65 = arith.constant 0 : index
      %c0_66 = arith.constant 0 : index
      %60 = vector.load %arg6[%c0_65, %c0_66] : memref<2x32xf32, #tpu.memory_space<vmem>>, vector<2x32xf32>
      tpu.vector_store %arg6[%c0_65, %c0_66], %59 {strides = array<i32>} : memref<2x32xf32, #tpu.memory_space<vmem>>, vector<2x32xf32>,
    } else {
    }
    %c0 = arith.constant 0 : index
    %c0_1 = arith.constant 0 : index
    %3 = vector.load %arg6[%c0, %c0_1] : memref<2x32xf32, #tpu.memory_space<vmem>>, vector<2x32xf32>
    %c0_2 = arith.constant 0 : index
    %c0_3 = arith.constant 0 : index
    %c0_4 = arith.constant 0 : index
    %4 = vector.load %arg2[%c0_2, %c0_3, %c0_4] : memref<8x2x256xbf16, #tpu.memory_space<vmem>>, vector<1x2x256xbf16>
    %5 = vector.shape_cast %4 : vector<1x2x256xbf16> to vector<2x256xbf16>
    %c0_5 = arith.constant 0 : index
    %c0_6 = arith.constant 0 : index
    %c0_7 = arith.constant 0 : index
    %c0_8 = arith.constant 0 : index
    %6 = vector.load %arg3[%c0_5, %c0_6, %c0_7, %c0_8] : memref<1x8x256x32xbf16, #tpu.memory_space<vmem>>, vector<1x1x256x32xbf16>
    %7 = vector.shape_cast %6 : vector<1x1x256x32xbf16> to vector<256x32xbf16>
    %cst = arith.constant dense<0.000000e+00> : vector<2x32xf32>
    %8 = tpu.matmul %5, %7, %cst {dimension_numbers = #tpu.dot_dimension_numbers<[1], [0], [0], [1], [0, 0, 1, 1], [], []>} : vector<2x256xbf16>, vector<256x32xbf16>, vector<2x32xf32> -> vector<2x32xf32>
    %9 = arith.addf %3, %8 : vector<2x32xf32>
    %c1 = arith.constant 1 : index
    %c0_9 = arith.constant 0 : index
    %c0_10 = arith.constant 0 : index
    %10 = vector.load %arg2[%c1, %c0_9, %c0_10] : memref<8x2x256xbf16, #tpu.memory_space<vmem>>, vector<1x2x256xbf16>
    %11 = vector.shape_cast %10 : vector<1x2x256xbf16> to vector<2x256xbf16>
    %c0_11 = arith.constant 0 : index
    %c1_12 = arith.constant 1 : index
    %c0_13 = arith.constant 0 : index
    %c0_14 = arith.constant 0 : index
    %12 = vector.load %arg3[%c0_11, %c1_12, %c0_13, %c0_14] : memref<1x8x256x32xbf16, #tpu.memory_space<vmem>>, vector<1x1x256x32xbf16>
    %13 = vector.shape_cast %12 : vector<1x1x256x32xbf16> to vector<256x32xbf16>
    %cst_15 = arith.constant dense<0.000000e+00> : vector<2x32xf32>
    %14 = tpu.matmul %11, %13, %cst_15 {dimension_numbers = #tpu.dot_dimension_numbers<[1], [0], [0], [1], [0, 0, 1, 1], [], []>} : vector<2x256xbf16>, vector<256x32xbf16>, vector<2x32xf32> -> vector<2x32xf32>
    %15 = arith.addf %9, %14 : vector<2x32xf32>
    %c2 = arith.constant 2 : index
    %c0_16 = arith.constant 0 : index
    %c0_17 = arith.constant 0 : index
    %16 = vector.load %arg2[%c2, %c0_16, %c0_17] : memref<8x2x256xbf16, #tpu.memory_space<vmem>>, vector<1x2x256xbf16>
    %17 = vector.shape_cast %16 : vector<1x2x256xbf16> to vector<2x256xbf16>
    %c0_18 = arith.constant 0 : index
    %c2_19 = arith.constant 2 : index
    %c0_20 = arith.constant 0 : index
    %c0_21 = arith.constant 0 : index
    %18 = vector.load %arg3[%c0_18, %c2_19, %c0_20, %c0_21] : memref<1x8x256x32xbf16, #tpu.memory_space<vmem>>, vector<1x1x256x32xbf16>
    %19 = vector.shape_cast %18 : vector<1x1x256x32xbf16> to vector<256x32xbf16>
    %cst_22 = arith.constant dense<0.000000e+00> : vector<2x32xf32>
    %20 = tpu.matmul %17, %19, %cst_22 {dimension_numbers = #tpu.dot_dimension_numbers<[1], [0], [0], [1], [0, 0, 1, 1], [], []>} : vector<2x256xbf16>, vector<256x32xbf16>, vector<2x32xf32> -> vector<2x32xf32>
    %21 = arith.addf %15, %20 : vector<2x32xf32>
    %c3 = arith.constant 3 : index
    %c0_23 = arith.constant 0 : index
    %c0_24 = arith.constant 0 : index
    %22 = vector.load %arg2[%c3, %c0_23, %c0_24] : memref<8x2x256xbf16, #tpu.memory_space<vmem>>, vector<1x2x256xbf16>
    %23 = vector.shape_cast %22 : vector<1x2x256xbf16> to vector<2x256xbf16>
    %c0_25 = arith.constant 0 : index
    %c3_26 = arith.constant 3 : index
    %c0_27 = arith.constant 0 : index
    %c0_28 = arith.constant 0 : index
    %24 = vector.load %arg3[%c0_25, %c3_26, %c0_27, %c0_28] : memref<1x8x256x32xbf16, #tpu.memory_space<vmem>>, vector<1x1x256x32xbf16>
    %25 = vector.shape_cast %24 : vector<1x1x256x32xbf16> to vector<256x32xbf16>
    %cst_29 = arith.constant dense<0.000000e+00> : vector<2x32xf32>
    %26 = tpu.matmul %23, %25, %cst_29 {dimension_numbers = #tpu.dot_dimension_numbers<[1], [0], [0], [1], [0, 0, 1, 1], [], []>} : vector<2x256xbf16>, vector<256x32xbf16>, vector<2x32xf32> -> vector<2x32xf32>
    %27 = arith.addf %21, %26 : vector<2x32xf32>
    %c4 = arith.constant 4 : index
    %c0_30 = arith.constant 0 : index
    %c0_31 = arith.constant 0 : index
    %28 = vector.load %arg2[%c4, %c0_30, %c0_31] : memref<8x2x256xbf16, #tpu.memory_space<vmem>>, vector<1x2x256xbf16>
    %29 = vector.shape_cast %28 : vector<1x2x256xbf16> to vector<2x256xbf16>
    %c0_32 = arith.constant 0 : index
    %c4_33 = arith.constant 4 : index
    %c0_34 = arith.constant 0 : index
    %c0_35 = arith.constant 0 : index
    %30 = vector.load %arg3[%c0_32, %c4_33, %c0_34, %c0_35] : memref<1x8x256x32xbf16, #tpu.memory_space<vmem>>, vector<1x1x256x32xbf16>
    %31 = vector.shape_cast %30 : vector<1x1x256x32xbf16> to vector<256x32xbf16>
    %cst_36 = arith.constant dense<0.000000e+00> : vector<2x32xf32>
    %32 = tpu.matmul %29, %31, %cst_36 {dimension_numbers = #tpu.dot_dimension_numbers<[1], [0], [0], [1], [0, 0, 1, 1], [], []>} : vector<2x256xbf16>, vector<256x32xbf16>, vector<2x32xf32> -> vector<2x32xf32>
    %33 = arith.addf %27, %32 : vector<2x32xf32>
    %c5 = arith.constant 5 : index
    %c0_37 = arith.constant 0 : index
    %c0_38 = arith.constant 0 : index
    %34 = vector.load %arg2[%c5, %c0_37, %c0_38] : memref<8x2x256xbf16, #tpu.memory_space<vmem>>, vector<1x2x256xbf16>
    %35 = vector.shape_cast %34 : vector<1x2x256xbf16> to vector<2x256xbf16>
    %c0_39 = arith.constant 0 : index
    %c5_40 = arith.constant 5 : index
    %c0_41 = arith.constant 0 : index
    %c0_42 = arith.constant 0 : index
    %36 = vector.load %arg3[%c0_39, %c5_40, %c0_41, %c0_42] : memref<1x8x256x32xbf16, #tpu.memory_space<vmem>>, vector<1x1x256x32xbf16>
    %37 = vector.shape_cast %36 : vector<1x1x256x32xbf16> to vector<256x32xbf16>
    %cst_43 = arith.constant dense<0.000000e+00> : vector<2x32xf32>
    %38 = tpu.matmul %35, %37, %cst_43 {dimension_numbers = #tpu.dot_dimension_numbers<[1], [0], [0], [1], [0, 0, 1, 1], [], []>} : vector<2x256xbf16>, vector<256x32xbf16>, vector<2x32xf32> -> vector<2x32xf32>
    %39 = arith.addf %33, %38 : vector<2x32xf32>
    %c6 = arith.constant 6 : index
    %c0_44 = arith.constant 0 : index
    %c0_45 = arith.constant 0 : index
    %40 = vector.load %arg2[%c6, %c0_44, %c0_45] : memref<8x2x256xbf16, #tpu.memory_space<vmem>>, vector<1x2x256xbf16>
    %41 = vector.shape_cast %40 : vector<1x2x256xbf16> to vector<2x256xbf16>
    %c0_46 = arith.constant 0 : index
    %c6_47 = arith.constant 6 : index
    %c0_48 = arith.constant 0 : index
    %c0_49 = arith.constant 0 : index
    %42 = vector.load %arg3[%c0_46, %c6_47, %c0_48, %c0_49] : memref<1x8x256x32xbf16, #tpu.memory_space<vmem>>, vector<1x1x256x32xbf16>
    %43 = vector.shape_cast %42 : vector<1x1x256x32xbf16> to vector<256x32xbf16>
    %cst_50 = arith.constant dense<0.000000e+00> : vector<2x32xf32>
    %44 = tpu.matmul %41, %43, %cst_50 {dimension_numbers = #tpu.dot_dimension_numbers<[1], [0], [0], [1], [0, 0, 1, 1], [], []>} : vector<2x256xbf16>, vector<256x32xbf16>, vector<2x32xf32> -> vector<2x32xf32>
    %45 = arith.addf %39, %44 : vector<2x32xf32>
    %c7 = arith.constant 7 : index
    %c0_51 = arith.constant 0 : index
    %c0_52 = arith.constant 0 : index
    %46 = vector.load %arg2[%c7, %c0_51, %c0_52] : memref<8x2x256xbf16, #tpu.memory_space<vmem>>, vector<1x2x256xbf16>
    %47 = vector.shape_cast %46 : vector<1x2x256xbf16> to vector<2x256xbf16>
    %c0_53 = arith.constant 0 : index
    %c7_54 = arith.constant 7 : index
    %c0_55 = arith.constant 0 : index
    %c0_56 = arith.constant 0 : index
    %48 = vector.load %arg3[%c0_53, %c7_54, %c0_55, %c0_56] : memref<1x8x256x32xbf16, #tpu.memory_space<vmem>>, vector<1x1x256x32xbf16>
    %49 = vector.shape_cast %48 : vector<1x1x256x32xbf16> to vector<256x32xbf16>
    %cst_57 = arith.constant dense<0.000000e+00> : vector<2x32xf32>
    %50 = tpu.matmul %47, %49, %cst_57 {dimension_numbers = #tpu.dot_dimension_numbers<[1], [0], [0], [1], [0, 0, 1, 1], [], []>} : vector<2x256xbf16>, vector<256x32xbf16>, vector<2x32xf32> -> vector<2x32xf32>
    %51 = arith.addf %45, %50 : vector<2x32xf32>
    %c0_58 = arith.constant 0 : index
    %c0_59 = arith.constant 0 : index
    %52 = vector.load %arg6[%c0_58, %c0_59] : memref<2x32xf32, #tpu.memory_space<vmem>>, vector<2x32xf32>
    tpu.vector_store %arg6[%c0_58, %c0_59], %51 {strides = array<i32>} : memref<2x32xf32, #tpu.memory_space<vmem>>, vector<2x32xf32>,
    %c0_i32_60 = arith.constant 0 : i32
    %53 = arith.cmpi eq, %arg1, %c0_i32_60 : i32
    %54 = arith.extui %53 : i1 to i32
    %c0_i32_61 = arith.constant 0 : i32
    %55 = arith.cmpi ne, %54, %c0_i32_61 : i32
    scf.if %55 {
      %c0_62 = arith.constant 0 : index
      %c0_63 = arith.constant 0 : index
      %56 = vector.load %arg6[%c0_62, %c0_63] : memref<2x32xf32, #tpu.memory_space<vmem>>, vector<2x32xf32>
      %cst_64 = arith.constant dense<0xFF800000> : vector<2xf32>
      %57 = vector.multi_reduction <maximumf>, %56, %cst_64 [1] : vector<2x32xf32> to vector<2xf32>
      %58 = vector.shape_cast %57 : vector<2xf32> to vector<2x1xf32>
      %59 = vector.broadcast %58 : vector<2x1xf32> to vector<2x32xf32>
      %60 = arith.subf %56, %59 : vector<2x32xf32>
      %61 = math.exp %60 : vector<2x32xf32>
      %cst_65 = arith.constant dense<0.000000e+00> : vector<2xf32>
      %62 = vector.multi_reduction <add>, %61, %cst_65 [1] : vector<2x32xf32> to vector<2xf32>
      %63 = vector.shape_cast %62 : vector<2xf32> to vector<2x1xf32>
      %64 = math.log %63 : vector<2x1xf32>
      %65 = vector.broadcast %64 : vector<2x1xf32> to vector<2x32xf32>
      %66 = arith.subf %60, %65 : vector<2x32xf32>
      %c0_66 = arith.constant 0 : index
      %c0_67 = arith.constant 0 : index
      %c0_68 = arith.constant 0 : index
      %67 = vector.load %arg5[%c0_66, %c0_67, %c0_68] : memref<1x2x32xf32, #tpu.memory_space<vmem>>, vector<1x2x32xf32>
      %68 = vector.shape_cast %67 : vector<1x2x32xf32> to vector<2x32xf32>
      %69 = vector.shape_cast %66 : vector<2x32xf32> to vector<1x2x32xf32>
      tpu.vector_store %arg5[%c0_66, %c0_67, %c0_68], %69 {strides = array<i32>} : memref<1x2x32xf32, #tpu.memory_space<vmem>>, vector<1x2x32xf32>,
    } else {
    }
    return
  }
  func.func @transform_0(%arg0: i32, %arg1: i32) -> (i32, i32, i32) {
    %c0_i32 = arith.constant 0 : i32
    %c0_i32_0 = arith.constant 0 : i32
    %c0_i32_1 = arith.constant 0 : i32
    return %arg1, %c0_i32, %c0_i32_0 : i32, i32, i32
  }
  func.func @transform_1(%arg0: i32, %arg1: i32) -> (i32, i32, i32, i32) {
    %c0_i32 = arith.constant 0 : i32
    %c0_i32_0 = arith.constant 0 : i32
    %c0_i32_1 = arith.constant 0 : i32
    return %arg0, %arg1, %c0_i32, %c0_i32_0 : i32, i32, i32, i32
  }
  func.func @transform_2(%arg0: i32, %arg1: i32) -> (i32, i32, i32) {
    %c0_i32 = arith.constant 0 : i32
    %c0_i32_0 = arith.constant 0 : i32
    %c0_i32_1 = arith.constant 0 : i32
    return %arg0, %c0_i32, %c0_i32_0 : i32, i32, i32
  }
  func.func @transform_3(%arg0: i32, %arg1: i32) -> (i32, i32, i32) {
    %c0_i32 = arith.constant 0 : i32
    %c0_i32_0 = arith.constant 0 : i32
    %c0_i32_1 = arith.constant 0 : i32
    return %arg0, %c0_i32, %c0_i32_0 : i32, i32, i32
  }
}

</mosaic_0001>

<bundles_post_ra>
// kernel: model_forward.10
= control target key start
LH: loop header
LB: loop body
LE: loop exit
PB: predicated region body
PF: predicated region fallthrough
CT: control target
= control target key end

     0   :  { %10 = vsyncpa [#allocation3], 0  ;;  %s480_s18 = smov [#allocation2]   ;;  %s632_s0 = inlined_call_operand.vmem [shape: bf16[16,128], index: 0, kind: input, shape index: {}]   ;;  %s633_s1 = inlined_call_operand.vmem [shape: bf16[16,128], index: 1, kind: input, shape index: {}]   ;;  %s634_s2 = inlined_call_operand.vmem [shape: bf16[128,256], index: 2, kind: input, shape index: {}]   ;;  %s635_s3 = inlined_call_operand.vmem [shape: bf16[128,256], index: 3, kind: input, shape index: {}]   ;;  %s636_s4 = inlined_call_operand.hbm [shape: f32[1,256], index: 4, kind: input, shape index: {}]   ;;  %s637_s5 = inlined_call_operand.vmem [shape: bf16[16,256], index: 5, kind: output, shape index: {}]  }
   0x1   :  { %s25_s19 = sshll.u32 %s480_s18, 4  ;;  %s456_s22 = scalar_lea.hbm %s636_s4, 32  ;;  %s26_s19 = int_to_ptr.vmem [resolvable:$true] %s25_s19 }
   0x2   :  { %p457_p0 = scmp.ne.s32.totalorder %s636_s4, %s456_s22  ;;  %p460_p1 = scmp.lt.u32.totalorder %s456_s22, %s636_s4 }
   0x4   :  { %p462_p2 = pnand %p460_p1, %p457_p0 }
   0x6   :  { %465 = shalt.err (!%p462_p2)
}
   0x7   :  { %s466_s27 = scalar_lea.vmem %s26_s19, 32  ;;  %p471_p4 = scmp.lt.s32.totalorder %s26_s19, %s26_s19 }
   0x8   :  { %p467_p3 = scmp.ne.s32.totalorder %s26_s19, %s466_s27  ;;  %p472_p5 = scmp.lt.s32.totalorder %s466_s27, %s466_s27 }
   0xa   :  { %p473_p6 = por %p472_p5, %p471_p4 }
   0xc   :  { %p474_p7 = pnand %p473_p6, %p467_p3 }
   0xe   :  { %477 = shalt.err (!%p474_p7)
}
   0xf   :  { %28 = dma.hbm_to_vmem [thread:$0]  %s636_s4, 32, %s26_s19, [#allocation3]  }
  0x10   :  { %478 = dma.done.wait [#allocation3], 32  }
  0x11   :  { %479 = vsyncadd [#allocation3], 4294967264  ;;  %v481_v0 = vmov 0   ;;  %v406_v1 = vld [vmem:[%s635_s3 + $0x4] ss:$8 sps:$4 sm:$0xff]   ;;  %v329_v35 = vlaneseq }
  0x12   :  { %187 = vmatprep.mubr.bf16.mxu1 %v481_v0  ;;  %316 = vmatprep.mubr.bf16.mxu0 %v481_v0  ;;  %v408_v2 = vld [vmem:[%s634_s2 + $0x4] ss:$8 sps:$4 sm:$0xff]   ;;  %v410_v3 = vld [vmem:[%s635_s3] ss:$8 sps:$4 sm:$0xff]   ;;  %v412_v5 = vld [vmem:[%s635_s3 + $0x14] ss:$8 sps:$4 sm:$0xff]  }
  0x13   :  { %155 = vmatprep.subr.bf16.mxu1 %v406_v1  ;;  %v411_v4 = vld [vmem:[%s634_s2] ss:$8 sps:$4 sm:$0xff]   ;;  %284 = vmatprep.subr.bf16.mxu0 %v408_v2  ;;  %v414_v6 = vld [vmem:[%s634_s2 + $0x14] ss:$8 sps:$4 sm:$0xff]   ;;  %v416_v7 = vld [vmem:[%s635_s3 + $0x10] ss:$8 sps:$4 sm:$0xff]  }
  0x14   :  { %156 = vmatpush1.bf16.msra.mxu1 %v410_v3  ;;  %285 = vmatpush1.bf16.msra.mxu0 %v411_v4  ;;  %v417_v8 = vld [vmem:[%s634_s2 + $0x10] ss:$8 sps:$4 sm:$0xff]   ;;  %v418_v9 = vld [vmem:[%s635_s3 + $0x24] ss:$8 sps:$4 sm:$0xff]   ;;  %v422_v11 = vld [vmem:[%s635_s3 + $0x20] ss:$8 sps:$4 sm:$0xff]  }
  0x15   :  { %157 = vmatprep.subr.bf16.mxu1 %v412_v5  ;;  %286 = vmatprep.subr.bf16.mxu0 %v414_v6  ;;  %v420_v10 = vld [vmem:[%s634_s2 + $0x24] ss:$8 sps:$4 sm:$0xff]   ;;  %v423_v12 = vld [vmem:[%s634_s2 + $0x20] ss:$8 sps:$4 sm:$0xff]   ;;  %v424_v13 = vld [vmem:[%s635_s3 + $0x34] ss:$8 sps:$4 sm:$0xff]  }
  0x16   :  { %v426_v14 = vld [vmem:[%s634_s2 + $0x34] ss:$8 sps:$4 sm:$0xff]   ;;  %v428_v15 = vld [vmem:[%s635_s3 + $0x30] ss:$8 sps:$4 sm:$0xff]   ;;  %v430_v17 = vld [vmem:[%s635_s3 + $0x44] ss:$8 sps:$4 sm:$0xff]  }
  0x17   :  { %v429_v16 = vld [vmem:[%s634_s2 + $0x30] ss:$8 sps:$4 sm:$0xff]   ;;  %v432_v18 = vld [vmem:[%s634_s2 + $0x44] ss:$8 sps:$4 sm:$0xff]   ;;  %v434_v19 = vld [vmem:[%s635_s3 + $0x40] ss:$8 sps:$4 sm:$0xff]  }
  0x18   :  { %158 = vmatpush1.bf16.msra.mxu1 %v416_v7  ;;  %287 = vmatpush1.bf16.msra.mxu0 %v417_v8  ;;  %v435_v20 = vld [vmem:[%s634_s2 + $0x40] ss:$8 sps:$4 sm:$0xff]   ;;  %v436_v21 = vld [vmem:[%s635_s3 + $0x54] ss:$8 sps:$4 sm:$0xff]   ;;  %v440_v23 = vld [vmem:[%s635_s3 + $0x50] ss:$8 sps:$4 sm:$0xff]  }
  0x19   :  { %159 = vmatprep.subr.bf16.mxu1 %v418_v9  ;;  %288 = vmatprep.subr.bf16.mxu0 %v420_v10  ;;  %v438_v22 = vld [vmem:[%s634_s2 + $0x54] ss:$8 sps:$4 sm:$0xff]   ;;  %v441_v24 = vld [vmem:[%s634_s2 + $0x50] ss:$8 sps:$4 sm:$0xff]   ;;  %v442_v25 = vld [vmem:[%s635_s3 + $0x64] ss:$8 sps:$4 sm:$0xff]  }
  0x1a   :  { %v444_v26 = vld [vmem:[%s634_s2 + $0x64] ss:$8 sps:$4 sm:$0xff]   ;;  %v446_v27 = vld [vmem:[%s635_s3 + $0x60] ss:$8 sps:$4 sm:$0xff]   ;;  %v448_v29 = vld [vmem:[%s635_s3 + $0x74] ss:$8 sps:$4 sm:$0xff]  }
  0x1b   :  { %v447_v28 = vld [vmem:[%s634_s2 + $0x60] ss:$8 sps:$4 sm:$0xff]   ;;  %v450_v30 = vld [vmem:[%s634_s2 + $0x74] ss:$8 sps:$4 sm:$0xff]   ;;  %v452_v31 = vld [vmem:[%s635_s3 + $0x70] ss:$8 sps:$4 sm:$0xff]  }
  0x1c   :  { %160 = vmatpush1.bf16.msra.mxu1 %v422_v11  ;;  %289 = vmatpush1.bf16.msra.mxu0 %v423_v12  ;;  %v453_v32 = vld [vmem:[%s634_s2 + $0x70] ss:$8 sps:$4 sm:$0xff]   ;;  %v454_v33 = vld [vmem:[%s633_s1] sm:$0xff]   ;;  %v330_v36 = vshrl.u32 %v329_v35, 7 }
  0x1d   :  { %161 = vmatprep.subr.bf16.mxu1 %v424_v13  ;;  %290 = vmatprep.subr.bf16.mxu0 %v426_v14  ;;  %v455_v34 = vld [vmem:[%s632_s0] sm:$0xff]  }
  0x1e   :  { %v331_v37 = vsub.s32 0, %v330_v36  ;;  %v327_v38 = vld [vmem:[#allocation2] sm:$0x3]  ;;  %v335_v39 = vsub.s32 1, %v330_v36 }
  0x20   :  { %162 = vmatpush1.bf16.msra.mxu1 %v428_v15  ;;  %291 = vmatpush1.bf16.msra.mxu0 %v429_v16  ;;  %v332_v40 = vrot.slane %v327_v38, %v331_v37  ;;  %v336_v43 = vrot.slane %v327_v38, %v335_v39 }
  0x21   :  { %163 = vmatprep.subr.bf16.mxu1 %v430_v17  ;;  %292 = vmatprep.subr.bf16.mxu0 %v432_v18 }
  0x24   :  { %164 = vmatpush1.bf16.msra.mxu1 %v434_v19  ;;  %293 = vmatpush1.bf16.msra.mxu0 %v435_v20 }
  0x25   :  { %165 = vmatprep.subr.bf16.mxu1 %v436_v21  ;;  %294 = vmatprep.subr.bf16.mxu0 %v438_v22 }
  0x28   :  { %166 = vmatpush1.bf16.msra.mxu1 %v440_v23  ;;  %295 = vmatpush1.bf16.msra.mxu0 %v441_v24 }
  0x29   :  { %167 = vmatprep.subr.bf16.mxu1 %v442_v25  ;;  %296 = vmatprep.subr.bf16.mxu0 %v444_v26 }
  0x2c   :  { %168 = vmatpush1.bf16.msra.mxu1 %v446_v27  ;;  %297 = vmatpush1.bf16.msra.mxu0 %v447_v28 }
  0x2d   :  { %169 = vmatprep.subr.bf16.mxu1 %v448_v29  ;;  %298 = vmatprep.subr.bf16.mxu0 %v450_v30 }
  0x30   :  { %170 = vmatpush1.bf16.msra.mxu1 %v452_v31  ;;  %299 = vmatpush1.bf16.msra.mxu0 %v453_v32 }
  0x33   :  { %188 = vmatmul.mubr.bf16.vlgmr.msra.gmra.mrb[0].mxu1 %v454_v33  ;;  %317 = vmatmul.mubr.bf16.vlgmr.msra.gmra.mrb[0].mxu0 %v455_v34 }
 0x106   :  { %v189_v41 = vpop.f32.mrb[0].mxu1  ;;  %v318_v42 = vpop.f32.mrb[0].mxu0 }
 0x107   :  { %v319_v44 = vadd.f32 %v318_v42, %v189_v41  ;;  %v191_v45 = vpop.f32.mrb[1].mxu1  ;;  %v320_v46 = vpop.f32.mrb[1].mxu0 }
 0x108   :  { %v321_v47 = vadd.f32 %v320_v46, %v191_v45  ;;  %v193_v48 = vpop.f32.mrb[2].mxu1  ;;  %v322_v49 = vpop.f32.mrb[2].mxu0 }
 0x109   :  { %v339_v50 = vadd.f32 %v332_v40, %v319_v44  ;;  %v323_v51 = vadd.f32 %v322_v49, %v193_v48  ;;  %v195_v52 = vpop.f32.mrb[3].mxu1  ;;  %v324_v53 = vpop.f32.mrb[3].mxu0 }
 0x10a   :  { %v340_v54 = vadd.f32 %v336_v43, %v321_v47  ;;  %v325_v55 = vadd.f32 %v324_v53, %v195_v52 }
 0x10b   :  { %v341_v56 = vadd.f32 %v332_v40, %v323_v51 }
 0x10c   :  { %v398_v57 = vpack.c.bf16 %v340_v54, %v339_v50  ;;  %v342_v58 = vadd.f32 %v336_v43, %v325_v55 }
 0x10e   :  { %355 = vst [vmem:[%s637_s5] sm:$0xff] %v398_v57  ;;  %v399_v59 = vpack.c.bf16 %v342_v58, %v341_v56 }
 0x110   :  { %356 = vst [vmem:[%s637_s5 + $0x8] sm:$0xff] %v399_v59 }
 0x111   :  { %361 = vsyncpa [#allocation3], 1 }

// kernel: model_forward.6
= control target key start
LH: loop header
LB: loop body
LE: loop exit
PB: predicated region body
PF: predicated region fallthrough
CT: control target
= control target key end

     0   :  { %8 = vsyncpa [#allocation3], 0  ;;  %s898_s0 = inlined_call_operand.vmem [shape: bf16[16,128], index: 0, kind: input, shape index: {}]   ;;  %s899_s1 = inlined_call_operand.hbm [shape: bf16[128,1024], index: 1, kind: input, shape index: {}]   ;;  %s900_s2 = inlined_call_operand.hbm [shape: f32[1,1024], index: 2, kind: input, shape index: {}]   ;;  %s901_s3 = inlined_call_operand.vmem [shape: f32[16,1024], index: 3, kind: output, shape index: {}]  }
   0x1   :  { %9 = vsyncpa [#allocation5], 0  ;;  %s788_s12 = smov [#allocation2]   ;;  %s740_s16 = scalar_lea.hbm %s899_s1, 8192 }
   0x2   :  { %s17_s13 = sshll.u32 %s788_s12, 4  ;;  %p741_p0 = scmp.ne.s32.totalorder %s899_s1, %s740_s16  ;;  %s18_s13 = int_to_ptr.vmem [resolvable:$true] %s17_s13 }
   0x3   :  { %p744_p1 = scmp.lt.u32.totalorder %s740_s16, %s899_s1 }
   0x5   :  { %p746_p2 = pnand %p744_p1, %p741_p0 }
   0x7   :  { %749 = shalt.err (!%p746_p2)
}
   0x8   :  { %s750_s21 = scalar_lea.vmem %s18_s13, 8192  ;;  %p755_p4 = scmp.lt.s32.totalorder %s18_s13, %s18_s13 }
   0x9   :  { %p751_p3 = scmp.ne.s32.totalorder %s18_s13, %s750_s21  ;;  %p756_p5 = scmp.lt.s32.totalorder %s750_s21, %s750_s21 }
   0xb   :  { %p757_p6 = por %p756_p5, %p755_p4 }
   0xd   :  { %p758_p7 = pnand %p757_p6, %p751_p3 }
   0xf   :  { %761 = shalt.err (!%p758_p7)
}
  0x10   :  { %s789_s22 = smov 512   ;;  %s790_s23 = smov 32  }
  0x11   :  { %23 = dma.hbm_to_vmem [thread:$0]  %s899_s1, 8192, %s18_s13, [#allocation3], %s789_s22, %s789_s22, %s790_s23  }
  0x12   :  { %s791_s26 = smov [#allocation4]   ;;  %s762_s30 = scalar_lea.hbm %s900_s2, 128 }
  0x13   :  { %s30_s27 = sshll.u32 %s791_s26, 4  ;;  %p763_p8 = scmp.ne.s32.totalorder %s900_s2, %s762_s30  ;;  %s31_s27 = int_to_ptr.vmem [resolvable:$true] %s30_s27 }
  0x14   :  { %p766_p9 = scmp.lt.u32.totalorder %s762_s30, %s900_s2 }
  0x16   :  { %p768_p10 = pnand %p766_p9, %p763_p8 }
  0x18   :  { %771 = shalt.err (!%p768_p10)
}
  0x19   :  { %s772_s8 = scalar_lea.vmem %s31_s27, 128  ;;  %p777_p12 = scmp.lt.s32.totalorder %s31_s27, %s31_s27 }
  0x1a   :  { %p773_p11 = scmp.ne.s32.totalorder %s31_s27, %s772_s8  ;;  %p778_p13 = scmp.lt.s32.totalorder %s772_s8, %s772_s8 }
  0x1c   :  { %p779_p0 = por %p778_p13, %p777_p12 }
  0x1e   :  { %p780_p1 = pnand %p779_p0, %p773_p11 }
  0x20   :  { %783 = shalt.err (!%p780_p1)
}
  0x21   :  { %33 = dma.hbm_to_vmem [thread:$0]  %s900_s2, 128, %s31_s27, [#allocation5]  }
  0x22   :  { %784 = dma.done.wait [#allocation3], 8192  }
  0x23   :  { %785 = vsyncadd [#allocation3], 4294959104 }
  0x24   :  { %786 = dma.done.wait [#allocation5], 128  }
  0x25   :  { %787 = vsyncadd [#allocation5], 4294967168  ;;  %v792_v0 = vmov 0   ;;  %v43_v1 = vld [vmem:[#allocation2] sm:$0xff]  ;;  %v44_v3 = vld [vmem:[#allocation2 + $0x8] sm:$0xff] }
  0x26   :  { %507 = vmatprep.mubr.bf16.mxu0 %v792_v0  ;;  %550 = vmatprep.mubr.bf16.mxu1 %v792_v0  ;;  %v47_v2 = vld [vmem:[#allocation2 + $0x20] sm:$0xff]  ;;  %v48_v5 = vld [vmem:[#allocation2 + $0x28] sm:$0xff]  ;;  %v45_v63 = vld [vmem:[#allocation2 + $0x10] sm:$0xff] }
  0x27   :  { %v671_v4 = vcombine.high %v43_v1, %v47_v2  ;;  %v670_v6 = vcombine.low %v43_v1, %v47_v2  ;;  %v51_v7 = vld [vmem:[#allocation2 + $0x40] sm:$0xff]  ;;  %v673_v9 = vcombine.high %v44_v3, %v48_v5  ;;  %v672_v10 = vcombine.low %v44_v3, %v48_v5  ;;  %v52_v12 = vld [vmem:[#allocation2 + $0x48] sm:$0xff]  ;;  %v49_v1 = vld [vmem:[#allocation2 + $0x30] sm:$0xff] }
  0x28   :  { %v55_v8 = vld [vmem:[#allocation2 + $0x60] sm:$0xff]  ;;  %v56_v13 = vld [vmem:[#allocation2 + $0x68] sm:$0xff]  ;;  %v46_v2 = vld [vmem:[#allocation2 + $0x18] sm:$0xff] }
  0x29   :  { %v679_v11 = vcombine.high %v51_v7, %v55_v8  ;;  %v59_v14 = vld [vmem:[#allocation2 + $0x80] sm:$0xff]  ;;  %475 = vmatprep.subr.bf16.mxu0 %v671_v4  ;;  %v681_v15 = vcombine.high %v52_v12, %v56_v13  ;;  %v60_v17 = vld [vmem:[#allocation2 + $0x88] sm:$0xff]  ;;  %518 = vmatprep.subr.bf16.mxu1 %v673_v9  ;;  %v678_v19 = vcombine.low %v51_v7, %v55_v8  ;;  %v50_v3 = vld [vmem:[#allocation2 + $0x38] sm:$0xff] }
  0x2a   :  { %v63_v16 = vld [vmem:[#allocation2 + $0xa0] sm:$0xff]  ;;  %v64_v18 = vld [vmem:[#allocation2 + $0xa8] sm:$0xff]  ;;  %476 = vmatpush1.bf16.msra.mxu0 %v670_v6  ;;  %519 = vmatpush1.bf16.msra.mxu1 %v672_v10  ;;  %v680_v20 = vcombine.low %v52_v12, %v56_v13  ;;  %v675_v6 = vcombine.high %v45_v63, %v49_v1  ;;  %v677_v7 = vcombine.high %v46_v2, %v50_v3  ;;  %v53_v8 = vld [vmem:[#allocation2 + $0x50] sm:$0xff] }
  0x2b   :  { %477 = vmatprep.subr.bf16.mxu0 %v679_v11  ;;  %v687_v21 = vcombine.high %v59_v14, %v63_v16  ;;  %520 = vmatprep.subr.bf16.mxu1 %v681_v15  ;;  %v689_v22 = vcombine.high %v60_v17, %v64_v18  ;;  %v67_v23 = vld [vmem:[#allocation2 + $0xc0] sm:$0xff]  ;;  %v68_v25 = vld [vmem:[#allocation2 + $0xc8] sm:$0xff]  ;;  %v686_v27 = vcombine.low %v59_v14, %v63_v16  ;;  %v57_v9 = vld [vmem:[#allocation2 + $0x70] sm:$0xff] }
  0x2c   :  { %v71_v24 = vld [vmem:[#allocation2 + $0xe0] sm:$0xff]  ;;  %v72_v26 = vld [vmem:[#allocation2 + $0xe8] sm:$0xff]  ;;  %v688_v28 = vcombine.low %v60_v17, %v64_v18  ;;  %v54_v11 = vld [vmem:[#allocation2 + $0x58] sm:$0xff]  ;;  %v674_v13 = vcombine.low %v45_v63, %v49_v1  ;;  %v676_v14 = vcombine.low %v46_v2, %v50_v3  ;;  %v683_v15 = vcombine.high %v53_v8, %v57_v9 }
  0x2d   :  { %v695_v29 = vcombine.high %v67_v23, %v71_v24  ;;  %v697_v30 = vcombine.high %v68_v25, %v72_v26  ;;  %v75_v31 = vld [vmem:[#allocation2 + $0x100] sm:$0xff]  ;;  %v76_v33 = vld [vmem:[#allocation2 + $0x108] sm:$0xff]  ;;  %v694_v35 = vcombine.low %v67_v23, %v71_v24  ;;  %v696_v36 = vcombine.low %v68_v25, %v72_v26  ;;  %v58_v12 = vld [vmem:[#allocation2 + $0x78] sm:$0xff] }
  0x2e   :  { %478 = vmatpush1.bf16.msra.mxu0 %v678_v19  ;;  %521 = vmatpush1.bf16.msra.mxu1 %v680_v20  ;;  %v79_v32 = vld [vmem:[#allocation2 + $0x120] sm:$0xff]  ;;  %v80_v34 = vld [vmem:[#allocation2 + $0x128] sm:$0xff]  ;;  %v685_v16 = vcombine.high %v54_v11, %v58_v12  ;;  %v61_v17 = vld [vmem:[#allocation2 + $0x90] sm:$0xff]  ;;  %v109_v3 = vlaneseq }
  0x2f   :  { %479 = vmatprep.subr.bf16.mxu0 %v687_v21  ;;  %522 = vmatprep.subr.bf16.mxu1 %v689_v22  ;;  %v703_v37 = vcombine.high %v75_v31, %v79_v32  ;;  %v705_v38 = vcombine.high %v76_v33, %v80_v34  ;;  %v83_v39 = vld [vmem:[#allocation2 + $0x140] sm:$0xff]  ;;  %v84_v41 = vld [vmem:[#allocation2 + $0x148] sm:$0xff]  ;;  %v702_v43 = vcombine.low %v75_v31, %v79_v32  ;;  %v65_v18 = vld [vmem:[#allocation2 + $0xb0] sm:$0xff] }
  0x30   :  { %v87_v40 = vld [vmem:[#allocation2 + $0x160] sm:$0xff]  ;;  %v88_v42 = vld [vmem:[#allocation2 + $0x168] sm:$0xff]  ;;  %v704_v44 = vcombine.low %v76_v33, %v80_v34  ;;  %v62_v19 = vld [vmem:[#allocation2 + $0x98] sm:$0xff]  ;;  %v682_v21 = vcombine.low %v53_v8, %v57_v9  ;;  %v684_v22 = vcombine.low %v54_v11, %v58_v12  ;;  %v691_v23 = vcombine.high %v61_v17, %v65_v18 }
  0x31   :  { %v711_v45 = vcombine.high %v83_v39, %v87_v40  ;;  %v713_v46 = vcombine.high %v84_v41, %v88_v42  ;;  %v91_v47 = vld [vmem:[#allocation2 + $0x180] sm:$0xff]  ;;  %v92_v49 = vld [vmem:[#allocation2 + $0x188] sm:$0xff]  ;;  %v710_v51 = vcombine.low %v83_v39, %v87_v40  ;;  %v712_v52 = vcombine.low %v84_v41, %v88_v42  ;;  %v66_v20 = vld [vmem:[#allocation2 + $0xb8] sm:$0xff] }
  0x32   :  { %480 = vmatpush1.bf16.msra.mxu0 %v686_v27  ;;  %523 = vmatpush1.bf16.msra.mxu1 %v688_v28  ;;  %v95_v48 = vld [vmem:[#allocation2 + $0x1a0] sm:$0xff]  ;;  %v96_v50 = vld [vmem:[#allocation2 + $0x1a8] sm:$0xff]  ;;  %v693_v24 = vcombine.high %v62_v19, %v66_v20  ;;  %v69_v25 = vld [vmem:[#allocation2 + $0xd0] sm:$0xff] }
  0x33   :  { %481 = vmatprep.subr.bf16.mxu0 %v695_v29  ;;  %524 = vmatprep.subr.bf16.mxu1 %v697_v30  ;;  %v719_v53 = vcombine.high %v91_v47, %v95_v48  ;;  %v721_v54 = vcombine.high %v92_v49, %v96_v50  ;;  %v99_v55 = vld [vmem:[#allocation2 + $0x1c0] sm:$0xff]  ;;  %v100_v57 = vld [vmem:[#allocation2 + $0x1c8] sm:$0xff]  ;;  %v718_v59 = vcombine.low %v91_v47, %v95_v48  ;;  %v73_v26 = vld [vmem:[#allocation2 + $0xf0] sm:$0xff] }
  0x34   :  { %v103_v56 = vld [vmem:[#allocation2 + $0x1e0] sm:$0xff]  ;;  %v104_v58 = vld [vmem:[#allocation2 + $0x1e8] sm:$0xff]  ;;  %v720_v60 = vcombine.low %v92_v49, %v96_v50  ;;  %v70_v27 = vld [vmem:[#allocation2 + $0xd8] sm:$0xff]  ;;  %v690_v29 = vcombine.low %v61_v17, %v65_v18  ;;  %v692_v30 = vcombine.low %v62_v19, %v66_v20  ;;  %v699_v31 = vcombine.high %v69_v25, %v73_v26 }
  0x35   :  { %v727_v61 = vcombine.high %v99_v55, %v103_v56  ;;  %v729_v62 = vcombine.high %v100_v57, %v104_v58  ;;  %v726_v4 = vcombine.low %v99_v55, %v103_v56  ;;  %v728_v5 = vcombine.low %v100_v57, %v104_v58  ;;  %v842_v10 = vld [vmem:[%s898_s0] sm:$0xff]   ;;  %v74_v28 = vld [vmem:[#allocation2 + $0xf8] sm:$0xff]  ;;  %v77_v33 = vld [vmem:[#allocation2 + $0x110] sm:$0xff] }
  0x36   :  { %482 = vmatpush1.bf16.msra.mxu0 %v694_v35  ;;  %525 = vmatpush1.bf16.msra.mxu1 %v696_v36  ;;  %v701_v32 = vcombine.high %v70_v27, %v74_v28  ;;  %v81_v34 = vld [vmem:[#allocation2 + $0x130] sm:$0xff]  ;;  %v78_v35 = vld [vmem:[#allocation2 + $0x118] sm:$0xff] }
  0x37   :  { %483 = vmatprep.subr.bf16.mxu0 %v703_v37  ;;  %526 = vmatprep.subr.bf16.mxu1 %v705_v38  ;;  %v82_v36 = vld [vmem:[#allocation2 + $0x138] sm:$0xff]  ;;  %v698_v37 = vcombine.low %v69_v25, %v73_v26  ;;  %v700_v38 = vcombine.low %v70_v27, %v74_v28  ;;  %v707_v39 = vcombine.high %v77_v33, %v81_v34  ;;  %v85_v40 = vld [vmem:[#allocation2 + $0x150] sm:$0xff] }
  0x38   :  { %v89_v41 = vld [vmem:[#allocation2 + $0x170] sm:$0xff]  ;;  %v86_v42 = vld [vmem:[#allocation2 + $0x158] sm:$0xff] }
  0x39   :  { %v93_v48 = vld [vmem:[#allocation2 + $0x190] sm:$0xff]  ;;  %v94_v50 = vld [vmem:[#allocation2 + $0x198] sm:$0xff] }
  0x3a   :  { %484 = vmatpush1.bf16.msra.mxu0 %v702_v43  ;;  %527 = vmatpush1.bf16.msra.mxu1 %v704_v44  ;;  %v90_v43 = vld [vmem:[#allocation2 + $0x178] sm:$0xff]  ;;  %v706_v44 = vcombine.low %v77_v33, %v81_v34  ;;  %v97_v49 = vld [vmem:[#allocation2 + $0x1b0] sm:$0xff] }
  0x3b   :  { %485 = vmatprep.subr.bf16.mxu0 %v711_v45  ;;  %528 = vmatprep.subr.bf16.mxu1 %v713_v46  ;;  %v708_v45 = vcombine.low %v78_v35, %v82_v36  ;;  %v715_v46 = vcombine.high %v85_v40, %v89_v41  ;;  %v717_v47 = vcombine.high %v86_v42, %v90_v43  ;;  %v101_v56 = vld [vmem:[#allocation2 + $0x1d0] sm:$0xff]  ;;  %v102_v58 = vld [vmem:[#allocation2 + $0x1d8] sm:$0xff] }
  0x3c   :  { %v105_v57 = vld [vmem:[#allocation2 + $0x1f0] sm:$0xff] }
  0x3d   :  { %v730_v1 = vcombine.low %v101_v56, %v105_v57 }
  0x3e   :  { %486 = vmatpush1.bf16.msra.mxu0 %v710_v51  ;;  %529 = vmatpush1.bf16.msra.mxu1 %v712_v52  ;;  %v98_v51 = vld [vmem:[#allocation2 + $0x1b8] sm:$0xff]  ;;  %v714_v52 = vcombine.low %v85_v40, %v89_v41 }
  0x3f   :  { %487 = vmatprep.subr.bf16.mxu0 %v719_v53  ;;  %530 = vmatprep.subr.bf16.mxu1 %v721_v54  ;;  %v716_v53 = vcombine.low %v86_v42, %v90_v43  ;;  %v723_v54 = vcombine.high %v93_v48, %v97_v49  ;;  %v725_v55 = vcombine.high %v94_v50, %v98_v51 }
  0x42   :  { %488 = vmatpush1.bf16.msra.mxu0 %v718_v59  ;;  %531 = vmatpush1.bf16.msra.mxu1 %v720_v60  ;;  %v106_v59 = vld [vmem:[#allocation2 + $0x1f8] sm:$0xff]  ;;  %v722_v60 = vcombine.low %v93_v48, %v97_v49 }
  0x43   :  { %489 = vmatprep.subr.bf16.mxu0 %v727_v61  ;;  %532 = vmatprep.subr.bf16.mxu1 %v729_v62  ;;  %v724_v61 = vcombine.low %v94_v50, %v98_v51  ;;  %v731_v62 = vcombine.high %v101_v56, %v105_v57  ;;  %v733_v63 = vcombine.high %v102_v58, %v106_v59 }
  0x44   :  { %v732_v2 = vcombine.low %v102_v58, %v106_v59 }
  0x46   :  { %490 = vmatpush1.bf16.msra.mxu0 %v726_v4  ;;  %533 = vmatpush1.bf16.msra.mxu1 %v728_v5  ;;  %v110_v4 = vshrl.u32 %v109_v3, 7 }
  0x47   :  { %561 = vmatprep.subr.bf16.mxu0 %v675_v6  ;;  %604 = vmatprep.subr.bf16.mxu1 %v677_v7  ;;  %v107_v6 = vld [vmem:[#allocation4] sm:$0xff] }
  0x48   :  { %v111_v5 = vsub.s32 0, %v110_v4  ;;  %v119_v7 = vsub.s32 2, %v110_v4  ;;  %v115_v8 = vsub.s32 1, %v110_v4  ;;  %v123_v9 = vsub.s32 3, %v110_v4 }
  0x49   :  { %508 = vmatmul.mubr.bf16.vlgmr.msra.gmra.mrb[0].mxu0 %v842_v10  ;;  %551 = vmatmul.mubr.bf16.vlgmr.msra.gmra.mrb[0].mxu1 %v842_v10  ;;  %v139_v33 = vsub.s32 7, %v110_v4 }
  0x4a   :  { %562 = vmatpush1.bf16.msra.mxu0 %v674_v13  ;;  %605 = vmatpush1.bf16.msra.mxu1 %v676_v14  ;;  %v112_v11 = vrot.slane %v107_v6, %v111_v5  ;;  %v120_v12 = vrot.slane %v107_v6, %v119_v7  ;;  %v116_v13 = vrot.slane %v107_v6, %v115_v8 }
  0x4b   :  { %563 = vmatprep.subr.bf16.mxu0 %v683_v15  ;;  %606 = vmatprep.subr.bf16.mxu1 %v685_v16  ;;  %v124_v14 = vrot.slane %v107_v6, %v123_v9 }
  0x4c   :  { %593 = vmatprep.mubr.bf16.mxu0 %v792_v0  ;;  %636 = vmatprep.mubr.bf16.mxu1 %v792_v0  ;;  %v709_v0 = vcombine.high %v78_v35, %v82_v36 }
  0x4e   :  { %564 = vmatpush1.bf16.msra.mxu0 %v682_v21  ;;  %607 = vmatpush1.bf16.msra.mxu1 %v684_v22 }
  0x4f   :  { %565 = vmatprep.subr.bf16.mxu0 %v691_v23  ;;  %608 = vmatprep.subr.bf16.mxu1 %v693_v24 }
  0x52   :  { %566 = vmatpush1.bf16.msra.mxu0 %v690_v29  ;;  %609 = vmatpush1.bf16.msra.mxu1 %v692_v30  ;;  %v127_v30 = vsub.s32 4, %v110_v4 }
  0x53   :  { %567 = vmatprep.subr.bf16.mxu0 %v699_v31  ;;  %610 = vmatprep.subr.bf16.mxu1 %v701_v32  ;;  %v135_v31 = vsub.s32 6, %v110_v4  ;;  %v131_v32 = vsub.s32 5, %v110_v4 }
  0x54   :  { %v128_v34 = vrot.slane %v107_v6, %v127_v30 }
  0x55   :  { %v136_v35 = vrot.slane %v107_v6, %v135_v31  ;;  %v132_v36 = vrot.slane %v107_v6, %v131_v32 }
  0x56   :  { %568 = vmatpush1.bf16.msra.mxu0 %v698_v37  ;;  %611 = vmatpush1.bf16.msra.mxu1 %v700_v38  ;;  %v140_v37 = vrot.slane %v107_v6, %v139_v33 }
  0x57   :  { %569 = vmatprep.subr.bf16.mxu0 %v707_v39  ;;  %612 = vmatprep.subr.bf16.mxu1 %v709_v0 }
  0x5a   :  { %570 = vmatpush1.bf16.msra.mxu0 %v706_v44  ;;  %613 = vmatpush1.bf16.msra.mxu1 %v708_v45 }
  0x5b   :  { %571 = vmatprep.subr.bf16.mxu0 %v715_v46  ;;  %614 = vmatprep.subr.bf16.mxu1 %v717_v47 }
  0x5e   :  { %572 = vmatpush1.bf16.msra.mxu0 %v714_v52  ;;  %615 = vmatpush1.bf16.msra.mxu1 %v716_v53 }
  0x5f   :  { %573 = vmatprep.subr.bf16.mxu0 %v723_v54  ;;  %616 = vmatprep.subr.bf16.mxu1 %v725_v55 }
  0x62   :  { %574 = vmatpush1.bf16.msra.mxu0 %v722_v60  ;;  %617 = vmatpush1.bf16.msra.mxu1 %v724_v61 }
  0x63   :  { %575 = vmatprep.subr.bf16.mxu0 %v731_v62  ;;  %618 = vmatprep.subr.bf16.mxu1 %v733_v63 }
  0x66   :  { %576 = vmatpush1.bf16.msra.mxu0 %v730_v1  ;;  %619 = vmatpush1.bf16.msra.mxu1 %v732_v2 }
  0x69   :  { %594 = vmatmul.mubr.bf16.vlgmr.msra.gmra.mrb[4].mxu0 %v842_v10  ;;  %637 = vmatmul.mubr.bf16.vlgmr.msra.gmra.mrb[4].mxu1 %v842_v10 }
 0x11c   :  { %v509_v15 = vpop.f32.mrb[0].mxu0  ;;  %v552_v17 = vpop.f32.mrb[0].mxu1 }
 0x11d   :  { %v510_v16 = vadd.f32 %v509_v15, %v112_v11  ;;  %v511_v18 = vpop.f32.mrb[1].mxu0  ;;  %v553_v19 = vadd.f32 %v552_v17, %v120_v12  ;;  %v554_v21 = vpop.f32.mrb[1].mxu1 }
 0x11e   :  { %v512_v20 = vadd.f32 %v511_v18, %v116_v13  ;;  %v513_v22 = vpop.f32.mrb[2].mxu0  ;;  %v555_v10 = vadd.f32 %v554_v21, %v124_v14  ;;  %v556_v24 = vpop.f32.mrb[2].mxu1 }
 0x11f   :  { %647 = vst [vmem:[%s901_s3] sm:$0xff] %v510_v16  ;;  %v514_v23 = vadd.f32 %v513_v22, %v112_v11  ;;  %v515_v25 = vpop.f32.mrb[3].mxu0  ;;  %649 = vst [vmem:[%s901_s3 + $0x10] sm:$0xff] %v553_v19  ;;  %v557_v26 = vadd.f32 %v556_v24, %v120_v12  ;;  %v558_v28 = vpop.f32.mrb[3].mxu1 }
 0x120   :  { %648 = vst [vmem:[%s901_s3 + $0x8] sm:$0xff] %v512_v20  ;;  %v516_v27 = vadd.f32 %v515_v25, %v116_v13  ;;  %650 = vst [vmem:[%s901_s3 + $0x18] sm:$0xff] %v555_v10  ;;  %v559_v29 = vadd.f32 %v558_v28, %v124_v14 }
 0x121   :  { %655 = vst [vmem:[%s901_s3 + $0x40] sm:$0xff] %v514_v23  ;;  %657 = vst [vmem:[%s901_s3 + $0x50] sm:$0xff] %v557_v26 }
 0x122   :  { %656 = vst [vmem:[%s901_s3 + $0x48] sm:$0xff] %v516_v27  ;;  %658 = vst [vmem:[%s901_s3 + $0x58] sm:$0xff] %v559_v29 }
 0x13c   :  { %v595_v38 = vpop.f32.mrb[4].mxu0  ;;  %v638_v0 = vpop.f32.mrb[4].mxu1 }
 0x13d   :  { %v596_v39 = vadd.f32 %v595_v38, %v128_v34  ;;  %v597_v40 = vpop.f32.mrb[5].mxu0  ;;  %v639_v41 = vadd.f32 %v638_v0, %v136_v35  ;;  %v640_v43 = vpop.f32.mrb[5].mxu1 }
 0x13e   :  { %v598_v42 = vadd.f32 %v597_v40, %v132_v36  ;;  %v599_v44 = vpop.f32.mrb[6].mxu0  ;;  %v641_v45 = vadd.f32 %v640_v43, %v140_v37  ;;  %v642_v47 = vpop.f32.mrb[6].mxu1 }
 0x13f   :  { %651 = vst [vmem:[%s901_s3 + $0x20] sm:$0xff] %v596_v39  ;;  %v600_v46 = vadd.f32 %v599_v44, %v128_v34  ;;  %v601_v48 = vpop.f32.mrb[7].mxu0  ;;  %653 = vst [vmem:[%s901_s3 + $0x30] sm:$0xff] %v639_v41  ;;  %v643_v49 = vadd.f32 %v642_v47, %v136_v35  ;;  %v644_v51 = vpop.f32.mrb[7].mxu1 }
 0x140   :  { %652 = vst [vmem:[%s901_s3 + $0x28] sm:$0xff] %v598_v42  ;;  %v602_v50 = vadd.f32 %v601_v48, %v132_v36  ;;  %654 = vst [vmem:[%s901_s3 + $0x38] sm:$0xff] %v641_v45  ;;  %v645_v52 = vadd.f32 %v644_v51, %v140_v37 }
 0x141   :  { %659 = vst [vmem:[%s901_s3 + $0x60] sm:$0xff] %v600_v46  ;;  %661 = vst [vmem:[%s901_s3 + $0x70] sm:$0xff] %v643_v49 }
 0x142   :  { %660 = vst [vmem:[%s901_s3 + $0x68] sm:$0xff] %v602_v50  ;;  %662 = vst [vmem:[%s901_s3 + $0x78] sm:$0xff] %v645_v52 }
 0x143   :  { %667 = vsyncpa [#allocation3], 1 }
 0x144   :  { %668 = vsyncpa [#allocation5], 1 }

// kernel: model_forward.8
= control target key start
LH: loop header
LB: loop body
LE: loop exit
PB: predicated region body
PF: predicated region fallthrough
CT: control target
= control target key end

     0   :  { %10 = vsyncpa [#allocation3], 0  ;;  %s1645_s0 = inlined_call_operand.vmem [shape: bf16[16,128], index: 0, kind: input, shape index: {}]   ;;  %s1646_s1 = inlined_call_operand.vmem [shape: bf16[16,128], index: 1, kind: input, shape index: {}]   ;;  %s1647_s2 = inlined_call_operand.hbm [shape: bf16[128,1024], index: 2, kind: input, shape index: {}]   ;;  %s1648_s3 = inlined_call_operand.hbm [shape: bf16[128,1024], index: 3, kind: input, shape index: {}]   ;;  %s1649_s4 = inlined_call_operand.hbm [shape: f32[1,1024], index: 4, kind: input, shape index: {}]   ;;  %s1650_s5 = inlined_call_operand.vmem [shape: f32[16,1024], index: 5, kind: output, shape index: {}]  }
   0x1   :  { %11 = vsyncpa [#allocation5], 0  ;;  %s1492_s18 = smov [#allocation4]   ;;  %s1493_s20 = smov [#allocation2]  }
   0x2   :  { %s33_s19 = sshll.u32 %s1492_s18, 4  ;;  %s21_s21 = sshll.u32 %s1493_s20, 4  ;;  %s34_s19 = int_to_ptr.vmem [resolvable:$true] %s33_s19  ;;  %s1528_s21 = int_to_ptr.vmem [resolvable:$true] %s21_s21 }
   0x3   :  { %s1422_s24 = scalar_lea.hbm %s1648_s3, 8192 }
   0x4   :  { %p1423_p0 = scmp.ne.s32.totalorder %s1648_s3, %s1422_s24  ;;  %p1426_p1 = scmp.lt.u32.totalorder %s1422_s24, %s1648_s3 }
   0x6   :  { %p1428_p2 = pnand %p1426_p1, %p1423_p0 }
   0x8   :  { %1431 = shalt.err (!%p1428_p2)
}
   0x9   :  { %s1432_s29 = scalar_lea.vmem %s34_s19, 8192  ;;  %p1437_p4 = scmp.lt.s32.totalorder %s34_s19, %s34_s19 }
   0xa   :  { %p1433_p3 = scmp.ne.s32.totalorder %s34_s19, %s1432_s29  ;;  %p1438_p5 = scmp.lt.s32.totalorder %s1432_s29, %s1432_s29 }
   0xc   :  { %p1439_p6 = por %p1438_p5, %p1437_p4 }
   0xe   :  { %p1440_p7 = pnand %p1439_p6, %p1433_p3 }
  0x10   :  { %1443 = shalt.err (!%p1440_p7)
}
  0x11   :  { %s1494_s30 = smov 512   ;;  %s1495_s6 = smov 32  }
  0x12   :  { %39 = dma.hbm_to_vmem [thread:$0]  %s1648_s3, 8192, %s34_s19, [#allocation5], %s1494_s30, %s1494_s30, %s1495_s6  }
  0x13   :  { %s1444_s11 = scalar_lea.hbm %s1647_s2, 8192 }
  0x14   :  { %p1445_p8 = scmp.ne.s32.totalorder %s1647_s2, %s1444_s11  ;;  %p1448_p9 = scmp.lt.u32.totalorder %s1444_s11, %s1647_s2 }
  0x16   :  { %p1450_p10 = pnand %p1448_p9, %p1445_p8 }
  0x18   :  { %1453 = shalt.err (!%p1450_p10)
}
  0x19   :  { %s1454_s16 = scalar_lea.vmem %s1528_s21, 8192  ;;  %p1459_p12 = scmp.lt.s32.totalorder %s1528_s21, %s1528_s21 }
  0x1a   :  { %p1455_p11 = scmp.ne.s32.totalorder %s1528_s21, %s1454_s16  ;;  %p1460_p13 = scmp.lt.s32.totalorder %s1454_s16, %s1454_s16 }
  0x1c   :  { %p1461_p0 = por %p1460_p13, %p1459_p12 }
  0x1e   :  { %p1462_p1 = pnand %p1461_p0, %p1455_p11 }
  0x20   :  { %1465 = shalt.err (!%p1462_p1)
}
  0x21   :  { %27 = dma.hbm_to_vmem [thread:$0]  %s1647_s2, 8192, %s1528_s21, [#allocation3], %s1494_s30, %s1494_s30, %s1495_s6  }
  0x22   :  { %s1496_s18 = smov [#allocation6]   ;;  %s1466_s23 = scalar_lea.hbm %s1649_s4, 128 }
  0x23   :  { %s46_s19 = sshll.u32 %s1496_s18, 4  ;;  %p1467_p2 = scmp.ne.s32.totalorder %s1649_s4, %s1466_s23  ;;  %s47_s19 = int_to_ptr.vmem [resolvable:$true] %s46_s19 }
  0x24   :  { %p1470_p3 = scmp.lt.u32.totalorder %s1466_s23, %s1649_s4 }
  0x26   :  { %p1472_p4 = pnand %p1470_p3, %p1467_p2 }
  0x28   :  { %1475 = shalt.err (!%p1472_p4)
}
  0x29   :  { %s1476_s28 = scalar_lea.vmem %s47_s19, 128  ;;  %p1481_p6 = scmp.lt.s32.totalorder %s47_s19, %s47_s19 }
  0x2a   :  { %p1477_p5 = scmp.ne.s32.totalorder %s47_s19, %s1476_s28  ;;  %p1482_p7 = scmp.lt.s32.totalorder %s1476_s28, %s1476_s28 }
  0x2c   :  { %p1483_p8 = por %p1482_p7, %p1481_p6 }
  0x2e   :  { %p1484_p9 = pnand %p1483_p8, %p1477_p5 }
  0x30   :  { %1487 = shalt.err (!%p1484_p9)
}
  0x31   :  { %49 = dma.hbm_to_vmem [thread:$0]  %s1649_s4, 128, %s47_s19, [#allocation5]  }
  0x32   :  { %1488 = dma.done.wait [#allocation3], 8192  }
  0x33   :  { %1489 = vsyncadd [#allocation3], 4294959104 }
  0x34   :  { %1490 = dma.done.wait [#allocation5], 8320  }
  0x35   :  { %1491 = vsyncadd [#allocation5], 4294958976  ;;  %v1497_v0 = vmov 0   ;;  %v128_v1 = vld [vmem:[#allocation4] sm:$0xff]  ;;  %v129_v3 = vld [vmem:[#allocation4 + $0x8] sm:$0xff] }
  0x36   :  { %550 = vmatprep.mubr.bf16.mxu0 %v1497_v0  ;;  %593 = vmatprep.mubr.bf16.mxu1 %v1497_v0  ;;  %v132_v2 = vld [vmem:[#allocation4 + $0x20] sm:$0xff]  ;;  %v133_v5 = vld [vmem:[#allocation4 + $0x28] sm:$0xff]  ;;  %v130_v63 = vld [vmem:[#allocation4 + $0x10] sm:$0xff] }
  0x37   :  { %v1270_v4 = vcombine.high %v128_v1, %v132_v2  ;;  %v1269_v6 = vcombine.low %v128_v1, %v132_v2  ;;  %v136_v7 = vld [vmem:[#allocation4 + $0x40] sm:$0xff]  ;;  %v1272_v9 = vcombine.high %v129_v3, %v133_v5  ;;  %v1271_v10 = vcombine.low %v129_v3, %v133_v5  ;;  %v137_v12 = vld [vmem:[#allocation4 + $0x48] sm:$0xff]  ;;  %v134_v1 = vld [vmem:[#allocation4 + $0x30] sm:$0xff] }
  0x38   :  { %v140_v8 = vld [vmem:[#allocation4 + $0x60] sm:$0xff]  ;;  %v141_v13 = vld [vmem:[#allocation4 + $0x68] sm:$0xff]  ;;  %v131_v2 = vld [vmem:[#allocation4 + $0x18] sm:$0xff] }
  0x39   :  { %v1278_v11 = vcombine.high %v136_v7, %v140_v8  ;;  %v144_v14 = vld [vmem:[#allocation4 + $0x80] sm:$0xff]  ;;  %518 = vmatprep.subr.bf16.mxu0 %v1270_v4  ;;  %v1280_v15 = vcombine.high %v137_v12, %v141_v13  ;;  %v145_v17 = vld [vmem:[#allocation4 + $0x88] sm:$0xff]  ;;  %561 = vmatprep.subr.bf16.mxu1 %v1272_v9  ;;  %v1277_v19 = vcombine.low %v136_v7, %v140_v8  ;;  %v135_v3 = vld [vmem:[#allocation4 + $0x38] sm:$0xff] }
  0x3a   :  { %v148_v16 = vld [vmem:[#allocation4 + $0xa0] sm:$0xff]  ;;  %v149_v18 = vld [vmem:[#allocation4 + $0xa8] sm:$0xff]  ;;  %519 = vmatpush1.bf16.msra.mxu0 %v1269_v6  ;;  %562 = vmatpush1.bf16.msra.mxu1 %v1271_v10  ;;  %v1279_v20 = vcombine.low %v137_v12, %v141_v13  ;;  %v1274_v6 = vcombine.high %v130_v63, %v134_v1  ;;  %v1276_v7 = vcombine.high %v131_v2, %v135_v3  ;;  %v138_v8 = vld [vmem:[#allocation4 + $0x50] sm:$0xff] }
  0x3b   :  { %520 = vmatprep.subr.bf16.mxu0 %v1278_v11  ;;  %v1286_v21 = vcombine.high %v144_v14, %v148_v16  ;;  %563 = vmatprep.subr.bf16.mxu1 %v1280_v15  ;;  %v1288_v22 = vcombine.high %v145_v17, %v149_v18  ;;  %v152_v23 = vld [vmem:[#allocation4 + $0xc0] sm:$0xff]  ;;  %v153_v25 = vld [vmem:[#allocation4 + $0xc8] sm:$0xff]  ;;  %v1285_v27 = vcombine.low %v144_v14, %v148_v16  ;;  %v142_v9 = vld [vmem:[#allocation4 + $0x70] sm:$0xff] }
  0x3c   :  { %v156_v24 = vld [vmem:[#allocation4 + $0xe0] sm:$0xff]  ;;  %v157_v26 = vld [vmem:[#allocation4 + $0xe8] sm:$0xff]  ;;  %v1287_v28 = vcombine.low %v145_v17, %v149_v18  ;;  %v139_v11 = vld [vmem:[#allocation4 + $0x58] sm:$0xff]  ;;  %v1273_v13 = vcombine.low %v130_v63, %v134_v1  ;;  %v1275_v14 = vcombine.low %v131_v2, %v135_v3  ;;  %v1282_v15 = vcombine.high %v138_v8, %v142_v9 }
  0x3d   :  { %v1294_v29 = vcombine.high %v152_v23, %v156_v24  ;;  %v1296_v30 = vcombine.high %v153_v25, %v157_v26  ;;  %v160_v31 = vld [vmem:[#allocation4 + $0x100] sm:$0xff]  ;;  %v161_v33 = vld [vmem:[#allocation4 + $0x108] sm:$0xff]  ;;  %v1293_v35 = vcombine.low %v152_v23, %v156_v24  ;;  %v1295_v36 = vcombine.low %v153_v25, %v157_v26  ;;  %v143_v12 = vld [vmem:[#allocation4 + $0x78] sm:$0xff] }
  0x3e   :  { %521 = vmatpush1.bf16.msra.mxu0 %v1277_v19  ;;  %564 = vmatpush1.bf16.msra.mxu1 %v1279_v20  ;;  %v164_v32 = vld [vmem:[#allocation4 + $0x120] sm:$0xff]  ;;  %v165_v34 = vld [vmem:[#allocation4 + $0x128] sm:$0xff]  ;;  %v1284_v16 = vcombine.high %v139_v11, %v143_v12  ;;  %v146_v17 = vld [vmem:[#allocation4 + $0x90] sm:$0xff] }
  0x3f   :  { %522 = vmatprep.subr.bf16.mxu0 %v1286_v21  ;;  %565 = vmatprep.subr.bf16.mxu1 %v1288_v22  ;;  %v1302_v37 = vcombine.high %v160_v31, %v164_v32  ;;  %v1304_v38 = vcombine.high %v161_v33, %v165_v34  ;;  %v168_v39 = vld [vmem:[#allocation4 + $0x140] sm:$0xff]  ;;  %v169_v41 = vld [vmem:[#allocation4 + $0x148] sm:$0xff]  ;;  %v1301_v43 = vcombine.low %v160_v31, %v164_v32  ;;  %v150_v18 = vld [vmem:[#allocation4 + $0xb0] sm:$0xff] }
  0x40   :  { %v172_v40 = vld [vmem:[#allocation4 + $0x160] sm:$0xff]  ;;  %v173_v42 = vld [vmem:[#allocation4 + $0x168] sm:$0xff]  ;;  %v1303_v44 = vcombine.low %v161_v33, %v165_v34  ;;  %v147_v19 = vld [vmem:[#allocation4 + $0x98] sm:$0xff]  ;;  %v1281_v21 = vcombine.low %v138_v8, %v142_v9  ;;  %v1283_v22 = vcombine.low %v139_v11, %v143_v12  ;;  %v1290_v23 = vcombine.high %v146_v17, %v150_v18 }
  0x41   :  { %v1310_v45 = vcombine.high %v168_v39, %v172_v40  ;;  %v1312_v46 = vcombine.high %v169_v41, %v173_v42  ;;  %v176_v47 = vld [vmem:[#allocation4 + $0x180] sm:$0xff]  ;;  %v177_v49 = vld [vmem:[#allocation4 + $0x188] sm:$0xff]  ;;  %v1309_v51 = vcombine.low %v168_v39, %v172_v40  ;;  %v1311_v52 = vcombine.low %v169_v41, %v173_v42  ;;  %v151_v20 = vld [vmem:[#allocation4 + $0xb8] sm:$0xff] }
  0x42   :  { %523 = vmatpush1.bf16.msra.mxu0 %v1285_v27  ;;  %566 = vmatpush1.bf16.msra.mxu1 %v1287_v28  ;;  %v180_v48 = vld [vmem:[#allocation4 + $0x1a0] sm:$0xff]  ;;  %v181_v50 = vld [vmem:[#allocation4 + $0x1a8] sm:$0xff]  ;;  %v1292_v24 = vcombine.high %v147_v19, %v151_v20  ;;  %v154_v25 = vld [vmem:[#allocation4 + $0xd0] sm:$0xff] }
  0x43   :  { %524 = vmatprep.subr.bf16.mxu0 %v1294_v29  ;;  %567 = vmatprep.subr.bf16.mxu1 %v1296_v30  ;;  %v1318_v53 = vcombine.high %v176_v47, %v180_v48  ;;  %v1320_v54 = vcombine.high %v177_v49, %v181_v50  ;;  %v184_v55 = vld [vmem:[#allocation4 + $0x1c0] sm:$0xff]  ;;  %v185_v57 = vld [vmem:[#allocation4 + $0x1c8] sm:$0xff]  ;;  %v1317_v59 = vcombine.low %v176_v47, %v180_v48  ;;  %v158_v26 = vld [vmem:[#allocation4 + $0xf0] sm:$0xff] }
  0x44   :  { %v188_v56 = vld [vmem:[#allocation4 + $0x1e0] sm:$0xff]  ;;  %v189_v58 = vld [vmem:[#allocation4 + $0x1e8] sm:$0xff]  ;;  %v1319_v60 = vcombine.low %v177_v49, %v181_v50  ;;  %v155_v27 = vld [vmem:[#allocation4 + $0xd8] sm:$0xff]  ;;  %v1289_v29 = vcombine.low %v146_v17, %v150_v18  ;;  %v1291_v30 = vcombine.low %v147_v19, %v151_v20  ;;  %v1298_v31 = vcombine.high %v154_v25, %v158_v26 }
  0x45   :  { %v1326_v61 = vcombine.high %v184_v55, %v188_v56  ;;  %v1328_v62 = vcombine.high %v185_v57, %v189_v58  ;;  %v1325_v4 = vcombine.low %v184_v55, %v188_v56  ;;  %v1327_v5 = vcombine.low %v185_v57, %v189_v58  ;;  %v1576_v10 = vld [vmem:[%s1646_s1] sm:$0xff]   ;;  %v159_v28 = vld [vmem:[#allocation4 + $0xf8] sm:$0xff]  ;;  %v162_v33 = vld [vmem:[#allocation4 + $0x110] sm:$0xff] }
  0x46   :  { %525 = vmatpush1.bf16.msra.mxu0 %v1293_v35  ;;  %568 = vmatpush1.bf16.msra.mxu1 %v1295_v36  ;;  %v1300_v32 = vcombine.high %v155_v27, %v159_v28  ;;  %v166_v34 = vld [vmem:[#allocation4 + $0x130] sm:$0xff]  ;;  %v163_v35 = vld [vmem:[#allocation4 + $0x118] sm:$0xff]  ;;  %v62_v2 = vld [vmem:[#allocation2] sm:$0xff] }
  0x47   :  { %526 = vmatprep.subr.bf16.mxu0 %v1302_v37  ;;  %569 = vmatprep.subr.bf16.mxu1 %v1304_v38  ;;  %v167_v36 = vld [vmem:[#allocation4 + $0x138] sm:$0xff]  ;;  %v1297_v37 = vcombine.low %v154_v25, %v158_v26  ;;  %v1299_v38 = vcombine.low %v155_v27, %v159_v28  ;;  %v1306_v39 = vcombine.high %v162_v33, %v166_v34  ;;  %v170_v41 = vld [vmem:[#allocation4 + $0x150] sm:$0xff]  ;;  %v66_v3 = vld [vmem:[#allocation2 + $0x20] sm:$0xff] }
  0x48   :  { %v1308_v40 = vcombine.high %v163_v35, %v167_v36  ;;  %v174_v42 = vld [vmem:[#allocation4 + $0x170] sm:$0xff]  ;;  %v1335_v8 = vcombine.high %v62_v2, %v66_v3  ;;  %v70_v11 = vld [vmem:[#allocation2 + $0x40] sm:$0xff] }
  0x49   :  { %v1314_v47 = vcombine.high %v170_v41, %v174_v42  ;;  %v178_v49 = vld [vmem:[#allocation4 + $0x190] sm:$0xff]  ;;  %v74_v12 = vld [vmem:[#allocation2 + $0x60] sm:$0xff] }
  0x4a   :  { %527 = vmatpush1.bf16.msra.mxu0 %v1301_v43  ;;  %570 = vmatpush1.bf16.msra.mxu1 %v1303_v44  ;;  %v171_v43 = vld [vmem:[#allocation4 + $0x158] sm:$0xff]  ;;  %v182_v50 = vld [vmem:[#allocation4 + $0x1b0] sm:$0xff]  ;;  %v1343_v17 = vcombine.high %v70_v11, %v74_v12  ;;  %v78_v19 = vld [vmem:[#allocation2 + $0x80] sm:$0xff] }
  0x4b   :  { %528 = vmatprep.subr.bf16.mxu0 %v1310_v45  ;;  %571 = vmatprep.subr.bf16.mxu1 %v1312_v46  ;;  %v175_v44 = vld [vmem:[#allocation4 + $0x178] sm:$0xff]  ;;  %v1305_v45 = vcombine.low %v162_v33, %v166_v34  ;;  %v1307_v46 = vcombine.low %v163_v35, %v167_v36  ;;  %v1322_v55 = vcombine.high %v178_v49, %v182_v50  ;;  %v186_v57 = vld [vmem:[#allocation4 + $0x1d0] sm:$0xff]  ;;  %v82_v20 = vld [vmem:[#allocation2 + $0xa0] sm:$0xff] }
  0x4c   :  { %v1316_v48 = vcombine.high %v171_v43, %v175_v44  ;;  %v190_v58 = vld [vmem:[#allocation4 + $0x1f0] sm:$0xff]  ;;  %v1351_v25 = vcombine.high %v78_v19, %v82_v20  ;;  %v86_v27 = vld [vmem:[#allocation2 + $0xc0] sm:$0xff]  ;;  %v95_v36 = vld [vmem:[#allocation2 + $0x108] sm:$0xff] }
  0x4d   :  { %v1330_v63 = vcombine.high %v186_v57, %v190_v58  ;;  %v90_v28 = vld [vmem:[#allocation2 + $0xe0] sm:$0xff] }
  0x4e   :  { %529 = vmatpush1.bf16.msra.mxu0 %v1309_v51  ;;  %572 = vmatpush1.bf16.msra.mxu1 %v1311_v52  ;;  %v179_v51 = vld [vmem:[#allocation4 + $0x198] sm:$0xff]  ;;  %v94_v34 = vld [vmem:[#allocation2 + $0x100] sm:$0xff] }
  0x4f   :  { %530 = vmatprep.subr.bf16.mxu0 %v1318_v53  ;;  %573 = vmatprep.subr.bf16.mxu1 %v1320_v54  ;;  %v183_v52 = vld [vmem:[#allocation4 + $0x1b8] sm:$0xff]  ;;  %v1313_v53 = vcombine.low %v170_v41, %v174_v42  ;;  %v1315_v54 = vcombine.low %v171_v43, %v175_v44  ;;  %v98_v35 = vld [vmem:[#allocation2 + $0x120] sm:$0xff]  ;;  %v103_v44 = vld [vmem:[#allocation2 + $0x148] sm:$0xff] }
  0x50   :  { %v1324_v56 = vcombine.high %v179_v51, %v183_v52  ;;  %v102_v42 = vld [vmem:[#allocation2 + $0x140] sm:$0xff] }
  0x51   :  { %v106_v43 = vld [vmem:[#allocation2 + $0x160] sm:$0xff] }
  0x52   :  { %531 = vmatpush1.bf16.msra.mxu0 %v1317_v59  ;;  %574 = vmatpush1.bf16.msra.mxu1 %v1319_v60  ;;  %v187_v59 = vld [vmem:[#allocation4 + $0x1d8] sm:$0xff] }
  0x53   :  { %532 = vmatprep.subr.bf16.mxu0 %v1326_v61  ;;  %575 = vmatprep.subr.bf16.mxu1 %v1328_v62  ;;  %v191_v60 = vld [vmem:[#allocation4 + $0x1f8] sm:$0xff]  ;;  %v1321_v61 = vcombine.low %v178_v49, %v182_v50  ;;  %v1323_v62 = vcombine.low %v179_v51, %v183_v52  ;;  %v110_v50 = vld [vmem:[#allocation2 + $0x180] sm:$0xff]  ;;  %v111_v52 = vld [vmem:[#allocation2 + $0x188] sm:$0xff] }
  0x54   :  { %v1332_v1 = vcombine.high %v187_v59, %v191_v60  ;;  %v114_v51 = vld [vmem:[#allocation2 + $0x1a0] sm:$0xff] }
  0x56   :  { %533 = vmatpush1.bf16.msra.mxu0 %v1325_v4  ;;  %576 = vmatpush1.bf16.msra.mxu1 %v1327_v5  ;;  %v63_v4 = vld [vmem:[#allocation2 + $0x8] sm:$0xff] }
  0x57   :  { %604 = vmatprep.subr.bf16.mxu0 %v1274_v6  ;;  %647 = vmatprep.subr.bf16.mxu1 %v1276_v7  ;;  %v67_v5 = vld [vmem:[#allocation2 + $0x28] sm:$0xff]  ;;  %v1329_v6 = vcombine.low %v186_v57, %v190_v58  ;;  %v1331_v7 = vcombine.low %v187_v59, %v191_v60  ;;  %v118_v58 = vld [vmem:[#allocation2 + $0x1c0] sm:$0xff] }
  0x58   :  { %v1337_v9 = vcombine.high %v63_v4, %v67_v5  ;;  %v122_v59 = vld [vmem:[#allocation2 + $0x1e0] sm:$0xff]  ;;  %v119_v60 = vld [vmem:[#allocation2 + $0x1c8] sm:$0xff] }
  0x59   :  { %551 = vmatmul.mubr.bf16.vlgmr.msra.gmra.mrb[0].mxu0 %v1576_v10  ;;  %594 = vmatmul.mubr.bf16.vlgmr.msra.gmra.mrb[0].mxu1 %v1576_v10 }
  0x5a   :  { %605 = vmatpush1.bf16.msra.mxu0 %v1273_v13  ;;  %648 = vmatpush1.bf16.msra.mxu1 %v1275_v14  ;;  %v71_v13 = vld [vmem:[#allocation2 + $0x48] sm:$0xff] }
  0x5b   :  { %606 = vmatprep.subr.bf16.mxu0 %v1282_v15  ;;  %649 = vmatprep.subr.bf16.mxu1 %v1284_v16  ;;  %v75_v14 = vld [vmem:[#allocation2 + $0x68] sm:$0xff]  ;;  %v1334_v15 = vcombine.low %v62_v2, %v66_v3  ;;  %v1336_v16 = vcombine.low %v63_v4, %v67_v5  ;;  %v64_v3 = vld [vmem:[#allocation2 + $0x10] sm:$0xff]  ;;  %v65_v5 = vld [vmem:[#allocation2 + $0x18] sm:$0xff] }
  0x5c   :  { %636 = vmatprep.mubr.bf16.mxu0 %v1497_v0  ;;  %679 = vmatprep.mubr.bf16.mxu1 %v1497_v0  ;;  %v1345_v18 = vcombine.high %v71_v13, %v75_v14  ;;  %v68_v4 = vld [vmem:[#allocation2 + $0x30] sm:$0xff] }
  0x5e   :  { %607 = vmatpush1.bf16.msra.mxu0 %v1281_v21  ;;  %650 = vmatpush1.bf16.msra.mxu1 %v1283_v22  ;;  %v79_v21 = vld [vmem:[#allocation2 + $0x88] sm:$0xff] }
  0x5f   :  { %608 = vmatprep.subr.bf16.mxu0 %v1290_v23  ;;  %651 = vmatprep.subr.bf16.mxu1 %v1292_v24  ;;  %v83_v22 = vld [vmem:[#allocation2 + $0xa8] sm:$0xff]  ;;  %v1342_v23 = vcombine.low %v70_v11, %v74_v12  ;;  %v1344_v24 = vcombine.low %v71_v13, %v75_v14  ;;  %v72_v12 = vld [vmem:[#allocation2 + $0x50] sm:$0xff]  ;;  %v1589_v14 = vld [vmem:[%s1645_s0] sm:$0xff]  }
  0x60   :  { %v1353_v26 = vcombine.high %v79_v21, %v83_v22  ;;  %v76_v13 = vld [vmem:[#allocation2 + $0x70] sm:$0xff] }
  0x62   :  { %609 = vmatpush1.bf16.msra.mxu0 %v1289_v29  ;;  %652 = vmatpush1.bf16.msra.mxu1 %v1291_v30  ;;  %v87_v29 = vld [vmem:[#allocation2 + $0xc8] sm:$0xff] }
  0x63   :  { %610 = vmatprep.subr.bf16.mxu0 %v1298_v31  ;;  %653 = vmatprep.subr.bf16.mxu1 %v1300_v32  ;;  %v91_v30 = vld [vmem:[#allocation2 + $0xe8] sm:$0xff]  ;;  %v1350_v31 = vcombine.low %v78_v19, %v82_v20  ;;  %v1359_v32 = vcombine.high %v86_v27, %v90_v28  ;;  %v1347_v19 = vcombine.high %v72_v12, %v76_v13 }
  0x64   :  { %v1361_v33 = vcombine.high %v87_v29, %v91_v30 }
  0x66   :  { %611 = vmatpush1.bf16.msra.mxu0 %v1297_v37  ;;  %654 = vmatpush1.bf16.msra.mxu1 %v1299_v38  ;;  %v99_v37 = vld [vmem:[#allocation2 + $0x128] sm:$0xff]  ;;  %v1358_v38 = vcombine.low %v86_v27, %v90_v28 }
  0x67   :  { %612 = vmatprep.subr.bf16.mxu0 %v1306_v39  ;;  %655 = vmatprep.subr.bf16.mxu1 %v1308_v40  ;;  %v1360_v39 = vcombine.low %v87_v29, %v91_v30  ;;  %v1367_v40 = vcombine.high %v94_v34, %v98_v35  ;;  %v1369_v41 = vcombine.high %v95_v36, %v99_v37  ;;  %v88_v29 = vld [vmem:[#allocation2 + $0xd0] sm:$0xff] }
  0x68   :  { %v92_v30 = vld [vmem:[#allocation2 + $0xf0] sm:$0xff] }
  0x6a   :  { %613 = vmatpush1.bf16.msra.mxu0 %v1305_v45  ;;  %656 = vmatpush1.bf16.msra.mxu1 %v1307_v46  ;;  %v107_v45 = vld [vmem:[#allocation2 + $0x168] sm:$0xff]  ;;  %v1366_v46 = vcombine.low %v94_v34, %v98_v35  ;;  %v1363_v34 = vcombine.high %v88_v29, %v92_v30 }
  0x6b   :  { %614 = vmatprep.subr.bf16.mxu0 %v1314_v47  ;;  %657 = vmatprep.subr.bf16.mxu1 %v1316_v48  ;;  %v1368_v47 = vcombine.low %v95_v36, %v99_v37  ;;  %v1375_v48 = vcombine.high %v102_v42, %v106_v43  ;;  %v1377_v49 = vcombine.high %v103_v44, %v107_v45  ;;  %v96_v36 = vld [vmem:[#allocation2 + $0x110] sm:$0xff] }
  0x6c   :  { %v100_v37 = vld [vmem:[#allocation2 + $0x130] sm:$0xff] }
  0x6e   :  { %615 = vmatpush1.bf16.msra.mxu0 %v1313_v53  ;;  %658 = vmatpush1.bf16.msra.mxu1 %v1315_v54  ;;  %v115_v53 = vld [vmem:[#allocation2 + $0x1a8] sm:$0xff]  ;;  %v1374_v54 = vcombine.low %v102_v42, %v106_v43  ;;  %v1371_v42 = vcombine.high %v96_v36, %v100_v37  ;;  %v104_v43 = vld [vmem:[#allocation2 + $0x150] sm:$0xff] }
  0x6f   :  { %616 = vmatprep.subr.bf16.mxu0 %v1322_v55  ;;  %659 = vmatprep.subr.bf16.mxu1 %v1324_v56  ;;  %v1376_v55 = vcombine.low %v103_v44, %v107_v45  ;;  %v1383_v56 = vcombine.high %v110_v50, %v114_v51  ;;  %v1385_v57 = vcombine.high %v111_v52, %v115_v53  ;;  %v108_v44 = vld [vmem:[#allocation2 + $0x170] sm:$0xff]  ;;  %v105_v45 = vld [vmem:[#allocation2 + $0x158] sm:$0xff] }
  0x72   :  { %617 = vmatpush1.bf16.msra.mxu0 %v1321_v61  ;;  %660 = vmatpush1.bf16.msra.mxu1 %v1323_v62  ;;  %v123_v61 = vld [vmem:[#allocation2 + $0x1e8] sm:$0xff]  ;;  %v1382_v62 = vcombine.low %v110_v50, %v114_v51  ;;  %v112_v51 = vld [vmem:[#allocation2 + $0x190] sm:$0xff] }
  0x73   :  { %618 = vmatprep.subr.bf16.mxu0 %v1330_v63  ;;  %661 = vmatprep.subr.bf16.mxu1 %v1332_v1  ;;  %v1384_v63 = vcombine.low %v111_v52, %v115_v53  ;;  %v1391_v1 = vcombine.high %v118_v58, %v122_v59  ;;  %v1393_v2 = vcombine.high %v119_v60, %v123_v61  ;;  %v116_v52 = vld [vmem:[#allocation2 + $0x1b0] sm:$0xff]  ;;  %v113_v53 = vld [vmem:[#allocation2 + $0x198] sm:$0xff] }
  0x76   :  { %619 = vmatpush1.bf16.msra.mxu0 %v1329_v6  ;;  %662 = vmatpush1.bf16.msra.mxu1 %v1331_v7  ;;  %v69_v6 = vld [vmem:[#allocation2 + $0x38] sm:$0xff]  ;;  %v1390_v7 = vcombine.low %v118_v58, %v122_v59  ;;  %v120_v59 = vld [vmem:[#allocation2 + $0x1d0] sm:$0xff] }
  0x77   :  { %1016 = vmatprep.subr.bf16.mxu0 %v1335_v8  ;;  %1059 = vmatprep.subr.bf16.mxu1 %v1337_v9  ;;  %v1392_v8 = vcombine.low %v119_v60, %v123_v61  ;;  %v1339_v9 = vcombine.high %v64_v3, %v68_v4  ;;  %v1341_v11 = vcombine.high %v65_v5, %v69_v6  ;;  %v124_v60 = vld [vmem:[#allocation2 + $0x1f0] sm:$0xff]  ;;  %v121_v61 = vld [vmem:[#allocation2 + $0x1d8] sm:$0xff] }
  0x79   :  { %637 = vmatmul.mubr.bf16.vlgmr.msra.gmra.mrb[4].mxu0 %v1576_v10  ;;  %680 = vmatmul.mubr.bf16.vlgmr.msra.gmra.mrb[4].mxu1 %v1576_v10  ;;  %v1352_v10 = vcombine.low %v79_v21, %v83_v22  ;;  %v80_v21 = vld [vmem:[#allocation2 + $0x90] sm:$0xff] }
  0x7a   :  { %1017 = vmatpush1.bf16.msra.mxu0 %v1334_v15  ;;  %1060 = vmatpush1.bf16.msra.mxu1 %v1336_v16  ;;  %v73_v15 = vld [vmem:[#allocation2 + $0x58] sm:$0xff]  ;;  %v84_v22 = vld [vmem:[#allocation2 + $0xb0] sm:$0xff] }
  0x7b   :  { %1018 = vmatprep.subr.bf16.mxu0 %v1343_v17  ;;  %1061 = vmatprep.subr.bf16.mxu1 %v1345_v18  ;;  %v77_v16 = vld [vmem:[#allocation2 + $0x78] sm:$0xff]  ;;  %v1338_v17 = vcombine.low %v64_v3, %v68_v4  ;;  %v1340_v18 = vcombine.low %v65_v5, %v69_v6  ;;  %v1355_v27 = vcombine.high %v80_v21, %v84_v22  ;;  %v1190_v6 = vlaneseq }
  0x7c   :  { %1048 = vmatprep.mubr.bf16.mxu0 %v1497_v0  ;;  %1091 = vmatprep.mubr.bf16.mxu1 %v1497_v0  ;;  %v1349_v20 = vcombine.high %v73_v15, %v77_v16  ;;  %v1394_v4 = vcombine.low %v120_v59, %v124_v60 }
  0x7e   :  { %1019 = vmatpush1.bf16.msra.mxu0 %v1342_v23  ;;  %1062 = vmatpush1.bf16.msra.mxu1 %v1344_v24  ;;  %v81_v23 = vld [vmem:[#allocation2 + $0x98] sm:$0xff] }
  0x7f   :  { %1020 = vmatprep.subr.bf16.mxu0 %v1351_v25  ;;  %1063 = vmatprep.subr.bf16.mxu1 %v1353_v26  ;;  %v85_v24 = vld [vmem:[#allocation2 + $0xb8] sm:$0xff]  ;;  %v1346_v25 = vcombine.low %v72_v12, %v76_v13  ;;  %v1348_v26 = vcombine.low %v73_v15, %v77_v16 }
  0x80   :  { %v1357_v28 = vcombine.high %v81_v23, %v85_v24 }
  0x82   :  { %1021 = vmatpush1.bf16.msra.mxu0 %v1350_v31  ;;  %1064 = vmatpush1.bf16.msra.mxu1 %v1352_v10  ;;  %v89_v31 = vld [vmem:[#allocation2 + $0xd8] sm:$0xff] }
  0x83   :  { %1022 = vmatprep.subr.bf16.mxu0 %v1359_v32  ;;  %1065 = vmatprep.subr.bf16.mxu1 %v1361_v33  ;;  %v93_v10 = vld [vmem:[#allocation2 + $0xf8] sm:$0xff]  ;;  %v1354_v32 = vcombine.low %v80_v21, %v84_v22  ;;  %v1356_v33 = vcombine.low %v81_v23, %v85_v24 }
  0x84   :  { %v1365_v35 = vcombine.high %v89_v31, %v93_v10 }
  0x86   :  { %1023 = vmatpush1.bf16.msra.mxu0 %v1358_v38  ;;  %1066 = vmatpush1.bf16.msra.mxu1 %v1360_v39  ;;  %v97_v38 = vld [vmem:[#allocation2 + $0x118] sm:$0xff] }
  0x87   :  { %1024 = vmatprep.subr.bf16.mxu0 %v1367_v40  ;;  %1067 = vmatprep.subr.bf16.mxu1 %v1369_v41  ;;  %v101_v39 = vld [vmem:[#allocation2 + $0x138] sm:$0xff]  ;;  %v1362_v40 = vcombine.low %v88_v29, %v92_v30  ;;  %v1364_v41 = vcombine.low %v89_v31, %v93_v10 }
  0x8a   :  { %1025 = vmatpush1.bf16.msra.mxu0 %v1366_v46  ;;  %1068 = vmatpush1.bf16.msra.mxu1 %v1368_v47  ;;  %v109_v46 = vld [vmem:[#allocation2 + $0x178] sm:$0xff]  ;;  %v1370_v47 = vcombine.low %v96_v36, %v100_v37 }
  0x8b   :  { %1026 = vmatprep.subr.bf16.mxu0 %v1375_v48  ;;  %1069 = vmatprep.subr.bf16.mxu1 %v1377_v49  ;;  %v1372_v48 = vcombine.low %v97_v38, %v101_v39  ;;  %v1379_v49 = vcombine.high %v104_v43, %v108_v44  ;;  %v1381_v50 = vcombine.high %v105_v45, %v109_v46 }
  0x8e   :  { %1027 = vmatpush1.bf16.msra.mxu0 %v1374_v54  ;;  %1070 = vmatpush1.bf16.msra.mxu1 %v1376_v55  ;;  %v117_v54 = vld [vmem:[#allocation2 + $0x1b8] sm:$0xff]  ;;  %v1378_v55 = vcombine.low %v104_v43, %v108_v44 }
  0x8f   :  { %1028 = vmatprep.subr.bf16.mxu0 %v1383_v56  ;;  %1071 = vmatprep.subr.bf16.mxu1 %v1385_v57  ;;  %v1380_v56 = vcombine.low %v105_v45, %v109_v46  ;;  %v1387_v57 = vcombine.high %v112_v51, %v116_v52  ;;  %v1389_v58 = vcombine.high %v113_v53, %v117_v54 }
  0x92   :  { %1029 = vmatpush1.bf16.msra.mxu0 %v1382_v62  ;;  %1072 = vmatpush1.bf16.msra.mxu1 %v1384_v63  ;;  %v125_v62 = vld [vmem:[#allocation2 + $0x1f8] sm:$0xff]  ;;  %v1386_v63 = vcombine.low %v112_v51, %v116_v52 }
  0x93   :  { %1030 = vmatprep.subr.bf16.mxu0 %v1391_v1  ;;  %1073 = vmatprep.subr.bf16.mxu1 %v1393_v2  ;;  %v1388_v1 = vcombine.low %v113_v53, %v117_v54  ;;  %v1395_v2 = vcombine.high %v120_v59, %v124_v60  ;;  %v1397_v3 = vcombine.high %v121_v61, %v125_v62 }
  0x94   :  { %v1396_v5 = vcombine.low %v121_v61, %v125_v62 }
  0x96   :  { %1031 = vmatpush1.bf16.msra.mxu0 %v1390_v7  ;;  %1074 = vmatpush1.bf16.msra.mxu1 %v1392_v8  ;;  %v1191_v7 = vshrl.u32 %v1190_v6, 7 }
  0x97   :  { %1102 = vmatprep.subr.bf16.mxu0 %v1339_v9  ;;  %1145 = vmatprep.subr.bf16.mxu1 %v1341_v11  ;;  %v1188_v9 = vld [vmem:[#allocation6] sm:$0xff] }
  0x98   :  { %v1192_v8 = vsub.s32 0, %v1191_v7  ;;  %v1200_v11 = vsub.s32 2, %v1191_v7  ;;  %v1196_v12 = vsub.s32 1, %v1191_v7  ;;  %v1204_v13 = vsub.s32 3, %v1191_v7 }
  0x99   :  { %1049 = vmatmul.mubr.bf16.vlgmr.msra.gmra.mrb[0].mxu0 %v1589_v14  ;;  %1092 = vmatmul.mubr.bf16.vlgmr.msra.gmra.mrb[0].mxu1 %v1589_v14  ;;  %v1220_v36 = vsub.s32 7, %v1191_v7 }
  0x9a   :  { %1103 = vmatpush1.bf16.msra.mxu0 %v1338_v17  ;;  %1146 = vmatpush1.bf16.msra.mxu1 %v1340_v18  ;;  %v1193_v15 = vrot.slane %v1188_v9, %v1192_v8  ;;  %v1201_v16 = vrot.slane %v1188_v9, %v1200_v11  ;;  %v1197_v17 = vrot.slane %v1188_v9, %v1196_v12 }
  0x9b   :  { %1104 = vmatprep.subr.bf16.mxu0 %v1347_v19  ;;  %1147 = vmatprep.subr.bf16.mxu1 %v1349_v20  ;;  %v1205_v18 = vrot.slane %v1188_v9, %v1204_v13 }
  0x9c   :  { %1134 = vmatprep.mubr.bf16.mxu0 %v1497_v0  ;;  %1177 = vmatprep.mubr.bf16.mxu1 %v1497_v0  ;;  %v1373_v0 = vcombine.high %v97_v38, %v101_v39 }
  0x9e   :  { %1105 = vmatpush1.bf16.msra.mxu0 %v1346_v25  ;;  %1148 = vmatpush1.bf16.msra.mxu1 %v1348_v26 }
  0x9f   :  { %1106 = vmatprep.subr.bf16.mxu0 %v1355_v27  ;;  %1149 = vmatprep.subr.bf16.mxu1 %v1357_v28 }
  0xa2   :  { %1107 = vmatpush1.bf16.msra.mxu0 %v1354_v32  ;;  %1150 = vmatpush1.bf16.msra.mxu1 %v1356_v33  ;;  %v1208_v33 = vsub.s32 4, %v1191_v7 }
  0xa3   :  { %1108 = vmatprep.subr.bf16.mxu0 %v1363_v34  ;;  %1151 = vmatprep.subr.bf16.mxu1 %v1365_v35  ;;  %v1216_v34 = vsub.s32 6, %v1191_v7  ;;  %v1212_v35 = vsub.s32 5, %v1191_v7 }
  0xa4   :  { %v1209_v37 = vrot.slane %v1188_v9, %v1208_v33 }
  0xa5   :  { %v1217_v38 = vrot.slane %v1188_v9, %v1216_v34  ;;  %v1213_v39 = vrot.slane %v1188_v9, %v1212_v35 }
  0xa6   :  { %1109 = vmatpush1.bf16.msra.mxu0 %v1362_v40  ;;  %1152 = vmatpush1.bf16.msra.mxu1 %v1364_v41  ;;  %v1221_v40 = vrot.slane %v1188_v9, %v1220_v36 }
  0xa7   :  { %1110 = vmatprep.subr.bf16.mxu0 %v1371_v42  ;;  %1153 = vmatprep.subr.bf16.mxu1 %v1373_v0 }
  0xaa   :  { %1111 = vmatpush1.bf16.msra.mxu0 %v1370_v47  ;;  %1154 = vmatpush1.bf16.msra.mxu1 %v1372_v48 }
  0xab   :  { %1112 = vmatprep.subr.bf16.mxu0 %v1379_v49  ;;  %1155 = vmatprep.subr.bf16.mxu1 %v1381_v50 }
  0xae   :  { %1113 = vmatpush1.bf16.msra.mxu0 %v1378_v55  ;;  %1156 = vmatpush1.bf16.msra.mxu1 %v1380_v56 }
  0xaf   :  { %1114 = vmatprep.subr.bf16.mxu0 %v1387_v57  ;;  %1157 = vmatprep.subr.bf16.mxu1 %v1389_v58 }
  0xb2   :  { %1115 = vmatpush1.bf16.msra.mxu0 %v1386_v63  ;;  %1158 = vmatpush1.bf16.msra.mxu1 %v1388_v1 }
  0xb3   :  { %1116 = vmatprep.subr.bf16.mxu0 %v1395_v2  ;;  %1159 = vmatprep.subr.bf16.mxu1 %v1397_v3 }
  0xb6   :  { %1117 = vmatpush1.bf16.msra.mxu0 %v1394_v4  ;;  %1160 = vmatpush1.bf16.msra.mxu1 %v1396_v5 }
  0xb9   :  { %1135 = vmatmul.mubr.bf16.vlgmr.msra.gmra.mrb[4].mxu0 %v1589_v14  ;;  %1178 = vmatmul.mubr.bf16.vlgmr.msra.gmra.mrb[4].mxu1 %v1589_v14 }
 0x16c   :  { %v1050_v19 = vpop.f32.mrb[0].mxu0  ;;  %v1093_v21 = vpop.f32.mrb[0].mxu1 }
 0x16d   :  { %v1230_v20 = vadd.f32 %v1193_v15, %v1050_v19  ;;  %v1052_v22 = vpop.f32.mrb[1].mxu0  ;;  %v1232_v23 = vadd.f32 %v1201_v16, %v1093_v21  ;;  %v1095_v25 = vpop.f32.mrb[1].mxu1 }
 0x16e   :  { %v1231_v24 = vadd.f32 %v1197_v17, %v1052_v22  ;;  %v1054_v26 = vpop.f32.mrb[2].mxu0  ;;  %v1233_v14 = vadd.f32 %v1205_v18, %v1095_v25  ;;  %v1097_v28 = vpop.f32.mrb[2].mxu1 }
 0x16f   :  { %1246 = vst [vmem:[%s1650_s5] sm:$0xff] %v1230_v20  ;;  %v1238_v27 = vadd.f32 %v1193_v15, %v1054_v26  ;;  %v1056_v29 = vpop.f32.mrb[3].mxu0  ;;  %1248 = vst [vmem:[%s1650_s5 + $0x10] sm:$0xff] %v1232_v23  ;;  %v1240_v30 = vadd.f32 %v1201_v16, %v1097_v28  ;;  %v1099_v10 = vpop.f32.mrb[3].mxu1 }
 0x170   :  { %1247 = vst [vmem:[%s1650_s5 + $0x8] sm:$0xff] %v1231_v24  ;;  %v1239_v31 = vadd.f32 %v1197_v17, %v1056_v29  ;;  %1249 = vst [vmem:[%s1650_s5 + $0x18] sm:$0xff] %v1233_v14  ;;  %v1241_v32 = vadd.f32 %v1205_v18, %v1099_v10 }
 0x171   :  { %1254 = vst [vmem:[%s1650_s5 + $0x40] sm:$0xff] %v1238_v27  ;;  %1256 = vst [vmem:[%s1650_s5 + $0x50] sm:$0xff] %v1240_v30 }
 0x172   :  { %1255 = vst [vmem:[%s1650_s5 + $0x48] sm:$0xff] %v1239_v31  ;;  %1257 = vst [vmem:[%s1650_s5 + $0x58] sm:$0xff] %v1241_v32 }
 0x18c   :  { %v1136_v41 = vpop.f32.mrb[4].mxu0  ;;  %v1179_v0 = vpop.f32.mrb[4].mxu1 }
 0x18d   :  { %v1234_v42 = vadd.f32 %v1209_v37, %v1136_v41  ;;  %v1138_v43 = vpop.f32.mrb[5].mxu0  ;;  %v1236_v44 = vadd.f32 %v1217_v38, %v1179_v0  ;;  %v1181_v46 = vpop.f32.mrb[5].mxu1 }
 0x18e   :  { %v1235_v45 = vadd.f32 %v1213_v39, %v1138_v43  ;;  %v1140_v47 = vpop.f32.mrb[6].mxu0  ;;  %v1237_v48 = vadd.f32 %v1221_v40, %v1181_v46  ;;  %v1183_v50 = vpop.f32.mrb[6].mxu1 }
 0x18f   :  { %1250 = vst [vmem:[%s1650_s5 + $0x20] sm:$0xff] %v1234_v42  ;;  %v1242_v49 = vadd.f32 %v1209_v37, %v1140_v47  ;;  %v1142_v51 = vpop.f32.mrb[7].mxu0  ;;  %1252 = vst [vmem:[%s1650_s5 + $0x30] sm:$0xff] %v1236_v44  ;;  %v1244_v52 = vadd.f32 %v1217_v38, %v1183_v50  ;;  %v1185_v54 = vpop.f32.mrb[7].mxu1 }
 0x190   :  { %1251 = vst [vmem:[%s1650_s5 + $0x28] sm:$0xff] %v1235_v45  ;;  %v1243_v53 = vadd.f32 %v1213_v39, %v1142_v51  ;;  %1253 = vst [vmem:[%s1650_s5 + $0x38] sm:$0xff] %v1237_v48  ;;  %v1245_v55 = vadd.f32 %v1221_v40, %v1185_v54 }
 0x191   :  { %1258 = vst [vmem:[%s1650_s5 + $0x60] sm:$0xff] %v1242_v49  ;;  %1260 = vst [vmem:[%s1650_s5 + $0x70] sm:$0xff] %v1244_v52 }
 0x192   :  { %1259 = vst [vmem:[%s1650_s5 + $0x68] sm:$0xff] %v1243_v53  ;;  %1261 = vst [vmem:[%s1650_s5 + $0x78] sm:$0xff] %v1245_v55 }
 0x193   :  { %1266 = vsyncpa [#allocation3], 1 }
 0x194   :  { %1267 = vsyncpa [#allocation5], 1 }

// kernel: model_forward.7
= control target key start
LH: loop header
LB: loop body
LE: loop exit
PB: predicated region body
PF: predicated region fallthrough
CT: control target
= control target key end

     0   :  { %12 = vsyncpa [#allocation9], 0  ;;  %s3765_s9 = smov [#allocation8]   ;;  %s5164_s0 = inlined_call_operand.vmem [shape: s32[2,1], index: 0, kind: input, shape index: {}]   ;;  %s5165_s1 = inlined_call_operand.vmem [shape: f32[8,2,1024], index: 1, kind: input, shape index: {}, may-alias: {1,2}]   ;;  %s5166_s2 = inlined_call_operand.vmem [shape: f32[8,2,1024], index: 2, kind: input, shape index: {}, may-alias: {1,2}]   ;;  %s5167_s3 = inlined_call_operand.hbm [shape: bf16[128,512], index: 3, kind: input, shape index: {}]   ;;  %s5168_s4 = inlined_call_operand.hbm [shape: bf16[128,512], index: 4, kind: input, shape index: {}]   ;;  %s5169_s5 = inlined_call_operand.vmem [shape: bf16[8,2,128], index: 5, kind: output, shape index: {0}]   ;;  %s5170_s6 = inlined_call_operand.vmem [shape: bf16[8,2,128], index: 6, kind: output, shape index: {1}]  }
   0x1   :  { %v3810_v0 = vld [vmem:[%s5165_s1] sm:$0xff]  ;;  %v3815_v1 = vld [vmem:[%s5165_s1 + $0x10] sm:$0xff]  ;;  %s151_s10 = sshll.u32 %s3765_s9, 4  ;;  %v3850_v8 = vld [vmem:[%s5166_s2 + $0x8] sm:$0xff]  ;;  %s152_s10 = int_to_ptr.vmem [resolvable:$true] %s151_s10 }
   0x2   :  { %5271 = vst [vmem:[#allocation14_spill] sm:$0xff] %v3815_v1  ;;  %v3820_v2 = vld [vmem:[%s5165_s1 + $0x20] sm:$0xff]  ;;  %v3825_v3 = vld [vmem:[%s5165_s1 + $0x30] sm:$0xff]  ;;  %5278 = vst [vmem:[#allocation21_spill] sm:$0xff] %v3850_v8 }
   0x3   :  { %5272 = vst [vmem:[#allocation15_spill] sm:$0xff] %v3820_v2  ;;  %5273 = vst [vmem:[#allocation16_spill] sm:$0xff] %v3825_v3  ;;  %v3830_v4 = vld [vmem:[%s5165_s1 + $0x40] sm:$0xff]  ;;  %v3835_v5 = vld [vmem:[%s5165_s1 + $0x50] sm:$0xff] }
   0x4   :  { %5274 = vst [vmem:[#allocation17_spill] sm:$0xff] %v3830_v4  ;;  %5275 = vst [vmem:[#allocation18_spill] sm:$0xff] %v3835_v5  ;;  %v3840_v6 = vld [vmem:[%s5165_s1 + $0x60] sm:$0xff]  ;;  %v3845_v7 = vld [vmem:[%s5165_s1 + $0x70] sm:$0xff]  ;;  %s3766_s1 = smov [#allocation10]  }
   0x5   :  { %5276 = vst [vmem:[#allocation19_spill] sm:$0xff] %v3840_v6  ;;  %5277 = vst [vmem:[#allocation20_spill] sm:$0xff] %v3845_v7  ;;  %v3855_v9 = vld [vmem:[%s5166_s2 + $0x18] sm:$0xff]  ;;  %v3860_v10 = vld [vmem:[%s5166_s2 + $0x28] sm:$0xff]  ;;  %s163_s23 = sshll.u32 %s3766_s1, 4  ;;  %s3882_s23 = int_to_ptr.vmem [resolvable:$true] %s163_s23 }
   0x6   :  { %5279 = vst [vmem:[#allocation22_spill] sm:$0xff] %v3855_v9  ;;  %5280 = vst [vmem:[#allocation23_spill] sm:$0xff] %v3860_v10  ;;  %v3865_v11 = vld [vmem:[%s5166_s2 + $0x38] sm:$0xff]  ;;  %v3870_v12 = vld [vmem:[%s5166_s2 + $0x48] sm:$0xff] }
   0x7   :  { %5281 = vst [vmem:[#allocation24_spill] sm:$0xff] %v3865_v11  ;;  %5282 = vst [vmem:[#allocation25_spill] sm:$0xff] %v3870_v12  ;;  %v3875_v13 = vld [vmem:[%s5166_s2 + $0x58] sm:$0xff]  ;;  %v3880_v14 = vld [vmem:[%s5166_s2 + $0x68] sm:$0xff] }
   0x8   :  { %5283 = vst [vmem:[#allocation26_spill] sm:$0xff] %v3875_v13  ;;  %5284 = vst [vmem:[#allocation27_spill] sm:$0xff] %v3880_v14  ;;  %v3887_v15 = vld [vmem:[%s5166_s2 + $0x78] sm:$0xff] }
   0x9   :  { %13 = vsyncpa [#allocation11], 0  ;;  %s3717_s11 = scalar_lea.hbm %s5167_s3, 4096 }
   0xa   :  { %p3718_p0 = scmp.ne.s32.totalorder %s5167_s3, %s3717_s11  ;;  %p3721_p1 = scmp.lt.u32.totalorder %s3717_s11, %s5167_s3 }
   0xc   :  { %p3723_p2 = pnand %p3721_p1, %p3718_p0 }
   0xe   :  { %3726 = shalt.err (!%p3723_p2)
}
   0xf   :  { %s3727_s16 = scalar_lea.vmem %s152_s10, 4096  ;;  %p3732_p4 = scmp.lt.s32.totalorder %s152_s10, %s152_s10 }
  0x10   :  { %p3728_p3 = scmp.ne.s32.totalorder %s152_s10, %s3727_s16  ;;  %p3733_p5 = scmp.lt.s32.totalorder %s3727_s16, %s3727_s16 }
  0x12   :  { %p3734_p6 = por %p3733_p5, %p3732_p4 }
  0x14   :  { %p3735_p7 = pnand %p3734_p6, %p3728_p3 }
  0x16   :  { %3738 = shalt.err (!%p3735_p7)
}
  0x17   :  { %s3767_s2 = smov 256   ;;  %s3768_s17 = smov 16  }
  0x18   :  { %157 = dma.hbm_to_vmem [thread:$0]  %s5167_s3, 4096, %s152_s10, [#allocation9], %s3767_s2, %s3767_s2, %s3768_s17  }
  0x19   :  { %s3739_s22 = scalar_lea.hbm %s5168_s4, 4096 }
  0x1a   :  { %p3740_p8 = scmp.ne.s32.totalorder %s5168_s4, %s3739_s22  ;;  %p3743_p9 = scmp.lt.u32.totalorder %s3739_s22, %s5168_s4 }
  0x1c   :  { %p3745_p10 = pnand %p3743_p9, %p3740_p8 }
  0x1e   :  { %3748 = shalt.err (!%p3745_p10)
}
  0x1f   :  { %s3749_s27 = scalar_lea.vmem %s3882_s23, 4096  ;;  %p3754_p12 = scmp.lt.s32.totalorder %s3882_s23, %s3882_s23 }
  0x20   :  { %p3750_p11 = scmp.ne.s32.totalorder %s3882_s23, %s3749_s27  ;;  %p3755_p13 = scmp.lt.s32.totalorder %s3749_s27, %s3749_s27 }
  0x22   :  { %p3756_p0 = por %p3755_p13, %p3754_p12 }
  0x24   :  { %p3757_p1 = pnand %p3756_p0, %p3750_p11 }
  0x26   :  { %3760 = shalt.err (!%p3757_p1)
}
  0x27   :  { %169 = dma.hbm_to_vmem [thread:$0]  %s5168_s4, 4096, %s3882_s23, [#allocation11], %s3767_s2, %s3767_s2, %s3768_s17  }
  0x28   :  { %3761 = dma.done.wait [#allocation9], 4096  }
  0x29   :  { %3762 = vsyncadd [#allocation9], 4294963200 }
  0x2a   :  { %3763 = dma.done.wait [#allocation11], 4096  }
  0x2b   :  { %3764 = vsyncadd [#allocation11], 4294963200  ;;  %v5171_v16 = vmov 0   ;;  %v3770_v17 = vmov 0.0   ;;  %v3922_v18 = vld [vmem:[#allocation8 + $0x4] ss:$16 sps:$4 sm:$0xff]  }
  0x2c   :  { %472 = vmatprep.mubr.bf16.mxu0 %v5171_v16  ;;  %513 = vmatprep.mubr.bf16.mxu1 %v5171_v16  ;;  %199 = vst [vmem:[#allocation2] sm:$0x3] %v3770_v17  ;;  %202 = vst [vmem:[#allocation5] sm:$0x3] %v3770_v17  ;;  %v3924_v19 = vld [vmem:[#allocation8 + $0xc] ss:$16 sps:$4 sm:$0xff]  }
  0x2d   :  { %200 = vst [vmem:[#allocation3] sm:$0x3] %v3770_v17  ;;  %201 = vst [vmem:[#allocation4] sm:$0x3] %v3770_v17  ;;  %3235 = vset.pattern.permute.xlu0 %v5171_v16  ;;  %3236 = vset.pattern.permute.xlu1 %v5171_v16  ;;  %v3927_v20 = vld [vmem:[#allocation8] ss:$16 sps:$4 sm:$0xff]  }
  0x2e   :  { %440 = vmatprep.subr.bf16.mxu0 %v3922_v18  ;;  %v3929_v21 = vld [vmem:[#allocation8 + $0x8] ss:$16 sps:$4 sm:$0xff]   ;;  %481 = vmatprep.subr.bf16.mxu1 %v3924_v19  ;;  %v3932_v22 = vld [vmem:[#allocation8 + $0x24] ss:$16 sps:$4 sm:$0xff]   ;;  %v3936_v23 = vld [vmem:[#allocation8 + $0x2c] ss:$16 sps:$4 sm:$0xff]  }
  0x2f   :  { %441 = vmatpush1.bf16.msra.mxu0 %v3927_v20  ;;  %482 = vmatpush1.bf16.msra.mxu1 %v3929_v21  ;;  %v3938_v24 = vld [vmem:[#allocation8 + $0x20] ss:$16 sps:$4 sm:$0xff]   ;;  %v3941_v25 = vld [vmem:[#allocation8 + $0x28] ss:$16 sps:$4 sm:$0xff]   ;;  %v3944_v26 = vld [vmem:[#allocation8 + $0x44] ss:$16 sps:$4 sm:$0xff]  }
  0x30   :  { %442 = vmatprep.subr.bf16.mxu0 %v3932_v22  ;;  %483 = vmatprep.subr.bf16.mxu1 %v3936_v23  ;;  %v3946_v27 = vld [vmem:[#allocation8 + $0x4c] ss:$16 sps:$4 sm:$0xff]   ;;  %v3948_v28 = vld [vmem:[#allocation8 + $0x40] ss:$16 sps:$4 sm:$0xff]   ;;  %v3950_v29 = vld [vmem:[#allocation8 + $0x48] ss:$16 sps:$4 sm:$0xff]  }
  0x31   :  { %v3954_v30 = vld [vmem:[#allocation8 + $0x64] ss:$16 sps:$4 sm:$0xff]   ;;  %v3958_v31 = vld [vmem:[#allocation8 + $0x6c] ss:$16 sps:$4 sm:$0xff]   ;;  %v3960_v32 = vld [vmem:[#allocation8 + $0x60] ss:$16 sps:$4 sm:$0xff]  }
  0x32   :  { %v3964_v33 = vld [vmem:[#allocation8 + $0x68] ss:$16 sps:$4 sm:$0xff]   ;;  %v3966_v34 = vld [vmem:[#allocation8 + $0x84] ss:$16 sps:$4 sm:$0xff]   ;;  %v3970_v35 = vld [vmem:[#allocation8 + $0x8c] ss:$16 sps:$4 sm:$0xff]  }
  0x33   :  { %443 = vmatpush1.bf16.msra.mxu0 %v3938_v24  ;;  %484 = vmatpush1.bf16.msra.mxu1 %v3941_v25  ;;  %v3972_v36 = vld [vmem:[#allocation8 + $0x80] ss:$16 sps:$4 sm:$0xff]   ;;  %v3974_v37 = vld [vmem:[#allocation8 + $0x88] ss:$16 sps:$4 sm:$0xff]   ;;  %v3978_v38 = vld [vmem:[#allocation8 + $0xa4] ss:$16 sps:$4 sm:$0xff]  }
  0x34   :  { %444 = vmatprep.subr.bf16.mxu0 %v3944_v26  ;;  %485 = vmatprep.subr.bf16.mxu1 %v3946_v27  ;;  %v3982_v39 = vld [vmem:[#allocation8 + $0xac] ss:$16 sps:$4 sm:$0xff]   ;;  %v3986_v40 = vld [vmem:[#allocation8 + $0xa0] ss:$16 sps:$4 sm:$0xff]   ;;  %v3988_v41 = vld [vmem:[#allocation8 + $0xa8] ss:$16 sps:$4 sm:$0xff]  }
  0x35   :  { %5285 = vst [vmem:[#allocation28_spill] sm:$0xff] %v3982_v39  ;;  %5286 = vst [vmem:[#allocation29_spill] sm:$0xff] %v3986_v40  ;;  %v3992_v42 = vld [vmem:[#allocation8 + $0xc4] ss:$16 sps:$4 sm:$0xff]   ;;  %v3994_v43 = vld [vmem:[#allocation8 + $0xcc] ss:$16 sps:$4 sm:$0xff]  }
  0x36   :  { %5287 = vst [vmem:[#allocation30_spill] sm:$0xff] %v3988_v41  ;;  %5288 = vst [vmem:[#allocation31_spill] sm:$0xff] %v3992_v42  ;;  %v3996_v44 = vld [vmem:[#allocation8 + $0xc0] ss:$16 sps:$4 sm:$0xff]   ;;  %v3998_v45 = vld [vmem:[#allocation8 + $0xc8] ss:$16 sps:$4 sm:$0xff]  }
  0x37   :  { %445 = vmatpush1.bf16.msra.mxu0 %v3948_v28  ;;  %486 = vmatpush1.bf16.msra.mxu1 %v3950_v29  ;;  %5289 = vst [vmem:[#allocation32_spill] sm:$0xff] %v3994_v43  ;;  %5290 = vst [vmem:[#allocation33_spill] sm:$0xff] %v3996_v44  ;;  %v4002_v46 = vld [vmem:[#allocation8 + $0xe4] ss:$16 sps:$4 sm:$0xff]   ;;  %v4006_v47 = vld [vmem:[#allocation8 + $0xec] ss:$16 sps:$4 sm:$0xff]  }
  0x38   :  { %446 = vmatprep.subr.bf16.mxu0 %v3954_v30  ;;  %487 = vmatprep.subr.bf16.mxu1 %v3958_v31  ;;  %5291 = vst [vmem:[#allocation34_spill] sm:$0xff] %v3998_v45  ;;  %5292 = vst [vmem:[#allocation35_spill] sm:$0xff] %v4002_v46  ;;  %v4008_v48 = vld [vmem:[#allocation8 + $0xe0] ss:$16 sps:$4 sm:$0xff]   ;;  %v4010_v49 = vld [vmem:[#allocation8 + $0xe8] ss:$16 sps:$4 sm:$0xff]  }
  0x39   :  { %5293 = vst [vmem:[#allocation36_spill] sm:$0xff] %v4006_v47  ;;  %5294 = vst [vmem:[#allocation37_spill] sm:$0xff] %v4008_v48  ;;  %v4014_v50 = vld [vmem:[#allocation2] sm:$0x3]  ;;  %v4018_v51 = vld [vmem:[#allocation10 + $0x4] ss:$16 sps:$4 sm:$0xff]  }
  0x3a   :  { %5295 = vst [vmem:[#allocation38_spill] sm:$0xff] %v4010_v49  ;;  %5296 = vst [vmem:[#allocation39_spill] sm:$0xff] %v4018_v51  ;;  %v4020_v52 = vld [vmem:[#allocation10 + $0xc] ss:$16 sps:$4 sm:$0xff]   ;;  %v279_v53 = vpack.c.bf16 %v4014_v50, %v4014_v50  ;;  %v4024_v54 = vld [vmem:[#allocation10] ss:$16 sps:$4 sm:$0xff]  }
  0x3b   :  { %447 = vmatpush1.bf16.msra.mxu0 %v3960_v32  ;;  %488 = vmatpush1.bf16.msra.mxu1 %v3964_v33  ;;  %5297 = vst [vmem:[#allocation40_spill] sm:$0xff] %v4020_v52  ;;  %v4026_v55 = vld [vmem:[#allocation10 + $0x8] ss:$16 sps:$4 sm:$0xff]   ;;  %v4030_v56 = vld [vmem:[#allocation10 + $0x24] ss:$16 sps:$4 sm:$0xff]   ;;  %v5303_v10 = vmov 0  }
  0x3c   :  { %448 = vmatprep.subr.bf16.mxu0 %v3966_v34  ;;  %489 = vmatprep.subr.bf16.mxu1 %v3970_v35  ;;  %v4034_v57 = vld [vmem:[#allocation10 + $0x2c] ss:$16 sps:$4 sm:$0xff]   ;;  %v4036_v58 = vld [vmem:[#allocation10 + $0x20] ss:$16 sps:$4 sm:$0xff]   ;;  %v4040_v59 = vld [vmem:[#allocation10 + $0x28] ss:$16 sps:$4 sm:$0xff]  }
  0x3d   :  { %v4044_v60 = vld [vmem:[#allocation10 + $0x44] ss:$16 sps:$4 sm:$0xff]   ;;  %v4046_v61 = vld [vmem:[#allocation10 + $0x4c] ss:$16 sps:$4 sm:$0xff]   ;;  %v4050_v62 = vld [vmem:[#allocation10 + $0x40] ss:$16 sps:$4 sm:$0xff]  }
  0x3e   :  { %v4052_v63 = vld [vmem:[#allocation10 + $0x48] ss:$16 sps:$4 sm:$0xff]   ;;  %v4056_v17 = vld [vmem:[#allocation10 + $0x64] ss:$16 sps:$4 sm:$0xff]   ;;  %v4069_v8 = vld [vmem:[#allocation10 + $0x60] ss:$16 sps:$4 sm:$0xff]  }
  0x3f   :  { %449 = vmatpush1.bf16.msra.mxu0 %v3972_v36  ;;  %490 = vmatpush1.bf16.msra.mxu1 %v3974_v37  ;;  %5299 = vst [vmem:[#allocation42_spill] sm:$0xff] %v4069_v8  ;;  %v4071_v7 = vld [vmem:[#allocation10 + $0x68] ss:$16 sps:$4 sm:$0xff]   ;;  %v4077_v9 = vld [vmem:[#allocation10 + $0x84] ss:$16 sps:$4 sm:$0xff]  }
  0x40   :  { %450 = vmatprep.subr.bf16.mxu0 %v3978_v38  ;;  %491 = vmatprep.subr.bf16.mxu1 %v3982_v39  ;;  %5300 = vst [vmem:[#allocation43_spill] sm:$0xff] %v4071_v7  ;;  %5301 = vst [vmem:[#allocation44_spill] sm:$0xff] %v4077_v9  ;;  %v4079_v6 = vld [vmem:[#allocation10 + $0x8c] ss:$16 sps:$4 sm:$0xff]   ;;  %v4090_v4 = vld [vmem:[#allocation10 + $0x80] ss:$16 sps:$4 sm:$0xff]  }
  0x41   :  { %5302 = vst [vmem:[#allocation45_spill] sm:$0xff] %v4079_v6  ;;  %5304 = vst [vmem:[#allocation46_spill] sm:$0xff] %v4090_v4  ;;  %v4092_v12 = vld [vmem:[#allocation10 + $0x88] ss:$16 sps:$4 sm:$0xff]   ;;  %v4097_v3 = vld [vmem:[#allocation10 + $0xa4] ss:$16 sps:$4 sm:$0xff]  }
  0x42   :  { %5305 = vst [vmem:[#allocation47_spill] sm:$0xff] %v4092_v12  ;;  %5306 = vst [vmem:[#allocation48_spill] sm:$0xff] %v4097_v3  ;;  %v4099_v13 = vld [vmem:[#allocation10 + $0xac] ss:$16 sps:$4 sm:$0xff]   ;;  %v4107_v14 = vld [vmem:[#allocation10 + $0xa0] ss:$16 sps:$4 sm:$0xff]  }
  0x43   :  { %451 = vmatpush1.bf16.msra.mxu0 %v3986_v40  ;;  %492 = vmatpush1.bf16.msra.mxu1 %v3988_v41  ;;  %5307 = vst [vmem:[#allocation49_spill] sm:$0xff] %v4099_v13  ;;  %5308 = vst [vmem:[#allocation50_spill] sm:$0xff] %v4107_v14  ;;  %v4109_v1 = vld [vmem:[#allocation10 + $0xa8] ss:$16 sps:$4 sm:$0xff]  }
  0x44   :  { %452 = vmatprep.subr.bf16.mxu0 %v3992_v42  ;;  %493 = vmatprep.subr.bf16.mxu1 %v3994_v43  ;;  %5309 = vst [vmem:[#allocation51_spill] sm:$0xff] %v4109_v1 }
  0x47   :  { %453 = vmatpush1.bf16.msra.mxu0 %v3996_v44  ;;  %494 = vmatpush1.bf16.msra.mxu1 %v3998_v45 }
  0x48   :  { %454 = vmatprep.subr.bf16.mxu0 %v4002_v46  ;;  %495 = vmatprep.subr.bf16.mxu1 %v4006_v47 }
  0x4b   :  { %455 = vmatpush1.bf16.msra.mxu0 %v4008_v48  ;;  %496 = vmatpush1.bf16.msra.mxu1 %v4010_v49 }
  0x4c   :  { %749 = vmatprep.subr.bf16.mxu0 %v4018_v51  ;;  %790 = vmatprep.subr.bf16.mxu1 %v4020_v52 }
  0x4e   :  { %473 = vmatmul.mubr.bf16.vlgmr.msra.gmra.mrb[0].mxu0 %v279_v53  ;;  %514 = vmatmul.mubr.bf16.vlgmr.msra.gmra.mrb[0].mxu1 %v279_v53  ;;  %v4060_v53 = vld [vmem:[#allocation10 + $0x6c] ss:$16 sps:$4 sm:$0xff]  }
  0x4f   :  { %750 = vmatpush1.bf16.msra.mxu0 %v4024_v54  ;;  %791 = vmatpush1.bf16.msra.mxu1 %v4026_v55  ;;  %5298 = vst [vmem:[#allocation41_spill] sm:$0xff] %v4060_v53 }
  0x50   :  { %751 = vmatprep.subr.bf16.mxu0 %v4030_v56  ;;  %792 = vmatprep.subr.bf16.mxu1 %v4034_v57 }
  0x51   :  { %781 = vmatprep.mubr.bf16.mxu0 %v5171_v16  ;;  %822 = vmatprep.mubr.bf16.mxu1 %v5171_v16  ;;  %v4065_v16 = vld [vmem:[%s5164_s0] sm:$0x3] }
  0x52   :  { %vm3086_vm0 = vcmp.gt.s32.totalorder %v4065_v16, 0  ;;  %vm3087_vm1 = vcmp.gt.s32.totalorder %v4065_v16, 7  ;;  %vm3169_vm2 = vcmp.gt.s32.totalorder %v4065_v16, 2  ;;  %vm3179_vm3 = vcmp.gt.s32.totalorder %v4065_v16, 3 }
  0x53   :  { %752 = vmatpush1.bf16.msra.mxu0 %v4036_v58  ;;  %793 = vmatpush1.bf16.msra.mxu1 %v4040_v59  ;;  %v4082_v5 = vsel %vm3086_vm0, 1, %v5303_v10  ;;  %v4086_v11 = vsel %vm3087_vm1, 1, %v5303_v10  ;;  %v4103_v2 = vsel %vm3169_vm2, 1, %v5303_v10  ;;  %vm3180_vm4 = vcmp.gt.s32.totalorder %v4065_v16, 4 }
  0x54   :  { %753 = vmatprep.subr.bf16.mxu0 %v4044_v60  ;;  %794 = vmatprep.subr.bf16.mxu1 %v4046_v61  ;;  %vm3170_vm5 = vcmp.gt.s32.totalorder %v4065_v16, 5  ;;  %vm3160_vm6 = vcmp.gt.s32.totalorder %v4065_v16, 6  ;;  %vm3159_vm7 = vcmp.gt.s32.totalorder %v4065_v16, 1 }
  0x55   :  { %578 = vperm.xlu0 %3235, %v4082_v5  }
  0x57   :  { %754 = vmatpush1.bf16.msra.mxu0 %v4050_v62  ;;  %795 = vmatpush1.bf16.msra.mxu1 %v4052_v63 }
  0x58   :  { %755 = vmatprep.subr.bf16.mxu0 %v4056_v17  ;;  %796 = vmatprep.subr.bf16.mxu1 %v4060_v53  ;;  %v4143_v53 = vld [vmem:[#allocation4] sm:$0x3] }
  0x59   :  { %887 = vperm.xlu0 %3235, %v4086_v11  }
  0x5b   :  { %756 = vmatpush1.bf16.msra.mxu0 %v4069_v8  ;;  %797 = vmatpush1.bf16.msra.mxu1 %v4071_v7  ;;  %v4126_v7 = vld [vmem:[#allocation10 + $0xc8] ss:$16 sps:$4 sm:$0xff]   ;;  %v4136_v8 = vld [vmem:[#allocation10 + $0xe0] ss:$16 sps:$4 sm:$0xff]  }
  0x5c   :  { %757 = vmatprep.subr.bf16.mxu0 %v4077_v9  ;;  %798 = vmatprep.subr.bf16.mxu1 %v4079_v6  ;;  %v4114_v6 = vld [vmem:[#allocation10 + $0xc4] ss:$16 sps:$4 sm:$0xff]   ;;  %v4116_v9 = vld [vmem:[#allocation10 + $0xcc] ss:$16 sps:$4 sm:$0xff]   ;;  %5312 = vst [vmem:[#allocation54_spill] sm:$0xff] %v4126_v7 }
  0x5d   :  { %5310 = vst [vmem:[#allocation52_spill] sm:$0xff] %v4114_v6  ;;  %5311 = vst [vmem:[#allocation53_spill] sm:$0xff] %v4116_v9  ;;  %1349 = vperm.xlu0 %3235, %v4103_v2  }
  0x5f   :  { %758 = vmatpush1.bf16.msra.mxu0 %v4090_v4  ;;  %799 = vmatpush1.bf16.msra.mxu1 %v4092_v12  ;;  %v4120_v4 = vsel %vm3179_vm3, 1, %v5303_v10  ;;  %v4124_v12 = vld [vmem:[#allocation10 + $0xc0] ss:$16 sps:$4 sm:$0xff]  }
  0x60   :  { %759 = vmatprep.subr.bf16.mxu0 %v4097_v3  ;;  %800 = vmatprep.subr.bf16.mxu1 %v4099_v13  ;;  %v4131_v13 = vld [vmem:[#allocation10 + $0xe4] ss:$16 sps:$4 sm:$0xff]   ;;  %v4133_v3 = vld [vmem:[#allocation10 + $0xec] ss:$16 sps:$4 sm:$0xff]  }
  0x61   :  { %5313 = vst [vmem:[#allocation55_spill] sm:$0xff] %v4133_v3  ;;  %1655 = vperm.xlu0 %3235, %v4120_v4  }
  0x63   :  { %760 = vmatpush1.bf16.msra.mxu0 %v4107_v14  ;;  %801 = vmatpush1.bf16.msra.mxu1 %v4109_v1  ;;  %v1803_v1 = vsel %vm3180_vm4, 1, %v5303_v10  ;;  %v4141_v14 = vld [vmem:[#allocation10 + $0xe8] ss:$16 sps:$4 sm:$0xff]  }
  0x64   :  { %761 = vmatprep.subr.bf16.mxu0 %v4114_v6  ;;  %802 = vmatprep.subr.bf16.mxu1 %v4116_v9  ;;  %v588_v9 = vpack.c.bf16 %v4143_v53, %v4143_v53  ;;  %v1497_v6 = vsel %vm3170_vm5, 1, %v5303_v10 }
  0x65   :  { %1961 = vperm.xlu0 %3235, %v1803_v1  }
  0x67   :  { %762 = vmatpush1.bf16.msra.mxu0 %v4124_v12  ;;  %803 = vmatpush1.bf16.msra.mxu1 %v4126_v7 }
  0x68   :  { %763 = vmatprep.subr.bf16.mxu0 %v4131_v13  ;;  %804 = vmatprep.subr.bf16.mxu1 %v4133_v3  ;;  %v1191_v3 = vsel %vm3160_vm6, 1, %v5303_v10 }
  0x69   :  { %2267 = vperm.xlu0 %3235, %v1497_v6  }
  0x6b   :  { %764 = vmatpush1.bf16.msra.mxu0 %v4136_v8  ;;  %805 = vmatpush1.bf16.msra.mxu1 %v4141_v14 }
  0x6c   :  { %905 = vmatprep.subr.bf16.mxu0 %v3922_v18  ;;  %946 = vmatprep.subr.bf16.mxu1 %v3924_v19 }
  0x6d   :  { %2573 = vperm.xlu0 %3235, %v1191_v3  }
  0x6e   :  { %782 = vmatmul.mubr.bf16.vlgmr.msra.gmra.mrb[4].mxu0 %v588_v9  ;;  %823 = vmatmul.mubr.bf16.vlgmr.msra.gmra.mrb[4].mxu1 %v588_v9  ;;  %v1041_v9 = vsel %vm3159_vm7, 1, %v5303_v10 }
  0x6f   :  { %906 = vmatpush1.bf16.msra.mxu0 %v3927_v20  ;;  %947 = vmatpush1.bf16.msra.mxu1 %v3929_v21 }
  0x70   :  { %907 = vmatprep.subr.bf16.mxu0 %v3932_v22  ;;  %948 = vmatprep.subr.bf16.mxu1 %v3936_v23 }
  0x71   :  { %937 = vmatprep.mubr.bf16.mxu0 %v5303_v10  ;;  %978 = vmatprep.mubr.bf16.mxu1 %v5303_v10 }
  0x72   :  { %2879 = vperm.xlu0 %3235, %v4086_v11   ;;  %1043 = vperm.xlu1 %3236, %v1041_v9   ;;  %v3771_v11 = vmov 1983009808  }
  0x73   :  { %908 = vmatpush1.bf16.msra.mxu0 %v3938_v24  ;;  %949 = vmatpush1.bf16.msra.mxu1 %v3941_v25 }
  0x74   :  { %909 = vmatprep.subr.bf16.mxu0 %v3944_v26  ;;  %950 = vmatprep.subr.bf16.mxu1 %v3946_v27 }
  0x76   :  { %1193 = vperm.xlu1 %3236, %v1191_v3  }
  0x77   :  { %910 = vmatpush1.bf16.msra.mxu0 %v3948_v28  ;;  %951 = vmatpush1.bf16.msra.mxu1 %v3950_v29 }
  0x78   :  { %911 = vmatprep.subr.bf16.mxu0 %v3954_v30  ;;  %952 = vmatprep.subr.bf16.mxu1 %v3958_v31 }
  0x7a   :  { %1499 = vperm.xlu1 %3236, %v1497_v6  }
  0x7b   :  { %912 = vmatpush1.bf16.msra.mxu0 %v3960_v32  ;;  %953 = vmatpush1.bf16.msra.mxu1 %v3964_v33 }
  0x7c   :  { %913 = vmatprep.subr.bf16.mxu0 %v3966_v34  ;;  %954 = vmatprep.subr.bf16.mxu1 %v3970_v35 }
  0x7e   :  { %1805 = vperm.xlu1 %3236, %v1803_v1  }
  0x7f   :  { %914 = vmatpush1.bf16.msra.mxu0 %v3972_v36  ;;  %955 = vmatpush1.bf16.msra.mxu1 %v3974_v37 }
  0x80   :  { %915 = vmatprep.subr.bf16.mxu0 %v3978_v38  ;;  %956 = vmatprep.subr.bf16.mxu1 %v3982_v39 }
  0x82   :  { %2111 = vperm.xlu1 %3236, %v4120_v4  }
  0x83   :  { %916 = vmatpush1.bf16.msra.mxu0 %v3986_v40  ;;  %957 = vmatpush1.bf16.msra.mxu1 %v3988_v41 }
  0x84   :  { %917 = vmatprep.subr.bf16.mxu0 %v3992_v42  ;;  %958 = vmatprep.subr.bf16.mxu1 %v3994_v43 }
  0x86   :  { %2417 = vperm.xlu1 %3236, %v4103_v2  }
  0x87   :  { %918 = vmatpush1.bf16.msra.mxu0 %v3996_v44  ;;  %959 = vmatpush1.bf16.msra.mxu1 %v3998_v45 }
  0x88   :  { %919 = vmatprep.subr.bf16.mxu0 %v4002_v46  ;;  %960 = vmatprep.subr.bf16.mxu1 %v4006_v47 }
  0x8a   :  { %2723 = vperm.xlu1 %3236, %v1041_v9  }
  0x8b   :  { %920 = vmatpush1.bf16.msra.mxu0 %v4008_v48  ;;  %961 = vmatpush1.bf16.msra.mxu1 %v4010_v49  ;;  %v529_v48 = vunpack.c.l.s4 %v3771_v11  ;;  %v531_v49 = vlaneseq }
  0x8c   :  { %1055 = vmatprep.subr.bf16.mxu0 %v4018_v51  ;;  %1096 = vmatprep.subr.bf16.mxu1 %v4020_v52 }
  0x8d   :  { %v530_v51 = vunpack.c.0.s8 %v529_v48  ;;  %v532_v52 = vshrl.u32 %v531_v49, 7 }
  0x8e   :  { %3028 = vperm.xlu1 %3236, %v4082_v5  }
  0x8f   :  { %v4197_v46 = vsub.s32 %v530_v51, %v532_v52 }
 0x121   :  { %v474_v47 = vpop.f32.mrb[0].mxu0  ;;  %v515_v16 = vpop.f32.mrb[0].mxu1 }
 0x122   :  { %v476_v45 = vpop.f32.mrb[1].mxu0  ;;  %v517_v3 = vpop.f32.mrb[1].mxu1 }
 0x123   :  { %v526_v6 = vcombine.low %v474_v47, %v476_v45  ;;  %v527_v1 = vcombine.low %v515_v16, %v517_v3  ;;  %v478_v44 = vpop.f32.mrb[2].mxu0  ;;  %v519_v4 = vpop.f32.mrb[2].mxu1 }
 0x124   :  { %v479_v43 = vpop.f32.mrb[3].mxu0  ;;  %v520_v2 = vpop.f32.mrb[3].mxu1 }
 0x125   :  { %v534_v9 = vrot.slane %v526_v6, %v4197_v46  ;;  %v541_v11 = vrot.slane %v527_v1, %v4197_v46 }
 0x127   :  { %v542_v42 = vcombine.low %v534_v9, %v541_v11 }
 0x129   :  { %v544_v5 = vadd.f32 %v542_v42, %v3810_v0 }
 0x12b   :  { %v3120_v48 = vmul.f32 -1.442695, %v544_v5  ;;  %v552_v49 = vrot.slane %v544_v5, 2  ;;  %v563_v52 = vrot.slane %v544_v5, 6  ;;  %v560_v47 = vrot.slane %v544_v5, 4 }
 0x12d   :  { %3333 = vpow2.f32 %v3120_v48  ;;  %v3121_v51 = vmul.f32 -1.442695, %v552_v49  ;;  %v3122_v41 = vmul.f32 -1.442695, %v563_v52  ;;  %v269_v49 = vld [vmem:[#allocation3] sm:$0x3] }
 0x12f   :  { %3335 = vpow2.f32 %v3121_v51 }
 0x130   :  { %3337 = vpow2.f32 %v3122_v41 }
 0x137   :  { %v3334_v45 = vpop.eup %3333 }
 0x138   :  { %v548_v44 = vadd.f32 1.0, %v3334_v45 }
 0x139   :  { %v3336_v16 = vpop.eup %3335 }
 0x13a   :  { %3339 = vrcp.f32 %v548_v44  ;;  %v557_v43 = vadd.f32 1.0, %v3336_v16  ;;  %v3338_v42 = vpop.eup %3337  ;;  %v579_v16 = vpop.permute.xlu0 %578 }
 0x13b   :  { %3341 = vtanh.f32 %v560_v47  ;;  %v568_v44 = vadd.f32 1.0, %v3338_v42  ;;  %vm580_vm8 = vcmp.eq.s32.totalorder %v579_v16, 1  ;;  %v271_v16 = vld [vmem:[#allocation5] sm:$0x3] }
 0x13c   :  { %3343 = vrcp.f32 %v557_v43 }
 0x13d   :  { %3345 = vrcp.f32 %v568_v44 }
 0x141   :  { %v783_v3 = vpop.f32.mrb[4].mxu0  ;;  %v824_v6 = vpop.f32.mrb[4].mxu1 }
 0x142   :  { %v785_v1 = vpop.f32.mrb[5].mxu0  ;;  %v826_v0 = vpop.f32.mrb[5].mxu1 }
 0x143   :  { %v835_v4 = vcombine.low %v783_v3, %v785_v1  ;;  %v836_v2 = vcombine.low %v824_v6, %v826_v0  ;;  %v787_v9 = vpop.f32.mrb[6].mxu0  ;;  %v828_v11 = vpop.f32.mrb[6].mxu1 }
 0x144   :  { %v3340_v48 = vpop.eup %3339  ;;  %v788_v51 = vpop.f32.mrb[7].mxu0 }
 0x145   :  { %v829_v5 = vpop.f32.mrb[7].mxu1  ;;  %v3342_v52 = vpop.eup %3341  ;;  %v843_v41 = vrot.slane %v835_v4, %v4197_v46  ;;  %v850_v45 = vrot.slane %v836_v2, %v4197_v46 }
 0x146   :  { %v3344_v47 = vpop.eup %3343  ;;  %v572_v40 = vmul.f32 %v3342_v52, %v3340_v48 }
 0x147   :  { %v571_v43 = vmul.f32 %v3344_v47, %v269_v49  ;;  %v851_v39 = vcombine.low %v843_v41, %v850_v45  ;;  %v3346_v42 = vpop.eup %3345 }
 0x149   :  { %v573_v3 = vadd.f32 %v572_v40, %v571_v43  ;;  %v853_v6 = vadd.f32 %v3887_v15, %v851_v39 }
 0x14b   :  { %3347 = vtanh.f32 %v573_v3  ;;  %v4206_v1 = vsel %vm580_vm8, %v573_v3, %v269_v49  ;;  %v3155_v0 = vmul.f32 -1.442695, %v853_v6  ;;  %v861_v9 = vrot.slane %v853_v6, 2  ;;  %v5314_v3 = vld [vmem:[#allocation41_spill] sm:$0xff] }
 0x14c   :  { %v872_v2 = vrot.slane %v853_v6, 6  ;;  %v869_v52 = vrot.slane %v853_v6, 4 }
 0x14d   :  { %3349 = vpow2.f32 %v3155_v0  ;;  %v3156_v4 = vmul.f32 -1.442695, %v861_v9 }
 0x14e   :  { %v3157_v51 = vmul.f32 -1.442695, %v872_v2  ;;  %v5315_v2 = vld [vmem:[#allocation42_spill] sm:$0xff] }
 0x14f   :  { %3351 = vpow2.f32 %v3156_v4 }
 0x150   :  { %3353 = vpow2.f32 %v3157_v51  ;;  %v5317_v51 = vld [vmem:[#allocation44_spill] sm:$0xff] }
 0x155   :  { %v3348_v11 = vpop.eup %3347 }
 0x156   :  { %v575_v48 = vmul.f32 %v3348_v11, %v3346_v42  ;;  %v5316_v42 = vld [vmem:[#allocation43_spill] sm:$0xff]  ;;  %v888_v11 = vpop.permute.xlu0 %887 }
 0x157   :  { %v3350_v5 = vpop.eup %3349  ;;  %vm889_vm9 = vcmp.eq.s32.totalorder %v888_v11, 1 }
 0x158   :  { %v4210_v15 = vsel %vm580_vm8, %v575_v48, %v4014_v50  ;;  %v583_v39 = vsel %vm580_vm8, %v575_v48, 0.0  ;;  %v857_v40 = vadd.f32 1.0, %v3350_v5  ;;  %v5318_v48 = vld [vmem:[#allocation45_spill] sm:$0xff] }
 0x159   :  { %v3352_v49 = vpop.eup %3351  ;;  %v584_v41 = vpack.c.bf16 %v583_v39, %v583_v39  ;;  %v904_v45 = vpack.c.bf16 %v4210_v15, %v4210_v15  ;;  %v5319_v39 = vld [vmem:[#allocation46_spill] sm:$0xff] }
 0x15a   :  { %3355 = vrcp.f32 %v857_v40  ;;  %v866_v47 = vadd.f32 1.0, %v3352_v49  ;;  %v3354_v50 = vpop.eup %3353  ;;  %v5320_v40 = vld [vmem:[#allocation47_spill] sm:$0xff]  ;;  %v5321_v49 = vld [vmem:[#allocation48_spill] sm:$0xff] }
 0x15b   :  { %585 = vst [vmem:[%s5169_s5] sm:$0x1] %v584_v41  ;;  %3357 = vtanh.f32 %v869_v52  ;;  %938 = vmatmul.mubr.bf16.vlgmr.msra.gmra.mrb[8].mxu0 %v904_v45  ;;  %979 = vmatmul.mubr.bf16.vlgmr.msra.gmra.mrb[8].mxu1 %v904_v45  ;;  %v877_v0 = vadd.f32 1.0, %v3354_v50  ;;  %v5322_v41 = vld [vmem:[#allocation49_spill] sm:$0xff]  ;;  %v5323_v45 = vld [vmem:[#allocation50_spill] sm:$0xff]  ;;  %v5325_v50 = vld [vmem:[#allocation52_spill] sm:$0xff] }
 0x15c   :  { %3359 = vrcp.f32 %v866_v47  ;;  %1056 = vmatpush1.bf16.msra.mxu0 %v4024_v54  ;;  %1097 = vmatpush1.bf16.msra.mxu1 %v4026_v55  ;;  %v5324_v47 = vld [vmem:[#allocation51_spill] sm:$0xff] }
 0x15d   :  { %1057 = vmatprep.subr.bf16.mxu0 %v4030_v56  ;;  %1098 = vmatprep.subr.bf16.mxu1 %v4034_v57  ;;  %3361 = vrcp.f32 %v877_v0 }
 0x15e   :  { %1087 = vmatprep.mubr.bf16.mxu0 %v5303_v10  ;;  %1128 = vmatprep.mubr.bf16.mxu1 %v5303_v10 }
 0x160   :  { %1058 = vmatpush1.bf16.msra.mxu0 %v4036_v58  ;;  %1099 = vmatpush1.bf16.msra.mxu1 %v4040_v59 }
 0x161   :  { %1059 = vmatprep.subr.bf16.mxu0 %v4044_v60  ;;  %1100 = vmatprep.subr.bf16.mxu1 %v4046_v61 }
 0x164   :  { %v3356_v44 = vpop.eup %3355  ;;  %1060 = vmatpush1.bf16.msra.mxu0 %v4050_v62  ;;  %1101 = vmatpush1.bf16.msra.mxu1 %v4052_v63 }
 0x165   :  { %v3358_v43 = vpop.eup %3357  ;;  %1061 = vmatprep.subr.bf16.mxu0 %v4056_v17  ;;  %1102 = vmatprep.subr.bf16.mxu1 %v5314_v3 }
 0x166   :  { %v3360_v6 = vpop.eup %3359  ;;  %v881_v9 = vmul.f32 %v3358_v43, %v3356_v44  ;;  %v5326_v44 = vld [vmem:[#allocation53_spill] sm:$0xff] }
 0x167   :  { %v880_v4 = vmul.f32 %v3360_v6, %v271_v16  ;;  %v3362_v43 = vpop.eup %3361  ;;  %v5327_v6 = vld [vmem:[#allocation55_spill] sm:$0xff] }
 0x168   :  { %1062 = vmatpush1.bf16.msra.mxu0 %v5315_v2  ;;  %1103 = vmatpush1.bf16.msra.mxu1 %v5316_v42 }
 0x169   :  { %1063 = vmatprep.subr.bf16.mxu0 %v5317_v51  ;;  %1104 = vmatprep.subr.bf16.mxu1 %v5318_v48  ;;  %v882_v5 = vadd.f32 %v881_v9, %v880_v4 }
 0x16b   :  { %3363 = vtanh.f32 %v882_v5  ;;  %v4237_v52 = vsel %vm889_vm9, %v882_v5, %v271_v16 }
 0x16c   :  { %1064 = vmatpush1.bf16.msra.mxu0 %v5319_v39  ;;  %1105 = vmatpush1.bf16.msra.mxu1 %v5320_v40 }
 0x16d   :  { %1065 = vmatprep.subr.bf16.mxu0 %v5321_v49  ;;  %1106 = vmatprep.subr.bf16.mxu1 %v5322_v41 }
 0x170   :  { %1066 = vmatpush1.bf16.msra.mxu0 %v5323_v45  ;;  %1107 = vmatpush1.bf16.msra.mxu1 %v5324_v47 }
 0x171   :  { %1067 = vmatprep.subr.bf16.mxu0 %v5325_v50  ;;  %1108 = vmatprep.subr.bf16.mxu1 %v5326_v44 }
 0x174   :  { %1068 = vmatpush1.bf16.msra.mxu0 %v4124_v12  ;;  %1109 = vmatpush1.bf16.msra.mxu1 %v4126_v7 }
 0x175   :  { %v3364_v16 = vpop.eup %3363  ;;  %1069 = vmatprep.subr.bf16.mxu0 %v4131_v13  ;;  %1110 = vmatprep.subr.bf16.mxu1 %v5327_v6 }
 0x176   :  { %v884_v0 = vmul.f32 %v3364_v16, %v3362_v43 }
 0x178   :  { %1070 = vmatpush1.bf16.msra.mxu0 %v4136_v8  ;;  %1111 = vmatpush1.bf16.msra.mxu1 %v4141_v14  ;;  %v4255_v9 = vsel %vm889_vm9, %v884_v0, %v4143_v53  ;;  %v892_v4 = vsel %vm889_vm9, %v884_v0, 0.0  ;;  %v5341_v0 = vld [vmem:[#allocation14_spill] sm:$0xff] }
 0x179   :  { %v893_v5 = vpack.c.bf16 %v892_v4, %v892_v4  ;;  %v1054_v7 = vpack.c.bf16 %v4255_v9, %v4255_v9  ;;  %1211 = vmatprep.subr.bf16.mxu0 %v3922_v18  ;;  %1252 = vmatprep.subr.bf16.mxu1 %v3924_v19  ;;  %v5329_v18 = vld [vmem:[#allocation29_spill] sm:$0xff]  ;;  %v5330_v19 = vld [vmem:[#allocation30_spill] sm:$0xff] }
 0x17b   :  { %3158 = vst [vmem:[%s5170_s6 + $0x7] sm:$0x1] %v893_v5  ;;  %1088 = vmatmul.mubr.bf16.vlgmr.msra.gmra.mrb[12].mxu0 %v1054_v7  ;;  %1129 = vmatmul.mubr.bf16.vlgmr.msra.gmra.mrb[12].mxu1 %v1054_v7  ;;  %v5328_v7 = vld [vmem:[#allocation28_spill] sm:$0xff] }
 0x17c   :  { %1212 = vmatpush1.bf16.msra.mxu0 %v3927_v20  ;;  %1253 = vmatpush1.bf16.msra.mxu1 %v3929_v21  ;;  %v5331_v20 = vld [vmem:[#allocation31_spill] sm:$0xff]  ;;  %v5332_v21 = vld [vmem:[#allocation32_spill] sm:$0xff] }
 0x17d   :  { %1213 = vmatprep.subr.bf16.mxu0 %v3932_v22  ;;  %1254 = vmatprep.subr.bf16.mxu1 %v3936_v23  ;;  %v5333_v22 = vld [vmem:[#allocation33_spill] sm:$0xff]  ;;  %v5334_v23 = vld [vmem:[#allocation34_spill] sm:$0xff] }
 0x17e   :  { %1243 = vmatprep.mubr.bf16.mxu0 %v5303_v10  ;;  %1284 = vmatprep.mubr.bf16.mxu1 %v5303_v10 }
 0x180   :  { %1214 = vmatpush1.bf16.msra.mxu0 %v3938_v24  ;;  %1255 = vmatpush1.bf16.msra.mxu1 %v3941_v25  ;;  %v5335_v24 = vld [vmem:[#allocation35_spill] sm:$0xff]  ;;  %v5336_v25 = vld [vmem:[#allocation36_spill] sm:$0xff] }
 0x181   :  { %1215 = vmatprep.subr.bf16.mxu0 %v3944_v26  ;;  %1256 = vmatprep.subr.bf16.mxu1 %v3946_v27  ;;  %v5337_v26 = vld [vmem:[#allocation37_spill] sm:$0xff]  ;;  %v5338_v27 = vld [vmem:[#allocation38_spill] sm:$0xff] }
 0x184   :  { %1216 = vmatpush1.bf16.msra.mxu0 %v3948_v28  ;;  %1257 = vmatpush1.bf16.msra.mxu1 %v3950_v29  ;;  %v5339_v28 = vld [vmem:[#allocation39_spill] sm:$0xff]  ;;  %v5340_v29 = vld [vmem:[#allocation40_spill] sm:$0xff] }
 0x185   :  { %1217 = vmatprep.subr.bf16.mxu0 %v3954_v30  ;;  %1258 = vmatprep.subr.bf16.mxu1 %v3958_v31 }
 0x188   :  { %1218 = vmatpush1.bf16.msra.mxu0 %v3960_v32  ;;  %1259 = vmatpush1.bf16.msra.mxu1 %v3964_v33 }
 0x189   :  { %1219 = vmatprep.subr.bf16.mxu0 %v3966_v34  ;;  %1260 = vmatprep.subr.bf16.mxu1 %v3970_v35 }
 0x18c   :  { %1220 = vmatpush1.bf16.msra.mxu0 %v3972_v36  ;;  %1261 = vmatpush1.bf16.msra.mxu1 %v3974_v37 }
 0x18d   :  { %1221 = vmatprep.subr.bf16.mxu0 %v3978_v38  ;;  %1262 = vmatprep.subr.bf16.mxu1 %v5328_v7 }
 0x190   :  { %1222 = vmatpush1.bf16.msra.mxu0 %v5329_v18  ;;  %1263 = vmatpush1.bf16.msra.mxu1 %v5330_v19 }
 0x191   :  { %1223 = vmatprep.subr.bf16.mxu0 %v5331_v20  ;;  %1264 = vmatprep.subr.bf16.mxu1 %v5332_v21 }
 0x194   :  { %1224 = vmatpush1.bf16.msra.mxu0 %v5333_v22  ;;  %1265 = vmatpush1.bf16.msra.mxu1 %v5334_v23 }
 0x195   :  { %1225 = vmatprep.subr.bf16.mxu0 %v5335_v24  ;;  %1266 = vmatprep.subr.bf16.mxu1 %v5336_v25 }
 0x198   :  { %1226 = vmatpush1.bf16.msra.mxu0 %v5337_v26  ;;  %1267 = vmatpush1.bf16.msra.mxu1 %v5338_v27 }
 0x199   :  { %1361 = vmatprep.subr.bf16.mxu0 %v5339_v28  ;;  %1402 = vmatprep.subr.bf16.mxu1 %v5340_v29 }
 0x22e   :  { %v939_v30 = vpop.f32.mrb[8].mxu0  ;;  %v980_v31 = vpop.f32.mrb[8].mxu1 }
 0x22f   :  { %v941_v32 = vpop.f32.mrb[9].mxu0  ;;  %v982_v33 = vpop.f32.mrb[9].mxu1 }
 0x230   :  { %v991_v34 = vcombine.low %v939_v30, %v941_v32  ;;  %v992_v35 = vcombine.low %v980_v31, %v982_v33  ;;  %v943_v36 = vpop.f32.mrb[10].mxu0  ;;  %v984_v37 = vpop.f32.mrb[10].mxu1 }
 0x231   :  { %v944_v38 = vpop.f32.mrb[11].mxu0  ;;  %v985_v53 = vpop.f32.mrb[11].mxu1 }
 0x232   :  { %v999_v11 = vrot.slane %v991_v34, %v4197_v46  ;;  %v1006_v43 = vrot.slane %v992_v35, %v4197_v46 }
 0x234   :  { %v1007_v16 = vcombine.low %v999_v11, %v1006_v43 }
 0x236   :  { %v1009_v4 = vadd.f32 %v1007_v16, %v5341_v0  ;;  %v1044_v0 = vpop.permute.xlu1 %1043 }
 0x237   :  { %vm1045_vm10 = vcmp.eq.s32.totalorder %v1044_v0, 1  ;;  %v4426_v0 = vld [vmem:[#allocation8 + $0x88] ss:$16 sps:$4 sm:$0xff]  }
 0x238   :  { %v3161_v5 = vmul.f32 -1.442695, %v1009_v4  ;;  %v1017_v7 = vrot.slane %v1009_v4, 2  ;;  %v1028_v19 = vrot.slane %v1009_v4, 6  ;;  %v1025_v22 = vrot.slane %v1009_v4, 4 }
 0x23a   :  { %3365 = vpow2.f32 %v3161_v5  ;;  %v3162_v18 = vmul.f32 -1.442695, %v1017_v7  ;;  %v3163_v20 = vmul.f32 -1.442695, %v1028_v19  ;;  %v5342_v19 = vld [vmem:[#allocation27_spill] sm:$0xff] }
 0x23c   :  { %3367 = vpow2.f32 %v3162_v18 }
 0x23d   :  { %3369 = vpow2.f32 %v3163_v20 }
 0x244   :  { %v3366_v21 = vpop.eup %3365 }
 0x245   :  { %v1013_v23 = vadd.f32 1.0, %v3366_v21 }
 0x246   :  { %v3368_v24 = vpop.eup %3367 }
 0x247   :  { %3371 = vrcp.f32 %v1013_v23  ;;  %v1022_v25 = vadd.f32 1.0, %v3368_v24  ;;  %v3370_v30 = vpop.eup %3369 }
 0x248   :  { %3373 = vtanh.f32 %v1025_v22  ;;  %v1033_v16 = vadd.f32 1.0, %v3370_v30 }
 0x249   :  { %3375 = vrcp.f32 %v1022_v25 }
 0x24a   :  { %3377 = vrcp.f32 %v1033_v16  ;;  %v4423_v16 = vld [vmem:[#allocation8 + $0x80] ss:$16 sps:$4 sm:$0xff]  }
 0x24e   :  { %v1089_v26 = vpop.f32.mrb[12].mxu0  ;;  %v1130_v27 = vpop.f32.mrb[12].mxu1 }
 0x24f   :  { %v1091_v28 = vpop.f32.mrb[13].mxu0  ;;  %v1132_v29 = vpop.f32.mrb[13].mxu1 }
 0x250   :  { %v1141_v31 = vcombine.low %v1089_v26, %v1091_v28  ;;  %v1142_v32 = vcombine.low %v1130_v27, %v1132_v29  ;;  %v1093_v33 = vpop.f32.mrb[14].mxu0  ;;  %v1134_v34 = vpop.f32.mrb[14].mxu1 }
 0x251   :  { %v3372_v35 = vpop.eup %3371  ;;  %v1094_v36 = vpop.f32.mrb[15].mxu0 }
 0x252   :  { %v1135_v37 = vpop.f32.mrb[15].mxu1  ;;  %v3374_v38 = vpop.eup %3373  ;;  %v1149_v53 = vrot.slane %v1141_v31, %v4197_v46  ;;  %v1156_v11 = vrot.slane %v1142_v32, %v4197_v46 }
 0x253   :  { %v3376_v43 = vpop.eup %3375  ;;  %v1037_v5 = vmul.f32 %v3374_v38, %v3372_v35  ;;  %v4411_v38 = vld [vmem:[#allocation8 + $0x60] ss:$16 sps:$4 sm:$0xff]  }
 0x254   :  { %v1036_v4 = vmul.f32 %v3376_v43, %v4206_v1  ;;  %v1157_v7 = vcombine.low %v1149_v53, %v1156_v11  ;;  %v3378_v26 = vpop.eup %3377  ;;  %v4414_v53 = vld [vmem:[#allocation8 + $0x68] ss:$16 sps:$4 sm:$0xff]   ;;  %v4417_v11 = vld [vmem:[#allocation8 + $0x84] ss:$16 sps:$4 sm:$0xff]   ;;  %v4420_v43 = vld [vmem:[#allocation8 + $0x8c] ss:$16 sps:$4 sm:$0xff]  }
 0x256   :  { %v1038_v18 = vadd.f32 %v1037_v5, %v1036_v4  ;;  %v1159_v20 = vadd.f32 %v5342_v19, %v1157_v7  ;;  %v4429_v4 = vld [vmem:[#allocation8 + $0xa4] ss:$16 sps:$4 sm:$0xff]   ;;  %v4432_v5 = vld [vmem:[#allocation8 + $0xac] ss:$16 sps:$4 sm:$0xff]   ;;  %v4435_v7 = vld [vmem:[#allocation8 + $0xa0] ss:$16 sps:$4 sm:$0xff]  }
 0x257   :  { %5344 = vst [vmem:[#allocation41_spill] sm:$0xff] %v4429_v4  ;;  %5345 = vst [vmem:[#allocation42_spill] sm:$0xff] %v4432_v5  ;;  %v4441_v19 = vld [vmem:[#allocation8 + $0xc4] ss:$16 sps:$4 sm:$0xff]  }
 0x258   :  { %3379 = vtanh.f32 %v1038_v18  ;;  %v4308_v21 = vsel %vm1045_vm10, %v1038_v18, %v4206_v1  ;;  %v3165_v22 = vmul.f32 -1.442695, %v1159_v20  ;;  %v1167_v23 = vrot.slane %v1159_v20, 2  ;;  %5346 = vst [vmem:[#allocation43_spill] sm:$0xff] %v4435_v7  ;;  %v4438_v18 = vld [vmem:[#allocation8 + $0xa8] ss:$16 sps:$4 sm:$0xff]  }
 0x259   :  { %v1178_v25 = vrot.slane %v1159_v20, 6  ;;  %v1175_v31 = vrot.slane %v1159_v20, 4  ;;  %5347 = vst [vmem:[#allocation44_spill] sm:$0xff] %v4438_v18  ;;  %5348 = vst [vmem:[#allocation45_spill] sm:$0xff] %v4441_v19  ;;  %v4444_v20 = vld [vmem:[#allocation8 + $0xcc] ss:$16 sps:$4 sm:$0xff]  }
 0x25a   :  { %3381 = vpow2.f32 %v3165_v22  ;;  %v3166_v24 = vmul.f32 -1.442695, %v1167_v23  ;;  %5349 = vst [vmem:[#allocation46_spill] sm:$0xff] %v4444_v20  ;;  %v4447_v22 = vld [vmem:[#allocation8 + $0xc0] ss:$16 sps:$4 sm:$0xff]  }
 0x25b   :  { %v3167_v28 = vmul.f32 -1.442695, %v1178_v25  ;;  %5350 = vst [vmem:[#allocation47_spill] sm:$0xff] %v4447_v22  ;;  %v4450_v23 = vld [vmem:[#allocation8 + $0xc8] ss:$16 sps:$4 sm:$0xff]  }
 0x25c   :  { %3383 = vpow2.f32 %v3166_v24  ;;  %5351 = vst [vmem:[#allocation48_spill] sm:$0xff] %v4450_v23  ;;  %v4453_v24 = vld [vmem:[#allocation8 + $0xe4] ss:$16 sps:$4 sm:$0xff]   ;;  %v4456_v25 = vld [vmem:[#allocation8 + $0xec] ss:$16 sps:$4 sm:$0xff]  }
 0x25d   :  { %3385 = vpow2.f32 %v3167_v28  ;;  %5352 = vst [vmem:[#allocation49_spill] sm:$0xff] %v4453_v24  ;;  %5353 = vst [vmem:[#allocation50_spill] sm:$0xff] %v4456_v25  ;;  %v4465_v28 = vld [vmem:[#allocation10 + $0x4] ss:$16 sps:$4 sm:$0xff]  }
 0x25e   :  { %5356 = vst [vmem:[#allocation53_spill] sm:$0xff] %v4465_v28 }
 0x262   :  { %v3380_v27 = vpop.eup %3379 }
 0x263   :  { %v1040_v29 = vmul.f32 %v3380_v27, %v3378_v26  ;;  %v4459_v26 = vld [vmem:[#allocation8 + $0xe0] ss:$16 sps:$4 sm:$0xff]   ;;  %v4462_v27 = vld [vmem:[#allocation8 + $0xe8] ss:$16 sps:$4 sm:$0xff]  }
 0x264   :  { %v3382_v30 = vpop.eup %3381  ;;  %5354 = vst [vmem:[#allocation51_spill] sm:$0xff] %v4459_v26  ;;  %5355 = vst [vmem:[#allocation52_spill] sm:$0xff] %v4462_v27 }
 0x265   :  { %v4312_v32 = vsel %vm1045_vm10, %v1040_v29, %v4210_v15  ;;  %v1048_v33 = vsel %vm1045_vm10, %v1040_v29, 0.0  ;;  %v1163_v1 = vadd.f32 1.0, %v3382_v30  ;;  %v4468_v29 = vld [vmem:[#allocation10 + $0xc] ss:$16 sps:$4 sm:$0xff]  }
 0x266   :  { %v3384_v34 = vpop.eup %3383  ;;  %v1049_v35 = vpack.c.bf16 %v1048_v33, %v1048_v33  ;;  %v1210_v36 = vpack.c.bf16 %v4312_v32, %v4312_v32  ;;  %5357 = vst [vmem:[#allocation55_spill] sm:$0xff] %v4468_v29 }
 0x267   :  { %3387 = vrcp.f32 %v1163_v1  ;;  %v1172_v37 = vadd.f32 1.0, %v3384_v34  ;;  %v3386_v15 = vpop.eup %3385 }
 0x268   :  { %3164 = vst [vmem:[%s5169_s5 + $0x1] sm:$0x1] %v1049_v35  ;;  %3389 = vtanh.f32 %v1175_v31  ;;  %1244 = vmatmul.mubr.bf16.vlgmr.msra.gmra.mrb[16].mxu0 %v1210_v36  ;;  %1285 = vmatmul.mubr.bf16.vlgmr.msra.gmra.mrb[16].mxu1 %v1210_v36 }
 0x269   :  { %3391 = vrcp.f32 %v1172_v37  ;;  %1362 = vmatpush1.bf16.msra.mxu0 %v4024_v54  ;;  %1403 = vmatpush1.bf16.msra.mxu1 %v4026_v55 }
 0x26a   :  { %1363 = vmatprep.subr.bf16.mxu0 %v4030_v56  ;;  %1404 = vmatprep.subr.bf16.mxu1 %v4034_v57  ;;  %v1183_v57 = vadd.f32 1.0, %v3386_v15 }
 0x26b   :  { %1393 = vmatprep.mubr.bf16.mxu0 %v5303_v10  ;;  %1434 = vmatprep.mubr.bf16.mxu1 %v5303_v10 }
 0x26c   :  { %3393 = vrcp.f32 %v1183_v57 }
 0x26d   :  { %1364 = vmatpush1.bf16.msra.mxu0 %v4036_v58  ;;  %1405 = vmatpush1.bf16.msra.mxu1 %v4040_v59 }
 0x26e   :  { %1365 = vmatprep.subr.bf16.mxu0 %v4044_v60  ;;  %1406 = vmatprep.subr.bf16.mxu1 %v4046_v61  ;;  %v1194_v60 = vpop.permute.xlu1 %1193 }
 0x26f   :  { %vm1195_vm11 = vcmp.eq.s32.totalorder %v1194_v60, 1 }
 0x271   :  { %v3388_v54 = vpop.eup %3387  ;;  %1366 = vmatpush1.bf16.msra.mxu0 %v4050_v62  ;;  %1407 = vmatpush1.bf16.msra.mxu1 %v4052_v63 }
 0x272   :  { %v3390_v55 = vpop.eup %3389  ;;  %1367 = vmatprep.subr.bf16.mxu0 %v4056_v17  ;;  %1408 = vmatprep.subr.bf16.mxu1 %v5314_v3  ;;  %v5343_v17 = vld [vmem:[#allocation54_spill] sm:$0xff] }
 0x273   :  { %v3392_v56 = vpop.eup %3391  ;;  %v1187_v58 = vmul.f32 %v3390_v55, %v3388_v54 }
 0x274   :  { %v1186_v59 = vmul.f32 %v3392_v56, %v4237_v52 }
 0x275   :  { %1368 = vmatpush1.bf16.msra.mxu0 %v5315_v2  ;;  %1409 = vmatpush1.bf16.msra.mxu1 %v5316_v42 }
 0x276   :  { %1369 = vmatprep.subr.bf16.mxu0 %v5317_v51  ;;  %1410 = vmatprep.subr.bf16.mxu1 %v5318_v48  ;;  %v1188_v61 = vadd.f32 %v1187_v58, %v1186_v59  ;;  %v3394_v63 = vpop.eup %3393  ;;  %v5358_v58 = vld [vmem:[#allocation15_spill] sm:$0xff] }
 0x278   :  { %3395 = vtanh.f32 %v1188_v61  ;;  %v4341_v62 = vsel %vm1195_vm11, %v1188_v61, %v4237_v52  ;;  %v4364_v52 = vld [vmem:[#allocation8 + $0x4] ss:$16 sps:$4 sm:$0xff]  }
 0x279   :  { %1370 = vmatpush1.bf16.msra.mxu0 %v5319_v39  ;;  %1411 = vmatpush1.bf16.msra.mxu1 %v5320_v40  ;;  %v4379_v39 = vld [vmem:[#allocation8 + $0x24] ss:$16 sps:$4 sm:$0xff]   ;;  %v4382_v40 = vld [vmem:[#allocation8 + $0x2c] ss:$16 sps:$4 sm:$0xff]  }
 0x27a   :  { %1371 = vmatprep.subr.bf16.mxu0 %v5321_v49  ;;  %1412 = vmatprep.subr.bf16.mxu1 %v5322_v41  ;;  %v4387_v49 = vld [vmem:[#allocation8 + $0x20] ss:$16 sps:$4 sm:$0xff]   ;;  %v4390_v41 = vld [vmem:[#allocation8 + $0x28] ss:$16 sps:$4 sm:$0xff]  }
 0x27d   :  { %1372 = vmatpush1.bf16.msra.mxu0 %v5323_v45  ;;  %1413 = vmatpush1.bf16.msra.mxu1 %v5324_v47  ;;  %v4393_v45 = vld [vmem:[#allocation8 + $0x44] ss:$16 sps:$4 sm:$0xff]   ;;  %v4396_v47 = vld [vmem:[#allocation8 + $0x4c] ss:$16 sps:$4 sm:$0xff]  }
 0x27e   :  { %1373 = vmatprep.subr.bf16.mxu0 %v5325_v50  ;;  %1414 = vmatprep.subr.bf16.mxu1 %v5326_v44  ;;  %v4399_v50 = vld [vmem:[#allocation8 + $0x40] ss:$16 sps:$4 sm:$0xff]   ;;  %v4402_v44 = vld [vmem:[#allocation8 + $0x48] ss:$16 sps:$4 sm:$0xff]  }
 0x281   :  { %1374 = vmatpush1.bf16.msra.mxu0 %v4124_v12  ;;  %1415 = vmatpush1.bf16.msra.mxu1 %v5343_v17 }
 0x282   :  { %v3396_v3 = vpop.eup %3395  ;;  %1375 = vmatprep.subr.bf16.mxu0 %v4131_v13  ;;  %1416 = vmatprep.subr.bf16.mxu1 %v5327_v6  ;;  %v4367_v13 = vld [vmem:[#allocation8 + $0xc] ss:$16 sps:$4 sm:$0xff]   ;;  %v4405_v6 = vld [vmem:[#allocation8 + $0x64] ss:$16 sps:$4 sm:$0xff]  }
 0x283   :  { %v1190_v2 = vmul.f32 %v3396_v3, %v3394_v63 }
 0x285   :  { %1376 = vmatpush1.bf16.msra.mxu0 %v4136_v8  ;;  %1417 = vmatpush1.bf16.msra.mxu1 %v4141_v14  ;;  %v4359_v42 = vsel %vm1195_vm11, %v1190_v2, %v4255_v9  ;;  %v1198_v51 = vsel %vm1195_vm11, %v1190_v2, 0.0  ;;  %v4373_v8 = vld [vmem:[#allocation8] ss:$16 sps:$4 sm:$0xff]   ;;  %v4376_v14 = vld [vmem:[#allocation8 + $0x8] ss:$16 sps:$4 sm:$0xff]  }
 0x286   :  { %v1199_v48 = vpack.c.bf16 %v1198_v51, %v1198_v51  ;;  %v1360_v12 = vpack.c.bf16 %v4359_v42, %v4359_v42  ;;  %1517 = vmatprep.subr.bf16.mxu0 %v4364_v52  ;;  %1558 = vmatprep.subr.bf16.mxu1 %v4367_v13  ;;  %v4408_v9 = vld [vmem:[#allocation8 + $0x6c] ss:$16 sps:$4 sm:$0xff]  }
 0x288   :  { %3168 = vst [vmem:[%s5170_s6 + $0x6] sm:$0x1] %v1199_v48  ;;  %1394 = vmatmul.mubr.bf16.vlgmr.msra.gmra.mrb[20].mxu0 %v1360_v12  ;;  %1435 = vmatmul.mubr.bf16.vlgmr.msra.gmra.mrb[20].mxu1 %v1360_v12 }
 0x289   :  { %1518 = vmatpush1.bf16.msra.mxu0 %v4373_v8  ;;  %1559 = vmatpush1.bf16.msra.mxu1 %v4376_v14 }
 0x28a   :  { %1519 = vmatprep.subr.bf16.mxu0 %v4379_v39  ;;  %1560 = vmatprep.subr.bf16.mxu1 %v4382_v40 }
 0x28b   :  { %1549 = vmatprep.mubr.bf16.mxu0 %v5303_v10  ;;  %1590 = vmatprep.mubr.bf16.mxu1 %v5303_v10 }
 0x28d   :  { %1520 = vmatpush1.bf16.msra.mxu0 %v4387_v49  ;;  %1561 = vmatpush1.bf16.msra.mxu1 %v4390_v41 }
 0x28e   :  { %1521 = vmatprep.subr.bf16.mxu0 %v4393_v45  ;;  %1562 = vmatprep.subr.bf16.mxu1 %v4396_v47 }
 0x291   :  { %1522 = vmatpush1.bf16.msra.mxu0 %v4399_v50  ;;  %1563 = vmatpush1.bf16.msra.mxu1 %v4402_v44 }
 0x292   :  { %1523 = vmatprep.subr.bf16.mxu0 %v4405_v6  ;;  %1564 = vmatprep.subr.bf16.mxu1 %v4408_v9 }
 0x295   :  { %1524 = vmatpush1.bf16.msra.mxu0 %v4411_v38  ;;  %1565 = vmatpush1.bf16.msra.mxu1 %v4414_v53 }
 0x296   :  { %1525 = vmatprep.subr.bf16.mxu0 %v4417_v11  ;;  %1566 = vmatprep.subr.bf16.mxu1 %v4420_v43 }
 0x299   :  { %1526 = vmatpush1.bf16.msra.mxu0 %v4423_v16  ;;  %1567 = vmatpush1.bf16.msra.mxu1 %v4426_v0 }
 0x29a   :  { %1527 = vmatprep.subr.bf16.mxu0 %v4429_v4  ;;  %1568 = vmatprep.subr.bf16.mxu1 %v4432_v5 }
 0x29d   :  { %1528 = vmatpush1.bf16.msra.mxu0 %v4435_v7  ;;  %1569 = vmatpush1.bf16.msra.mxu1 %v4438_v18 }
 0x29e   :  { %1529 = vmatprep.subr.bf16.mxu0 %v4441_v19  ;;  %1570 = vmatprep.subr.bf16.mxu1 %v4444_v20 }
 0x2a1   :  { %1530 = vmatpush1.bf16.msra.mxu0 %v4447_v22  ;;  %1571 = vmatpush1.bf16.msra.mxu1 %v4450_v23 }
 0x2a2   :  { %1531 = vmatprep.subr.bf16.mxu0 %v4453_v24  ;;  %1572 = vmatprep.subr.bf16.mxu1 %v4456_v25 }
 0x2a5   :  { %1532 = vmatpush1.bf16.msra.mxu0 %v4459_v26  ;;  %1573 = vmatpush1.bf16.msra.mxu1 %v4462_v27 }
 0x2a6   :  { %1667 = vmatprep.subr.bf16.mxu0 %v4465_v28  ;;  %1708 = vmatprep.subr.bf16.mxu1 %v4468_v29 }
 0x33b   :  { %v1245_v30 = vpop.f32.mrb[16].mxu0  ;;  %v1286_v31 = vpop.f32.mrb[16].mxu1 }
 0x33c   :  { %v1247_v33 = vpop.f32.mrb[17].mxu0  ;;  %v1288_v1 = vpop.f32.mrb[17].mxu1 }
 0x33d   :  { %v1297_v34 = vcombine.low %v1245_v30, %v1247_v33  ;;  %v1298_v35 = vcombine.low %v1286_v31, %v1288_v1  ;;  %v1249_v36 = vpop.f32.mrb[18].mxu0  ;;  %v1290_v37 = vpop.f32.mrb[18].mxu1 }
 0x33e   :  { %v1250_v15 = vpop.f32.mrb[19].mxu0  ;;  %v1291_v54 = vpop.f32.mrb[19].mxu1 }
 0x33f   :  { %v1305_v55 = vrot.slane %v1297_v34, %v4197_v46  ;;  %v1312_v56 = vrot.slane %v1298_v35, %v4197_v46 }
 0x341   :  { %v1313_v57 = vcombine.low %v1305_v55, %v1312_v56 }
 0x343   :  { %v1315_v59 = vadd.f32 %v1313_v57, %v5358_v58 }
 0x345   :  { %v3171_v60 = vmul.f32 -1.442695, %v1315_v59  ;;  %v1323_v61 = vrot.slane %v1315_v59, 2  ;;  %v1334_v17 = vrot.slane %v1315_v59, 6  ;;  %v1331_v51 = vrot.slane %v1315_v59, 4 }
 0x347   :  { %3397 = vpow2.f32 %v3171_v60  ;;  %v3172_v63 = vmul.f32 -1.442695, %v1323_v61  ;;  %v3173_v3 = vmul.f32 -1.442695, %v1334_v17 }
 0x349   :  { %3399 = vpow2.f32 %v3172_v63 }
 0x34a   :  { %3401 = vpow2.f32 %v3173_v3 }
 0x351   :  { %v3398_v2 = vpop.eup %3397 }
 0x352   :  { %v1319_v48 = vadd.f32 1.0, %v3398_v2 }
 0x353   :  { %v3400_v12 = vpop.eup %3399 }
 0x354   :  { %3403 = vrcp.f32 %v1319_v48  ;;  %v1328_v30 = vadd.f32 1.0, %v3400_v12  ;;  %v3402_v35 = vpop.eup %3401 }
 0x355   :  { %3405 = vtanh.f32 %v1331_v51  ;;  %v1339_v63 = vadd.f32 1.0, %v3402_v35  ;;  %v5359_v51 = vld [vmem:[#allocation26_spill] sm:$0xff] }
 0x356   :  { %3407 = vrcp.f32 %v1328_v30  ;;  %v1350_v30 = vpop.permute.xlu0 %1349 }
 0x357   :  { %vm1351_vm12 = vcmp.eq.s32.totalorder %v1350_v30, 1  ;;  %3409 = vrcp.f32 %v1339_v63  ;;  %v4515_v30 = vld [vmem:[#allocation10 + $0x4c] ss:$16 sps:$4 sm:$0xff]  }
 0x35b   :  { %v1395_v31 = vpop.f32.mrb[20].mxu0  ;;  %v1436_v33 = vpop.f32.mrb[20].mxu1 }
 0x35c   :  { %v1397_v1 = vpop.f32.mrb[21].mxu0  ;;  %v1438_v34 = vpop.f32.mrb[21].mxu1 }
 0x35d   :  { %v1447_v36 = vcombine.low %v1395_v31, %v1397_v1  ;;  %v1448_v37 = vcombine.low %v1436_v33, %v1438_v34  ;;  %v1399_v15 = vpop.f32.mrb[22].mxu0  ;;  %v1440_v54 = vpop.f32.mrb[22].mxu1 }
 0x35e   :  { %v3404_v55 = vpop.eup %3403  ;;  %v1400_v56 = vpop.f32.mrb[23].mxu0 }
 0x35f   :  { %v1441_v57 = vpop.f32.mrb[23].mxu1  ;;  %v3406_v58 = vpop.eup %3405  ;;  %v1455_v59 = vrot.slane %v1447_v36, %v4197_v46  ;;  %v1462_v60 = vrot.slane %v1448_v37, %v4197_v46 }
 0x360   :  { %v3408_v61 = vpop.eup %3407  ;;  %v1343_v17 = vmul.f32 %v3406_v58, %v3404_v55 }
 0x361   :  { %v1463_v3 = vcombine.low %v1455_v59, %v1462_v60  ;;  %v1342_v2 = vmul.f32 %v3408_v61, %v4308_v21  ;;  %v3410_v36 = vpop.eup %3409 }
 0x363   :  { %v1465_v48 = vadd.f32 %v5359_v51, %v1463_v3  ;;  %v1344_v12 = vadd.f32 %v1343_v17, %v1342_v2  ;;  %v4492_v17 = vld [vmem:[#allocation10] ss:$16 sps:$4 sm:$0xff]   ;;  %v4498_v3 = vld [vmem:[#allocation10 + $0x24] ss:$16 sps:$4 sm:$0xff]   ;;  %v4501_v2 = vld [vmem:[#allocation10 + $0x2c] ss:$16 sps:$4 sm:$0xff]  }
 0x364   :  { %v4506_v51 = vld [vmem:[#allocation10 + $0x20] ss:$16 sps:$4 sm:$0xff]  }
 0x365   :  { %v3175_v31 = vmul.f32 -1.442695, %v1465_v48  ;;  %v1473_v33 = vrot.slane %v1465_v48, 2  ;;  %3411 = vtanh.f32 %v1344_v12  ;;  %v4480_v1 = vsel %vm1351_vm12, %v1344_v12, %v4308_v21  ;;  %v4512_v12 = vld [vmem:[#allocation10 + $0x44] ss:$16 sps:$4 sm:$0xff]  }
 0x366   :  { %v1484_v35 = vrot.slane %v1465_v48, 6  ;;  %v1481_v55 = vrot.slane %v1465_v48, 4  ;;  %v4509_v48 = vld [vmem:[#allocation10 + $0x28] ss:$16 sps:$4 sm:$0xff]  }
 0x367   :  { %3413 = vpow2.f32 %v3175_v31  ;;  %v3176_v34 = vmul.f32 -1.442695, %v1473_v33 }
 0x368   :  { %v3177_v37 = vmul.f32 -1.442695, %v1484_v35  ;;  %v4518_v35 = vld [vmem:[#allocation10 + $0x40] ss:$16 sps:$4 sm:$0xff]  }
 0x369   :  { %3415 = vpow2.f32 %v3176_v34 }
 0x36a   :  { %3417 = vpow2.f32 %v3177_v37 }
 0x36f   :  { %v3412_v15 = vpop.eup %3411 }
 0x370   :  { %v1346_v56 = vmul.f32 %v3412_v15, %v3410_v36  ;;  %v4521_v36 = vld [vmem:[#allocation10 + $0x48] ss:$16 sps:$4 sm:$0xff]  }
 0x371   :  { %v3414_v54 = vpop.eup %3413 }
 0x372   :  { %v1469_v57 = vadd.f32 1.0, %v3414_v54  ;;  %v4484_v59 = vsel %vm1351_vm12, %v1346_v56, %v4312_v32  ;;  %v1354_v21 = vsel %vm1351_vm12, %v1346_v56, 0.0  ;;  %v4495_v32 = vld [vmem:[#allocation10 + $0x8] ss:$16 sps:$4 sm:$0xff]   ;;  %v4524_v54 = vld [vmem:[#allocation10 + $0x64] ss:$16 sps:$4 sm:$0xff]  }
 0x373   :  { %v3416_v58 = vpop.eup %3415  ;;  %v1355_v61 = vpack.c.bf16 %v1354_v21, %v1354_v21  ;;  %v1516_v63 = vpack.c.bf16 %v4484_v59, %v4484_v59  ;;  %v4531_v21 = vld [vmem:[#allocation10 + $0x60] ss:$16 sps:$4 sm:$0xff]  }
 0x374   :  { %3419 = vrcp.f32 %v1469_v57  ;;  %v1478_v60 = vadd.f32 1.0, %v3416_v58  ;;  %v3418_v31 = vpop.eup %3417  ;;  %v1500_v58 = vpop.permute.xlu1 %1499 }
 0x375   :  { %3421 = vtanh.f32 %v1481_v55  ;;  %3174 = vst [vmem:[%s5169_s5 + $0x2] sm:$0x1] %v1355_v61  ;;  %1550 = vmatmul.mubr.bf16.vlgmr.msra.gmra.mrb[24].mxu0 %v1516_v63  ;;  %1591 = vmatmul.mubr.bf16.vlgmr.msra.gmra.mrb[24].mxu1 %v1516_v63  ;;  %v1489_v15 = vadd.f32 1.0, %v3418_v31  ;;  %v4527_v55 = vld [vmem:[#allocation10 + $0x6c] ss:$16 sps:$4 sm:$0xff]   ;;  %vm1501_vm13 = vcmp.eq.s32.totalorder %v1500_v58, 1 }
 0x376   :  { %3423 = vrcp.f32 %v1478_v60  ;;  %1668 = vmatpush1.bf16.msra.mxu0 %v4492_v17  ;;  %1709 = vmatpush1.bf16.msra.mxu1 %v4495_v32  ;;  %v4534_v60 = vld [vmem:[#allocation10 + $0x68] ss:$16 sps:$4 sm:$0xff]   ;;  %v4537_v63 = vld [vmem:[#allocation10 + $0x84] ss:$16 sps:$4 sm:$0xff]   ;;  %v4540_v31 = vld [vmem:[#allocation10 + $0x8c] ss:$16 sps:$4 sm:$0xff]  }
 0x377   :  { %1669 = vmatprep.subr.bf16.mxu0 %v4498_v3  ;;  %1710 = vmatprep.subr.bf16.mxu1 %v4501_v2  ;;  %5360 = vst [vmem:[#allocation28_spill] sm:$0xff] %v4534_v60  ;;  %3425 = vrcp.f32 %v1489_v15  ;;  %5361 = vst [vmem:[#allocation29_spill] sm:$0xff] %v4537_v63  ;;  %v4553_v15 = vld [vmem:[#allocation10 + $0xa4] ss:$16 sps:$4 sm:$0xff]  }
 0x378   :  { %1699 = vmatprep.mubr.bf16.mxu0 %v5303_v10  ;;  %1740 = vmatprep.mubr.bf16.mxu1 %v5303_v10  ;;  %5362 = vst [vmem:[#allocation30_spill] sm:$0xff] %v4540_v31  ;;  %5365 = vst [vmem:[#allocation33_spill] sm:$0xff] %v4553_v15 }
 0x37a   :  { %1670 = vmatpush1.bf16.msra.mxu0 %v4506_v51  ;;  %1711 = vmatpush1.bf16.msra.mxu1 %v4509_v48 }
 0x37b   :  { %1671 = vmatprep.subr.bf16.mxu0 %v4512_v12  ;;  %1712 = vmatprep.subr.bf16.mxu1 %v4515_v30 }
 0x37e   :  { %v3420_v33 = vpop.eup %3419  ;;  %1672 = vmatpush1.bf16.msra.mxu0 %v4518_v35  ;;  %1713 = vmatpush1.bf16.msra.mxu1 %v4521_v36 }
 0x37f   :  { %v3422_v34 = vpop.eup %3421  ;;  %1673 = vmatprep.subr.bf16.mxu0 %v4524_v54  ;;  %1714 = vmatprep.subr.bf16.mxu1 %v4527_v55 }
 0x380   :  { %v3424_v37 = vpop.eup %3423  ;;  %v1493_v56 = vmul.f32 %v3422_v34, %v3420_v33  ;;  %v4547_v34 = vld [vmem:[#allocation10 + $0x80] ss:$16 sps:$4 sm:$0xff]  }
 0x381   :  { %v1492_v57 = vmul.f32 %v3424_v37, %v4341_v62  ;;  %5363 = vst [vmem:[#allocation31_spill] sm:$0xff] %v4547_v34  ;;  %v4550_v37 = vld [vmem:[#allocation10 + $0x88] ss:$16 sps:$4 sm:$0xff]  }
 0x382   :  { %1674 = vmatpush1.bf16.msra.mxu0 %v4531_v21  ;;  %1715 = vmatpush1.bf16.msra.mxu1 %v4534_v60  ;;  %5364 = vst [vmem:[#allocation32_spill] sm:$0xff] %v4550_v37 }
 0x383   :  { %v1494_v61 = vadd.f32 %v1493_v56, %v1492_v57  ;;  %1675 = vmatprep.subr.bf16.mxu0 %v4537_v63  ;;  %1716 = vmatprep.subr.bf16.mxu1 %v4540_v31  ;;  %v4556_v56 = vld [vmem:[#allocation10 + $0xac] ss:$16 sps:$4 sm:$0xff]   ;;  %v4559_v57 = vld [vmem:[#allocation10 + $0xa0] ss:$16 sps:$4 sm:$0xff]  }
 0x384   :  { %5366 = vst [vmem:[#allocation34_spill] sm:$0xff] %v4556_v56  ;;  %5367 = vst [vmem:[#allocation35_spill] sm:$0xff] %v4559_v57  ;;  %v4571_v31 = vld [vmem:[#allocation10 + $0xc0] ss:$16 sps:$4 sm:$0xff]  }
 0x385   :  { %3427 = vtanh.f32 %v1494_v61  ;;  %v4545_v33 = vsel %vm1501_vm13, %v1494_v61, %v4341_v62  ;;  %v4562_v62 = vld [vmem:[#allocation10 + $0xa8] ss:$16 sps:$4 sm:$0xff]   ;;  %v4565_v61 = vld [vmem:[#allocation10 + $0xc4] ss:$16 sps:$4 sm:$0xff]   ;;  %5371 = vst [vmem:[#allocation39_spill] sm:$0xff] %v4571_v31 }
 0x386   :  { %1676 = vmatpush1.bf16.msra.mxu0 %v4547_v34  ;;  %1717 = vmatpush1.bf16.msra.mxu1 %v4550_v37  ;;  %5368 = vst [vmem:[#allocation36_spill] sm:$0xff] %v4562_v62  ;;  %5369 = vst [vmem:[#allocation37_spill] sm:$0xff] %v4565_v61  ;;  %v4568_v37 = vld [vmem:[#allocation10 + $0xcc] ss:$16 sps:$4 sm:$0xff]  }
 0x387   :  { %1677 = vmatprep.subr.bf16.mxu0 %v4553_v15  ;;  %1718 = vmatprep.subr.bf16.mxu1 %v4556_v56  ;;  %5370 = vst [vmem:[#allocation38_spill] sm:$0xff] %v4568_v37  ;;  %v3426_v15 = vpop.eup %3425  ;;  %v4574_v56 = vld [vmem:[#allocation10 + $0xc8] ss:$16 sps:$4 sm:$0xff]  }
 0x388   :  { %5372 = vst [vmem:[#allocation40_spill] sm:$0xff] %v4574_v56 }
 0x38a   :  { %1678 = vmatpush1.bf16.msra.mxu0 %v4559_v57  ;;  %1719 = vmatpush1.bf16.msra.mxu1 %v4562_v62  ;;  %v4577_v57 = vld [vmem:[#allocation10 + $0xe4] ss:$16 sps:$4 sm:$0xff]   ;;  %v4580_v62 = vld [vmem:[#allocation10 + $0xec] ss:$16 sps:$4 sm:$0xff]  }
 0x38b   :  { %1679 = vmatprep.subr.bf16.mxu0 %v4565_v61  ;;  %1720 = vmatprep.subr.bf16.mxu1 %v4568_v37  ;;  %5373 = vst [vmem:[#allocation14_spill] sm:$0xff] %v4577_v57 }
 0x38e   :  { %1680 = vmatpush1.bf16.msra.mxu0 %v4571_v31  ;;  %1721 = vmatpush1.bf16.msra.mxu1 %v4574_v56  ;;  %v4588_v31 = vld [vmem:[#allocation10 + $0xe0] ss:$16 sps:$4 sm:$0xff]   ;;  %v4591_v56 = vld [vmem:[#allocation10 + $0xe8] ss:$16 sps:$4 sm:$0xff]  }
 0x38f   :  { %v3428_v34 = vpop.eup %3427  ;;  %1681 = vmatprep.subr.bf16.mxu0 %v4577_v57  ;;  %1722 = vmatprep.subr.bf16.mxu1 %v4580_v62 }
 0x390   :  { %v1496_v61 = vmul.f32 %v3428_v34, %v3426_v15 }
 0x392   :  { %v4585_v37 = vsel %vm1501_vm13, %v1496_v61, %v4359_v42  ;;  %v1504_v63 = vsel %vm1501_vm13, %v1496_v61, 0.0  ;;  %1682 = vmatpush1.bf16.msra.mxu0 %v4588_v31  ;;  %1723 = vmatpush1.bf16.msra.mxu1 %v4591_v56 }
 0x393   :  { %v1505_v57 = vpack.c.bf16 %v1504_v63, %v1504_v63  ;;  %v1666_v60 = vpack.c.bf16 %v4585_v37, %v4585_v37  ;;  %1823 = vmatprep.subr.bf16.mxu0 %v4364_v52  ;;  %1864 = vmatprep.subr.bf16.mxu1 %v4367_v13 }
 0x395   :  { %3178 = vst [vmem:[%s5170_s6 + $0x5] sm:$0x1] %v1505_v57  ;;  %1700 = vmatmul.mubr.bf16.vlgmr.msra.gmra.mrb[28].mxu0 %v1666_v60  ;;  %1741 = vmatmul.mubr.bf16.vlgmr.msra.gmra.mrb[28].mxu1 %v1666_v60 }
 0x396   :  { %1824 = vmatpush1.bf16.msra.mxu0 %v4373_v8  ;;  %1865 = vmatpush1.bf16.msra.mxu1 %v4376_v14 }
 0x397   :  { %1825 = vmatprep.subr.bf16.mxu0 %v4379_v39  ;;  %1866 = vmatprep.subr.bf16.mxu1 %v4382_v40 }
 0x398   :  { %1855 = vmatprep.mubr.bf16.mxu0 %v5303_v10  ;;  %1896 = vmatprep.mubr.bf16.mxu1 %v5303_v10 }
 0x39a   :  { %1826 = vmatpush1.bf16.msra.mxu0 %v4387_v49  ;;  %1867 = vmatpush1.bf16.msra.mxu1 %v4390_v41 }
 0x39b   :  { %1827 = vmatprep.subr.bf16.mxu0 %v4393_v45  ;;  %1868 = vmatprep.subr.bf16.mxu1 %v4396_v47 }
 0x39e   :  { %1828 = vmatpush1.bf16.msra.mxu0 %v4399_v50  ;;  %1869 = vmatpush1.bf16.msra.mxu1 %v4402_v44 }
 0x39f   :  { %1829 = vmatprep.subr.bf16.mxu0 %v4405_v6  ;;  %1870 = vmatprep.subr.bf16.mxu1 %v4408_v9 }
 0x3a2   :  { %1830 = vmatpush1.bf16.msra.mxu0 %v4411_v38  ;;  %1871 = vmatpush1.bf16.msra.mxu1 %v4414_v53 }
 0x3a3   :  { %1831 = vmatprep.subr.bf16.mxu0 %v4417_v11  ;;  %1872 = vmatprep.subr.bf16.mxu1 %v4420_v43 }
 0x3a6   :  { %1832 = vmatpush1.bf16.msra.mxu0 %v4423_v16  ;;  %1873 = vmatpush1.bf16.msra.mxu1 %v4426_v0 }
 0x3a7   :  { %1833 = vmatprep.subr.bf16.mxu0 %v4429_v4  ;;  %1874 = vmatprep.subr.bf16.mxu1 %v4432_v5  ;;  %v5375_v5 = vld [vmem:[#allocation25_spill] sm:$0xff] }
 0x3aa   :  { %1834 = vmatpush1.bf16.msra.mxu0 %v4435_v7  ;;  %1875 = vmatpush1.bf16.msra.mxu1 %v4438_v18 }
 0x3ab   :  { %1835 = vmatprep.subr.bf16.mxu0 %v4441_v19  ;;  %1876 = vmatprep.subr.bf16.mxu1 %v4444_v20 }
 0x3ae   :  { %1836 = vmatpush1.bf16.msra.mxu0 %v4447_v22  ;;  %1877 = vmatpush1.bf16.msra.mxu1 %v4450_v23 }
 0x3af   :  { %1837 = vmatprep.subr.bf16.mxu0 %v4453_v24  ;;  %1878 = vmatprep.subr.bf16.mxu1 %v4456_v25 }
 0x3b2   :  { %1838 = vmatpush1.bf16.msra.mxu0 %v4459_v26  ;;  %1879 = vmatpush1.bf16.msra.mxu1 %v4462_v27  ;;  %v5374_v27 = vld [vmem:[#allocation16_spill] sm:$0xff] }
 0x3b3   :  { %1973 = vmatprep.subr.bf16.mxu0 %v4465_v28  ;;  %2014 = vmatprep.subr.bf16.mxu1 %v4468_v29 }
 0x448   :  { %v1551_v42 = vpop.f32.mrb[24].mxu0  ;;  %v1592_v58 = vpop.f32.mrb[24].mxu1 }
 0x449   :  { %v1553_v60 = vpop.f32.mrb[25].mxu0  ;;  %v1594_v63 = vpop.f32.mrb[25].mxu1 }
 0x44a   :  { %v1603_v34 = vcombine.low %v1551_v42, %v1553_v60  ;;  %v1604_v15 = vcombine.low %v1592_v58, %v1594_v63  ;;  %v1555_v57 = vpop.f32.mrb[26].mxu0  ;;  %v1596_v61 = vpop.f32.mrb[26].mxu1 }
 0x44b   :  { %v1556_v23 = vpop.f32.mrb[27].mxu0  ;;  %v1597_v24 = vpop.f32.mrb[27].mxu1 }
 0x44c   :  { %v1611_v25 = vrot.slane %v1603_v34, %v4197_v46  ;;  %v1618_v26 = vrot.slane %v1604_v15, %v4197_v46 }
 0x44e   :  { %v1619_v22 = vcombine.low %v1611_v25, %v1618_v26 }
 0x450   :  { %v1621_v20 = vadd.f32 %v1619_v22, %v5374_v27 }
 0x452   :  { %v3181_v28 = vmul.f32 -1.442695, %v1621_v20  ;;  %v1629_v19 = vrot.slane %v1621_v20, 2  ;;  %v1640_v18 = vrot.slane %v1621_v20, 6  ;;  %v1637_v58 = vrot.slane %v1621_v20, 4 }
 0x454   :  { %3429 = vpow2.f32 %v3181_v28  ;;  %v3182_v29 = vmul.f32 -1.442695, %v1629_v19  ;;  %v3183_v7 = vmul.f32 -1.442695, %v1640_v18 }
 0x456   :  { %3431 = vpow2.f32 %v3182_v29 }
 0x457   :  { %3433 = vpow2.f32 %v3183_v7 }
 0x45e   :  { %v3430_v42 = vpop.eup %3429 }
 0x45f   :  { %v1625_v60 = vadd.f32 1.0, %v3430_v42 }
 0x460   :  { %v3432_v63 = vpop.eup %3431 }
 0x461   :  { %3435 = vrcp.f32 %v1625_v60  ;;  %v1634_v23 = vadd.f32 1.0, %v3432_v63  ;;  %v3434_v27 = vpop.eup %3433 }
 0x462   :  { %3437 = vtanh.f32 %v1637_v58  ;;  %v1645_v58 = vadd.f32 1.0, %v3434_v27 }
 0x463   :  { %3439 = vrcp.f32 %v1634_v23 }
 0x464   :  { %3441 = vrcp.f32 %v1645_v58 }
 0x468   :  { %v1701_v24 = vpop.f32.mrb[28].mxu0  ;;  %v1742_v25 = vpop.f32.mrb[28].mxu1 }
 0x469   :  { %v1703_v26 = vpop.f32.mrb[29].mxu0  ;;  %v1744_v22 = vpop.f32.mrb[29].mxu1 }
 0x46a   :  { %v1753_v34 = vcombine.low %v1701_v24, %v1703_v26  ;;  %v1754_v28 = vcombine.low %v1742_v25, %v1744_v22  ;;  %v1705_v19 = vpop.f32.mrb[30].mxu0  ;;  %v1746_v29 = vpop.f32.mrb[30].mxu1 }
 0x46b   :  { %v3436_v15 = vpop.eup %3435  ;;  %v1706_v18 = vpop.f32.mrb[31].mxu0 }
 0x46c   :  { %v1747_v57 = vpop.f32.mrb[31].mxu1  ;;  %v3438_v20 = vpop.eup %3437  ;;  %v1761_v61 = vrot.slane %v1753_v34, %v4197_v46  ;;  %v1768_v7 = vrot.slane %v1754_v28, %v4197_v46 }
 0x46d   :  { %v3440_v42 = vpop.eup %3439  ;;  %v1649_v60 = vmul.f32 %v3438_v20, %v3436_v15  ;;  %v1656_v25 = vpop.permute.xlu0 %1655 }
 0x46e   :  { %v1769_v63 = vcombine.low %v1761_v61, %v1768_v7  ;;  %v1648_v23 = vmul.f32 %v3440_v42, %v4480_v1  ;;  %vm1657_vm14 = vcmp.eq.s32.totalorder %v1656_v25, 1  ;;  %v3442_v19 = vpop.eup %3441 }
 0x470   :  { %v1771_v4 = vadd.f32 %v5375_v5, %v1769_v63  ;;  %v1650_v24 = vadd.f32 %v1649_v60, %v1648_v23 }
 0x472   :  { %v3185_v26 = vmul.f32 -1.442695, %v1771_v4  ;;  %v1779_v22 = vrot.slane %v1771_v4, 2  ;;  %3443 = vtanh.f32 %v1650_v24  ;;  %v4644_v34 = vsel %vm1657_vm14, %v1650_v24, %v4480_v1 }
 0x473   :  { %v1790_v27 = vrot.slane %v1771_v4, 6  ;;  %v1787_v5 = vrot.slane %v1771_v4, 4 }
 0x474   :  { %3445 = vpow2.f32 %v3185_v26  ;;  %v3186_v28 = vmul.f32 -1.442695, %v1779_v22  ;;  %v1806_v22 = vpop.permute.xlu1 %1805 }
 0x475   :  { %v3187_v29 = vmul.f32 -1.442695, %v1790_v27  ;;  %vm1807_vm15 = vcmp.eq.s32.totalorder %v1806_v22, 1 }
 0x476   :  { %3447 = vpow2.f32 %v3186_v28  ;;  %v5376_v28 = vld [vmem:[#allocation28_spill] sm:$0xff] }
 0x477   :  { %3449 = vpow2.f32 %v3187_v29  ;;  %v5378_v29 = vld [vmem:[#allocation30_spill] sm:$0xff] }
 0x47c   :  { %v3444_v15 = vpop.eup %3443 }
 0x47d   :  { %v1652_v57 = vmul.f32 %v3444_v15, %v3442_v19  ;;  %v5377_v19 = vld [vmem:[#allocation29_spill] sm:$0xff] }
 0x47e   :  { %v3446_v18 = vpop.eup %3445 }
 0x47f   :  { %v1775_v20 = vadd.f32 1.0, %v3446_v18  ;;  %v4648_v7 = vsel %vm1657_vm14, %v1652_v57, %v4484_v59  ;;  %v1660_v1 = vsel %vm1657_vm14, %v1652_v57, 0.0  ;;  %v5379_v18 = vld [vmem:[#allocation31_spill] sm:$0xff]  ;;  %v5381_v57 = vld [vmem:[#allocation33_spill] sm:$0xff] }
 0x480   :  { %v3448_v61 = vpop.eup %3447  ;;  %v1661_v58 = vpack.c.bf16 %v1660_v1, %v1660_v1  ;;  %v1822_v60 = vpack.c.bf16 %v4648_v7, %v4648_v7  ;;  %v5384_v1 = vld [vmem:[#allocation36_spill] sm:$0xff] }
 0x481   :  { %3451 = vrcp.f32 %v1775_v20  ;;  %v1784_v42 = vadd.f32 1.0, %v3448_v61  ;;  %v3450_v4 = vpop.eup %3449  ;;  %v5382_v20 = vld [vmem:[#allocation34_spill] sm:$0xff]  ;;  %v5383_v61 = vld [vmem:[#allocation35_spill] sm:$0xff] }
 0x482   :  { %3453 = vtanh.f32 %v1787_v5  ;;  %3184 = vst [vmem:[%s5169_s5 + $0x3] sm:$0x1] %v1661_v58  ;;  %1856 = vmatmul.mubr.bf16.vlgmr.msra.gmra.mrb[32].mxu0 %v1822_v60  ;;  %1897 = vmatmul.mubr.bf16.vlgmr.msra.gmra.mrb[32].mxu1 %v1822_v60  ;;  %v1795_v24 = vadd.f32 1.0, %v3450_v4  ;;  %v5380_v5 = vld [vmem:[#allocation32_spill] sm:$0xff]  ;;  %v5386_v58 = vld [vmem:[#allocation38_spill] sm:$0xff] }
 0x483   :  { %3455 = vrcp.f32 %v1784_v42  ;;  %1974 = vmatpush1.bf16.msra.mxu0 %v4492_v17  ;;  %2015 = vmatpush1.bf16.msra.mxu1 %v4495_v32  ;;  %v5385_v42 = vld [vmem:[#allocation37_spill] sm:$0xff] }
 0x484   :  { %1975 = vmatprep.subr.bf16.mxu0 %v4498_v3  ;;  %2016 = vmatprep.subr.bf16.mxu1 %v4501_v2  ;;  %3457 = vrcp.f32 %v1795_v24 }
 0x485   :  { %2005 = vmatprep.mubr.bf16.mxu0 %v5303_v10  ;;  %2046 = vmatprep.mubr.bf16.mxu1 %v5303_v10 }
 0x487   :  { %1976 = vmatpush1.bf16.msra.mxu0 %v4506_v51  ;;  %2017 = vmatpush1.bf16.msra.mxu1 %v4509_v48 }
 0x488   :  { %1977 = vmatprep.subr.bf16.mxu0 %v4512_v12  ;;  %2018 = vmatprep.subr.bf16.mxu1 %v4515_v30 }
 0x48b   :  { %v3452_v59 = vpop.eup %3451  ;;  %1978 = vmatpush1.bf16.msra.mxu0 %v4518_v35  ;;  %2019 = vmatpush1.bf16.msra.mxu1 %v4521_v36 }
 0x48c   :  { %v3454_v63 = vpop.eup %3453  ;;  %1979 = vmatprep.subr.bf16.mxu0 %v4524_v54  ;;  %2020 = vmatprep.subr.bf16.mxu1 %v4527_v55 }
 0x48d   :  { %v3456_v23 = vpop.eup %3455  ;;  %v1799_v25 = vmul.f32 %v3454_v63, %v3452_v59  ;;  %v5388_v59 = vld [vmem:[#allocation40_spill] sm:$0xff]  ;;  %v5389_v63 = vld [vmem:[#allocation14_spill] sm:$0xff] }
 0x48e   :  { %v1798_v26 = vmul.f32 %v3456_v23, %v4545_v33  ;;  %v3458_v60 = vpop.eup %3457 }
 0x48f   :  { %1980 = vmatpush1.bf16.msra.mxu0 %v4531_v21  ;;  %2021 = vmatpush1.bf16.msra.mxu1 %v5376_v28 }
 0x490   :  { %v1800_v27 = vadd.f32 %v1799_v25, %v1798_v26  ;;  %1981 = vmatprep.subr.bf16.mxu0 %v5377_v19  ;;  %2022 = vmatprep.subr.bf16.mxu1 %v5378_v29 }
 0x492   :  { %3459 = vtanh.f32 %v1800_v27  ;;  %v4677_v15 = vsel %vm1807_vm15, %v1800_v27, %v4545_v33  ;;  %v5387_v33 = vld [vmem:[#allocation39_spill] sm:$0xff] }
 0x493   :  { %1982 = vmatpush1.bf16.msra.mxu0 %v5379_v18  ;;  %2023 = vmatpush1.bf16.msra.mxu1 %v5380_v5 }
 0x494   :  { %1983 = vmatprep.subr.bf16.mxu0 %v5381_v57  ;;  %2024 = vmatprep.subr.bf16.mxu1 %v5382_v20 }
 0x497   :  { %1984 = vmatpush1.bf16.msra.mxu0 %v5383_v61  ;;  %2025 = vmatpush1.bf16.msra.mxu1 %v5384_v1 }
 0x498   :  { %1985 = vmatprep.subr.bf16.mxu0 %v5385_v42  ;;  %2026 = vmatprep.subr.bf16.mxu1 %v5386_v58 }
 0x49b   :  { %1986 = vmatpush1.bf16.msra.mxu0 %v5387_v33  ;;  %2027 = vmatpush1.bf16.msra.mxu1 %v5388_v59 }
 0x49c   :  { %v3460_v4 = vpop.eup %3459  ;;  %1987 = vmatprep.subr.bf16.mxu0 %v5389_v63  ;;  %2028 = vmatprep.subr.bf16.mxu1 %v4580_v62 }
 0x49d   :  { %v1802_v23 = vmul.f32 %v3460_v4, %v3458_v60 }
 0x49f   :  { %v4693_v24 = vsel %vm1807_vm15, %v1802_v23, %v4585_v37  ;;  %v1810_v25 = vsel %vm1807_vm15, %v1802_v23, 0.0  ;;  %1988 = vmatpush1.bf16.msra.mxu0 %v4588_v31  ;;  %2029 = vmatpush1.bf16.msra.mxu1 %v4591_v56 }
 0x4a0   :  { %v1811_v26 = vpack.c.bf16 %v1810_v25, %v1810_v25  ;;  %v1972_v27 = vpack.c.bf16 %v4693_v24, %v4693_v24  ;;  %2129 = vmatprep.subr.bf16.mxu0 %v4364_v52  ;;  %2170 = vmatprep.subr.bf16.mxu1 %v4367_v13  ;;  %v5390_v52 = vld [vmem:[#allocation41_spill] sm:$0xff]  ;;  %v5391_v13 = vld [vmem:[#allocation42_spill] sm:$0xff] }
 0x4a2   :  { %3188 = vst [vmem:[%s5170_s6 + $0x4] sm:$0x1] %v1811_v26  ;;  %2006 = vmatmul.mubr.bf16.vlgmr.msra.gmra.mrb[36].mxu0 %v1972_v27  ;;  %2047 = vmatmul.mubr.bf16.vlgmr.msra.gmra.mrb[36].mxu1 %v1972_v27  ;;  %v5404_v27 = vld [vmem:[#allocation17_spill] sm:$0xff] }
 0x4a3   :  { %2130 = vmatpush1.bf16.msra.mxu0 %v4373_v8  ;;  %2171 = vmatpush1.bf16.msra.mxu1 %v4376_v14  ;;  %v5392_v8 = vld [vmem:[#allocation43_spill] sm:$0xff]  ;;  %v5393_v14 = vld [vmem:[#allocation44_spill] sm:$0xff] }
 0x4a4   :  { %2131 = vmatprep.subr.bf16.mxu0 %v4379_v39  ;;  %2172 = vmatprep.subr.bf16.mxu1 %v4382_v40  ;;  %v5394_v39 = vld [vmem:[#allocation45_spill] sm:$0xff]  ;;  %v5395_v40 = vld [vmem:[#allocation46_spill] sm:$0xff] }
 0x4a5   :  { %2161 = vmatprep.mubr.bf16.mxu0 %v5303_v10  ;;  %2202 = vmatprep.mubr.bf16.mxu1 %v5303_v10 }
 0x4a7   :  { %2132 = vmatpush1.bf16.msra.mxu0 %v4387_v49  ;;  %2173 = vmatpush1.bf16.msra.mxu1 %v4390_v41  ;;  %v5396_v49 = vld [vmem:[#allocation47_spill] sm:$0xff]  ;;  %v5397_v41 = vld [vmem:[#allocation48_spill] sm:$0xff] }
 0x4a8   :  { %2133 = vmatprep.subr.bf16.mxu0 %v4393_v45  ;;  %2174 = vmatprep.subr.bf16.mxu1 %v4396_v47  ;;  %v5398_v45 = vld [vmem:[#allocation49_spill] sm:$0xff]  ;;  %v5399_v47 = vld [vmem:[#allocation50_spill] sm:$0xff] }
 0x4ab   :  { %2134 = vmatpush1.bf16.msra.mxu0 %v4399_v50  ;;  %2175 = vmatpush1.bf16.msra.mxu1 %v4402_v44  ;;  %v5400_v50 = vld [vmem:[#allocation51_spill] sm:$0xff]  ;;  %v5401_v44 = vld [vmem:[#allocation52_spill] sm:$0xff] }
 0x4ac   :  { %2135 = vmatprep.subr.bf16.mxu0 %v4405_v6  ;;  %2176 = vmatprep.subr.bf16.mxu1 %v4408_v9  ;;  %v5402_v6 = vld [vmem:[#allocation53_spill] sm:$0xff]  ;;  %v5403_v9 = vld [vmem:[#allocation55_spill] sm:$0xff] }
 0x4af   :  { %2136 = vmatpush1.bf16.msra.mxu0 %v4411_v38  ;;  %2177 = vmatpush1.bf16.msra.mxu1 %v4414_v53 }
 0x4b0   :  { %2137 = vmatprep.subr.bf16.mxu0 %v4417_v11  ;;  %2178 = vmatprep.subr.bf16.mxu1 %v4420_v43 }
 0x4b3   :  { %2138 = vmatpush1.bf16.msra.mxu0 %v4423_v16  ;;  %2179 = vmatpush1.bf16.msra.mxu1 %v4426_v0 }
 0x4b4   :  { %2139 = vmatprep.subr.bf16.mxu0 %v5390_v52  ;;  %2180 = vmatprep.subr.bf16.mxu1 %v5391_v13 }
 0x4b7   :  { %2140 = vmatpush1.bf16.msra.mxu0 %v5392_v8  ;;  %2181 = vmatpush1.bf16.msra.mxu1 %v5393_v14 }
 0x4b8   :  { %2141 = vmatprep.subr.bf16.mxu0 %v5394_v39  ;;  %2182 = vmatprep.subr.bf16.mxu1 %v5395_v40 }
 0x4bb   :  { %2142 = vmatpush1.bf16.msra.mxu0 %v5396_v49  ;;  %2183 = vmatpush1.bf16.msra.mxu1 %v5397_v41 }
 0x4bc   :  { %2143 = vmatprep.subr.bf16.mxu0 %v5398_v45  ;;  %2184 = vmatprep.subr.bf16.mxu1 %v5399_v47 }
 0x4bf   :  { %2144 = vmatpush1.bf16.msra.mxu0 %v5400_v50  ;;  %2185 = vmatpush1.bf16.msra.mxu1 %v5401_v44 }
 0x4c0   :  { %2279 = vmatprep.subr.bf16.mxu0 %v5402_v6  ;;  %2320 = vmatprep.subr.bf16.mxu1 %v5403_v9 }
 0x555   :  { %v1857_v38 = vpop.f32.mrb[32].mxu0  ;;  %v1898_v53 = vpop.f32.mrb[32].mxu1 }
 0x556   :  { %v1859_v11 = vpop.f32.mrb[33].mxu0  ;;  %v1900_v43 = vpop.f32.mrb[33].mxu1 }
 0x557   :  { %v1909_v16 = vcombine.low %v1857_v38, %v1859_v11  ;;  %v1910_v0 = vcombine.low %v1898_v53, %v1900_v43  ;;  %v1861_v37 = vpop.f32.mrb[34].mxu0  ;;  %v1902_v22 = vpop.f32.mrb[34].mxu1 }
 0x558   :  { %v1862_v60 = vpop.f32.mrb[35].mxu0  ;;  %v1903_v4 = vpop.f32.mrb[35].mxu1 }
 0x559   :  { %v1917_v23 = vrot.slane %v1909_v16, %v4197_v46  ;;  %v1924_v25 = vrot.slane %v1910_v0, %v4197_v46 }
 0x55b   :  { %v1925_v26 = vcombine.low %v1917_v23, %v1924_v25 }
 0x55d   :  { %v1927_v52 = vadd.f32 %v1925_v26, %v5404_v27 }
 0x55f   :  { %v3191_v13 = vmul.f32 -1.442695, %v1927_v52  ;;  %v1935_v8 = vrot.slane %v1927_v52, 2  ;;  %v1946_v39 = vrot.slane %v1927_v52, 6  ;;  %v1943_v41 = vrot.slane %v1927_v52, 4 }
 0x561   :  { %3461 = vpow2.f32 %v3191_v13  ;;  %v3192_v14 = vmul.f32 -1.442695, %v1935_v8  ;;  %v3193_v40 = vmul.f32 -1.442695, %v1946_v39 }
 0x563   :  { %3463 = vpow2.f32 %v3192_v14  ;;  %v5405_v14 = vld [vmem:[#allocation24_spill] sm:$0xff] }
 0x564   :  { %3465 = vpow2.f32 %v3193_v40 }
 0x56b   :  { %v3462_v49 = vpop.eup %3461 }
 0x56c   :  { %v1931_v45 = vadd.f32 1.0, %v3462_v49  ;;  %v1962_v49 = vpop.permute.xlu0 %1961 }
 0x56d   :  { %v3464_v47 = vpop.eup %3463  ;;  %vm1963_vm0 = vcmp.eq.s32.totalorder %v1962_v49, 1  ;;  %v4887_v49 = vld [vmem:[#allocation8 + $0xc0] ss:$16 sps:$4 sm:$0xff]  }
 0x56e   :  { %3467 = vrcp.f32 %v1931_v45  ;;  %v1940_v50 = vadd.f32 1.0, %v3464_v47  ;;  %v3466_v53 = vpop.eup %3465 }
 0x56f   :  { %3469 = vtanh.f32 %v1943_v41  ;;  %v1951_v27 = vadd.f32 1.0, %v3466_v53 }
 0x570   :  { %3471 = vrcp.f32 %v1940_v50 }
 0x571   :  { %3473 = vrcp.f32 %v1951_v27  ;;  %v4866_v27 = vld [vmem:[#allocation8 + $0x88] ss:$16 sps:$4 sm:$0xff]  }
 0x575   :  { %v2007_v44 = vpop.f32.mrb[36].mxu0  ;;  %v2048_v6 = vpop.f32.mrb[36].mxu1 }
 0x576   :  { %v2009_v9 = vpop.f32.mrb[37].mxu0  ;;  %v2050_v38 = vpop.f32.mrb[37].mxu1 }
 0x577   :  { %v2059_v11 = vcombine.low %v2007_v44, %v2009_v9  ;;  %v2060_v43 = vcombine.low %v2048_v6, %v2050_v38  ;;  %v2011_v16 = vpop.f32.mrb[38].mxu0  ;;  %v2052_v0 = vpop.f32.mrb[38].mxu1 }
 0x578   :  { %v3468_v37 = vpop.eup %3467  ;;  %v2012_v22 = vpop.f32.mrb[39].mxu0 }
 0x579   :  { %v2053_v60 = vpop.f32.mrb[39].mxu1  ;;  %v3470_v4 = vpop.eup %3469  ;;  %v2067_v23 = vrot.slane %v2059_v11, %v4197_v46  ;;  %v2074_v25 = vrot.slane %v2060_v43, %v4197_v46 }
 0x57a   :  { %v3472_v26 = vpop.eup %3471  ;;  %v1955_v52 = vmul.f32 %v3470_v4, %v3468_v37 }
 0x57b   :  { %v2075_v13 = vcombine.low %v2067_v23, %v2074_v25  ;;  %v1954_v8 = vmul.f32 %v3472_v26, %v4644_v34  ;;  %v3474_v6 = vpop.eup %3473  ;;  %v4860_v25 = vld [vmem:[#allocation8 + $0x8c] ss:$16 sps:$4 sm:$0xff]   ;;  %v4863_v26 = vld [vmem:[#allocation8 + $0x80] ss:$16 sps:$4 sm:$0xff]  }
 0x57d   :  { %v2077_v39 = vadd.f32 %v5405_v14, %v2075_v13  ;;  %v1956_v40 = vadd.f32 %v1955_v52, %v1954_v8  ;;  %v4869_v52 = vld [vmem:[#allocation8 + $0xa4] ss:$16 sps:$4 sm:$0xff]   ;;  %v4872_v13 = vld [vmem:[#allocation8 + $0xac] ss:$16 sps:$4 sm:$0xff]   ;;  %v4875_v8 = vld [vmem:[#allocation8 + $0xa0] ss:$16 sps:$4 sm:$0xff]  }
 0x57e   :  { %v4878_v14 = vld [vmem:[#allocation8 + $0xa8] ss:$16 sps:$4 sm:$0xff]  }
 0x57f   :  { %v3195_v41 = vmul.f32 -1.442695, %v2077_v39  ;;  %v2085_v45 = vrot.slane %v2077_v39, 2  ;;  %3475 = vtanh.f32 %v1956_v40  ;;  %v4748_v47 = vsel %vm1963_vm0, %v1956_v40, %v4644_v34  ;;  %v4884_v40 = vld [vmem:[#allocation8 + $0xcc] ss:$16 sps:$4 sm:$0xff]  }
 0x580   :  { %v2096_v44 = vrot.slane %v2077_v39, 6  ;;  %v2093_v11 = vrot.slane %v2077_v39, 4  ;;  %v4881_v39 = vld [vmem:[#allocation8 + $0xc4] ss:$16 sps:$4 sm:$0xff]  }
 0x581   :  { %3477 = vpow2.f32 %v3195_v41  ;;  %v3196_v50 = vmul.f32 -1.442695, %v2085_v45  ;;  %v4890_v41 = vld [vmem:[#allocation8 + $0xc8] ss:$16 sps:$4 sm:$0xff]   ;;  %v4893_v45 = vld [vmem:[#allocation8 + $0xe4] ss:$16 sps:$4 sm:$0xff]  }
 0x582   :  { %v3197_v9 = vmul.f32 -1.442695, %v2096_v44  ;;  %v4899_v44 = vld [vmem:[#allocation8 + $0xe0] ss:$16 sps:$4 sm:$0xff]  }
 0x583   :  { %3479 = vpow2.f32 %v3196_v50  ;;  %v4896_v50 = vld [vmem:[#allocation8 + $0xec] ss:$16 sps:$4 sm:$0xff]  }
 0x584   :  { %3481 = vpow2.f32 %v3197_v9  ;;  %v4905_v9 = vld [vmem:[#allocation10 + $0x4] ss:$16 sps:$4 sm:$0xff]  }
 0x589   :  { %v3476_v38 = vpop.eup %3475 }
 0x58a   :  { %v1958_v43 = vmul.f32 %v3476_v38, %v3474_v6  ;;  %v4902_v6 = vld [vmem:[#allocation8 + $0xe8] ss:$16 sps:$4 sm:$0xff]   ;;  %v4908_v38 = vld [vmem:[#allocation10 + $0xc] ss:$16 sps:$4 sm:$0xff]  }
 0x58b   :  { %v3478_v53 = vpop.eup %3477 }
 0x58c   :  { %v2081_v16 = vadd.f32 1.0, %v3478_v53  ;;  %v4752_v37 = vsel %vm1963_vm0, %v1958_v43, %v4648_v7  ;;  %v1966_v34 = vsel %vm1963_vm0, %v1958_v43, 0.0 }
 0x58d   :  { %v3480_v0 = vpop.eup %3479  ;;  %v1967_v60 = vpack.c.bf16 %v1966_v34, %v1966_v34  ;;  %v2128_v4 = vpack.c.bf16 %v4752_v37, %v4752_v37 }
 0x58e   :  { %3483 = vrcp.f32 %v2081_v16  ;;  %v2090_v22 = vadd.f32 1.0, %v3480_v0  ;;  %v3482_v7 = vpop.eup %3481 }
 0x58f   :  { %3485 = vtanh.f32 %v2093_v11  ;;  %3194 = vst [vmem:[%s5169_s5 + $0x4] sm:$0x1] %v1967_v60  ;;  %2162 = vmatmul.mubr.bf16.vlgmr.msra.gmra.mrb[40].mxu0 %v2128_v4  ;;  %2203 = vmatmul.mubr.bf16.vlgmr.msra.gmra.mrb[40].mxu1 %v2128_v4 }
 0x590   :  { %3487 = vrcp.f32 %v2090_v22  ;;  %2280 = vmatpush1.bf16.msra.mxu0 %v4492_v17  ;;  %2321 = vmatpush1.bf16.msra.mxu1 %v4495_v32 }
 0x591   :  { %2281 = vmatprep.subr.bf16.mxu0 %v4498_v3  ;;  %2322 = vmatprep.subr.bf16.mxu1 %v4501_v2  ;;  %v2101_v3 = vadd.f32 1.0, %v3482_v7 }
 0x592   :  { %2311 = vmatprep.mubr.bf16.mxu0 %v5303_v10  ;;  %2352 = vmatprep.mubr.bf16.mxu1 %v5303_v10 }
 0x593   :  { %3489 = vrcp.f32 %v2101_v3  ;;  %v5406_v3 = vld [vmem:[#allocation18_spill] sm:$0xff] }
 0x594   :  { %2282 = vmatpush1.bf16.msra.mxu0 %v4506_v51  ;;  %2323 = vmatpush1.bf16.msra.mxu1 %v4509_v48  ;;  %v2112_v48 = vpop.permute.xlu1 %2111 }
 0x595   :  { %2283 = vmatprep.subr.bf16.mxu0 %v4512_v12  ;;  %2324 = vmatprep.subr.bf16.mxu1 %v4515_v30  ;;  %vm2113_vm1 = vcmp.eq.s32.totalorder %v2112_v48, 1 }
 0x598   :  { %v3484_v17 = vpop.eup %3483  ;;  %2284 = vmatpush1.bf16.msra.mxu0 %v4518_v35  ;;  %2325 = vmatpush1.bf16.msra.mxu1 %v4521_v36 }
 0x599   :  { %v3486_v23 = vpop.eup %3485  ;;  %2285 = vmatprep.subr.bf16.mxu0 %v4524_v54  ;;  %2326 = vmatprep.subr.bf16.mxu1 %v4527_v55 }
 0x59a   :  { %v3488_v32 = vpop.eup %3487  ;;  %v2105_v2 = vmul.f32 %v3486_v23, %v3484_v17 }
 0x59b   :  { %v2104_v51 = vmul.f32 %v3488_v32, %v4677_v15 }
 0x59c   :  { %2286 = vmatpush1.bf16.msra.mxu0 %v4531_v21  ;;  %2327 = vmatpush1.bf16.msra.mxu1 %v5376_v28 }
 0x59d   :  { %v2106_v12 = vadd.f32 %v2105_v2, %v2104_v51  ;;  %2287 = vmatprep.subr.bf16.mxu0 %v5377_v19  ;;  %2328 = vmatprep.subr.bf16.mxu1 %v5378_v29  ;;  %v3490_v35 = vpop.eup %3489  ;;  %v4804_v29 = vld [vmem:[#allocation8 + $0x4] ss:$16 sps:$4 sm:$0xff]  }
 0x59f   :  { %3491 = vtanh.f32 %v2106_v12  ;;  %v4781_v30 = vsel %vm2113_vm1, %v2106_v12, %v4677_v15  ;;  %v4819_v15 = vld [vmem:[#allocation8 + $0x24] ss:$16 sps:$4 sm:$0xff]  }
 0x5a0   :  { %2288 = vmatpush1.bf16.msra.mxu0 %v5379_v18  ;;  %2329 = vmatpush1.bf16.msra.mxu1 %v5380_v5  ;;  %v4822_v18 = vld [vmem:[#allocation8 + $0x2c] ss:$16 sps:$4 sm:$0xff]   ;;  %v4827_v5 = vld [vmem:[#allocation8 + $0x20] ss:$16 sps:$4 sm:$0xff]  }
 0x5a1   :  { %2289 = vmatprep.subr.bf16.mxu0 %v5381_v57  ;;  %2330 = vmatprep.subr.bf16.mxu1 %v5382_v20  ;;  %v4830_v57 = vld [vmem:[#allocation8 + $0x28] ss:$16 sps:$4 sm:$0xff]   ;;  %v4833_v20 = vld [vmem:[#allocation8 + $0x44] ss:$16 sps:$4 sm:$0xff]  }
 0x5a4   :  { %2290 = vmatpush1.bf16.msra.mxu0 %v5383_v61  ;;  %2331 = vmatpush1.bf16.msra.mxu1 %v5384_v1  ;;  %v4836_v61 = vld [vmem:[#allocation8 + $0x4c] ss:$16 sps:$4 sm:$0xff]   ;;  %v4839_v1 = vld [vmem:[#allocation8 + $0x40] ss:$16 sps:$4 sm:$0xff]  }
 0x5a5   :  { %2291 = vmatprep.subr.bf16.mxu0 %v5385_v42  ;;  %2332 = vmatprep.subr.bf16.mxu1 %v5386_v58  ;;  %v4842_v42 = vld [vmem:[#allocation8 + $0x48] ss:$16 sps:$4 sm:$0xff]   ;;  %v4845_v58 = vld [vmem:[#allocation8 + $0x64] ss:$16 sps:$4 sm:$0xff]  }
 0x5a8   :  { %2292 = vmatpush1.bf16.msra.mxu0 %v5387_v33  ;;  %2333 = vmatpush1.bf16.msra.mxu1 %v5388_v59  ;;  %v4848_v33 = vld [vmem:[#allocation8 + $0x6c] ss:$16 sps:$4 sm:$0xff]   ;;  %v4851_v59 = vld [vmem:[#allocation8 + $0x60] ss:$16 sps:$4 sm:$0xff]  }
 0x5a9   :  { %v3492_v36 = vpop.eup %3491  ;;  %2293 = vmatprep.subr.bf16.mxu0 %v5389_v63  ;;  %2334 = vmatprep.subr.bf16.mxu1 %v4580_v62  ;;  %v4807_v62 = vld [vmem:[#allocation8 + $0xc] ss:$16 sps:$4 sm:$0xff]   ;;  %v4854_v63 = vld [vmem:[#allocation8 + $0x68] ss:$16 sps:$4 sm:$0xff]  }
 0x5aa   :  { %v2108_v54 = vmul.f32 %v3492_v36, %v3490_v35 }
 0x5ac   :  { %v4797_v55 = vsel %vm2113_vm1, %v2108_v54, %v4693_v24  ;;  %v2116_v21 = vsel %vm2113_vm1, %v2108_v54, 0.0  ;;  %2294 = vmatpush1.bf16.msra.mxu0 %v4588_v31  ;;  %2335 = vmatpush1.bf16.msra.mxu1 %v4591_v56  ;;  %v4813_v31 = vld [vmem:[#allocation8] ss:$16 sps:$4 sm:$0xff]   ;;  %v4816_v56 = vld [vmem:[#allocation8 + $0x8] ss:$16 sps:$4 sm:$0xff]  }
 0x5ad   :  { %v2117_v28 = vpack.c.bf16 %v2116_v21, %v2116_v21  ;;  %v2278_v19 = vpack.c.bf16 %v4797_v55, %v4797_v55  ;;  %2435 = vmatprep.subr.bf16.mxu0 %v4804_v29  ;;  %2476 = vmatprep.subr.bf16.mxu1 %v4807_v62  ;;  %v4857_v24 = vld [vmem:[#allocation8 + $0x84] ss:$16 sps:$4 sm:$0xff]  }
 0x5af   :  { %3198 = vst [vmem:[%s5170_s6 + $0x3] sm:$0x1] %v2117_v28  ;;  %2312 = vmatmul.mubr.bf16.vlgmr.msra.gmra.mrb[44].mxu0 %v2278_v19  ;;  %2353 = vmatmul.mubr.bf16.vlgmr.msra.gmra.mrb[44].mxu1 %v2278_v19 }
 0x5b0   :  { %2436 = vmatpush1.bf16.msra.mxu0 %v4813_v31  ;;  %2477 = vmatpush1.bf16.msra.mxu1 %v4816_v56 }
 0x5b1   :  { %2437 = vmatprep.subr.bf16.mxu0 %v4819_v15  ;;  %2478 = vmatprep.subr.bf16.mxu1 %v4822_v18 }
 0x5b2   :  { %2467 = vmatprep.mubr.bf16.mxu0 %v5303_v10  ;;  %2508 = vmatprep.mubr.bf16.mxu1 %v5303_v10 }
 0x5b4   :  { %2438 = vmatpush1.bf16.msra.mxu0 %v4827_v5  ;;  %2479 = vmatpush1.bf16.msra.mxu1 %v4830_v57 }
 0x5b5   :  { %2439 = vmatprep.subr.bf16.mxu0 %v4833_v20  ;;  %2480 = vmatprep.subr.bf16.mxu1 %v4836_v61 }
 0x5b8   :  { %2440 = vmatpush1.bf16.msra.mxu0 %v4839_v1  ;;  %2481 = vmatpush1.bf16.msra.mxu1 %v4842_v42 }
 0x5b9   :  { %2441 = vmatprep.subr.bf16.mxu0 %v4845_v58  ;;  %2482 = vmatprep.subr.bf16.mxu1 %v4848_v33 }
 0x5bc   :  { %2442 = vmatpush1.bf16.msra.mxu0 %v4851_v59  ;;  %2483 = vmatpush1.bf16.msra.mxu1 %v4854_v63 }
 0x5bd   :  { %2443 = vmatprep.subr.bf16.mxu0 %v4857_v24  ;;  %2484 = vmatprep.subr.bf16.mxu1 %v4860_v25 }
 0x5c0   :  { %2444 = vmatpush1.bf16.msra.mxu0 %v4863_v26  ;;  %2485 = vmatpush1.bf16.msra.mxu1 %v4866_v27 }
 0x5c1   :  { %2445 = vmatprep.subr.bf16.mxu0 %v4869_v52  ;;  %2486 = vmatprep.subr.bf16.mxu1 %v4872_v13 }
 0x5c4   :  { %2446 = vmatpush1.bf16.msra.mxu0 %v4875_v8  ;;  %2487 = vmatpush1.bf16.msra.mxu1 %v4878_v14 }
 0x5c5   :  { %2447 = vmatprep.subr.bf16.mxu0 %v4881_v39  ;;  %2488 = vmatprep.subr.bf16.mxu1 %v4884_v40 }
 0x5c8   :  { %2448 = vmatpush1.bf16.msra.mxu0 %v4887_v49  ;;  %2489 = vmatpush1.bf16.msra.mxu1 %v4890_v41 }
 0x5c9   :  { %2449 = vmatprep.subr.bf16.mxu0 %v4893_v45  ;;  %2490 = vmatprep.subr.bf16.mxu1 %v4896_v50 }
 0x5cc   :  { %2450 = vmatpush1.bf16.msra.mxu0 %v4899_v44  ;;  %2491 = vmatpush1.bf16.msra.mxu1 %v4902_v6 }
 0x5cd   :  { %2585 = vmatprep.subr.bf16.mxu0 %v4905_v9  ;;  %2626 = vmatprep.subr.bf16.mxu1 %v4908_v38 }
 0x662   :  { %v2163_v53 = vpop.f32.mrb[40].mxu0  ;;  %v2204_v11 = vpop.f32.mrb[40].mxu1 }
 0x663   :  { %v2165_v43 = vpop.f32.mrb[41].mxu0  ;;  %v2206_v16 = vpop.f32.mrb[41].mxu1 }
 0x664   :  { %v2215_v0 = vcombine.low %v2163_v53, %v2165_v43  ;;  %v2216_v34 = vcombine.low %v2204_v11, %v2206_v16  ;;  %v2167_v22 = vpop.f32.mrb[42].mxu0  ;;  %v2208_v60 = vpop.f32.mrb[42].mxu1 }
 0x665   :  { %v2168_v4 = vpop.f32.mrb[43].mxu0  ;;  %v2209_v7 = vpop.f32.mrb[43].mxu1 }
 0x666   :  { %v2223_v17 = vrot.slane %v2215_v0, %v4197_v46  ;;  %v2230_v23 = vrot.slane %v2216_v34, %v4197_v46 }
 0x668   :  { %v2231_v32 = vcombine.low %v2223_v17, %v2230_v23 }
 0x66a   :  { %v2233_v2 = vadd.f32 %v2231_v32, %v5406_v3 }
 0x66c   :  { %v3201_v51 = vmul.f32 -1.442695, %v2233_v2  ;;  %v2241_v48 = vrot.slane %v2233_v2, 2  ;;  %v2252_v35 = vrot.slane %v2233_v2, 6  ;;  %v2249_v21 = vrot.slane %v2233_v2, 4 }
 0x66e   :  { %3493 = vpow2.f32 %v3201_v51  ;;  %v3202_v12 = vmul.f32 -1.442695, %v2241_v48  ;;  %v3203_v36 = vmul.f32 -1.442695, %v2252_v35 }
 0x670   :  { %3495 = vpow2.f32 %v3202_v12 }
 0x671   :  { %3497 = vpow2.f32 %v3203_v36 }
 0x678   :  { %v3494_v54 = vpop.eup %3493 }
 0x679   :  { %v2237_v28 = vadd.f32 1.0, %v3494_v54 }
 0x67a   :  { %v3496_v19 = vpop.eup %3495 }
 0x67b   :  { %3499 = vrcp.f32 %v2237_v28  ;;  %v2246_v53 = vadd.f32 1.0, %v3496_v19  ;;  %v3498_v34 = vpop.eup %3497 }
 0x67c   :  { %3501 = vtanh.f32 %v2249_v21  ;;  %v2257_v12 = vadd.f32 1.0, %v3498_v34  ;;  %v5407_v21 = vld [vmem:[#allocation23_spill] sm:$0xff] }
 0x67d   :  { %3503 = vrcp.f32 %v2246_v53  ;;  %v2268_v53 = vpop.permute.xlu0 %2267 }
 0x67e   :  { %vm2269_vm2 = vcmp.eq.s32.totalorder %v2268_v53, 1  ;;  %3505 = vrcp.f32 %v2257_v12  ;;  %v4955_v53 = vld [vmem:[#allocation10 + $0x4c] ss:$16 sps:$4 sm:$0xff]  }
 0x682   :  { %v2313_v11 = vpop.f32.mrb[44].mxu0  ;;  %v2354_v43 = vpop.f32.mrb[44].mxu1 }
 0x683   :  { %v2315_v16 = vpop.f32.mrb[45].mxu0  ;;  %v2356_v0 = vpop.f32.mrb[45].mxu1 }
 0x684   :  { %v2365_v22 = vcombine.low %v2313_v11, %v2315_v16  ;;  %v2366_v60 = vcombine.low %v2354_v43, %v2356_v0  ;;  %v2317_v4 = vpop.f32.mrb[46].mxu0  ;;  %v2358_v7 = vpop.f32.mrb[46].mxu1 }
 0x685   :  { %v3500_v17 = vpop.eup %3499  ;;  %v2318_v23 = vpop.f32.mrb[47].mxu0 }
 0x686   :  { %v2359_v32 = vpop.f32.mrb[47].mxu1  ;;  %v3502_v3 = vpop.eup %3501  ;;  %v2373_v2 = vrot.slane %v2365_v22, %v4197_v46  ;;  %v2380_v51 = vrot.slane %v2366_v60, %v4197_v46 }
 0x687   :  { %v3504_v48 = vpop.eup %3503  ;;  %v2261_v35 = vmul.f32 %v3502_v3, %v3500_v17 }
 0x688   :  { %v2381_v36 = vcombine.low %v2373_v2, %v2380_v51  ;;  %v2260_v54 = vmul.f32 %v3504_v48, %v4748_v47  ;;  %v3506_v22 = vpop.eup %3505 }
 0x68a   :  { %v2383_v28 = vadd.f32 %v5407_v21, %v2381_v36  ;;  %v2262_v19 = vadd.f32 %v2261_v35, %v2260_v54  ;;  %v4932_v35 = vld [vmem:[#allocation10] ss:$16 sps:$4 sm:$0xff]   ;;  %v4938_v36 = vld [vmem:[#allocation10 + $0x24] ss:$16 sps:$4 sm:$0xff]   ;;  %v4941_v54 = vld [vmem:[#allocation10 + $0x2c] ss:$16 sps:$4 sm:$0xff]  }
 0x68b   :  { %v4946_v21 = vld [vmem:[#allocation10 + $0x20] ss:$16 sps:$4 sm:$0xff]  }
 0x68c   :  { %v3205_v11 = vmul.f32 -1.442695, %v2383_v28  ;;  %v2391_v43 = vrot.slane %v2383_v28, 2  ;;  %3507 = vtanh.f32 %v2262_v19  ;;  %v4920_v16 = vsel %vm2269_vm2, %v2262_v19, %v4748_v47  ;;  %v4952_v19 = vld [vmem:[#allocation10 + $0x44] ss:$16 sps:$4 sm:$0xff]  }
 0x68d   :  { %v2402_v34 = vrot.slane %v2383_v28, 6  ;;  %v2399_v17 = vrot.slane %v2383_v28, 4  ;;  %v4949_v28 = vld [vmem:[#allocation10 + $0x28] ss:$16 sps:$4 sm:$0xff]  }
 0x68e   :  { %3509 = vpow2.f32 %v3205_v11  ;;  %v3206_v0 = vmul.f32 -1.442695, %v2391_v43 }
 0x68f   :  { %v3207_v60 = vmul.f32 -1.442695, %v2402_v34  ;;  %v4958_v34 = vld [vmem:[#allocation10 + $0x40] ss:$16 sps:$4 sm:$0xff]  }
 0x690   :  { %3511 = vpow2.f32 %v3206_v0 }
 0x691   :  { %3513 = vpow2.f32 %v3207_v60 }
 0x696   :  { %v3508_v4 = vpop.eup %3507 }
 0x697   :  { %v2264_v23 = vmul.f32 %v3508_v4, %v3506_v22  ;;  %v4961_v22 = vld [vmem:[#allocation10 + $0x48] ss:$16 sps:$4 sm:$0xff]  }
 0x698   :  { %v3510_v7 = vpop.eup %3509 }
 0x699   :  { %v2387_v32 = vadd.f32 1.0, %v3510_v7  ;;  %v4924_v2 = vsel %vm2269_vm2, %v2264_v23, %v4752_v37  ;;  %v2272_v47 = vsel %vm2269_vm2, %v2264_v23, 0.0  ;;  %v4935_v37 = vld [vmem:[#allocation10 + $0x8] ss:$16 sps:$4 sm:$0xff]   ;;  %v4964_v7 = vld [vmem:[#allocation10 + $0x64] ss:$16 sps:$4 sm:$0xff]  }
 0x69a   :  { %v3512_v3 = vpop.eup %3511  ;;  %v2273_v48 = vpack.c.bf16 %v2272_v47, %v2272_v47  ;;  %v2434_v12 = vpack.c.bf16 %v4924_v2, %v4924_v2  ;;  %v4971_v47 = vld [vmem:[#allocation10 + $0x60] ss:$16 sps:$4 sm:$0xff]  }
 0x69b   :  { %3515 = vrcp.f32 %v2387_v32  ;;  %v2396_v51 = vadd.f32 1.0, %v3512_v3  ;;  %v3514_v11 = vpop.eup %3513  ;;  %v2418_v3 = vpop.permute.xlu1 %2417 }
 0x69c   :  { %3517 = vtanh.f32 %v2399_v17  ;;  %3204 = vst [vmem:[%s5169_s5 + $0x5] sm:$0x1] %v2273_v48  ;;  %2468 = vmatmul.mubr.bf16.vlgmr.msra.gmra.mrb[48].mxu0 %v2434_v12  ;;  %2509 = vmatmul.mubr.bf16.vlgmr.msra.gmra.mrb[48].mxu1 %v2434_v12  ;;  %v2407_v4 = vadd.f32 1.0, %v3514_v11  ;;  %v4967_v17 = vld [vmem:[#allocation10 + $0x6c] ss:$16 sps:$4 sm:$0xff]   ;;  %vm2419_vm3 = vcmp.eq.s32.totalorder %v2418_v3, 1 }
 0x69d   :  { %3519 = vrcp.f32 %v2396_v51  ;;  %2586 = vmatpush1.bf16.msra.mxu0 %v4932_v35  ;;  %2627 = vmatpush1.bf16.msra.mxu1 %v4935_v37  ;;  %v4974_v51 = vld [vmem:[#allocation10 + $0x68] ss:$16 sps:$4 sm:$0xff]   ;;  %v4977_v12 = vld [vmem:[#allocation10 + $0x84] ss:$16 sps:$4 sm:$0xff]   ;;  %v4980_v11 = vld [vmem:[#allocation10 + $0x8c] ss:$16 sps:$4 sm:$0xff]  }
 0x69e   :  { %2587 = vmatprep.subr.bf16.mxu0 %v4938_v36  ;;  %2628 = vmatprep.subr.bf16.mxu1 %v4941_v54  ;;  %5408 = vst [vmem:[#allocation27_spill] sm:$0xff] %v4974_v51  ;;  %3521 = vrcp.f32 %v2407_v4  ;;  %5409 = vst [vmem:[#allocation54_spill] sm:$0xff] %v4977_v12  ;;  %v4993_v4 = vld [vmem:[#allocation10 + $0xa4] ss:$16 sps:$4 sm:$0xff]  }
 0x69f   :  { %2617 = vmatprep.mubr.bf16.mxu0 %v5303_v10  ;;  %2658 = vmatprep.mubr.bf16.mxu1 %v5303_v10  ;;  %5410 = vst [vmem:[#allocation15_spill] sm:$0xff] %v4980_v11  ;;  %5413 = vst [vmem:[#allocation25_spill] sm:$0xff] %v4993_v4 }
 0x6a1   :  { %2588 = vmatpush1.bf16.msra.mxu0 %v4946_v21  ;;  %2629 = vmatpush1.bf16.msra.mxu1 %v4949_v28 }
 0x6a2   :  { %2589 = vmatprep.subr.bf16.mxu0 %v4952_v19  ;;  %2630 = vmatprep.subr.bf16.mxu1 %v4955_v53 }
 0x6a5   :  { %v3516_v43 = vpop.eup %3515  ;;  %2590 = vmatpush1.bf16.msra.mxu0 %v4958_v34  ;;  %2631 = vmatpush1.bf16.msra.mxu1 %v4961_v22 }
 0x6a6   :  { %v3518_v0 = vpop.eup %3517  ;;  %2591 = vmatprep.subr.bf16.mxu0 %v4964_v7  ;;  %2632 = vmatprep.subr.bf16.mxu1 %v4967_v17 }
 0x6a7   :  { %v3520_v60 = vpop.eup %3519  ;;  %v2411_v23 = vmul.f32 %v3518_v0, %v3516_v43  ;;  %v4987_v0 = vld [vmem:[#allocation10 + $0x80] ss:$16 sps:$4 sm:$0xff]  }
 0x6a8   :  { %v2410_v32 = vmul.f32 %v3520_v60, %v4781_v30  ;;  %5411 = vst [vmem:[#allocation26_spill] sm:$0xff] %v4987_v0  ;;  %v4990_v60 = vld [vmem:[#allocation10 + $0x88] ss:$16 sps:$4 sm:$0xff]  }
 0x6a9   :  { %2592 = vmatpush1.bf16.msra.mxu0 %v4971_v47  ;;  %2633 = vmatpush1.bf16.msra.mxu1 %v4974_v51  ;;  %5412 = vst [vmem:[#allocation16_spill] sm:$0xff] %v4990_v60 }
 0x6aa   :  { %v2412_v48 = vadd.f32 %v2411_v23, %v2410_v32  ;;  %2593 = vmatprep.subr.bf16.mxu0 %v4977_v12  ;;  %2634 = vmatprep.subr.bf16.mxu1 %v4980_v11  ;;  %v4996_v23 = vld [vmem:[#allocation10 + $0xac] ss:$16 sps:$4 sm:$0xff]   ;;  %v4999_v32 = vld [vmem:[#allocation10 + $0xa0] ss:$16 sps:$4 sm:$0xff]  }
 0x6ab   :  { %5414 = vst [vmem:[#allocation28_spill] sm:$0xff] %v4996_v23  ;;  %5415 = vst [vmem:[#allocation29_spill] sm:$0xff] %v4999_v32  ;;  %v5011_v11 = vld [vmem:[#allocation10 + $0xc0] ss:$16 sps:$4 sm:$0xff]  }
 0x6ac   :  { %3523 = vtanh.f32 %v2412_v48  ;;  %v4985_v43 = vsel %vm2419_vm3, %v2412_v48, %v4781_v30  ;;  %v5002_v30 = vld [vmem:[#allocation10 + $0xa8] ss:$16 sps:$4 sm:$0xff]   ;;  %v5005_v48 = vld [vmem:[#allocation10 + $0xc4] ss:$16 sps:$4 sm:$0xff]   ;;  %5419 = vst [vmem:[#allocation33_spill] sm:$0xff] %v5011_v11 }
 0x6ad   :  { %2594 = vmatpush1.bf16.msra.mxu0 %v4987_v0  ;;  %2635 = vmatpush1.bf16.msra.mxu1 %v4990_v60  ;;  %5416 = vst [vmem:[#allocation30_spill] sm:$0xff] %v5002_v30  ;;  %5417 = vst [vmem:[#allocation31_spill] sm:$0xff] %v5005_v48  ;;  %v5008_v60 = vld [vmem:[#allocation10 + $0xcc] ss:$16 sps:$4 sm:$0xff]  }
 0x6ae   :  { %2595 = vmatprep.subr.bf16.mxu0 %v4993_v4  ;;  %2636 = vmatprep.subr.bf16.mxu1 %v4996_v23  ;;  %5418 = vst [vmem:[#allocation32_spill] sm:$0xff] %v5008_v60  ;;  %v3522_v4 = vpop.eup %3521  ;;  %v5014_v23 = vld [vmem:[#allocation10 + $0xc8] ss:$16 sps:$4 sm:$0xff]  }
 0x6af   :  { %5420 = vst [vmem:[#allocation34_spill] sm:$0xff] %v5014_v23 }
 0x6b1   :  { %2596 = vmatpush1.bf16.msra.mxu0 %v4999_v32  ;;  %2637 = vmatpush1.bf16.msra.mxu1 %v5002_v30  ;;  %v5017_v32 = vld [vmem:[#allocation10 + $0xe4] ss:$16 sps:$4 sm:$0xff]   ;;  %v5020_v30 = vld [vmem:[#allocation10 + $0xec] ss:$16 sps:$4 sm:$0xff]  }
 0x6b2   :  { %2597 = vmatprep.subr.bf16.mxu0 %v5005_v48  ;;  %2638 = vmatprep.subr.bf16.mxu1 %v5008_v60  ;;  %5421 = vst [vmem:[#allocation35_spill] sm:$0xff] %v5017_v32 }
 0x6b5   :  { %2598 = vmatpush1.bf16.msra.mxu0 %v5011_v11  ;;  %2639 = vmatpush1.bf16.msra.mxu1 %v5014_v23  ;;  %v5028_v11 = vld [vmem:[#allocation10 + $0xe0] ss:$16 sps:$4 sm:$0xff]   ;;  %v5031_v23 = vld [vmem:[#allocation10 + $0xe8] ss:$16 sps:$4 sm:$0xff]  }
 0x6b6   :  { %v3524_v0 = vpop.eup %3523  ;;  %2599 = vmatprep.subr.bf16.mxu0 %v5017_v32  ;;  %2640 = vmatprep.subr.bf16.mxu1 %v5020_v30 }
 0x6b7   :  { %v2414_v48 = vmul.f32 %v3524_v0, %v3522_v4 }
 0x6b9   :  { %v5025_v60 = vsel %vm2419_vm3, %v2414_v48, %v4797_v55  ;;  %v2422_v12 = vsel %vm2419_vm3, %v2414_v48, 0.0  ;;  %2600 = vmatpush1.bf16.msra.mxu0 %v5028_v11  ;;  %2641 = vmatpush1.bf16.msra.mxu1 %v5031_v23 }
 0x6ba   :  { %v2423_v32 = vpack.c.bf16 %v2422_v12, %v2422_v12  ;;  %v2584_v51 = vpack.c.bf16 %v5025_v60, %v5025_v60  ;;  %2741 = vmatprep.subr.bf16.mxu0 %v4804_v29  ;;  %2782 = vmatprep.subr.bf16.mxu1 %v4807_v62 }
 0x6bc   :  { %3208 = vst [vmem:[%s5170_s6 + $0x2] sm:$0x1] %v2423_v32  ;;  %2618 = vmatmul.mubr.bf16.vlgmr.msra.gmra.mrb[52].mxu0 %v2584_v51  ;;  %2659 = vmatmul.mubr.bf16.vlgmr.msra.gmra.mrb[52].mxu1 %v2584_v51 }
 0x6bd   :  { %2742 = vmatpush1.bf16.msra.mxu0 %v4813_v31  ;;  %2783 = vmatpush1.bf16.msra.mxu1 %v4816_v56 }
 0x6be   :  { %2743 = vmatprep.subr.bf16.mxu0 %v4819_v15  ;;  %2784 = vmatprep.subr.bf16.mxu1 %v4822_v18 }
 0x6bf   :  { %2773 = vmatprep.mubr.bf16.mxu0 %v5303_v10  ;;  %2814 = vmatprep.mubr.bf16.mxu1 %v5303_v10 }
 0x6c1   :  { %2744 = vmatpush1.bf16.msra.mxu0 %v4827_v5  ;;  %2785 = vmatpush1.bf16.msra.mxu1 %v4830_v57 }
 0x6c2   :  { %2745 = vmatprep.subr.bf16.mxu0 %v4833_v20  ;;  %2786 = vmatprep.subr.bf16.mxu1 %v4836_v61 }
 0x6c5   :  { %2746 = vmatpush1.bf16.msra.mxu0 %v4839_v1  ;;  %2787 = vmatpush1.bf16.msra.mxu1 %v4842_v42 }
 0x6c6   :  { %2747 = vmatprep.subr.bf16.mxu0 %v4845_v58  ;;  %2788 = vmatprep.subr.bf16.mxu1 %v4848_v33  ;;  %v5422_v58 = vld [vmem:[#allocation19_spill] sm:$0xff] }
 0x6c9   :  { %2748 = vmatpush1.bf16.msra.mxu0 %v4851_v59  ;;  %2789 = vmatpush1.bf16.msra.mxu1 %v4854_v63 }
 0x6ca   :  { %2749 = vmatprep.subr.bf16.mxu0 %v4857_v24  ;;  %2790 = vmatprep.subr.bf16.mxu1 %v4860_v25 }
 0x6cd   :  { %2750 = vmatpush1.bf16.msra.mxu0 %v4863_v26  ;;  %2791 = vmatpush1.bf16.msra.mxu1 %v4866_v27 }
 0x6ce   :  { %2751 = vmatprep.subr.bf16.mxu0 %v4869_v52  ;;  %2792 = vmatprep.subr.bf16.mxu1 %v4872_v13 }
 0x6d1   :  { %2752 = vmatpush1.bf16.msra.mxu0 %v4875_v8  ;;  %2793 = vmatpush1.bf16.msra.mxu1 %v4878_v14 }
 0x6d2   :  { %2753 = vmatprep.subr.bf16.mxu0 %v4881_v39  ;;  %2794 = vmatprep.subr.bf16.mxu1 %v4884_v40 }
 0x6d5   :  { %2754 = vmatpush1.bf16.msra.mxu0 %v4887_v49  ;;  %2795 = vmatpush1.bf16.msra.mxu1 %v4890_v41 }
 0x6d6   :  { %2755 = vmatprep.subr.bf16.mxu0 %v4893_v45  ;;  %2796 = vmatprep.subr.bf16.mxu1 %v4896_v50 }
 0x6d9   :  { %2756 = vmatpush1.bf16.msra.mxu0 %v4899_v44  ;;  %2797 = vmatpush1.bf16.msra.mxu1 %v4902_v6 }
 0x6da   :  { %2890 = vmatprep.subr.bf16.mxu0 %v4905_v9  ;;  %2931 = vmatprep.subr.bf16.mxu1 %v4908_v38 }
 0x76f   :  { %v2469_v55 = vpop.f32.mrb[48].mxu0  ;;  %v2510_v29 = vpop.f32.mrb[48].mxu1 }
 0x770   :  { %v2471_v62 = vpop.f32.mrb[49].mxu0  ;;  %v2512_v31 = vpop.f32.mrb[49].mxu1 }
 0x771   :  { %v2521_v56 = vcombine.low %v2469_v55, %v2471_v62  ;;  %v2522_v15 = vcombine.low %v2510_v29, %v2512_v31  ;;  %v2473_v18 = vpop.f32.mrb[50].mxu0  ;;  %v2514_v5 = vpop.f32.mrb[50].mxu1  ;;  %v5423_v31 = vld [vmem:[#allocation22_spill] sm:$0xff] }
 0x772   :  { %v2474_v57 = vpop.f32.mrb[51].mxu0  ;;  %v2515_v20 = vpop.f32.mrb[51].mxu1 }
 0x773   :  { %v2529_v61 = vrot.slane %v2521_v56, %v4197_v46  ;;  %v2536_v1 = vrot.slane %v2522_v15, %v4197_v46  ;;  %v2574_v18 = vpop.permute.xlu0 %2573 }
 0x774   :  { %vm2575_vm4 = vcmp.eq.s32.totalorder %v2574_v18, 1  ;;  %v5438_v18 = vld [vmem:[#allocation20_spill] sm:$0xff] }
 0x775   :  { %v2537_v42 = vcombine.low %v2529_v61, %v2536_v1 }
 0x777   :  { %v2539_v33 = vadd.f32 %v2537_v42, %v5422_v58 }
 0x779   :  { %v3211_v59 = vmul.f32 -1.442695, %v2539_v33  ;;  %v2547_v63 = vrot.slane %v2539_v33, 2  ;;  %v2558_v25 = vrot.slane %v2539_v33, 6  ;;  %v2555_v52 = vrot.slane %v2539_v33, 4 }
 0x77b   :  { %3525 = vpow2.f32 %v3211_v59  ;;  %v3212_v24 = vmul.f32 -1.442695, %v2547_v63  ;;  %v3213_v26 = vmul.f32 -1.442695, %v2558_v25 }
 0x77d   :  { %3527 = vpow2.f32 %v3212_v24 }
 0x77e   :  { %3529 = vpow2.f32 %v3213_v26 }
 0x785   :  { %v3526_v27 = vpop.eup %3525 }
 0x786   :  { %v2543_v13 = vadd.f32 1.0, %v3526_v27 }
 0x787   :  { %v3528_v8 = vpop.eup %3527 }
 0x788   :  { %3531 = vrcp.f32 %v2543_v13  ;;  %v2552_v14 = vadd.f32 1.0, %v3528_v8  ;;  %v3530_v45 = vpop.eup %3529 }
 0x789   :  { %3533 = vtanh.f32 %v2555_v52  ;;  %v2563_v48 = vadd.f32 1.0, %v3530_v45  ;;  %v5434_v45 = vld [vmem:[#allocation32_spill] sm:$0xff] }
 0x78a   :  { %3535 = vrcp.f32 %v2552_v14 }
 0x78b   :  { %3537 = vrcp.f32 %v2563_v48 }
 0x78f   :  { %v2619_v39 = vpop.f32.mrb[52].mxu0  ;;  %v2660_v40 = vpop.f32.mrb[52].mxu1 }
 0x790   :  { %v2621_v49 = vpop.f32.mrb[53].mxu0  ;;  %v2662_v41 = vpop.f32.mrb[53].mxu1 }
 0x791   :  { %v2671_v50 = vcombine.low %v2619_v39, %v2621_v49  ;;  %v2672_v44 = vcombine.low %v2660_v40, %v2662_v41  ;;  %v2623_v6 = vpop.f32.mrb[54].mxu0  ;;  %v2664_v9 = vpop.f32.mrb[54].mxu1  ;;  %v5429_v39 = vld [vmem:[#allocation25_spill] sm:$0xff]  ;;  %v5432_v49 = vld [vmem:[#allocation30_spill] sm:$0xff]  ;;  %v5433_v41 = vld [vmem:[#allocation31_spill] sm:$0xff] }
 0x792   :  { %v3532_v38 = vpop.eup %3531  ;;  %v2624_v3 = vpop.f32.mrb[55].mxu0  ;;  %v5431_v40 = vld [vmem:[#allocation29_spill] sm:$0xff]  ;;  %v5436_v6 = vld [vmem:[#allocation34_spill] sm:$0xff]  ;;  %v5437_v9 = vld [vmem:[#allocation35_spill] sm:$0xff] }
 0x793   :  { %v2665_v51 = vpop.f32.mrb[55].mxu1  ;;  %v3534_v12 = vpop.eup %3533  ;;  %v2679_v0 = vrot.slane %v2671_v50, %v4197_v46  ;;  %v2686_v4 = vrot.slane %v2672_v44, %v4197_v46 }
 0x794   :  { %v3536_v32 = vpop.eup %3535  ;;  %v2567_v55 = vmul.f32 %v3534_v12, %v3532_v38 }
 0x795   :  { %v2687_v29 = vcombine.low %v2679_v0, %v2686_v4  ;;  %v2566_v62 = vmul.f32 %v3536_v32, %v4920_v16  ;;  %v3538_v42 = vpop.eup %3537 }
 0x797   :  { %v2689_v56 = vadd.f32 %v5423_v31, %v2687_v29  ;;  %v2568_v15 = vadd.f32 %v2567_v55, %v2566_v62 }
 0x799   :  { %v3215_v5 = vmul.f32 -1.442695, %v2689_v56  ;;  %v2697_v57 = vrot.slane %v2689_v56, 2  ;;  %3539 = vtanh.f32 %v2568_v15  ;;  %v5084_v20 = vsel %vm2575_vm4, %v2568_v15, %v4920_v16 }
 0x79a   :  { %v2708_v1 = vrot.slane %v2689_v56, 6  ;;  %v2705_v63 = vrot.slane %v2689_v56, 4 }
 0x79b   :  { %3541 = vpow2.f32 %v3215_v5  ;;  %v3216_v61 = vmul.f32 -1.442695, %v2697_v57 }
 0x79c   :  { %v3217_v58 = vmul.f32 -1.442695, %v2708_v1 }
 0x79d   :  { %3543 = vpow2.f32 %v3216_v61 }
 0x79e   :  { %3545 = vpow2.f32 %v3217_v58 }
 0x7a3   :  { %v3540_v33 = vpop.eup %3539 }
 0x7a4   :  { %v2570_v24 = vmul.f32 %v3540_v33, %v3538_v42 }
 0x7a5   :  { %v3542_v59 = vpop.eup %3541 }
 0x7a6   :  { %v2693_v25 = vadd.f32 1.0, %v3542_v59  ;;  %v5088_v27 = vsel %vm2575_vm4, %v2570_v24, %v4924_v2  ;;  %v2578_v16 = vsel %vm2575_vm4, %v2570_v24, 0.0 }
 0x7a7   :  { %v3544_v26 = vpop.eup %3543  ;;  %v2579_v13 = vpack.c.bf16 %v2578_v16, %v2578_v16  ;;  %v2740_v8 = vpack.c.bf16 %v5088_v27, %v5088_v27 }
 0x7a8   :  { %3547 = vrcp.f32 %v2693_v25  ;;  %v2702_v52 = vadd.f32 1.0, %v3544_v26  ;;  %v3546_v2 = vpop.eup %3545 }
 0x7a9   :  { %3549 = vtanh.f32 %v2705_v63  ;;  %3214 = vst [vmem:[%s5169_s5 + $0x6] sm:$0x1] %v2579_v13  ;;  %2774 = vmatmul.mubr.bf16.vlgmr.msra.gmra.mrb[56].mxu0 %v2740_v8  ;;  %2815 = vmatmul.mubr.bf16.vlgmr.msra.gmra.mrb[56].mxu1 %v2740_v8 }
 0x7aa   :  { %3551 = vrcp.f32 %v2702_v52  ;;  %2891 = vmatpush1.bf16.msra.mxu0 %v4932_v35  ;;  %2932 = vmatpush1.bf16.msra.mxu1 %v4935_v37 }
 0x7ab   :  { %2892 = vmatprep.subr.bf16.mxu0 %v4938_v36  ;;  %2933 = vmatprep.subr.bf16.mxu1 %v4941_v54  ;;  %v2713_v36 = vadd.f32 1.0, %v3546_v2 }
 0x7ac   :  { %2922 = vmatprep.mubr.bf16.mxu0 %v5303_v10  ;;  %2963 = vmatprep.mubr.bf16.mxu1 %v5303_v10 }
 0x7ad   :  { %3553 = vrcp.f32 %v2713_v36 }
 0x7ae   :  { %2893 = vmatpush1.bf16.msra.mxu0 %v4946_v21  ;;  %2934 = vmatpush1.bf16.msra.mxu1 %v4949_v28  ;;  %v2724_v21 = vpop.permute.xlu1 %2723  ;;  %v5424_v28 = vld [vmem:[#allocation27_spill] sm:$0xff] }
 0x7af   :  { %2894 = vmatprep.subr.bf16.mxu0 %v4952_v19  ;;  %2935 = vmatprep.subr.bf16.mxu1 %v4955_v53  ;;  %vm2725_vm5 = vcmp.eq.s32.totalorder %v2724_v21, 1  ;;  %v5425_v53 = vld [vmem:[#allocation54_spill] sm:$0xff] }
 0x7b2   :  { %v3548_v35 = vpop.eup %3547  ;;  %2895 = vmatpush1.bf16.msra.mxu0 %v4958_v34  ;;  %2936 = vmatpush1.bf16.msra.mxu1 %v4961_v22  ;;  %v5426_v34 = vld [vmem:[#allocation15_spill] sm:$0xff] }
 0x7b3   :  { %v3550_v14 = vpop.eup %3549  ;;  %2896 = vmatprep.subr.bf16.mxu0 %v4964_v7  ;;  %2937 = vmatprep.subr.bf16.mxu1 %v4967_v17  ;;  %v5427_v7 = vld [vmem:[#allocation26_spill] sm:$0xff]  ;;  %v5428_v17 = vld [vmem:[#allocation16_spill] sm:$0xff] }
 0x7b4   :  { %v3552_v37 = vpop.eup %3551  ;;  %v2717_v10 = vmul.f32 %v3550_v14, %v3548_v35 }
 0x7b5   :  { %v2716_v54 = vmul.f32 %v3552_v37, %v4985_v43 }
 0x7b6   :  { %2897 = vmatpush1.bf16.msra.mxu0 %v4971_v47  ;;  %2938 = vmatpush1.bf16.msra.mxu1 %v5424_v28  ;;  %v5430_v47 = vld [vmem:[#allocation28_spill] sm:$0xff] }
 0x7b7   :  { %v2718_v19 = vadd.f32 %v2717_v10, %v2716_v54  ;;  %2898 = vmatprep.subr.bf16.mxu0 %v5425_v53  ;;  %2939 = vmatprep.subr.bf16.mxu1 %v5426_v34  ;;  %v3554_v50 = vpop.eup %3553 }
 0x7b9   :  { %3555 = vtanh.f32 %v2718_v19  ;;  %v5117_v22 = vsel %vm2725_vm5, %v2718_v19, %v4985_v43  ;;  %v5435_v43 = vld [vmem:[#allocation33_spill] sm:$0xff] }
 0x7ba   :  { %2899 = vmatpush1.bf16.msra.mxu0 %v5427_v7  ;;  %2940 = vmatpush1.bf16.msra.mxu1 %v5428_v17  ;;  %v2880_v7 = vpop.permute.xlu0 %2879 }
 0x7bb   :  { %2900 = vmatprep.subr.bf16.mxu0 %v5429_v39  ;;  %2941 = vmatprep.subr.bf16.mxu1 %v5430_v47  ;;  %vm2881_vm6 = vcmp.eq.s32.totalorder %v2880_v7, 1 }
 0x7be   :  { %2901 = vmatpush1.bf16.msra.mxu0 %v5431_v40  ;;  %2942 = vmatpush1.bf16.msra.mxu1 %v5432_v49  ;;  %v5439_v49 = vld [vmem:[#allocation21_spill] sm:$0xff] }
 0x7bf   :  { %2902 = vmatprep.subr.bf16.mxu0 %v5433_v41  ;;  %2943 = vmatprep.subr.bf16.mxu1 %v5434_v45 }
 0x7c2   :  { %2903 = vmatpush1.bf16.msra.mxu0 %v5435_v43  ;;  %2944 = vmatpush1.bf16.msra.mxu1 %v5436_v6 }
 0x7c3   :  { %v3556_v44 = vpop.eup %3555  ;;  %2904 = vmatprep.subr.bf16.mxu0 %v5437_v9  ;;  %2945 = vmatprep.subr.bf16.mxu1 %v5020_v30 }
 0x7c4   :  { %v2720_v38 = vmul.f32 %v3556_v44, %v3554_v50 }
 0x7c6   :  { %v5133_v3 = vsel %vm2725_vm5, %v2720_v38, %v5025_v60  ;;  %v2728_v51 = vsel %vm2725_vm5, %v2720_v38, 0.0  ;;  %2905 = vmatpush1.bf16.msra.mxu0 %v5028_v11  ;;  %2946 = vmatpush1.bf16.msra.mxu1 %v5031_v23 }
 0x7c7   :  { %v2729_v12 = vpack.c.bf16 %v2728_v51, %v2728_v51  ;;  %v2889_v0 = vpack.c.bf16 %v5133_v3, %v5133_v3 }
 0x7c9   :  { %3218 = vst [vmem:[%s5170_s6 + $0x1] sm:$0x1] %v2729_v12  ;;  %2923 = vmatmul.mubr.bf16.vlgmr.msra.gmra.mrb[60].mxu0 %v2889_v0  ;;  %2964 = vmatmul.mubr.bf16.vlgmr.msra.gmra.mrb[60].mxu1 %v2889_v0 }
 0x87c   :  { %v2775_v30 = vpop.f32.mrb[56].mxu0  ;;  %v2816_v4 = vpop.f32.mrb[56].mxu1 }
 0x87d   :  { %v2777_v60 = vpop.f32.mrb[57].mxu0  ;;  %v2818_v32 = vpop.f32.mrb[57].mxu1 }
 0x87e   :  { %v2827_v48 = vcombine.low %v2775_v30, %v2777_v60  ;;  %v2828_v55 = vcombine.low %v2816_v4, %v2818_v32  ;;  %v2779_v29 = vpop.f32.mrb[58].mxu0  ;;  %v2820_v11 = vpop.f32.mrb[58].mxu1 }
 0x87f   :  { %v2780_v62 = vpop.f32.mrb[59].mxu0  ;;  %v2821_v23 = vpop.f32.mrb[59].mxu1 }
 0x880   :  { %v2835_v31 = vrot.slane %v2827_v48, %v4197_v46  ;;  %v2842_v56 = vrot.slane %v2828_v55, %v4197_v46  ;;  %v3029_v23 = vpop.permute.xlu1 %3028 }
 0x881   :  { %vm3030_vm7 = vcmp.eq.s32.totalorder %v3029_v23, 1 }
 0x882   :  { %v2843_v15 = vcombine.low %v2835_v31, %v2842_v56 }
 0x884   :  { %v2845_v5 = vadd.f32 %v2843_v15, %v5438_v18 }
 0x886   :  { %v3221_v57 = vmul.f32 -1.442695, %v2845_v5  ;;  %v2853_v61 = vrot.slane %v2845_v5, 2  ;;  %v2864_v42 = vrot.slane %v2845_v5, 6  ;;  %v2861_v59 = vrot.slane %v2845_v5, 4 }
 0x888   :  { %3557 = vpow2.f32 %v3221_v57  ;;  %v3222_v1 = vmul.f32 -1.442695, %v2853_v61  ;;  %v3223_v58 = vmul.f32 -1.442695, %v2864_v42 }
 0x88a   :  { %3559 = vpow2.f32 %v3222_v1 }
 0x88b   :  { %3561 = vpow2.f32 %v3223_v58 }
 0x892   :  { %v3558_v33 = vpop.eup %3557 }
 0x893   :  { %v2849_v63 = vadd.f32 1.0, %v3558_v33 }
 0x894   :  { %v3560_v24 = vpop.eup %3559 }
 0x895   :  { %3563 = vrcp.f32 %v2849_v63  ;;  %v2858_v25 = vadd.f32 1.0, %v3560_v24  ;;  %v3562_v8 = vpop.eup %3561 }
 0x896   :  { %3565 = vtanh.f32 %v2861_v59  ;;  %v2869_v34 = vadd.f32 1.0, %v3562_v8 }
 0x897   :  { %3567 = vrcp.f32 %v2858_v25 }
 0x898   :  { %3569 = vrcp.f32 %v2869_v34 }
 0x89c   :  { %v2924_v26 = vpop.f32.mrb[60].mxu0  ;;  %v2965_v16 = vpop.f32.mrb[60].mxu1 }
 0x89d   :  { %v2926_v52 = vpop.f32.mrb[61].mxu0  ;;  %v2967_v13 = vpop.f32.mrb[61].mxu1 }
 0x89e   :  { %v2976_v2 = vcombine.low %v2924_v26, %v2926_v52  ;;  %v2977_v35 = vcombine.low %v2965_v16, %v2967_v13  ;;  %v2928_v14 = vpop.f32.mrb[62].mxu0  ;;  %v2969_v37 = vpop.f32.mrb[62].mxu1 }
 0x89f   :  { %v3564_v36 = vpop.eup %3563  ;;  %v2929_v10 = vpop.f32.mrb[63].mxu0 }
 0x8a0   :  { %v2970_v54 = vpop.f32.mrb[63].mxu1  ;;  %v3566_v21 = vpop.eup %3565  ;;  %v2984_v28 = vrot.slane %v2976_v2, %v4197_v46  ;;  %v2991_v19 = vrot.slane %v2977_v35, %v4197_v46 }
 0x8a1   :  { %v3568_v53 = vpop.eup %3567  ;;  %v2873_v39 = vmul.f32 %v3566_v21, %v3564_v36 }
 0x8a2   :  { %v2872_v17 = vmul.f32 %v3568_v53, %v5084_v20  ;;  %v2992_v47 = vcombine.low %v2984_v28, %v2991_v19  ;;  %v3570_v6 = vpop.eup %3569 }
 0x8a4   :  { %v2874_v40 = vadd.f32 %v2873_v39, %v2872_v17  ;;  %v2994_v41 = vadd.f32 %v5439_v49, %v2992_v47 }
 0x8a6   :  { %3571 = vtanh.f32 %v2874_v40  ;;  %v2882_v45 = vsel %vm2881_vm6, %v2874_v40, %v5084_v20  ;;  %v3225_v50 = vmul.f32 -1.442695, %v2994_v41  ;;  %v3002_v44 = vrot.slane %v2994_v41, 2 }
 0x8a7   :  { %3037 = vst [vmem:[#allocation3] sm:$0x3] %v2882_v45  ;;  %v3013_v43 = vrot.slane %v2994_v41, 6  ;;  %v3010_v0 = vrot.slane %v2994_v41, 4 }
 0x8a8   :  { %3573 = vpow2.f32 %v3225_v50  ;;  %v3226_v46 = vmul.f32 -1.442695, %v3002_v44 }
 0x8a9   :  { %v3227_v38 = vmul.f32 -1.442695, %v3013_v43 }
 0x8aa   :  { %3575 = vpow2.f32 %v3226_v46 }
 0x8ab   :  { %3577 = vpow2.f32 %v3227_v38 }
 0x8b0   :  { %v3572_v9 = vpop.eup %3571 }
 0x8b1   :  { %v2876_v51 = vmul.f32 %v3572_v9, %v3570_v6 }
 0x8b2   :  { %v3574_v12 = vpop.eup %3573 }
 0x8b3   :  { %v2883_v30 = vsel %vm2881_vm6, %v2876_v51, %v5088_v27  ;;  %v2884_v4 = vsel %vm2881_vm6, %v2876_v51, 0.0  ;;  %v2998_v60 = vadd.f32 1.0, %v3574_v12 }
 0x8b4   :  { %v3576_v20 = vpop.eup %3575  ;;  %v2885_v32 = vpack.c.bf16 %v2884_v4, %v2884_v4  ;;  %3036 = vst [vmem:[#allocation2] sm:$0x3] %v2883_v30 }
 0x8b5   :  { %3579 = vrcp.f32 %v2998_v60  ;;  %v3007_v48 = vadd.f32 1.0, %v3576_v20  ;;  %v3578_v55 = vpop.eup %3577 }
 0x8b6   :  { %3224 = vst [vmem:[%s5169_s5 + $0x7] sm:$0x1] %v2885_v32  ;;  %3581 = vtanh.f32 %v3010_v0  ;;  %v3018_v27 = vadd.f32 1.0, %v3578_v55 }
 0x8b7   :  { %3583 = vrcp.f32 %v3007_v48 }
 0x8b8   :  { %3585 = vrcp.f32 %v3018_v27 }
 0x8bf   :  { %v3580_v29 = vpop.eup %3579 }
 0x8c0   :  { %v3582_v11 = vpop.eup %3581 }
 0x8c1   :  { %v3584_v62 = vpop.eup %3583  ;;  %v3022_v56 = vmul.f32 %v3582_v11, %v3580_v29 }
 0x8c2   :  { %v3021_v31 = vmul.f32 %v3584_v62, %v5117_v22  ;;  %v3586_v5 = vpop.eup %3585 }
 0x8c4   :  { %v3023_v15 = vadd.f32 %v3022_v56, %v3021_v31 }
 0x8c6   :  { %3587 = vtanh.f32 %v3023_v15  ;;  %v3031_v18 = vsel %vm3030_vm7, %v3023_v15, %v5117_v22 }
 0x8c7   :  { %3039 = vst [vmem:[#allocation5] sm:$0x3] %v3031_v18 }
 0x8d0   :  { %v3588_v57 = vpop.eup %3587 }
 0x8d1   :  { %v3025_v61 = vmul.f32 %v3588_v57, %v3586_v5 }
 0x8d3   :  { %v3032_v1 = vsel %vm3030_vm7, %v3025_v61, %v5133_v3  ;;  %v3033_v42 = vsel %vm3030_vm7, %v3025_v61, 0.0 }
 0x8d4   :  { %v3034_v58 = vpack.c.bf16 %v3033_v42, %v3033_v42  ;;  %3038 = vst [vmem:[#allocation4] sm:$0x3] %v3032_v1 }
 0x8d6   :  { %3035 = vst [vmem:[%s5170_s6] sm:$0x1] %v3034_v58 }
 0x8d7   :  { %3060 = vsyncpa [#allocation9], 1 }
 0x8d8   :  { %3061 = vsyncpa [#allocation11], 1 }

// kernel: model_forward.11
= control target key start
LH: loop header
LB: loop body
LE: loop exit
PB: predicated region body
PF: predicated region fallthrough
CT: control target
= control target key end

     0   :  { %s2697_s12 = smov 0   ;;  %s2699_s13 = smov 0   ;;  %s2945_s0 = inlined_call_operand.vmem [shape: bf16[8,2,256], index: 0, kind: input, shape index: {}]   ;;  %s2946_s1 = inlined_call_operand.vmem [shape: bf16[4,8,256,32], index: 1, kind: input, shape index: {}]   ;;  %s2947_s2 = inlined_call_operand.vmem [shape: f32[4,1,32], index: 2, kind: input, shape index: {}]   ;;  %s2948_s3 = inlined_call_operand.vmem [shape: f32[4,2,32], index: 3, kind: output, shape index: {}]  }
   0x1   :  { %s2701_s14 = smov 0  }
   0x2 LB: > { %s25_s15 = sadd.s32 1, %s2670_s13  ;;  %p1944_p0 = scmp.ge.s32.totalorder %s2674_s14, 1  ;;  %s2674_s14 = sphi %s2701_s14, %s13_s14   ;;  %s2670_s13 = sphi %s2699_s13, %s2950_s13   ;;  %s2666_s12 = sphi %s2697_s12, %s2949_s12  }
   0x3   : > { %p27_p1 = scmp.ge.s32.totalorder %s25_s15, 4  ;;  %p176_p2 = scmp.lt.s32.totalorder %s2674_s14, 5 }
   0x5   : > { %s2952_s15 = smov (%p27_p1, %s25_s15), 0  ;;  %p177_p3 = pnand %p1944_p0, %p176_p2 }
   0x6   : > { %p219_p4 = scmp.lt.s32.totalorder (!%p177_p3), %s2666_s12, 3  ;;  %v2718_v0 = vld.sshfl [vmem:[%s2945_s0] sm:$0x11 pattern:$0x75316420] (!%p177_p3)  ;;  %v296_v1 = vlaneseq (!%p177_p3)  ;;  %vm248_vm0 = vcmask (!%p177_p3), 254976  }
   0x7   : > { %180 = sbr.rel (%p177_p3) target bundleno = 691 (0x2b3), region = 32  ;;  %v2723_v2 = vld.sshfl [vmem:[%s2945_s0 + $0x2] sm:$0x11 pattern:$0x75316420] (!%p177_p3)  ;;  %v292_v6 = vcombine.high (!%p177_p3), %v2718_v0, %v2718_v0 }
   0x8   : > { %v2676_v3 = vmov (!%p177_p3), 1966171168   ;;  %v297_v5 = vshrl.u32 (!%p177_p3), %v296_v1, 7  ;;  %v489_v8 = vcombine.high (!%p177_p3), %v2723_v2, %v2723_v2 }
   0x9   : > { %v294_v4 = vunpack.c.l.s4 (!%p177_p3), %v2676_v3  ;;  %v2769_v37 = vld.sshfl [vmem:[%s2945_s0 + $0x4] sm:$0x11 pattern:$0x75316420] (!%p177_p3) }
   0xa   : > { %v2775_v39 = vld.sshfl [vmem:[%s2945_s0 + $0x6] sm:$0x11 pattern:$0x75316420] (!%p177_p3)  ;;  %v686_v44 = vcombine.high (!%p177_p3), %v2769_v37, %v2769_v37 }
   0xb   : > { %v295_v7 = vunpack.c.0.s8 (!%p177_p3), %v294_v4  ;;  %v883_v46 = vcombine.high (!%p177_p3), %v2775_v39, %v2775_v39 }
   0xd   : > { %v2738_v10 = vsub.s32 (!%p177_p3), %v295_v7, %v297_v5 }
   0xe   : > { %s2954_s12 = smov (!%p219_p4, %s2666_s12), 3 }
   0xf   : > { %s2318_s20 = sshll.u32 %s2954_s12, 10  ;;  %v306_v13 = vrot.slane %v292_v6, %v2738_v10  ;;  %v503_v14 = vrot.slane %v489_v8, %v2738_v10  ;;  %v299_v48 = vrot.slane %v2718_v0, %v2738_v10  ;;  %v496_v49 = vrot.slane %v2723_v2, %v2738_v10  ;;  %s231_s7 = scalar_lea.vmem %s2947_s2, %s2954_s12 }
  0x10   : > { %s2735_s23 = scalar_lea.vmem %s2946_s1, %s2318_s20  ;;  %v700_v52 = vrot.slane %v686_v44, %v2738_v10  ;;  %v897_v54 = vrot.slane %v883_v46, %v2738_v10  ;;  %s1947_s16 = sshll.u32 %s2954_s12, 1 }
  0x11   : > { %v2520_v9 = vld [vmem:[%s2735_s23 + $0x40] sm:$0xff]   ;;  %v2524_v16 = vld [vmem:[%s2735_s23 + $0x48] sm:$0xff]   ;;  %437 = vmatprep.mubr.bf16.mxu0 %v306_v13  ;;  %634 = vmatprep.mubr.bf16.mxu1 %v503_v14  ;;  %v2528_v20 = vld [vmem:[%s2735_s23 + $0x50] sm:$0xff]   ;;  %s235_s19 = scalar_lea.vmem %s2948_s3, %s1947_s16 }
  0x12   : > { %v2521_v11 = vld [vmem:[%s2735_s23 + $0xc0] sm:$0xff]   ;;  %2319 = vmatprep.subr.bf16.mxu0 %v2520_v9  ;;  %v2525_v17 = vld [vmem:[%s2735_s23 + $0xc8] sm:$0xff]   ;;  %v2529_v21 = vld [vmem:[%s2735_s23 + $0xd0] sm:$0xff]  }
  0x13   : > { %v2522_v12 = vld [vmem:[%s2735_s23] sm:$0xff]   ;;  %2341 = vmatprep.subr.bf16.mxu1 %v2521_v11  ;;  %v2526_v18 = vld [vmem:[%s2735_s23 + $0x8] sm:$0xff]   ;;  %v2530_v22 = vld [vmem:[%s2735_s23 + $0x10] sm:$0xff]  }
  0x14   : > { %v2523_v15 = vld [vmem:[%s2735_s23 + $0x80] sm:$0xff]   ;;  %2320 = vmatpush3.bf16.msra.mxu0 %v2522_v12  ;;  %v2527_v19 = vld [vmem:[%s2735_s23 + $0x88] sm:$0xff]   ;;  %v2531_v23 = vld [vmem:[%s2735_s23 + $0x90] sm:$0xff]  }
  0x15   : > { %2342 = vmatpush3.bf16.msra.mxu1 %v2523_v15  ;;  %2321 = vmatprep.subr.bf16.mxu0 %v2524_v16  ;;  %v2532_v24 = vld [vmem:[%s2735_s23 + $0x58] sm:$0xff]   ;;  %v2536_v28 = vld [vmem:[%s2735_s23 + $0x60] sm:$0xff]   ;;  %v2540_v32 = vld [vmem:[%s2735_s23 + $0x68] sm:$0xff]  }
  0x16   : > { %2343 = vmatprep.subr.bf16.mxu1 %v2525_v17  ;;  %v2533_v25 = vld [vmem:[%s2735_s23 + $0xd8] sm:$0xff]   ;;  %v2537_v29 = vld [vmem:[%s2735_s23 + $0xe0] sm:$0xff]   ;;  %v2541_v33 = vld [vmem:[%s2735_s23 + $0xe8] sm:$0xff]  }
  0x17   : > { %v2534_v26 = vld [vmem:[%s2735_s23 + $0x18] sm:$0xff]   ;;  %v2538_v30 = vld [vmem:[%s2735_s23 + $0x20] sm:$0xff]   ;;  %v2542_v34 = vld [vmem:[%s2735_s23 + $0x28] sm:$0xff]  }
  0x18   : > { %2322 = vmatpush3.bf16.msra.mxu0 %v2526_v18  ;;  %v2535_v27 = vld [vmem:[%s2735_s23 + $0x98] sm:$0xff]   ;;  %v2539_v31 = vld [vmem:[%s2735_s23 + $0xa0] sm:$0xff]   ;;  %v2543_v35 = vld [vmem:[%s2735_s23 + $0xa8] sm:$0xff]  }
  0x19   : > { %2344 = vmatpush3.bf16.msra.mxu1 %v2527_v19  ;;  %2323 = vmatprep.subr.bf16.mxu0 %v2528_v20  ;;  %v2544_v36 = vld [vmem:[%s2735_s23 + $0x70] sm:$0xff]   ;;  %v2548_v42 = vld [vmem:[%s2735_s23 + $0x78] sm:$0xff]   ;;  %v2552_v50 = vld [vmem:[%s2735_s23 + $0x140] sm:$0xff]  }
  0x1a   : > { %2345 = vmatprep.subr.bf16.mxu1 %v2529_v21  ;;  %v2545_v38 = vld [vmem:[%s2735_s23 + $0xf0] sm:$0xff]   ;;  %v2549_v43 = vld [vmem:[%s2735_s23 + $0xf8] sm:$0xff]   ;;  %v2553_v51 = vld [vmem:[%s2735_s23 + $0x1c0] sm:$0xff]  }
  0x1b   : > { %v2546_v40 = vld [vmem:[%s2735_s23 + $0x30] sm:$0xff]   ;;  %v2550_v45 = vld [vmem:[%s2735_s23 + $0x38] sm:$0xff]   ;;  %v2554_v53 = vld [vmem:[%s2735_s23 + $0x100] sm:$0xff]  }
  0x1c   : > { %2324 = vmatpush3.bf16.msra.mxu0 %v2530_v22  ;;  %v2547_v41 = vld [vmem:[%s2735_s23 + $0xb0] sm:$0xff]   ;;  %v2551_v47 = vld [vmem:[%s2735_s23 + $0xb8] sm:$0xff]   ;;  %v2555_v55 = vld [vmem:[%s2735_s23 + $0x180] sm:$0xff]  }
  0x1d   : > { %2346 = vmatpush3.bf16.msra.mxu1 %v2531_v23  ;;  %2325 = vmatprep.subr.bf16.mxu0 %v2532_v24  ;;  %v2556_v56 = vld [vmem:[%s2735_s23 + $0x148] sm:$0xff]   ;;  %v2560_v60 = vld [vmem:[%s2735_s23 + $0x150] sm:$0xff]   ;;  %v2564_v0 = vld [vmem:[%s2735_s23 + $0x158] sm:$0xff]  }
  0x1e   : > { %2347 = vmatprep.subr.bf16.mxu1 %v2533_v25  ;;  %v2557_v57 = vld [vmem:[%s2735_s23 + $0x1c8] sm:$0xff]   ;;  %v2561_v61 = vld [vmem:[%s2735_s23 + $0x1d0] sm:$0xff]   ;;  %v2565_v1 = vld [vmem:[%s2735_s23 + $0x1d8] sm:$0xff]   ;;  %v693_v25 = vrot.slane %v2769_v37, %v2738_v10 }
  0x1f   : > { %v2558_v58 = vld [vmem:[%s2735_s23 + $0x108] sm:$0xff]   ;;  %v2562_v62 = vld [vmem:[%s2735_s23 + $0x110] sm:$0xff]   ;;  %v2566_v2 = vld [vmem:[%s2735_s23 + $0x118] sm:$0xff]  }
  0x20   : > { %2326 = vmatpush3.bf16.msra.mxu0 %v2534_v26  ;;  %v2559_v59 = vld [vmem:[%s2735_s23 + $0x188] sm:$0xff]   ;;  %v2563_v63 = vld [vmem:[%s2735_s23 + $0x190] sm:$0xff]   ;;  %v2567_v3 = vld [vmem:[%s2735_s23 + $0x198] sm:$0xff]   ;;  %v890_v26 = vrot.slane %v2775_v39, %v2738_v10 }
  0x21   : > { %2348 = vmatpush3.bf16.msra.mxu1 %v2535_v27  ;;  %2327 = vmatprep.subr.bf16.mxu0 %v2536_v28  ;;  %v2568_v4 = vld [vmem:[%s2735_s23 + $0x160] sm:$0xff]   ;;  %v2572_v8 = vld [vmem:[%s2735_s23 + $0x168] sm:$0xff]   ;;  %v2576_v13 = vld [vmem:[%s2735_s23 + $0x170] sm:$0xff]  }
  0x22   : > { %2349 = vmatprep.subr.bf16.mxu1 %v2537_v29  ;;  %v2569_v5 = vld [vmem:[%s2735_s23 + $0x1e0] sm:$0xff]   ;;  %v2573_v9 = vld [vmem:[%s2735_s23 + $0x1e8] sm:$0xff]   ;;  %v2577_v15 = vld [vmem:[%s2735_s23 + $0x1f0] sm:$0xff]  }
  0x23   : > { %v2570_v6 = vld [vmem:[%s2735_s23 + $0x120] sm:$0xff]   ;;  %v2574_v11 = vld [vmem:[%s2735_s23 + $0x128] sm:$0xff]   ;;  %v2578_v17 = vld [vmem:[%s2735_s23 + $0x130] sm:$0xff]  }
  0x24   : > { %2328 = vmatpush3.bf16.msra.mxu0 %v2538_v30  ;;  %v2571_v7 = vld [vmem:[%s2735_s23 + $0x1a0] sm:$0xff]   ;;  %v2575_v12 = vld [vmem:[%s2735_s23 + $0x1a8] sm:$0xff]   ;;  %v2579_v18 = vld [vmem:[%s2735_s23 + $0x1b0] sm:$0xff]  }
  0x25   : > { %2350 = vmatpush3.bf16.msra.mxu1 %v2539_v31  ;;  %2329 = vmatprep.subr.bf16.mxu0 %v2540_v32  ;;  %v2821_v14 = vld.sshfl [vmem:[%s2945_s0 + $0x8] sm:$0x11 pattern:$0x75316420]  ;;  %v2580_v19 = vld [vmem:[%s2735_s23 + $0x178] sm:$0xff]   ;;  %v2584_v27 = vld [vmem:[%s2735_s23 + $0x240] sm:$0xff]  }
  0x26   : > { %2351 = vmatprep.subr.bf16.mxu1 %v2541_v33  ;;  %v2827_v16 = vld.sshfl [vmem:[%s2945_s0 + $0xa] sm:$0x11 pattern:$0x75316420]  ;;  %v2581_v20 = vld [vmem:[%s2735_s23 + $0x1f8] sm:$0xff]   ;;  %v1080_v21 = vcombine.high %v2821_v14, %v2821_v14  ;;  %v2585_v28 = vld [vmem:[%s2735_s23 + $0x2c0] sm:$0xff]  }
  0x27   : > { %v2582_v22 = vld [vmem:[%s2735_s23 + $0x138] sm:$0xff]   ;;  %v1277_v23 = vcombine.high %v2827_v16, %v2827_v16  ;;  %v2586_v30 = vld [vmem:[%s2735_s23 + $0x200] sm:$0xff]   ;;  %v2588_v33 = vld [vmem:[%s2735_s23 + $0x248] sm:$0xff]  }
  0x28   : > { %2330 = vmatpush3.bf16.msra.mxu0 %v2542_v34  ;;  %v2583_v24 = vld [vmem:[%s2735_s23 + $0x1b8] sm:$0xff]   ;;  %v1094_v29 = vrot.slane %v1080_v21, %v2738_v10  ;;  %v2587_v32 = vld [vmem:[%s2735_s23 + $0x280] sm:$0xff]   ;;  %v2589_v34 = vld [vmem:[%s2735_s23 + $0x2c8] sm:$0xff]  }
  0x29   : > { %2352 = vmatpush3.bf16.msra.mxu1 %v2543_v35  ;;  %2331 = vmatprep.subr.bf16.mxu0 %v2544_v36  ;;  %v1291_v31 = vrot.slane %v1277_v23, %v2738_v10  ;;  %v2590_v35 = vld [vmem:[%s2735_s23 + $0x208] sm:$0xff]   ;;  %v2592_v37 = vld [vmem:[%s2735_s23 + $0x250] sm:$0xff]   ;;  %v2599_v44 = vld [vmem:[%s2735_s23 + $0x298] sm:$0xff]  }
  0x2a   : > { %2353 = vmatprep.subr.bf16.mxu1 %v2545_v38  ;;  %v2591_v36 = vld [vmem:[%s2735_s23 + $0x288] sm:$0xff]   ;;  %v2593_v38 = vld [vmem:[%s2735_s23 + $0x2d0] sm:$0xff]   ;;  %v2601_v46 = vld [vmem:[%s2735_s23 + $0x2e0] sm:$0xff]  }
  0x2b   : > { %v2594_v39 = vld [vmem:[%s2735_s23 + $0x210] sm:$0xff]   ;;  %v2637_v21 = vld [vmem:[%s2735_s23 + $0x3e8] sm:$0xff]  }
  0x2c   : > { %2332 = vmatpush3.bf16.msra.mxu0 %v2546_v40  ;;  %v2595_v40 = vld [vmem:[%s2735_s23 + $0x290] sm:$0xff]   ;;  %v2639_v23 = vld [vmem:[%s2735_s23 + $0x3a8] sm:$0xff]  }
  0x2d   : > { %2354 = vmatpush3.bf16.msra.mxu1 %v2547_v41  ;;  %2333 = vmatprep.subr.bf16.mxu0 %v2548_v42  ;;  %v2596_v41 = vld [vmem:[%s2735_s23 + $0x258] sm:$0xff]  }
  0x2e   : > { %2355 = vmatprep.subr.bf16.mxu1 %v2549_v43  ;;  %v2597_v42 = vld [vmem:[%s2735_s23 + $0x2d8] sm:$0xff]  }
  0x2f   : > { %v2598_v43 = vld [vmem:[%s2735_s23 + $0x218] sm:$0xff]  }
  0x30   : > { %2334 = vmatpush3.bf16.msra.mxu0 %v2550_v45  ;;  %v2600_v45 = vld [vmem:[%s2735_s23 + $0x260] sm:$0xff]  }
  0x31   : > { %2356 = vmatpush3.bf16.msra.mxu1 %v2551_v47  ;;  %2363 = vmatprep.subr.bf16.mxu0 %v2552_v50  ;;  %v2602_v47 = vld [vmem:[%s2735_s23 + $0x220] sm:$0xff]   ;;  %v2605_v50 = vld [vmem:[%s2735_s23 + $0x2e8] sm:$0xff]  }
  0x32   : > { %2385 = vmatprep.subr.bf16.mxu1 %v2553_v51  ;;  %v2606_v51 = vld [vmem:[%s2735_s23 + $0x228] sm:$0xff]  }
  0x33   : > { %438 = vmatmul.mubr.bf16.vlgmr.msra.gmra.mrb[0].mxu0 %v299_v48  ;;  %v2603_v48 = vld [vmem:[%s2735_s23 + $0x2a0] sm:$0xff]  }
  0x34   : > { %635 = vmatmul.mubr.bf16.vlgmr.msra.gmra.mrb[0].mxu1 %v496_v49  ;;  %2364 = vmatpush3.bf16.msra.mxu0 %v2554_v53  ;;  %v2604_v49 = vld [vmem:[%s2735_s23 + $0x268] sm:$0xff]   ;;  %v2608_v53 = vld [vmem:[%s2735_s23 + $0x270] sm:$0xff]  }
  0x35   : > { %2386 = vmatpush3.bf16.msra.mxu1 %v2555_v55  ;;  %831 = vmatprep.mubr.bf16.mxu0 %v700_v52  ;;  %v2607_v52 = vld [vmem:[%s2735_s23 + $0x2a8] sm:$0xff]   ;;  %v2610_v55 = vld [vmem:[%s2735_s23 + $0x230] sm:$0xff]  }
  0x36   : > { %2365 = vmatprep.subr.bf16.mxu0 %v2556_v56  ;;  %1028 = vmatprep.mubr.bf16.mxu1 %v897_v54  ;;  %v2609_v54 = vld [vmem:[%s2735_s23 + $0x2f0] sm:$0xff]  }
  0x37   : > { %2387 = vmatprep.subr.bf16.mxu1 %v2557_v57  ;;  %v2611_v56 = vld [vmem:[%s2735_s23 + $0x2b0] sm:$0xff]   ;;  %v2612_v57 = vld [vmem:[%s2735_s23 + $0x278] sm:$0xff]  }
  0x38   : > { %2366 = vmatpush3.bf16.msra.mxu0 %v2558_v58  ;;  %v2613_v58 = vld [vmem:[%s2735_s23 + $0x2f8] sm:$0xff]  }
  0x39   : > { %2388 = vmatpush3.bf16.msra.mxu1 %v2559_v59  ;;  %2367 = vmatprep.subr.bf16.mxu0 %v2560_v60  ;;  %v2614_v59 = vld [vmem:[%s2735_s23 + $0x238] sm:$0xff]  }
  0x3a   : > { %2389 = vmatprep.subr.bf16.mxu1 %v2561_v61  ;;  %v2615_v60 = vld [vmem:[%s2735_s23 + $0x2b8] sm:$0xff]   ;;  %v1087_v61 = vrot.slane %v2821_v14, %v2738_v10 }
  0x3b   : > { %v2630_v14 = vld [vmem:[%s2735_s23 + $0x318] sm:$0xff]  }
  0x3c   : > { %2368 = vmatpush3.bf16.msra.mxu0 %v2562_v62  ;;  %v1284_v62 = vrot.slane %v2827_v16, %v2738_v10  ;;  %v2632_v16 = vld [vmem:[%s2735_s23 + $0x360] sm:$0xff]  }
  0x3d   : > { %2390 = vmatpush3.bf16.msra.mxu1 %v2563_v63  ;;  %2369 = vmatprep.subr.bf16.mxu0 %v2564_v0  ;;  %v2616_v63 = vld [vmem:[%s2735_s23 + $0x340] sm:$0xff]  }
  0x3e   : > { %2391 = vmatprep.subr.bf16.mxu1 %v2565_v1  ;;  %v2617_v0 = vld [vmem:[%s2735_s23 + $0x3c0] sm:$0xff]  }
  0x3f   : > { %v2618_v1 = vld [vmem:[%s2735_s23 + $0x300] sm:$0xff]  }
  0x40   : > { %2370 = vmatpush3.bf16.msra.mxu0 %v2566_v2  ;;  %v2619_v2 = vld [vmem:[%s2735_s23 + $0x380] sm:$0xff]  }
  0x41   : > { %2392 = vmatpush3.bf16.msra.mxu1 %v2567_v3  ;;  %2371 = vmatprep.subr.bf16.mxu0 %v2568_v4  ;;  %v2620_v3 = vld [vmem:[%s2735_s23 + $0x348] sm:$0xff]  }
  0x42   : > { %2393 = vmatprep.subr.bf16.mxu1 %v2569_v5  ;;  %v2621_v4 = vld [vmem:[%s2735_s23 + $0x3c8] sm:$0xff]  }
  0x43   : > { %v2622_v5 = vld [vmem:[%s2735_s23 + $0x308] sm:$0xff]  }
  0x44   : > { %2372 = vmatpush3.bf16.msra.mxu0 %v2570_v6  ;;  %v2623_v6 = vld [vmem:[%s2735_s23 + $0x388] sm:$0xff]  }
  0x45   : > { %2394 = vmatpush3.bf16.msra.mxu1 %v2571_v7  ;;  %2373 = vmatprep.subr.bf16.mxu0 %v2572_v8  ;;  %v2624_v7 = vld [vmem:[%s2735_s23 + $0x350] sm:$0xff]  }
  0x46   : > { %2395 = vmatprep.subr.bf16.mxu1 %v2573_v9  ;;  %v2625_v8 = vld [vmem:[%s2735_s23 + $0x3d0] sm:$0xff]  }
  0x47   : > { %v2626_v9 = vld [vmem:[%s2735_s23 + $0x310] sm:$0xff]  }
  0x48   : > { %2374 = vmatpush3.bf16.msra.mxu0 %v2574_v11  ;;  %v2627_v11 = vld [vmem:[%s2735_s23 + $0x390] sm:$0xff]  }
  0x49   : > { %2396 = vmatpush3.bf16.msra.mxu1 %v2575_v12  ;;  %2375 = vmatprep.subr.bf16.mxu0 %v2576_v13  ;;  %v2628_v12 = vld [vmem:[%s2735_s23 + $0x358] sm:$0xff]  }
  0x4a   : > { %2397 = vmatprep.subr.bf16.mxu1 %v2577_v15  ;;  %v2629_v13 = vld [vmem:[%s2735_s23 + $0x3d8] sm:$0xff]  }
  0x4b   : > { %v2631_v15 = vld [vmem:[%s2735_s23 + $0x398] sm:$0xff]  }
  0x4c   : > { %2376 = vmatpush3.bf16.msra.mxu0 %v2578_v17  ;;  %v2633_v17 = vld [vmem:[%s2735_s23 + $0x3e0] sm:$0xff]  }
  0x4d   : > { %2398 = vmatpush3.bf16.msra.mxu1 %v2579_v18  ;;  %2377 = vmatprep.subr.bf16.mxu0 %v2580_v19  ;;  %v2634_v18 = vld [vmem:[%s2735_s23 + $0x320] sm:$0xff]  }
  0x4e   : > { %2399 = vmatprep.subr.bf16.mxu1 %v2581_v20  ;;  %v2635_v19 = vld [vmem:[%s2735_s23 + $0x3a0] sm:$0xff]   ;;  %v2636_v20 = vld [vmem:[%s2735_s23 + $0x368] sm:$0xff]  }
  0x50   : > { %2378 = vmatpush3.bf16.msra.mxu0 %v2582_v22  ;;  %v2638_v22 = vld [vmem:[%s2735_s23 + $0x328] sm:$0xff]  }
  0x51   : > { %2400 = vmatpush3.bf16.msra.mxu1 %v2583_v24  ;;  %2407 = vmatprep.subr.bf16.mxu0 %v2584_v27  ;;  %v2640_v24 = vld [vmem:[%s2735_s23 + $0x370] sm:$0xff]  }
  0x52   : > { %2429 = vmatprep.subr.bf16.mxu1 %v2585_v28  ;;  %v2643_v27 = vld [vmem:[%s2735_s23 + $0x3b0] sm:$0xff]   ;;  %v2644_v28 = vld [vmem:[%s2735_s23 + $0x378] sm:$0xff]  }
  0x53   : > { %832 = vmatmul.mubr.bf16.vlgmr.msra.gmra.mrb[4].mxu0 %v693_v25  ;;  %v2641_v25 = vld [vmem:[%s2735_s23 + $0x3f0] sm:$0xff]  }
  0x54   : > { %1029 = vmatmul.mubr.bf16.vlgmr.msra.gmra.mrb[4].mxu1 %v890_v26  ;;  %2408 = vmatpush3.bf16.msra.mxu0 %v2586_v30  ;;  %v2642_v26 = vld [vmem:[%s2735_s23 + $0x330] sm:$0xff]   ;;  %v2646_v30 = vld [vmem:[%s2735_s23 + $0x338] sm:$0xff]  }
  0x55   : > { %2430 = vmatpush3.bf16.msra.mxu1 %v2587_v32  ;;  %1225 = vmatprep.mubr.bf16.mxu0 %v1094_v29  ;;  %v2645_v29 = vld [vmem:[%s2735_s23 + $0x3f8] sm:$0xff]   ;;  %v2249_v32 = vld.sshfl [vmem:[%s2945_s0 + $0xc] sm:$0x11 pattern:$0x75316420] }
  0x56   : > { %2409 = vmatprep.subr.bf16.mxu0 %v2588_v33  ;;  %1422 = vmatprep.mubr.bf16.mxu1 %v1291_v31  ;;  %v2647_v31 = vld [vmem:[%s2735_s23 + $0x3b8] sm:$0xff]   ;;  %v1948_v33 = vld [vmem:[%s231_s7] ss:$0 sm:$0xff] }
  0x57   : > { %2431 = vmatprep.subr.bf16.mxu1 %v2589_v34  ;;  %v1474_v34 = vcombine.high %v2249_v32, %v2249_v32  ;;  %249 = vst.msk [vmem:[#allocation2] sm:$0x3] %vm248_vm0, %v1948_v33 }
  0x58   : > { %2410 = vmatpush3.bf16.msra.mxu0 %v2590_v35  ;;  %v2299_v35 = vld.sshfl [vmem:[%s2945_s0 + $0xe] sm:$0x11 pattern:$0x75316420] }
  0x59   : > { %2432 = vmatpush3.bf16.msra.mxu1 %v2591_v36  ;;  %2411 = vmatprep.subr.bf16.mxu0 %v2592_v37  ;;  %v1671_v36 = vcombine.high %v2299_v35, %v2299_v35  ;;  %v1481_v37 = vrot.slane %v2249_v32, %v2738_v10 }
  0x5a   : > { %2433 = vmatprep.subr.bf16.mxu1 %v2593_v38  ;;  %v1488_v38 = vrot.slane %v1474_v34, %v2738_v10 }
  0x5c   : > { %2412 = vmatpush3.bf16.msra.mxu0 %v2594_v39  ;;  %v1678_v39 = vrot.slane %v2299_v35, %v2738_v10 }
  0x5d   : > { %2434 = vmatpush3.bf16.msra.mxu1 %v2595_v40  ;;  %2413 = vmatprep.subr.bf16.mxu0 %v2596_v41  ;;  %v1685_v40 = vrot.slane %v1671_v36, %v2738_v10 }
  0x5e   : > { %2435 = vmatprep.subr.bf16.mxu1 %v2597_v42 }
  0x60   : > { %2414 = vmatpush3.bf16.msra.mxu0 %v2598_v43  ;;  %v250_v43 = vld [vmem:[#allocation2] sm:$0x3] }
  0x61   : > { %2436 = vmatpush3.bf16.msra.mxu1 %v2599_v44  ;;  %2415 = vmatprep.subr.bf16.mxu0 %v2600_v45 }
  0x62   : > { %2437 = vmatprep.subr.bf16.mxu1 %v2601_v46 }
  0x64   : > { %2416 = vmatpush3.bf16.msra.mxu0 %v2602_v47 }
  0x65   : > { %2438 = vmatpush3.bf16.msra.mxu1 %v2603_v48  ;;  %2417 = vmatprep.subr.bf16.mxu0 %v2604_v49 }
  0x66   : > { %2439 = vmatprep.subr.bf16.mxu1 %v2605_v50 }
  0x68   : > { %2418 = vmatpush3.bf16.msra.mxu0 %v2606_v51 }
  0x69   : > { %2440 = vmatpush3.bf16.msra.mxu1 %v2607_v52  ;;  %2419 = vmatprep.subr.bf16.mxu0 %v2608_v53 }
  0x6a   : > { %2441 = vmatprep.subr.bf16.mxu1 %v2609_v54 }
  0x6c   : > { %2420 = vmatpush3.bf16.msra.mxu0 %v2610_v55 }
  0x6d   : > { %2442 = vmatpush3.bf16.msra.mxu1 %v2611_v56  ;;  %2421 = vmatprep.subr.bf16.mxu0 %v2612_v57 }
  0x6e   : > { %2443 = vmatprep.subr.bf16.mxu1 %v2613_v58 }
  0x70   : > { %2422 = vmatpush3.bf16.msra.mxu0 %v2614_v59 }
  0x71   : > { %2444 = vmatpush3.bf16.msra.mxu1 %v2615_v60  ;;  %2451 = vmatprep.subr.bf16.mxu0 %v2616_v63 }
  0x72   : > { %2473 = vmatprep.subr.bf16.mxu1 %v2617_v0 }
  0x73   : > { %1226 = vmatmul.mubr.bf16.vlgmr.msra.gmra.mrb[8].mxu0 %v1087_v61 }
  0x74   : > { %1423 = vmatmul.mubr.bf16.vlgmr.msra.gmra.mrb[8].mxu1 %v1284_v62  ;;  %2452 = vmatpush3.bf16.msra.mxu0 %v2618_v1 }
  0x75   : > { %2474 = vmatpush3.bf16.msra.mxu1 %v2619_v2  ;;  %2453 = vmatprep.subr.bf16.mxu0 %v2620_v3 }
  0x76   : > { %2475 = vmatprep.subr.bf16.mxu1 %v2621_v4  ;;  %1619 = vmatprep.mubr.bf16.mxu0 %v1488_v38 }
  0x77   : > { %1816 = vmatprep.mubr.bf16.mxu1 %v1685_v40 }
  0x78   : > { %2454 = vmatpush3.bf16.msra.mxu0 %v2622_v5 }
  0x79   : > { %2476 = vmatpush3.bf16.msra.mxu1 %v2623_v6  ;;  %2455 = vmatprep.subr.bf16.mxu0 %v2624_v7 }
  0x7a   : > { %2477 = vmatprep.subr.bf16.mxu1 %v2625_v8 }
  0x7c   : > { %2456 = vmatpush3.bf16.msra.mxu0 %v2626_v9 }
  0x7d   : > { %2478 = vmatpush3.bf16.msra.mxu1 %v2627_v11  ;;  %2457 = vmatprep.subr.bf16.mxu0 %v2628_v12 }
  0x7e   : > { %2479 = vmatprep.subr.bf16.mxu1 %v2629_v13 }
  0x80   : > { %2458 = vmatpush3.bf16.msra.mxu0 %v2630_v14 }
  0x81   : > { %2480 = vmatpush3.bf16.msra.mxu1 %v2631_v15  ;;  %2459 = vmatprep.subr.bf16.mxu0 %v2632_v16 }
  0x82   : > { %2481 = vmatprep.subr.bf16.mxu1 %v2633_v17 }
  0x84   : > { %2460 = vmatpush3.bf16.msra.mxu0 %v2634_v18 }
  0x85   : > { %2482 = vmatpush3.bf16.msra.mxu1 %v2635_v19  ;;  %2461 = vmatprep.subr.bf16.mxu0 %v2636_v20 }
  0x86   : > { %2483 = vmatprep.subr.bf16.mxu1 %v2637_v21 }
  0x88   : > { %2462 = vmatpush3.bf16.msra.mxu0 %v2638_v22 }
  0x89   : > { %2484 = vmatpush3.bf16.msra.mxu1 %v2639_v23  ;;  %2463 = vmatprep.subr.bf16.mxu0 %v2640_v24 }
  0x8a   : > { %2485 = vmatprep.subr.bf16.mxu1 %v2641_v25 }
  0x8c   : > { %2464 = vmatpush3.bf16.msra.mxu0 %v2642_v26 }
  0x8d   : > { %2486 = vmatpush3.bf16.msra.mxu1 %v2643_v27  ;;  %2465 = vmatprep.subr.bf16.mxu0 %v2644_v28 }
  0x8e   : > { %2487 = vmatprep.subr.bf16.mxu1 %v2645_v29 }
  0x90   : > { %2466 = vmatpush3.bf16.msra.mxu0 %v2646_v30 }
  0x91   : > { %2488 = vmatpush3.bf16.msra.mxu1 %v2647_v31 }
  0x93   : > { %1620 = vmatmul.mubr.bf16.vlgmr.msra.gmra.mrb[12].mxu0 %v1481_v37 }
  0x94   : > { %1817 = vmatmul.mubr.bf16.vlgmr.msra.gmra.mrb[12].mxu1 %v1678_v39 }
 0x106   : > { %v2335_v41 = vpop.f32.mrb[0].mxu0 }
 0x107   : > { %v2357_v42 = vpop.f32.mrb[0].mxu1  ;;  %v2336_v44 = vpop.f32.mrb[1].mxu0 }
 0x108   : > { %v2337_v45 = vadd.f32 %v2336_v44, %v2335_v41  ;;  %v2358_v46 = vpop.f32.mrb[1].mxu1  ;;  %v2338_v47 = vpop.f32.mrb[2].mxu0 }
 0x109   : > { %v2359_v48 = vadd.f32 %v2358_v46, %v2357_v42  ;;  %v2360_v49 = vpop.f32.mrb[2].mxu1  ;;  %v2339_v50 = vpop.f32.mrb[3].mxu0 }
 0x10a   : > { %v445_v51 = vadd.f32 %v2337_v45, %v250_v43  ;;  %v2361_v52 = vpop.f32.mrb[3].mxu1 }
 0x10c   : > { %v642_v53 = vadd.f32 %v2359_v48, %v445_v51 }
 0x126   : > { %v2379_v54 = vpop.f32.mrb[4].mxu0 }
 0x127   : > { %v2401_v55 = vpop.f32.mrb[4].mxu1  ;;  %v2380_v10 = vpop.f32.mrb[5].mxu0 }
 0x128   : > { %v2381_v56 = vadd.f32 %v2380_v10, %v2379_v54  ;;  %v2402_v57 = vpop.f32.mrb[5].mxu1  ;;  %v2382_v58 = vpop.f32.mrb[6].mxu0 }
 0x129   : > { %v2403_v59 = vadd.f32 %v2402_v57, %v2401_v55  ;;  %v2404_v60 = vpop.f32.mrb[6].mxu1  ;;  %v2383_v61 = vpop.f32.mrb[7].mxu0 }
 0x12a   : > { %v839_v62 = vadd.f32 %v2381_v56, %v642_v53  ;;  %v2405_v63 = vpop.f32.mrb[7].mxu1 }
 0x12c   : > { %v1036_v0 = vadd.f32 %v2403_v59, %v839_v62 }
 0x146   : > { %v2423_v1 = vpop.f32.mrb[8].mxu0 }
 0x147   : > { %v2445_v2 = vpop.f32.mrb[8].mxu1  ;;  %v2424_v3 = vpop.f32.mrb[9].mxu0 }
 0x148   : > { %v2425_v4 = vadd.f32 %v2424_v3, %v2423_v1  ;;  %v2446_v5 = vpop.f32.mrb[9].mxu1  ;;  %v2426_v6 = vpop.f32.mrb[10].mxu0 }
 0x149   : > { %v2447_v7 = vadd.f32 %v2446_v5, %v2445_v2  ;;  %v2448_v8 = vpop.f32.mrb[10].mxu1  ;;  %v2427_v9 = vpop.f32.mrb[11].mxu0 }
 0x14a   : > { %v1233_v11 = vadd.f32 %v2425_v4, %v1036_v0  ;;  %v2449_v12 = vpop.f32.mrb[11].mxu1 }
 0x14c   : > { %v1430_v13 = vadd.f32 %v2447_v7, %v1233_v11 }
 0x166   : > { %v2467_v14 = vpop.f32.mrb[12].mxu0 }
 0x167   : > { %v2489_v15 = vpop.f32.mrb[12].mxu1  ;;  %v2468_v16 = vpop.f32.mrb[13].mxu0 }
 0x168   : > { %v2469_v17 = vadd.f32 %v2468_v16, %v2467_v14  ;;  %v2490_v18 = vpop.f32.mrb[13].mxu1  ;;  %v2470_v19 = vpop.f32.mrb[14].mxu0 }
 0x169   : > { %v2491_v20 = vadd.f32 %v2490_v18, %v2489_v15  ;;  %v2492_v21 = vpop.f32.mrb[14].mxu1  ;;  %v2471_v22 = vpop.f32.mrb[15].mxu0 }
 0x16a   : > { %v1627_v23 = vadd.f32 %v2469_v17, %v1430_v13  ;;  %v2493_v24 = vpop.f32.mrb[15].mxu1 }
 0x16c   : > { %v1824_v25 = vadd.f32 %v2491_v20, %v1627_v23 }
 0x16e   : > { %1826 = vst.msk [vmem:[#allocation2] sm:$0x3] %vm248_vm0, %v1824_v25 }
 0x175   : > { %v1830_v26 = vld [vmem:[#allocation2] sm:$0x3] }
 0x176   : > { %v1831_v27 = vsel %vm248_vm0, %v1830_v26, -inf }
 0x177   : > { %1832 = vmax.xlane.f32.xlu0 %v1831_v27 }
 0x204   : > { %v1833_v28 = vpop.xlane.xlu0 %1832 }
 0x205   : > { %v1834_v29 = vsub.f32 %v1830_v26, %v1833_v28 }
 0x207   : > { %v1835_v30 = vmul.f32 1.442695, %v1834_v29 }
 0x209   : > { %2648 = vpow2.f32 %v1835_v30 }
 0x213   : > { %v2649_v31 = vpop.eup %2648 }
 0x214   : > { %v1837_v32 = vsel %vm248_vm0, %v2649_v31, 0.0 }
 0x215   : > { %1838 = vadd.xlane.f32.xlu0 %v1837_v32 }
 0x2a2   : > { %v1839_v33 = vpop.xlane.xlu0 %1838 }
 0x2a3   : > { %2650 = vlog2.f32 %v1839_v33 }
 0x2ad   : > { %v2651_v34 = vpop.eup %2650 }
 0x2ae   : > { %v1841_v35 = vmul.f32 0.6931472, %v2651_v34 }
 0x2b0   : > { %v1842_v36 = vsub.f32 %v1834_v29, %v1841_v35 }
 0x2b2   : > { %1843 = vst.msk [vmem:[%s235_s19] sm:$0x3] %vm248_vm0, %v1842_v36 }
 0x2b3 PF: > { %s13_s14 = sadd.s32 1, %s2674_s14   ;;  %s2949_s12 = smov %s2670_s13 }
 0x2b4   : > { %p10_p5 = scmp.ge.s32.totalorder %s13_s14, 6   ;;  %s2950_s13 = smov %s2952_s15 }
 0x2b6   :  { %12 = sbr.rel (!%p10_p5) target bundleno = 2 (0x2), region = 90 }

</bundles_post_ra>
